<compile_context>
chip_gen: v5e
topology: v5e:2x2
jax: 0.10.0
libtpu: 0.0.40
codegen_flags: <defaults>
</compile_context>

<pallas_src>
import functools

import jax
import jax.numpy as jnp
from jax.experimental import pallas as pl
from jax.experimental.pallas import tpu as pltpu


# ---------------------------------------------------------------------------
# Pallas kernel: single-shot matmul with fused bias add + optional ReLU
# (full K per block -> no accumulator scratch, no pl.when phases)
# ---------------------------------------------------------------------------
def _fused_mm_kernel(x_ref, w_ref, b_ref, o_ref, *, apply_relu):
    y = jnp.dot(x_ref[...], w_ref[...], preferred_element_type=jnp.float32)
    y = y + b_ref[...]                      # (1, tn) bias row broadcasts over rows
    if apply_relu:
        y = jnp.maximum(y, 0.0)
    o_ref[...] = y.astype(o_ref.dtype)


# Pallas kernel: fused  heads = (relu(x @ lin_w + lin_b)) @ head_w + head_b
# (both matmuls live in one kernel; the [B,512] hidden never leaves VMEM)
def _mlp_head_kernel(x_ref, lw_ref, lb_ref, hw_ref, hb_ref, o_ref):
    h = jnp.dot(x_ref[...], lw_ref[...], preferred_element_type=jnp.float32)
    h = jnp.maximum(h + lb_ref[...], 0.0)
    y = jnp.dot(h, hw_ref[...], preferred_element_type=jnp.float32)
    o_ref[...] = (y + hb_ref[...]).astype(o_ref.dtype)


def _round_up(x, m):
    return ((x + m - 1) // m) * m


def _pick_tile(dim, unit, cap):
    """(padded_dim, tile): tile % unit == 0, tile <= cap, padded_dim % tile == 0."""
    dp = _round_up(dim, unit)
    if dp <= cap:
        return dp, dp
    for t in range(cap - cap % unit, unit - 1, -unit):
        if dp % t == 0:
            return dp, t
    return _round_up(dim, cap), cap


_VMEM_LIMIT = 32 * 1024 * 1024


def matmul_bias_act(x, w_mat, b_row, *, apply_relu, out_cols=None, m_cap=256):
    """y = relu?(x @ w_mat + b_row) via one fused Pallas GEMM.

    x:     [M, K]   unpadded activations
    w_mat: [Kp, Np] pre-laid-out weights (Kp = K rounded up to 128, zero rows)
    b_row: [1, Np]  pre-laid-out bias row
    Returns [M, out_cols] float32 (out_cols defaults to Np).
    """
    M, K = x.shape
    Kp, Np = w_mat.shape
    out_cols = Np if out_cols is None else out_cols

    # M: pad only to a multiple of 8 (f32 sublane); cap the tile so larger
    # batches still yield a multi-block "parallel" grid (megacore / 2-TC v7x).
    Mp, tm = _pick_tile(M, 8, m_cap)

    # N: small N (<128) stays unpadded (full-dim block, masked stores);
    # otherwise Np is already a multiple of 128 from weight prep.
    if Np < 128:
        tn = Np
    else:
        _, tn = _pick_tile(Np, 128, 512)

    xp = x.astype(jnp.float32)
    if Mp != M or Kp != K:
        xp = jnp.pad(xp, ((0, Mp - M), (0, Kp - K)))

    cost = pl.CostEstimate(
        flops=2 * Mp * Kp * Np,
        transcendentals=0,
        bytes_accessed=4 * (Mp * Kp + Kp * Np + Mp * Np + Np),
    )

    out = pl.pallas_call(
        functools.partial(_fused_mm_kernel, apply_relu=apply_relu),
        out_shape=jax.ShapeDtypeStruct((Mp, Np), jnp.float32),
        grid_spec=pltpu.PrefetchScalarGridSpec(
            num_scalar_prefetch=0,
            grid=(Mp // tm, Np // tn),
            in_specs=[
                pl.BlockSpec((tm, Kp), lambda i, j: (i, 0)),   # full-K block
                pl.BlockSpec((Kp, tn), lambda i, j: (0, j)),
                pl.BlockSpec((1, tn), lambda i, j: (0, j)),
            ],
            out_specs=pl.BlockSpec((tm, tn), lambda i, j: (i, j)),
        ),
        compiler_params=pltpu.CompilerParams(
            dimension_semantics=("parallel", "parallel"),
            vmem_limit_bytes=_VMEM_LIMIT,
        ),
        cost_estimate=cost,
    )(xp, w_mat, b_row)

    if Mp != M or out_cols != Np:
        out = out[:M, :out_cols]
    return out


def mlp_heads(x, lin_w, lin_b, head_w, head_b, *, out_cols):
    """heads = relu(x @ lin_w + lin_b) @ head_w + head_b, one Pallas kernel.

    x:      [M, K]    flattened conv features (K = 3136)
    lin_w:  [Kp, H]   Kp = 3200 (zero-padded), H = 512
    lin_b:  [1, H]
    head_w: [H, Np]   Np = 128 (policy/value cols 0..3, rest zero padding)
    head_b: [1, Np]
    Returns [M, out_cols] float32.
    """
    M, K = x.shape
    Kp, H = lin_w.shape
    _, Np = head_w.shape
    Mp = _round_up(M, 8)

    xp = x.astype(jnp.float32)
    if Mp != M or Kp != K:
        xp = jnp.pad(xp, ((0, Mp - M), (0, Kp - K)))

    out = pl.pallas_call(
        _mlp_head_kernel,
        out_shape=jax.ShapeDtypeStruct((Mp, Np), jnp.float32),
        grid_spec=pltpu.PrefetchScalarGridSpec(
            num_scalar_prefetch=0,
            grid=(1,),
            in_specs=[
                pl.BlockSpec((Mp, Kp), lambda i: (0, 0)),
                pl.BlockSpec((Kp, H), lambda i: (0, 0)),
                pl.BlockSpec((1, H), lambda i: (0, 0)),
                pl.BlockSpec((H, Np), lambda i: (0, 0)),
                pl.BlockSpec((1, Np), lambda i: (0, 0)),
            ],
            out_specs=pl.BlockSpec((Mp, Np), lambda i: (0, 0)),
        ),
        compiler_params=pltpu.CompilerParams(
            dimension_semantics=("arbitrary",),
            vmem_limit_bytes=_VMEM_LIMIT,
        ),
    )(xp, lin_w, lin_b, head_w, head_b)

    return out[:M, :out_cols]


# ---------------------------------------------------------------------------
# Conv2d + ReLU in NHWC as im2col + fused Pallas GEMM
# ---------------------------------------------------------------------------
def conv2d_relu_nhwc(x, w_mat, b_row, *, kh, kw, stride):
    """x: [B, H, W, C] NHWC; w_mat: [round_up(kh*kw*C, 128), OC]; b_row: [1, OC].
    Returns [B, OH, OW, OC] NHWC (ready for the next layer, no transpose)."""
    B, H, W, C = x.shape
    oc = b_row.shape[1]
    oh = (H - kh) // stride + 1
    ow = (W - kw) // stride + 1
    cols = []
    for i in range(kh):
        for j in range(kw):
            cols.append(x[:, i:i + stride * oh:stride, j:j + stride * ow:stride, :])
    # [B, OH, OW, KH*KW, C] -> [B*OH*OW, KH*KW*C]; feature index = (i*kw+j)*C + c
    p = jnp.stack(cols, axis=3).reshape(B * oh * ow, kh * kw * C)
    y = matmul_bias_act(p, w_mat, b_row, apply_relu=True)
    return y.reshape(B, oh, ow, oc)


# ---------------------------------------------------------------------------
# Parameter init (PyTorch layouts) + one-time GEMM-ready re-layout
# ---------------------------------------------------------------------------
def init_params(key):
    ks = jax.random.split(key, 12)

    def w_init(k, shape, fan_in):
        scale = (2.0 / fan_in) ** 0.5
        return scale * jax.random.normal(k, shape, dtype=jnp.float32)

    return {
        "conv1_w": w_init(ks[0], (32, 4, 8, 8), 4 * 8 * 8),
        "conv1_b": 0.01 * jax.random.normal(ks[1], (32,), dtype=jnp.float32),
        "conv2_w": w_init(ks[2], (64, 32, 4, 4), 32 * 4 * 4),
        "conv2_b": 0.01 * jax.random.normal(ks[3], (64,), dtype=jnp.float32),
        "conv3_w": w_init(ks[4], (64, 64, 3, 3), 64 * 3 * 3),
        "conv3_b": 0.01 * jax.random.normal(ks[5], (64,), dtype=jnp.float32),
        "lin_w": w_init(ks[6], (512, 7 * 7 * 64), 7 * 7 * 64),
        "lin_b": 0.01 * jax.random.normal(ks[7], (512,), dtype=jnp.float32),
        "pi_w": w_init(ks[8], (3, 512), 512),
        "pi_b": 0.01 * jax.random.normal(ks[9], (3,), dtype=jnp.float32),
        "val_w": w_init(ks[10], (1, 512), 512),
        "val_b": 0.01 * jax.random.normal(ks[11], (1,), dtype=jnp.float32),
    }


def _conv_w_mat(w):
    """PyTorch [OC, IC, KH, KW] -> GEMM [round_up(KH*KW*IC, 128), OC].
    Row order (kh, kw, ic) matches the NHWC im2col feature order."""
    oc, ic, kh, kw = w.shape
    m = jnp.transpose(w, (2, 3, 1, 0)).reshape(kh * kw * ic, oc).astype(jnp.float32)
    pad = _round_up(kh * kw * ic, 128) - kh * kw * ic
    if pad:
        m = jnp.pad(m, ((0, pad), (0, 0)))
    return m


def prepare_params(p):
    """One-time weight re-layout (hoisted out of the per-step forward)."""
    # 512-unit linear: permute input-feature rows so the NHWC (h, w, c) flatten
    # matches PyTorch's NCHW (c, h, w) flatten semantics, then [3136, 512]
    # transposed layout with K zero-padded to 3200.
    lw = p["lin_w"].reshape(512, 64, 7, 7)                     # [out, c, h, w]
    lw = jnp.transpose(lw, (2, 3, 1, 0)).reshape(7 * 7 * 64, 512).astype(jnp.float32)
    lw = jnp.pad(lw, ((0, 3200 - 3136), (0, 0)))

    # Fused policy/value head: [512, 4], N zero-padded to 128 (lane-dense out).
    head_w = jnp.concatenate([p["pi_w"], p["val_w"]], axis=0).T.astype(jnp.float32)
    head_w = jnp.pad(head_w, ((0, 0), (0, 128 - 4)))
    head_b = jnp.pad(jnp.concatenate([p["pi_b"], p["val_b"]]).astype(jnp.float32),
                     (0, 128 - 4))

    return {
        "c1_w": _conv_w_mat(p["conv1_w"]), "c1_b": p["conv1_b"].reshape(1, -1).astype(jnp.float32),
        "c2_w": _conv_w_mat(p["conv2_w"]), "c2_b": p["conv2_b"].reshape(1, -1).astype(jnp.float32),
        "c3_w": _conv_w_mat(p["conv3_w"]), "c3_b": p["conv3_b"].reshape(1, -1).astype(jnp.float32),
        "lin_w": lw, "lin_b": p["lin_b"].reshape(1, -1).astype(jnp.float32),
        "head_w": head_w, "head_b": head_b.reshape(1, -1),
    }


# ---------------------------------------------------------------------------
# Forward pass (mirrors Policy.forward)
# ---------------------------------------------------------------------------
def policy_forward(prep, obs):
    # obs: [B, 4, 84, 84] float32 (NCHW, like PyTorch); single transpose to NHWC.
    x = jnp.transpose(obs, (0, 2, 3, 1))
    h = conv2d_relu_nhwc(x, prep["c1_w"], prep["c1_b"], kh=8, kw=8, stride=4)  # [B,20,20,32]
    h = conv2d_relu_nhwc(h, prep["c2_w"], prep["c2_b"], kh=4, kw=4, stride=2)  # [B, 9, 9,64]
    h = conv2d_relu_nhwc(h, prep["c3_w"], prep["c3_b"], kh=3, kw=3, stride=1)  # [B, 7, 7,64]
    B = h.shape[0]
    h = h.reshape(B, 7 * 7 * 64)                     # NHWC flatten; lin_w rows pre-permuted
    # Single fused kernel: lin + ReLU + (pi_logits | value) heads.
    heads = mlp_heads(h, prep["lin_w"], prep["lin_b"],
                      prep["head_w"], prep["head_b"], out_cols=4)              # [B, 4]
    pi_logits = heads[:, :3]
    value = heads[:, 3]
    return pi_logits, value


if __name__ == "__main__":
    key = jax.random.PRNGKey(0)
    pkey, xkey = jax.random.split(key)
    params = init_params(pkey)
    prep = prepare_params(params)          # one-time weight layout, outside the hot path

    # The 7*7*64 linear pins the spatial size to 84x84 (Atari policy input).
    B = 2
    obs = jax.random.normal(xkey, (B, 4, 84, 84), dtype=jnp.float32)

    pi_logits, value = jax.jit(policy_forward)(prep, obs)
    jax.block_until_ready((pi_logits, value))

    assert pi_logits.shape == (B, 3), pi_logits.shape
    assert value.shape == (B,), value.shape
    assert bool(jnp.all(jnp.isfinite(pi_logits))) and bool(jnp.all(jnp.isfinite(value)))
    print("KERNEL_OK")
</pallas_src>

<mosaic_0001>
module attributes {stable_mosaic.version = 11 : i64} {
  func.func @_fused_mm_kernel(%arg0: i32, %arg1: i32, %arg2: memref<200x256xf32, #tpu.memory_space<vmem>>, %arg3: memref<256x32xf32, #tpu.memory_space<vmem>>, %arg4: memref<1x32xf32, #tpu.memory_space<vmem>>, %arg5: memref<200x32xf32, #tpu.memory_space<vmem>>) attributes {dimension_semantics = [#tpu.dimension_semantics<parallel>, #tpu.dimension_semantics<parallel>], iteration_bounds = array<i64: 4, 1>, scalar_prefetch = 0 : i64, scratch_operands = 0 : i64, tpu.core_type = #tpu.core_type<tc>, window_params = [{transform_indices = @transform_0, window_bounds = array<i64: 200, 256>}, {transform_indices = @transform_1, window_bounds = array<i64: 256, 32>}, {transform_indices = @transform_2, window_bounds = array<i64: 1, 32>}, {transform_indices = @transform_3, window_bounds = array<i64: 200, 32>}]} {
    %c0 = arith.constant 0 : index
    %c0_0 = arith.constant 0 : index
    %0 = vector.load %arg2[%c0, %c0_0] : memref<200x256xf32, #tpu.memory_space<vmem>>, vector<200x256xf32>
    %c0_1 = arith.constant 0 : index
    %c0_2 = arith.constant 0 : index
    %1 = vector.load %arg3[%c0_1, %c0_2] : memref<256x32xf32, #tpu.memory_space<vmem>>, vector<256x32xf32>
    %cst = arith.constant dense<0.000000e+00> : vector<200x32xf32>
    %2 = tpu.matmul %0, %1, %cst {dimension_numbers = #tpu.dot_dimension_numbers<[1], [0], [0], [1], [0, 0, 1, 1], [], []>} : vector<200x256xf32>, vector<256x32xf32>, vector<200x32xf32> -> vector<200x32xf32>
    %c0_3 = arith.constant 0 : index
    %c0_4 = arith.constant 0 : index
    %3 = vector.load %arg4[%c0_3, %c0_4] : memref<1x32xf32, #tpu.memory_space<vmem>>, vector<1x32xf32>
    %4 = vector.broadcast %3 : vector<1x32xf32> to vector<200x32xf32>
    %5 = arith.addf %2, %4 : vector<200x32xf32>
    %cst_5 = arith.constant 0.000000e+00 : f32
    %6 = vector.broadcast %cst_5 : f32 to vector<200x32xf32>
    %7 = arith.maximumf %5, %6 : vector<200x32xf32>
    %c0_6 = arith.constant 0 : index
    %c0_7 = arith.constant 0 : index
    %8 = vector.load %arg5[%c0_6, %c0_7] : memref<200x32xf32, #tpu.memory_space<vmem>>, vector<200x32xf32>
    tpu.vector_store %arg5[%c0_6, %c0_7], %7 {strides = array<i32>} : memref<200x32xf32, #tpu.memory_space<vmem>>, vector<200x32xf32>,
    return
  }
  func.func @transform_0(%arg0: i32, %arg1: i32) -> (i32, i32) {
    %c0_i32 = arith.constant 0 : i32
    %c0_i32_0 = arith.constant 0 : i32
    return %arg0, %c0_i32 : i32, i32
  }
  func.func @transform_1(%arg0: i32, %arg1: i32) -> (i32, i32) {
    %c0_i32 = arith.constant 0 : i32
    %c0_i32_0 = arith.constant 0 : i32
    return %c0_i32, %arg1 : i32, i32
  }
  func.func @transform_2(%arg0: i32, %arg1: i32) -> (i32, i32) {
    %c0_i32 = arith.constant 0 : i32
    %c0_i32_0 = arith.constant 0 : i32
    return %c0_i32, %arg1 : i32, i32
  }
  func.func @transform_3(%arg0: i32, %arg1: i32) -> (i32, i32) {
    %c0_i32 = arith.constant 0 : i32
    return %arg0, %arg1 : i32, i32
  }
}

module attributes {stable_mosaic.version = 11 : i64} {
  func.func @_fused_mm_kernel(%arg0: i32, %arg1: i32, %arg2: memref<168x512xf32, #tpu.memory_space<vmem>>, %arg3: memref<512x64xf32, #tpu.memory_space<vmem>>, %arg4: memref<1x64xf32, #tpu.memory_space<vmem>>, %arg5: memref<168x64xf32, #tpu.memory_space<vmem>>) attributes {dimension_semantics = [#tpu.dimension_semantics<parallel>, #tpu.dimension_semantics<parallel>], iteration_bounds = array<i64: 1, 1>, scalar_prefetch = 0 : i64, scratch_operands = 0 : i64, tpu.core_type = #tpu.core_type<tc>, window_params = [{transform_indices = @transform_0, window_bounds = array<i64: 168, 512>}, {transform_indices = @transform_1, window_bounds = array<i64: 512, 64>}, {transform_indices = @transform_2, window_bounds = array<i64: 1, 64>}, {transform_indices = @transform_3, window_bounds = array<i64: 168, 64>}]} {
    %c0 = arith.constant 0 : index
    %c0_0 = arith.constant 0 : index
    %0 = vector.load %arg2[%c0, %c0_0] : memref<168x512xf32, #tpu.memory_space<vmem>>, vector<168x512xf32>
    %c0_1 = arith.constant 0 : index
    %c0_2 = arith.constant 0 : index
    %1 = vector.load %arg3[%c0_1, %c0_2] : memref<512x64xf32, #tpu.memory_space<vmem>>, vector<512x64xf32>
    %cst = arith.constant dense<0.000000e+00> : vector<168x64xf32>
    %2 = tpu.matmul %0, %1, %cst {dimension_numbers = #tpu.dot_dimension_numbers<[1], [0], [0], [1], [0, 0, 1, 1], [], []>} : vector<168x512xf32>, vector<512x64xf32>, vector<168x64xf32> -> vector<168x64xf32>
    %c0_3 = arith.constant 0 : index
    %c0_4 = arith.constant 0 : index
    %3 = vector.load %arg4[%c0_3, %c0_4] : memref<1x64xf32, #tpu.memory_space<vmem>>, vector<1x64xf32>
    %4 = vector.broadcast %3 : vector<1x64xf32> to vector<168x64xf32>
    %5 = arith.addf %2, %4 : vector<168x64xf32>
    %cst_5 = arith.constant 0.000000e+00 : f32
    %6 = vector.broadcast %cst_5 : f32 to vector<168x64xf32>
    %7 = arith.maximumf %5, %6 : vector<168x64xf32>
    %c0_6 = arith.constant 0 : index
    %c0_7 = arith.constant 0 : index
    %8 = vector.load %arg5[%c0_6, %c0_7] : memref<168x64xf32, #tpu.memory_space<vmem>>, vector<168x64xf32>
    tpu.vector_store %arg5[%c0_6, %c0_7], %7 {strides = array<i32>} : memref<168x64xf32, #tpu.memory_space<vmem>>, vector<168x64xf32>,
    return
  }
  func.func @transform_0(%arg0: i32, %arg1: i32) -> (i32, i32) {
    %c0_i32 = arith.constant 0 : i32
    %c0_i32_0 = arith.constant 0 : i32
    return %arg0, %c0_i32 : i32, i32
  }
  func.func @transform_1(%arg0: i32, %arg1: i32) -> (i32, i32) {
    %c0_i32 = arith.constant 0 : i32
    %c0_i32_0 = arith.constant 0 : i32
    return %c0_i32, %arg1 : i32, i32
  }
  func.func @transform_2(%arg0: i32, %arg1: i32) -> (i32, i32) {
    %c0_i32 = arith.constant 0 : i32
    %c0_i32_0 = arith.constant 0 : i32
    return %c0_i32, %arg1 : i32, i32
  }
  func.func @transform_3(%arg0: i32, %arg1: i32) -> (i32, i32) {
    %c0_i32 = arith.constant 0 : i32
    return %arg0, %arg1 : i32, i32
  }
}

module attributes {stable_mosaic.version = 11 : i64} {
  func.func @_fused_mm_kernel(%arg0: i32, %arg1: i32, %arg2: memref<104x640xf32, #tpu.memory_space<vmem>>, %arg3: memref<640x64xf32, #tpu.memory_space<vmem>>, %arg4: memref<1x64xf32, #tpu.memory_space<vmem>>, %arg5: memref<104x64xf32, #tpu.memory_space<vmem>>) attributes {dimension_semantics = [#tpu.dimension_semantics<parallel>, #tpu.dimension_semantics<parallel>], iteration_bounds = array<i64: 1, 1>, scalar_prefetch = 0 : i64, scratch_operands = 0 : i64, tpu.core_type = #tpu.core_type<tc>, window_params = [{transform_indices = @transform_0, window_bounds = array<i64: 104, 640>}, {transform_indices = @transform_1, window_bounds = array<i64: 640, 64>}, {transform_indices = @transform_2, window_bounds = array<i64: 1, 64>}, {transform_indices = @transform_3, window_bounds = array<i64: 104, 64>}]} {
    %c0 = arith.constant 0 : index
    %c0_0 = arith.constant 0 : index
    %0 = vector.load %arg2[%c0, %c0_0] : memref<104x640xf32, #tpu.memory_space<vmem>>, vector<104x640xf32>
    %c0_1 = arith.constant 0 : index
    %c0_2 = arith.constant 0 : index
    %1 = vector.load %arg3[%c0_1, %c0_2] : memref<640x64xf32, #tpu.memory_space<vmem>>, vector<640x64xf32>
    %cst = arith.constant dense<0.000000e+00> : vector<104x64xf32>
    %2 = tpu.matmul %0, %1, %cst {dimension_numbers = #tpu.dot_dimension_numbers<[1], [0], [0], [1], [0, 0, 1, 1], [], []>} : vector<104x640xf32>, vector<640x64xf32>, vector<104x64xf32> -> vector<104x64xf32>
    %c0_3 = arith.constant 0 : index
    %c0_4 = arith.constant 0 : index
    %3 = vector.load %arg4[%c0_3, %c0_4] : memref<1x64xf32, #tpu.memory_space<vmem>>, vector<1x64xf32>
    %4 = vector.broadcast %3 : vector<1x64xf32> to vector<104x64xf32>
    %5 = arith.addf %2, %4 : vector<104x64xf32>
    %cst_5 = arith.constant 0.000000e+00 : f32
    %6 = vector.broadcast %cst_5 : f32 to vector<104x64xf32>
    %7 = arith.maximumf %5, %6 : vector<104x64xf32>
    %c0_6 = arith.constant 0 : index
    %c0_7 = arith.constant 0 : index
    %8 = vector.load %arg5[%c0_6, %c0_7] : memref<104x64xf32, #tpu.memory_space<vmem>>, vector<104x64xf32>
    tpu.vector_store %arg5[%c0_6, %c0_7], %7 {strides = array<i32>} : memref<104x64xf32, #tpu.memory_space<vmem>>, vector<104x64xf32>,
    return
  }
  func.func @transform_0(%arg0: i32, %arg1: i32) -> (i32, i32) {
    %c0_i32 = arith.constant 0 : i32
    %c0_i32_0 = arith.constant 0 : i32
    return %arg0, %c0_i32 : i32, i32
  }
  func.func @transform_1(%arg0: i32, %arg1: i32) -> (i32, i32) {
    %c0_i32 = arith.constant 0 : i32
    %c0_i32_0 = arith.constant 0 : i32
    return %c0_i32, %arg1 : i32, i32
  }
  func.func @transform_2(%arg0: i32, %arg1: i32) -> (i32, i32) {
    %c0_i32 = arith.constant 0 : i32
    %c0_i32_0 = arith.constant 0 : i32
    return %c0_i32, %arg1 : i32, i32
  }
  func.func @transform_3(%arg0: i32, %arg1: i32) -> (i32, i32) {
    %c0_i32 = arith.constant 0 : i32
    return %arg0, %arg1 : i32, i32
  }
}

module attributes {stable_mosaic.version = 11 : i64} {
  func.func @_mlp_head_kernel(%arg0: i32, %arg1: memref<8x3200xf32, #tpu.memory_space<vmem>>, %arg2: memref<3200x512xf32, #tpu.memory_space<vmem>>, %arg3: memref<1x512xf32, #tpu.memory_space<vmem>>, %arg4: memref<512x128xf32, #tpu.memory_space<vmem>>, %arg5: memref<1x128xf32, #tpu.memory_space<vmem>>, %arg6: memref<8x128xf32, #tpu.memory_space<vmem>>) attributes {dimension_semantics = [#tpu.dimension_semantics<arbitrary>], iteration_bounds = array<i64: 1>, scalar_prefetch = 0 : i64, scratch_operands = 0 : i64, tpu.core_type = #tpu.core_type<tc>, window_params = [{pipeline_mode = #tpu.pipeline_mode<synchronous>, transform_indices = @transform_0, window_bounds = array<i64: 8, 3200>}, {pipeline_mode = #tpu.pipeline_mode<synchronous>, transform_indices = @transform_1, window_bounds = array<i64: 3200, 512>}, {pipeline_mode = #tpu.pipeline_mode<synchronous>, transform_indices = @transform_2, window_bounds = array<i64: 1, 512>}, {pipeline_mode = #tpu.pipeline_mode<synchronous>, transform_indices = @transform_3, window_bounds = array<i64: 512, 128>}, {pipeline_mode = #tpu.pipeline_mode<synchronous>, transform_indices = @transform_4, window_bounds = array<i64: 1, 128>}, {pipeline_mode = #tpu.pipeline_mode<synchronous>, transform_indices = @transform_5, window_bounds = array<i64: 8, 128>}]} {
    %c0 = arith.constant 0 : index
    %c0_0 = arith.constant 0 : index
    %0 = vector.load %arg1[%c0, %c0_0] : memref<8x3200xf32, #tpu.memory_space<vmem>>, vector<8x3200xf32>
    %c0_1 = arith.constant 0 : index
    %c0_2 = arith.constant 0 : index
    %1 = vector.load %arg2[%c0_1, %c0_2] : memref<3200x512xf32, #tpu.memory_space<vmem>>, vector<3200x512xf32>
    %cst = arith.constant dense<0.000000e+00> : vector<8x512xf32>
    %2 = tpu.matmul %0, %1, %cst {dimension_numbers = #tpu.dot_dimension_numbers<[1], [0], [0], [1], [0, 0, 1, 1], [], []>} : vector<8x3200xf32>, vector<3200x512xf32>, vector<8x512xf32> -> vector<8x512xf32>
    %c0_3 = arith.constant 0 : index
    %c0_4 = arith.constant 0 : index
    %3 = vector.load %arg3[%c0_3, %c0_4] : memref<1x512xf32, #tpu.memory_space<vmem>>, vector<1x512xf32>
    %4 = vector.broadcast %3 : vector<1x512xf32> to vector<8x512xf32>
    %5 = arith.addf %2, %4 : vector<8x512xf32>
    %cst_5 = arith.constant 0.000000e+00 : f32
    %6 = vector.broadcast %cst_5 : f32 to vector<8x512xf32>
    %7 = arith.maximumf %5, %6 : vector<8x512xf32>
    %c0_6 = arith.constant 0 : index
    %c0_7 = arith.constant 0 : index
    %8 = vector.load %arg4[%c0_6, %c0_7] : memref<512x128xf32, #tpu.memory_space<vmem>>, vector<512x128xf32>
    %cst_8 = arith.constant dense<0.000000e+00> : vector<8x128xf32>
    %9 = tpu.matmul %7, %8, %cst_8 {dimension_numbers = #tpu.dot_dimension_numbers<[1], [0], [0], [1], [0, 0, 1, 1], [], []>} : vector<8x512xf32>, vector<512x128xf32>, vector<8x128xf32> -> vector<8x128xf32>
    %c0_9 = arith.constant 0 : index
    %c0_10 = arith.constant 0 : index
    %10 = vector.load %arg5[%c0_9, %c0_10] : memref<1x128xf32, #tpu.memory_space<vmem>>, vector<1x128xf32>
    %11 = vector.broadcast %10 : vector<1x128xf32> to vector<8x128xf32>
    %12 = arith.addf %9, %11 : vector<8x128xf32>
    %c0_11 = arith.constant 0 : index
    %c0_12 = arith.constant 0 : index
    %13 = vector.load %arg6[%c0_11, %c0_12] : memref<8x128xf32, #tpu.memory_space<vmem>>, vector<8x128xf32>
    tpu.vector_store %arg6[%c0_11, %c0_12], %12 {strides = array<i32>} : memref<8x128xf32, #tpu.memory_space<vmem>>, vector<8x128xf32>,
    return
  }
  func.func @transform_0(%arg0: i32) -> (i32, i32) {
    %c0_i32 = arith.constant 0 : i32
    %c0_i32_0 = arith.constant 0 : i32
    %c0_i32_1 = arith.constant 0 : i32
    return %c0_i32, %c0_i32_0 : i32, i32
  }
  func.func @transform_1(%arg0: i32) -> (i32, i32) {
    %c0_i32 = arith.constant 0 : i32
    %c0_i32_0 = arith.constant 0 : i32
    %c0_i32_1 = arith.constant 0 : i32
    return %c0_i32, %c0_i32_0 : i32, i32
  }
  func.func @transform_2(%arg0: i32) -> (i32, i32) {
    %c0_i32 = arith.constant 0 : i32
    %c0_i32_0 = arith.constant 0 : i32
    %c0_i32_1 = arith.constant 0 : i32
    return %c0_i32, %c0_i32_0 : i32, i32
  }
  func.func @transform_3(%arg0: i32) -> (i32, i32) {
    %c0_i32 = arith.constant 0 : i32
    %c0_i32_0 = arith.constant 0 : i32
    %c0_i32_1 = arith.constant 0 : i32
    return %c0_i32, %c0_i32_0 : i32, i32
  }
  func.func @transform_4(%arg0: i32) -> (i32, i32) {
    %c0_i32 = arith.constant 0 : i32
    %c0_i32_0 = arith.constant 0 : i32
    %c0_i32_1 = arith.constant 0 : i32
    return %c0_i32, %c0_i32_0 : i32, i32
  }
  func.func @transform_5(%arg0: i32) -> (i32, i32) {
    %c0_i32 = arith.constant 0 : i32
    %c0_i32_0 = arith.constant 0 : i32
    %c0_i32_1 = arith.constant 0 : i32
    return %c0_i32, %c0_i32_0 : i32, i32
  }
}

</mosaic_0001>

<bundles_post_ra>
// kernel: policy_forward.4
= control target key start
LH: loop header
LB: loop body
LE: loop exit
PB: predicated region body
PF: predicated region fallthrough
CT: control target
= control target key end

     0   :  { %s765_s12 = smov 0   ;;  %s767_s13 = smov 0   ;;  %s1038_s0 = inlined_call_operand.vmem [shape: f32[800,256], index: 0, kind: input, shape index: {}]   ;;  %s1039_s1 = inlined_call_operand.vmem [shape: f32[256,32], index: 1, kind: input, shape index: {}]   ;;  %s1040_s2 = inlined_call_operand.vmem [shape: f32[1,32], index: 2, kind: input, shape index: {}]   ;;  %s1041_s3 = inlined_call_operand.vmem [shape: f32[800,32], index: 3, kind: output, shape index: {}]  }
   0x1   :  { %s769_s14 = smov 0  }
   0x2 LB: > { %s25_s15 = sadd.s32 1, %s739_s13  ;;  %p657_p0 = scmp.ge.s32.totalorder %s743_s14, 1  ;;  %s743_s14 = sphi %s769_s14, %s13_s14   ;;  %s739_s13 = sphi %s767_s13, %s1043_s13   ;;  %s735_s12 = sphi %s765_s12, %s1042_s12  }
   0x3   : > { %p27_p1 = scmp.ge.s32.totalorder %s25_s15, 4  ;;  %p170_p2 = scmp.lt.s32.totalorder %s743_s14, 5 }
   0x5   : > { %s1045_s15 = smov (%p27_p1, %s25_s15), 0  ;;  %p171_p3 = pnand %p657_p0, %p170_p2 }
   0x6   : > { %s205_s21 = smul.u32 (!%p171_p3), 25, %s735_s12 }
   0x7   : > { %174 = sbr.rel (%p171_p3) target bundleno = 279 (0x117), region = 32 }
   0x8   : > { %p206_p4 = scmp.lt.s32.totalorder (!%p171_p3), %s205_s21, 99 }
   0xc   : > { %v293_v0 = vld [vmem:[%s1039_s1 + $0x78] sm:$0xff]  ;;  %v292_v2 = vld [vmem:[%s1039_s1 + $0x70] sm:$0xff]  ;;  %v291_v4 = vld [vmem:[%s1039_s1 + $0x68] sm:$0xff]  ;;  %s1047_s21 = smov (!%p206_p4, %s205_s21), 99  ;;  %vm523_vm0 = vcmask 261120  }
   0xd   : > { %v309_v1 = vld [vmem:[%s1039_s1 + $0xf8] sm:$0xff]  ;;  %664 = vmatpush.msra.mxu2 %v293_v0  ;;  %v308_v3 = vld [vmem:[%s1039_s1 + $0xf0] sm:$0xff]  ;;  %v307_v5 = vld [vmem:[%s1039_s1 + $0xe8] sm:$0xff]  ;;  %314 = vmatpush.msra.mxu0 %v293_v0  ;;  %s663_s23 = sshll.u32 %s1047_s21, 4  ;;  %s660_s17 = sshll.u32 %s1047_s21, 3 }
   0xe   : > { %406 = vmatpush.msra.mxu1 %v309_v1  ;;  %680 = vmatpush.msra.mxu3 %v309_v1  ;;  %v290_v6 = vld [vmem:[%s1039_s1 + $0x60] sm:$0xff]  ;;  %v289_v8 = vld [vmem:[%s1039_s1 + $0x58] sm:$0xff]  ;;  %v288_v10 = vld [vmem:[%s1039_s1 + $0x50] sm:$0xff]  ;;  %s882_s6 = scalar_lea.vmem %s1038_s0, %s663_s23  ;;  %s950_s20 = scalar_lea.vmem %s1041_s3, %s660_s17 }
   0xf   : > { %665 = vmatpush.msra.mxu2 %v292_v2  ;;  %v306_v7 = vld [vmem:[%s1039_s1 + $0xe0] sm:$0xff]  ;;  %315 = vmatpush.msra.mxu0 %v292_v2  ;;  %v305_v9 = vld [vmem:[%s1039_s1 + $0xd8] sm:$0xff]  ;;  %v304_v11 = vld [vmem:[%s1039_s1 + $0xd0] sm:$0xff] }
  0x10   : > { %407 = vmatpush.msra.mxu1 %v308_v3  ;;  %681 = vmatpush.msra.mxu3 %v308_v3  ;;  %v287_v12 = vld [vmem:[%s1039_s1 + $0x48] sm:$0xff]  ;;  %v286_v14 = vld [vmem:[%s1039_s1 + $0x40] sm:$0xff]  ;;  %v285_v16 = vld [vmem:[%s1039_s1 + $0x38] sm:$0xff] }
  0x11   : > { %666 = vmatpush.msra.mxu2 %v291_v4  ;;  %316 = vmatpush.msra.mxu0 %v291_v4  ;;  %v303_v13 = vld [vmem:[%s1039_s1 + $0xc8] sm:$0xff]  ;;  %v302_v15 = vld [vmem:[%s1039_s1 + $0xc0] sm:$0xff]  ;;  %v301_v17 = vld [vmem:[%s1039_s1 + $0xb8] sm:$0xff] }
  0x12   : > { %408 = vmatpush.msra.mxu1 %v307_v5  ;;  %682 = vmatpush.msra.mxu3 %v307_v5  ;;  %v284_v18 = vld [vmem:[%s1039_s1 + $0x30] sm:$0xff]  ;;  %v283_v20 = vld [vmem:[%s1039_s1 + $0x28] sm:$0xff]  ;;  %v282_v22 = vld [vmem:[%s1039_s1 + $0x20] sm:$0xff] }
  0x13   : > { %667 = vmatpush.msra.mxu2 %v290_v6  ;;  %317 = vmatpush.msra.mxu0 %v290_v6  ;;  %v300_v19 = vld [vmem:[%s1039_s1 + $0xb0] sm:$0xff]  ;;  %v299_v21 = vld [vmem:[%s1039_s1 + $0xa8] sm:$0xff]  ;;  %v298_v23 = vld [vmem:[%s1039_s1 + $0xa0] sm:$0xff] }
  0x14   : > { %409 = vmatpush.msra.mxu1 %v306_v7  ;;  %683 = vmatpush.msra.mxu3 %v306_v7  ;;  %v281_v24 = vld [vmem:[%s1039_s1 + $0x18] sm:$0xff]  ;;  %v280_v26 = vld [vmem:[%s1039_s1 + $0x10] sm:$0xff]  ;;  %v279_v28 = vld [vmem:[%s1039_s1 + $0x8] sm:$0xff] }
  0x15   : > { %668 = vmatpush.msra.mxu2 %v289_v8  ;;  %318 = vmatpush.msra.mxu0 %v289_v8  ;;  %v297_v25 = vld [vmem:[%s1039_s1 + $0x98] sm:$0xff]  ;;  %v296_v27 = vld [vmem:[%s1039_s1 + $0x90] sm:$0xff]  ;;  %v295_v29 = vld [vmem:[%s1039_s1 + $0x88] sm:$0xff] }
  0x16   : > { %410 = vmatpush.msra.mxu1 %v305_v9  ;;  %684 = vmatpush.msra.mxu3 %v305_v9  ;;  %v278_v30 = vld [vmem:[%s1039_s1] sm:$0xff]  ;;  %v229_v33 = vld [vmem:[%s882_s6 + $0x8] sm:$0xff]  ;;  %v255_v35 = vld [vmem:[%s882_s6 + $0xd8] sm:$0xff] }
  0x17   : > { %669 = vmatpush.msra.mxu2 %v288_v10  ;;  %319 = vmatpush.msra.mxu0 %v288_v10  ;;  %v294_v31 = vld [vmem:[%s1039_s1 + $0x80] sm:$0xff]  ;;  %v254_v36 = vld [vmem:[%s882_s6 + $0xd0] sm:$0xff]  ;;  %v231_v37 = vld [vmem:[%s882_s6 + $0x18] sm:$0xff] }
  0x18   : > { %411 = vmatpush.msra.mxu1 %v304_v11  ;;  %685 = vmatpush.msra.mxu3 %v304_v11  ;;  %v252_v32 = vld [vmem:[%s882_s6 + $0xc0] sm:$0xff]  ;;  %v230_v38 = vld [vmem:[%s882_s6 + $0x10] sm:$0xff]  ;;  %v257_v39 = vld [vmem:[%s882_s6 + $0xe8] sm:$0xff] }
  0x19   : > { %670 = vmatpush.msra.mxu2 %v287_v12  ;;  %320 = vmatpush.msra.mxu0 %v287_v12  ;;  %v228_v34 = vld [vmem:[%s882_s6] sm:$0xff]  ;;  %v233_v41 = vld [vmem:[%s882_s6 + $0x28] sm:$0xff]  ;;  %v259_v43 = vld [vmem:[%s882_s6 + $0xf8] sm:$0xff] }
  0x1a   : > { %412 = vmatpush.msra.mxu1 %v303_v13  ;;  %686 = vmatpush.msra.mxu3 %v303_v13  ;;  %v256_v40 = vld [vmem:[%s882_s6 + $0xe0] sm:$0xff]  ;;  %v258_v44 = vld [vmem:[%s882_s6 + $0xf0] sm:$0xff]  ;;  %v235_v45 = vld [vmem:[%s882_s6 + $0x38] sm:$0xff] }
  0x1b   : > { %671 = vmatpush.msra.mxu2 %v286_v14  ;;  %321 = vmatpush.msra.mxu0 %v286_v14  ;;  %v232_v42 = vld [vmem:[%s882_s6 + $0x20] sm:$0xff]  ;;  %v234_v46 = vld [vmem:[%s882_s6 + $0x30] sm:$0xff]  ;;  %v261_v47 = vld [vmem:[%s882_s6 + $0x108] sm:$0xff] }
  0x1c   : > { %413 = vmatpush.msra.mxu1 %v302_v15  ;;  %687 = vmatpush.msra.mxu3 %v302_v15  ;;  %v260_v48 = vld [vmem:[%s882_s6 + $0x100] sm:$0xff]  ;;  %v237_v49 = vld [vmem:[%s882_s6 + $0x48] sm:$0xff]  ;;  %v263_v51 = vld [vmem:[%s882_s6 + $0x118] sm:$0xff] }
  0x1d   : > { %672 = vmatpush.msra.mxu2 %v285_v16  ;;  %322 = vmatpush.msra.mxu0 %v285_v16  ;;  %v236_v50 = vld [vmem:[%s882_s6 + $0x40] sm:$0xff]  ;;  %v262_v52 = vld [vmem:[%s882_s6 + $0x110] sm:$0xff]  ;;  %v239_v53 = vld [vmem:[%s882_s6 + $0x58] sm:$0xff] }
  0x1e   : > { %414 = vmatpush.msra.mxu1 %v301_v17  ;;  %688 = vmatpush.msra.mxu3 %v301_v17  ;;  %v238_v54 = vld [vmem:[%s882_s6 + $0x50] sm:$0xff]  ;;  %v265_v55 = vld [vmem:[%s882_s6 + $0x128] sm:$0xff]  ;;  %v264_v56 = vld [vmem:[%s882_s6 + $0x120] sm:$0xff] }
  0x1f   : > { %673 = vmatpush.msra.mxu2 %v284_v18  ;;  %323 = vmatpush.msra.mxu0 %v284_v18  ;;  %v241_v57 = vld [vmem:[%s882_s6 + $0x68] sm:$0xff]  ;;  %v240_v58 = vld [vmem:[%s882_s6 + $0x60] sm:$0xff]  ;;  %v267_v59 = vld [vmem:[%s882_s6 + $0x138] sm:$0xff] }
  0x20   : > { %415 = vmatpush.msra.mxu1 %v300_v19  ;;  %689 = vmatpush.msra.mxu3 %v300_v19  ;;  %v266_v60 = vld [vmem:[%s882_s6 + $0x130] sm:$0xff]  ;;  %v243_v61 = vld [vmem:[%s882_s6 + $0x78] sm:$0xff]  ;;  %v269_v63 = vld [vmem:[%s882_s6 + $0x148] sm:$0xff] }
  0x21   : > { %674 = vmatpush.msra.mxu2 %v283_v20  ;;  %324 = vmatpush.msra.mxu0 %v283_v20  ;;  %v242_v62 = vld [vmem:[%s882_s6 + $0x70] sm:$0xff]  ;;  %v268_v0 = vld [vmem:[%s882_s6 + $0x140] sm:$0xff]  ;;  %v245_v1 = vld [vmem:[%s882_s6 + $0x88] sm:$0xff] }
  0x22   : > { %416 = vmatpush.msra.mxu1 %v299_v21  ;;  %690 = vmatpush.msra.mxu3 %v299_v21  ;;  %v244_v2 = vld [vmem:[%s882_s6 + $0x80] sm:$0xff]  ;;  %v271_v3 = vld [vmem:[%s882_s6 + $0x158] sm:$0xff]  ;;  %v270_v4 = vld [vmem:[%s882_s6 + $0x150] sm:$0xff] }
  0x23   : > { %675 = vmatpush.msra.mxu2 %v282_v22  ;;  %325 = vmatpush.msra.mxu0 %v282_v22  ;;  %v247_v5 = vld [vmem:[%s882_s6 + $0x98] sm:$0xff]  ;;  %v246_v6 = vld [vmem:[%s882_s6 + $0x90] sm:$0xff]  ;;  %v273_v7 = vld [vmem:[%s882_s6 + $0x168] sm:$0xff] }
  0x24   : > { %417 = vmatpush.msra.mxu1 %v298_v23  ;;  %691 = vmatpush.msra.mxu3 %v298_v23  ;;  %v272_v8 = vld [vmem:[%s882_s6 + $0x160] sm:$0xff]  ;;  %v249_v9 = vld [vmem:[%s882_s6 + $0xa8] sm:$0xff]  ;;  %v275_v11 = vld [vmem:[%s882_s6 + $0x178] sm:$0xff] }
  0x25   : > { %676 = vmatpush.msra.mxu2 %v281_v24  ;;  %326 = vmatpush.msra.mxu0 %v281_v24  ;;  %v248_v10 = vld [vmem:[%s882_s6 + $0xa0] sm:$0xff]  ;;  %v274_v12 = vld [vmem:[%s882_s6 + $0x170] sm:$0xff]  ;;  %v251_v13 = vld [vmem:[%s882_s6 + $0xb8] sm:$0xff] }
  0x26   : > { %418 = vmatpush.msra.mxu1 %v297_v25  ;;  %692 = vmatpush.msra.mxu3 %v297_v25  ;;  %v250_v14 = vld [vmem:[%s882_s6 + $0xb0] sm:$0xff]  ;;  %v277_v15 = vld [vmem:[%s882_s6 + $0x188] sm:$0xff]  ;;  %v276_v16 = vld [vmem:[%s882_s6 + $0x180] sm:$0xff] }
  0x27   : > { %677 = vmatpush.msra.mxu2 %v280_v26  ;;  %327 = vmatpush.msra.mxu0 %v280_v26  ;;  %v253_v17 = vld [vmem:[%s882_s6 + $0xc8] sm:$0xff]  ;;  %v943_v18 = vld [vmem:[%s1040_s2] ss:$0 sm:$0xff] }
  0x28   : > { %419 = vmatpush.msra.mxu1 %v296_v27  ;;  %693 = vmatpush.msra.mxu3 %v296_v27 }
  0x29   : > { %678 = vmatpush.msra.mxu2 %v279_v28  ;;  %328 = vmatpush.msra.mxu0 %v279_v28 }
  0x2a   : > { %420 = vmatpush.msra.mxu1 %v295_v29  ;;  %694 = vmatpush.msra.mxu3 %v295_v29 }
  0x2b   : > { %679 = vmatpush.msra.mxu2 %v278_v30  ;;  %329 = vmatpush.msra.mxu0 %v278_v30 }
  0x2c   : > { %421 = vmatpush.msra.mxu1 %v294_v31  ;;  %366 = vmatmul.f32.vlgmr.msra.gmra.mxu2 %v252_v32 }
  0x2d   : > { %422 = vmatmul.f32.vlgmr.msra.gmra.mxu1 %v229_v33  ;;  %695 = vmatpush.msra.mxu3 %v294_v31 }
  0x2e   : > { %330 = vmatmul.f32.vlgmr.msra.gmra.mxu0 %v228_v34  ;;  %461 = vmatmul.f32.vlgmr.msra.gmra.mxu3 %v255_v35 }
  0x34   : > { %369 = vmatmul.f32.gmra.mxu2 %v254_v36 }
  0x35   : > { %425 = vmatmul.f32.gmra.mxu1 %v231_v37 }
  0x36   : > { %333 = vmatmul.f32.gmra.mxu0 %v230_v38  ;;  %464 = vmatmul.f32.gmra.mxu3 %v257_v39 }
  0x3c   : > { %372 = vmatmul.f32.gmra.mxu2 %v256_v40 }
  0x3d   : > { %428 = vmatmul.f32.gmra.mxu1 %v233_v41 }
  0x3e   : > { %336 = vmatmul.f32.gmra.mxu0 %v232_v42  ;;  %467 = vmatmul.f32.gmra.mxu3 %v259_v43 }
  0x44   : > { %375 = vmatmul.f32.gmra.mxu2 %v258_v44 }
  0x45   : > { %431 = vmatmul.f32.gmra.mxu1 %v235_v45 }
  0x46   : > { %339 = vmatmul.f32.gmra.mxu0 %v234_v46  ;;  %470 = vmatmul.f32.gmra.mxu3 %v261_v47 }
  0x4c   : > { %378 = vmatmul.f32.gmra.mxu2 %v260_v48 }
  0x4d   : > { %434 = vmatmul.f32.gmra.mxu1 %v237_v49 }
  0x4e   : > { %342 = vmatmul.f32.gmra.mxu0 %v236_v50  ;;  %473 = vmatmul.f32.gmra.mxu3 %v263_v51 }
  0x54   : > { %381 = vmatmul.f32.gmra.mxu2 %v262_v52 }
  0x55   : > { %437 = vmatmul.f32.gmra.mxu1 %v239_v53 }
  0x56   : > { %345 = vmatmul.f32.gmra.mxu0 %v238_v54  ;;  %476 = vmatmul.f32.gmra.mxu3 %v265_v55 }
  0x5c   : > { %384 = vmatmul.f32.gmra.mxu2 %v264_v56 }
  0x5d   : > { %440 = vmatmul.f32.gmra.mxu1 %v241_v57 }
  0x5e   : > { %348 = vmatmul.f32.gmra.mxu0 %v240_v58  ;;  %479 = vmatmul.f32.gmra.mxu3 %v267_v59 }
  0x64   : > { %387 = vmatmul.f32.gmra.mxu2 %v266_v60 }
  0x65   : > { %443 = vmatmul.f32.gmra.mxu1 %v243_v61 }
  0x66   : > { %351 = vmatmul.f32.gmra.mxu0 %v242_v62  ;;  %482 = vmatmul.f32.gmra.mxu3 %v269_v63 }
  0x6c   : > { %390 = vmatmul.f32.gmra.mxu2 %v268_v0 }
  0x6d   : > { %446 = vmatmul.f32.gmra.mxu1 %v245_v1 }
  0x6e   : > { %354 = vmatmul.f32.gmra.mxu0 %v244_v2  ;;  %485 = vmatmul.f32.gmra.mxu3 %v271_v3 }
  0x74   : > { %393 = vmatmul.f32.gmra.mxu2 %v270_v4 }
  0x75   : > { %449 = vmatmul.f32.gmra.mxu1 %v247_v5 }
  0x76   : > { %357 = vmatmul.f32.gmra.mxu0 %v246_v6  ;;  %488 = vmatmul.f32.gmra.mxu3 %v273_v7 }
  0x7c   : > { %396 = vmatmul.f32.gmra.mxu2 %v272_v8 }
  0x7d   : > { %452 = vmatmul.f32.gmra.mxu1 %v249_v9 }
  0x7e   : > { %360 = vmatmul.f32.gmra.mxu0 %v248_v10  ;;  %491 = vmatmul.f32.gmra.mxu3 %v275_v11 }
  0x84   : > { %399 = vmatmul.f32.gmra.mxu2 %v274_v12 }
  0x85   : > { %455 = vmatmul.f32.gmra.mxu1 %v251_v13 }
  0x86   : > { %363 = vmatmul.f32.gmra.mxu0 %v250_v14  ;;  %494 = vmatmul.f32.gmra.mxu3 %v277_v15 }
  0x8c   : > { %402 = vmatmul.f32.gmra.mxu2 %v276_v16 }
  0x8d   : > { %458 = vmatmul.f32.gmra.mxu1 %v253_v17 }
  0xaa   : > { %v423_v19 = vpop.f32.mrf.mxu1 }
  0xab   : > { %v331_v20 = vpop.f32.mrf.mxu0 }
  0xac   : > { %v332_v21 = vadd.f32 %v943_v18, %v331_v20 }
  0xae   : > { %v424_v22 = vadd.f32 %v423_v19, %v332_v21 }
  0xaf   : > { %v952_v23 = vpop.f32.mrf.mxu2 }
  0xb0   : > { %v498_v24 = vmax.f32 %v424_v22, 0.0 }
  0xb1   : > { %v462_v26 = vpop.f32.mrf.mxu3 }
  0xb2   : > { %v426_v25 = vpop.f32.mrf.mxu1  ;;  %524 = vst.msk [vmem:[%s950_s20] sm:$0xff] %vm523_vm0, %v498_v24 }
  0xb3   : > { %v334_v27 = vpop.f32.mrf.mxu0 }
  0xb4   : > { %v335_v28 = vadd.f32 %v943_v18, %v334_v27 }
  0xb6   : > { %v427_v29 = vadd.f32 %v426_v25, %v335_v28 }
  0xb7   : > { %v370_v30 = vpop.f32.mrf.mxu2 }
  0xb8   : > { %v499_v31 = vmax.f32 %v427_v29, 0.0  ;;  %v371_v32 = vadd.f32 %v943_v18, %v370_v30 }
  0xb9   : > { %v465_v34 = vpop.f32.mrf.mxu3 }
  0xba   : > { %v429_v33 = vpop.f32.mrf.mxu1  ;;  %525 = vst.msk [vmem:[%s950_s20 + $0x8] sm:$0xff] %vm523_vm0, %v499_v31  ;;  %v463_v35 = vadd.f32 %v462_v26, %v371_v32 }
  0xbb   : > { %v337_v36 = vpop.f32.mrf.mxu0 }
  0xbc   : > { %v511_v37 = vmax.f32 %v463_v35, 0.0  ;;  %v338_v38 = vadd.f32 %v943_v18, %v337_v36 }
  0xbe   : > { %537 = vst.msk [vmem:[%s950_s20 + $0x68] sm:$0xff] %vm523_vm0, %v511_v37  ;;  %v430_v39 = vadd.f32 %v429_v33, %v338_v38 }
  0xbf   : > { %v373_v40 = vpop.f32.mrf.mxu2 }
  0xc0   : > { %v500_v41 = vmax.f32 %v430_v39, 0.0  ;;  %v374_v42 = vadd.f32 %v943_v18, %v373_v40 }
  0xc1   : > { %v468_v44 = vpop.f32.mrf.mxu3 }
  0xc2   : > { %v432_v43 = vpop.f32.mrf.mxu1  ;;  %526 = vst.msk [vmem:[%s950_s20 + $0x10] sm:$0xff] %vm523_vm0, %v500_v41  ;;  %v466_v45 = vadd.f32 %v465_v34, %v374_v42 }
  0xc3   : > { %v340_v46 = vpop.f32.mrf.mxu0 }
  0xc4   : > { %v512_v47 = vmax.f32 %v466_v45, 0.0  ;;  %v341_v48 = vadd.f32 %v943_v18, %v340_v46 }
  0xc6   : > { %538 = vst.msk [vmem:[%s950_s20 + $0x70] sm:$0xff] %vm523_vm0, %v512_v47  ;;  %v433_v49 = vadd.f32 %v432_v43, %v341_v48 }
  0xc7   : > { %v376_v50 = vpop.f32.mrf.mxu2 }
  0xc8   : > { %v501_v51 = vmax.f32 %v433_v49, 0.0  ;;  %v377_v52 = vadd.f32 %v943_v18, %v376_v50 }
  0xc9   : > { %v471_v54 = vpop.f32.mrf.mxu3 }
  0xca   : > { %v435_v53 = vpop.f32.mrf.mxu1  ;;  %527 = vst.msk [vmem:[%s950_s20 + $0x18] sm:$0xff] %vm523_vm0, %v501_v51  ;;  %v469_v55 = vadd.f32 %v468_v44, %v377_v52 }
  0xcb   : > { %v343_v56 = vpop.f32.mrf.mxu0 }
  0xcc   : > { %v513_v57 = vmax.f32 %v469_v55, 0.0  ;;  %v344_v58 = vadd.f32 %v943_v18, %v343_v56 }
  0xce   : > { %539 = vst.msk [vmem:[%s950_s20 + $0x78] sm:$0xff] %vm523_vm0, %v513_v57  ;;  %v436_v59 = vadd.f32 %v435_v53, %v344_v58 }
  0xcf   : > { %v379_v60 = vpop.f32.mrf.mxu2 }
  0xd0   : > { %v502_v61 = vmax.f32 %v436_v59, 0.0  ;;  %v380_v62 = vadd.f32 %v943_v18, %v379_v60 }
  0xd1   : > { %v474_v0 = vpop.f32.mrf.mxu3 }
  0xd2   : > { %v438_v63 = vpop.f32.mrf.mxu1  ;;  %528 = vst.msk [vmem:[%s950_s20 + $0x20] sm:$0xff] %vm523_vm0, %v502_v61  ;;  %v472_v1 = vadd.f32 %v471_v54, %v380_v62 }
  0xd3   : > { %v346_v2 = vpop.f32.mrf.mxu0 }
  0xd4   : > { %v514_v3 = vmax.f32 %v472_v1, 0.0  ;;  %v347_v4 = vadd.f32 %v943_v18, %v346_v2 }
  0xd6   : > { %540 = vst.msk [vmem:[%s950_s20 + $0x80] sm:$0xff] %vm523_vm0, %v514_v3  ;;  %v439_v5 = vadd.f32 %v438_v63, %v347_v4 }
  0xd7   : > { %v382_v6 = vpop.f32.mrf.mxu2 }
  0xd8   : > { %v503_v7 = vmax.f32 %v439_v5, 0.0  ;;  %v383_v8 = vadd.f32 %v943_v18, %v382_v6  ;;  %v368_v5 = vadd.f32 %v943_v18, %v952_v23 }
  0xd9   : > { %v477_v10 = vpop.f32.mrf.mxu3 }
  0xda   : > { %v441_v9 = vpop.f32.mrf.mxu1  ;;  %529 = vst.msk [vmem:[%s950_s20 + $0x28] sm:$0xff] %vm523_vm0, %v503_v7  ;;  %v475_v11 = vadd.f32 %v474_v0, %v383_v8 }
  0xdb   : > { %v349_v12 = vpop.f32.mrf.mxu0 }
  0xdc   : > { %v515_v13 = vmax.f32 %v475_v11, 0.0  ;;  %v350_v14 = vadd.f32 %v943_v18, %v349_v12 }
  0xde   : > { %541 = vst.msk [vmem:[%s950_s20 + $0x88] sm:$0xff] %vm523_vm0, %v515_v13  ;;  %v442_v15 = vadd.f32 %v441_v9, %v350_v14 }
  0xdf   : > { %v385_v16 = vpop.f32.mrf.mxu2 }
  0xe0   : > { %v504_v17 = vmax.f32 %v442_v15, 0.0  ;;  %v386_v19 = vadd.f32 %v943_v18, %v385_v16 }
  0xe1   : > { %v480_v21 = vpop.f32.mrf.mxu3 }
  0xe2   : > { %v444_v20 = vpop.f32.mrf.mxu1  ;;  %530 = vst.msk [vmem:[%s950_s20 + $0x30] sm:$0xff] %vm523_vm0, %v504_v17  ;;  %v478_v22 = vadd.f32 %v477_v10, %v386_v19 }
  0xe3   : > { %v352_v24 = vpop.f32.mrf.mxu0 }
  0xe4   : > { %v516_v25 = vmax.f32 %v478_v22, 0.0  ;;  %v353_v26 = vadd.f32 %v943_v18, %v352_v24 }
  0xe6   : > { %542 = vst.msk [vmem:[%s950_s20 + $0x90] sm:$0xff] %vm523_vm0, %v516_v25  ;;  %v445_v27 = vadd.f32 %v444_v20, %v353_v26 }
  0xe7   : > { %v388_v28 = vpop.f32.mrf.mxu2 }
  0xe8   : > { %v505_v29 = vmax.f32 %v445_v27, 0.0  ;;  %v389_v30 = vadd.f32 %v943_v18, %v388_v28 }
  0xe9   : > { %v483_v32 = vpop.f32.mrf.mxu3 }
  0xea   : > { %v447_v31 = vpop.f32.mrf.mxu1  ;;  %531 = vst.msk [vmem:[%s950_s20 + $0x38] sm:$0xff] %vm523_vm0, %v505_v29  ;;  %v481_v33 = vadd.f32 %v480_v21, %v389_v30 }
  0xeb   : > { %v355_v34 = vpop.f32.mrf.mxu0 }
  0xec   : > { %v517_v35 = vmax.f32 %v481_v33, 0.0  ;;  %v356_v36 = vadd.f32 %v943_v18, %v355_v34 }
  0xee   : > { %543 = vst.msk [vmem:[%s950_s20 + $0x98] sm:$0xff] %vm523_vm0, %v517_v35  ;;  %v448_v37 = vadd.f32 %v447_v31, %v356_v36 }
  0xef   : > { %v391_v38 = vpop.f32.mrf.mxu2 }
  0xf0   : > { %v506_v39 = vmax.f32 %v448_v37, 0.0  ;;  %v392_v40 = vadd.f32 %v943_v18, %v391_v38 }
  0xf1   : > { %v486_v42 = vpop.f32.mrf.mxu3 }
  0xf2   : > { %v450_v41 = vpop.f32.mrf.mxu1  ;;  %532 = vst.msk [vmem:[%s950_s20 + $0x40] sm:$0xff] %vm523_vm0, %v506_v39  ;;  %v484_v43 = vadd.f32 %v483_v32, %v392_v40 }
  0xf3   : > { %v358_v44 = vpop.f32.mrf.mxu0 }
  0xf4   : > { %v518_v45 = vmax.f32 %v484_v43, 0.0  ;;  %v359_v46 = vadd.f32 %v943_v18, %v358_v44 }
  0xf6   : > { %544 = vst.msk [vmem:[%s950_s20 + $0xa0] sm:$0xff] %vm523_vm0, %v518_v45  ;;  %v451_v47 = vadd.f32 %v450_v41, %v359_v46 }
  0xf7   : > { %v394_v48 = vpop.f32.mrf.mxu2 }
  0xf8   : > { %v507_v49 = vmax.f32 %v451_v47, 0.0  ;;  %v395_v50 = vadd.f32 %v943_v18, %v394_v48 }
  0xf9   : > { %v489_v54 = vpop.f32.mrf.mxu3 }
  0xfa   : > { %v453_v51 = vpop.f32.mrf.mxu1  ;;  %533 = vst.msk [vmem:[%s950_s20 + $0x48] sm:$0xff] %vm523_vm0, %v507_v49  ;;  %v487_v52 = vadd.f32 %v486_v42, %v395_v50 }
  0xfb   : > { %v361_v53 = vpop.f32.mrf.mxu0 }
  0xfc   : > { %v519_v55 = vmax.f32 %v487_v52, 0.0  ;;  %v362_v56 = vadd.f32 %v943_v18, %v361_v53 }
  0xfe   : > { %545 = vst.msk [vmem:[%s950_s20 + $0xa8] sm:$0xff] %vm523_vm0, %v519_v55  ;;  %v454_v57 = vadd.f32 %v453_v51, %v362_v56 }
  0xff   : > { %v397_v58 = vpop.f32.mrf.mxu2 }
 0x100   : > { %v508_v59 = vmax.f32 %v454_v57, 0.0  ;;  %v398_v60 = vadd.f32 %v943_v18, %v397_v58 }
 0x101   : > { %v492_v2 = vpop.f32.mrf.mxu3 }
 0x102   : > { %v456_v61 = vpop.f32.mrf.mxu1  ;;  %534 = vst.msk [vmem:[%s950_s20 + $0x50] sm:$0xff] %vm523_vm0, %v508_v59  ;;  %v490_v62 = vadd.f32 %v489_v54, %v398_v60 }
 0x103   : > { %v364_v63 = vpop.f32.mrf.mxu0 }
 0x104   : > { %v520_v0 = vmax.f32 %v490_v62, 0.0  ;;  %v365_v1 = vadd.f32 %v943_v18, %v364_v63 }
 0x106   : > { %546 = vst.msk [vmem:[%s950_s20 + $0xb0] sm:$0xff] %vm523_vm0, %v520_v0  ;;  %v457_v3 = vadd.f32 %v456_v61, %v365_v1 }
 0x107   : > { %v400_v4 = vpop.f32.mrf.mxu2 }
 0x108   : > { %v509_v6 = vmax.f32 %v457_v3, 0.0  ;;  %v401_v7 = vadd.f32 %v943_v18, %v400_v4 }
 0x109   : > { %v495_v14 = vpop.f32.mrf.mxu3 }
 0x10a   : > { %v459_v8 = vpop.f32.mrf.mxu1  ;;  %535 = vst.msk [vmem:[%s950_s20 + $0x58] sm:$0xff] %vm523_vm0, %v509_v6  ;;  %v493_v10 = vadd.f32 %v492_v2, %v401_v7 }
 0x10b   : > { %v460_v9 = vadd.f32 %v459_v8, %v368_v5 }
 0x10c   : > { %v521_v12 = vmax.f32 %v493_v10, 0.0 }
 0x10d   : > { %v510_v11 = vmax.f32 %v460_v9, 0.0 }
 0x10e   : > { %547 = vst.msk [vmem:[%s950_s20 + $0xb8] sm:$0xff] %vm523_vm0, %v521_v12 }
 0x10f   : > { %536 = vst.msk [vmem:[%s950_s20 + $0x60] sm:$0xff] %vm523_vm0, %v510_v11  ;;  %v403_v13 = vpop.f32.mrf.mxu2 }
 0x110   : > { %v404_v15 = vadd.f32 %v943_v18, %v403_v13 }
 0x112   : > { %v496_v23 = vadd.f32 %v495_v14, %v404_v15 }
 0x114   : > { %v522_v16 = vmax.f32 %v496_v23, 0.0 }
 0x116   : > { %548 = vst.msk [vmem:[%s950_s20 + $0xc0] sm:$0xff] %vm523_vm0, %v522_v16 }
 0x117 PF: > { %s13_s14 = sadd.s32 1, %s743_s14   ;;  %s1042_s12 = smov %s739_s13 }
 0x118   : > { %p10_p5 = scmp.ge.s32.totalorder %s13_s14, 6   ;;  %s1043_s13 = smov %s1045_s15 }
 0x11a   :  { %12 = sbr.rel (!%p10_p5) target bundleno = 2 (0x2), region = 68 }

// kernel: policy_forward.5
= control target key start
LH: loop header
LB: loop body
LE: loop exit
PB: predicated region body
PF: predicated region fallthrough
CT: control target
= control target key end

     0   :  { %vm507_vm0 = vcmask 523264   ;;  %s1108_s1 = inlined_call_operand.vmem [shape: f32[512,64], index: 1, kind: input, shape index: {}]   ;;  %s1109_s0 = inlined_call_operand.vmem [shape: f32[168,512], index: 0, kind: input, shape index: {}]   ;;  %s1110_s2 = inlined_call_operand.vmem [shape: f32[1,64], index: 2, kind: input, shape index: {}]   ;;  %s1111_s3 = inlined_call_operand.vmem [shape: f32[168,64], index: 3, kind: output, shape index: {}]  }
   0x1   :  { %v145_v0 = vld [vmem:[%s1108_s1 + $0x178] sm:$0xff]  ;;  %v144_v2 = vld [vmem:[%s1108_s1 + $0x170] sm:$0xff]  ;;  %v143_v6 = vld [vmem:[%s1108_s1 + $0x168] sm:$0xff] }
   0x2   :  { %v113_v1 = vld [vmem:[%s1108_s1 + $0x78] sm:$0xff]  ;;  %326 = vmatpush.msra.mxu2 %v145_v0  ;;  %v112_v4 = vld [vmem:[%s1108_s1 + $0x70] sm:$0xff]  ;;  %v111_v8 = vld [vmem:[%s1108_s1 + $0x68] sm:$0xff] }
   0x3   :  { %166 = vmatpush.msra.mxu0 %v113_v1  ;;  %v161_v3 = vld [vmem:[%s1108_s1 + $0x1f8] sm:$0xff]  ;;  %v160_v7 = vld [vmem:[%s1108_s1 + $0x1f0] sm:$0xff]  ;;  %v159_v10 = vld [vmem:[%s1108_s1 + $0x1e8] sm:$0xff] }
   0x4   :  { %v129_v5 = vld [vmem:[%s1108_s1 + $0xf8] sm:$0xff]  ;;  %406 = vmatpush.msra.mxu3 %v161_v3  ;;  %327 = vmatpush.msra.mxu2 %v144_v2  ;;  %v128_v9 = vld [vmem:[%s1108_s1 + $0xf0] sm:$0xff]  ;;  %v142_v11 = vld [vmem:[%s1108_s1 + $0x160] sm:$0xff] }
   0x5   :  { %246 = vmatpush.msra.mxu1 %v129_v5  ;;  %167 = vmatpush.msra.mxu0 %v112_v4  ;;  %v110_v12 = vld [vmem:[%s1108_s1 + $0x60] sm:$0xff]  ;;  %v127_v13 = vld [vmem:[%s1108_s1 + $0xe8] sm:$0xff]  ;;  %v141_v16 = vld [vmem:[%s1108_s1 + $0x158] sm:$0xff] }
   0x6   :  { %407 = vmatpush.msra.mxu3 %v160_v7  ;;  %328 = vmatpush.msra.mxu2 %v143_v6  ;;  %v158_v14 = vld [vmem:[%s1108_s1 + $0x1e0] sm:$0xff]  ;;  %v109_v17 = vld [vmem:[%s1108_s1 + $0x58] sm:$0xff]  ;;  %v140_v20 = vld [vmem:[%s1108_s1 + $0x150] sm:$0xff] }
   0x7   :  { %247 = vmatpush.msra.mxu1 %v128_v9  ;;  %168 = vmatpush.msra.mxu0 %v111_v8  ;;  %v126_v15 = vld [vmem:[%s1108_s1 + $0xe0] sm:$0xff]  ;;  %v157_v18 = vld [vmem:[%s1108_s1 + $0x1d8] sm:$0xff]  ;;  %v108_v21 = vld [vmem:[%s1108_s1 + $0x50] sm:$0xff] }
   0x8   :  { %408 = vmatpush.msra.mxu3 %v159_v10  ;;  %329 = vmatpush.msra.mxu2 %v142_v11  ;;  %v125_v19 = vld [vmem:[%s1108_s1 + $0xd8] sm:$0xff]  ;;  %v156_v22 = vld [vmem:[%s1108_s1 + $0x1d0] sm:$0xff]  ;;  %v139_v24 = vld [vmem:[%s1108_s1 + $0x148] sm:$0xff] }
   0x9   :  { %248 = vmatpush.msra.mxu1 %v127_v13  ;;  %169 = vmatpush.msra.mxu0 %v110_v12  ;;  %v124_v23 = vld [vmem:[%s1108_s1 + $0xd0] sm:$0xff]  ;;  %v107_v25 = vld [vmem:[%s1108_s1 + $0x48] sm:$0xff]  ;;  %v138_v28 = vld [vmem:[%s1108_s1 + $0x140] sm:$0xff] }
   0xa   :  { %409 = vmatpush.msra.mxu3 %v158_v14  ;;  %330 = vmatpush.msra.mxu2 %v141_v16  ;;  %v155_v26 = vld [vmem:[%s1108_s1 + $0x1c8] sm:$0xff]  ;;  %v106_v29 = vld [vmem:[%s1108_s1 + $0x40] sm:$0xff]  ;;  %v137_v32 = vld [vmem:[%s1108_s1 + $0x138] sm:$0xff] }
   0xb   :  { %249 = vmatpush.msra.mxu1 %v126_v15  ;;  %170 = vmatpush.msra.mxu0 %v109_v17  ;;  %v123_v27 = vld [vmem:[%s1108_s1 + $0xc8] sm:$0xff]  ;;  %v154_v30 = vld [vmem:[%s1108_s1 + $0x1c0] sm:$0xff]  ;;  %v105_v33 = vld [vmem:[%s1108_s1 + $0x38] sm:$0xff] }
   0xc   :  { %410 = vmatpush.msra.mxu3 %v157_v18  ;;  %331 = vmatpush.msra.mxu2 %v140_v20  ;;  %v122_v31 = vld [vmem:[%s1108_s1 + $0xc0] sm:$0xff]  ;;  %v153_v34 = vld [vmem:[%s1108_s1 + $0x1b8] sm:$0xff]  ;;  %v136_v36 = vld [vmem:[%s1108_s1 + $0x130] sm:$0xff] }
   0xd   :  { %250 = vmatpush.msra.mxu1 %v125_v19  ;;  %171 = vmatpush.msra.mxu0 %v108_v21  ;;  %v121_v35 = vld [vmem:[%s1108_s1 + $0xb8] sm:$0xff]  ;;  %v104_v37 = vld [vmem:[%s1108_s1 + $0x30] sm:$0xff]  ;;  %v135_v40 = vld [vmem:[%s1108_s1 + $0x128] sm:$0xff] }
   0xe   :  { %411 = vmatpush.msra.mxu3 %v156_v22  ;;  %332 = vmatpush.msra.mxu2 %v139_v24  ;;  %v152_v38 = vld [vmem:[%s1108_s1 + $0x1b0] sm:$0xff]  ;;  %v103_v41 = vld [vmem:[%s1108_s1 + $0x28] sm:$0xff]  ;;  %v134_v44 = vld [vmem:[%s1108_s1 + $0x120] sm:$0xff] }
   0xf   :  { %251 = vmatpush.msra.mxu1 %v124_v23  ;;  %172 = vmatpush.msra.mxu0 %v107_v25  ;;  %v120_v39 = vld [vmem:[%s1108_s1 + $0xb0] sm:$0xff]  ;;  %v151_v42 = vld [vmem:[%s1108_s1 + $0x1a8] sm:$0xff]  ;;  %v102_v45 = vld [vmem:[%s1108_s1 + $0x20] sm:$0xff] }
  0x10   :  { %412 = vmatpush.msra.mxu3 %v155_v26  ;;  %333 = vmatpush.msra.mxu2 %v138_v28  ;;  %v119_v43 = vld [vmem:[%s1108_s1 + $0xa8] sm:$0xff]  ;;  %v150_v46 = vld [vmem:[%s1108_s1 + $0x1a0] sm:$0xff]  ;;  %v133_v48 = vld [vmem:[%s1108_s1 + $0x118] sm:$0xff] }
  0x11   :  { %252 = vmatpush.msra.mxu1 %v123_v27  ;;  %173 = vmatpush.msra.mxu0 %v106_v29  ;;  %v118_v47 = vld [vmem:[%s1108_s1 + $0xa0] sm:$0xff]  ;;  %v101_v49 = vld [vmem:[%s1108_s1 + $0x18] sm:$0xff]  ;;  %v132_v52 = vld [vmem:[%s1108_s1 + $0x110] sm:$0xff] }
  0x12   :  { %413 = vmatpush.msra.mxu3 %v154_v30  ;;  %334 = vmatpush.msra.mxu2 %v137_v32  ;;  %v149_v50 = vld [vmem:[%s1108_s1 + $0x198] sm:$0xff]  ;;  %v100_v53 = vld [vmem:[%s1108_s1 + $0x10] sm:$0xff]  ;;  %v131_v56 = vld [vmem:[%s1108_s1 + $0x108] sm:$0xff] }
  0x13   :  { %253 = vmatpush.msra.mxu1 %v122_v31  ;;  %174 = vmatpush.msra.mxu0 %v105_v33  ;;  %v117_v51 = vld [vmem:[%s1108_s1 + $0x98] sm:$0xff]  ;;  %v148_v54 = vld [vmem:[%s1108_s1 + $0x190] sm:$0xff]  ;;  %v99_v57 = vld [vmem:[%s1108_s1 + $0x8] sm:$0xff] }
  0x14   :  { %414 = vmatpush.msra.mxu3 %v153_v34  ;;  %335 = vmatpush.msra.mxu2 %v136_v36  ;;  %v116_v55 = vld [vmem:[%s1108_s1 + $0x90] sm:$0xff]  ;;  %v147_v58 = vld [vmem:[%s1108_s1 + $0x188] sm:$0xff]  ;;  %v130_v60 = vld [vmem:[%s1108_s1 + $0x100] sm:$0xff] }
  0x15   :  { %254 = vmatpush.msra.mxu1 %v121_v35  ;;  %175 = vmatpush.msra.mxu0 %v104_v37  ;;  %v115_v59 = vld [vmem:[%s1108_s1 + $0x88] sm:$0xff]  ;;  %v98_v61 = vld [vmem:[%s1108_s1] sm:$0xff]  ;;  %v16_v62 = vld [vmem:[%s1109_s0 + $0x10] sm:$0xff] }
  0x16   :  { %415 = vmatpush.msra.mxu3 %v152_v38  ;;  %336 = vmatpush.msra.mxu2 %v135_v40  ;;  %v146_v63 = vld [vmem:[%s1108_s1 + $0x180] sm:$0xff]  ;;  %v17_v1 = vld [vmem:[%s1109_s0 + $0x18] sm:$0xff]  ;;  %v15_v3 = vld [vmem:[%s1109_s0 + $0x8] sm:$0xff] }
  0x17   :  { %255 = vmatpush.msra.mxu1 %v120_v39  ;;  %176 = vmatpush.msra.mxu0 %v103_v41  ;;  %v14_v0 = vld [vmem:[%s1109_s0] sm:$0xff]  ;;  %v20_v4 = vld [vmem:[%s1109_s0 + $0x30] sm:$0xff]  ;;  %v21_v6 = vld [vmem:[%s1109_s0 + $0x38] sm:$0xff] }
  0x18   :  { %416 = vmatpush.msra.mxu3 %v151_v42  ;;  %337 = vmatpush.msra.mxu2 %v134_v44  ;;  %v114_v2 = vld [vmem:[%s1108_s1 + $0x80] sm:$0xff]  ;;  %v19_v7 = vld [vmem:[%s1109_s0 + $0x28] sm:$0xff]  ;;  %v24_v8 = vld [vmem:[%s1109_s0 + $0x50] sm:$0xff] }
  0x19   :  { %256 = vmatpush.msra.mxu1 %v119_v43  ;;  %177 = vmatpush.msra.mxu0 %v102_v45  ;;  %v18_v5 = vld [vmem:[%s1109_s0 + $0x20] sm:$0xff]  ;;  %v25_v10 = vld [vmem:[%s1109_s0 + $0x58] sm:$0xff]  ;;  %v23_v11 = vld [vmem:[%s1109_s0 + $0x48] sm:$0xff] }
  0x1a   :  { %417 = vmatpush.msra.mxu3 %v150_v46  ;;  %338 = vmatpush.msra.mxu2 %v133_v48  ;;  %v22_v9 = vld [vmem:[%s1109_s0 + $0x40] sm:$0xff]  ;;  %v28_v12 = vld [vmem:[%s1109_s0 + $0x70] sm:$0xff]  ;;  %v29_v14 = vld [vmem:[%s1109_s0 + $0x78] sm:$0xff] }
  0x1b   :  { %257 = vmatpush.msra.mxu1 %v118_v47  ;;  %178 = vmatpush.msra.mxu0 %v101_v49  ;;  %v26_v13 = vld [vmem:[%s1109_s0 + $0x60] sm:$0xff]  ;;  %v27_v15 = vld [vmem:[%s1109_s0 + $0x68] sm:$0xff]  ;;  %v32_v16 = vld [vmem:[%s1109_s0 + $0x90] sm:$0xff] }
  0x1c   :  { %418 = vmatpush.msra.mxu3 %v149_v50  ;;  %339 = vmatpush.msra.mxu2 %v132_v52  ;;  %v30_v17 = vld [vmem:[%s1109_s0 + $0x80] sm:$0xff]  ;;  %v33_v18 = vld [vmem:[%s1109_s0 + $0x98] sm:$0xff]  ;;  %v31_v19 = vld [vmem:[%s1109_s0 + $0x88] sm:$0xff] }
  0x1d   :  { %258 = vmatpush.msra.mxu1 %v117_v51  ;;  %179 = vmatpush.msra.mxu0 %v100_v53  ;;  %v36_v20 = vld [vmem:[%s1109_s0 + $0xb0] sm:$0xff]  ;;  %v34_v21 = vld [vmem:[%s1109_s0 + $0xa0] sm:$0xff]  ;;  %v37_v22 = vld [vmem:[%s1109_s0 + $0xb8] sm:$0xff] }
  0x1e   :  { %419 = vmatpush.msra.mxu3 %v148_v54  ;;  %340 = vmatpush.msra.mxu2 %v131_v56  ;;  %v35_v23 = vld [vmem:[%s1109_s0 + $0xa8] sm:$0xff]  ;;  %v40_v24 = vld [vmem:[%s1109_s0 + $0xd0] sm:$0xff]  ;;  %v38_v25 = vld [vmem:[%s1109_s0 + $0xc0] sm:$0xff] }
  0x1f   :  { %259 = vmatpush.msra.mxu1 %v116_v55  ;;  %180 = vmatpush.msra.mxu0 %v99_v57  ;;  %v41_v26 = vld [vmem:[%s1109_s0 + $0xd8] sm:$0xff]  ;;  %v39_v27 = vld [vmem:[%s1109_s0 + $0xc8] sm:$0xff]  ;;  %v44_v28 = vld [vmem:[%s1109_s0 + $0xf0] sm:$0xff] }
  0x20   :  { %420 = vmatpush.msra.mxu3 %v147_v58  ;;  %341 = vmatpush.msra.mxu2 %v130_v60  ;;  %v42_v29 = vld [vmem:[%s1109_s0 + $0xe0] sm:$0xff]  ;;  %v45_v30 = vld [vmem:[%s1109_s0 + $0xf8] sm:$0xff]  ;;  %v43_v31 = vld [vmem:[%s1109_s0 + $0xe8] sm:$0xff] }
  0x21   :  { %260 = vmatpush.msra.mxu1 %v115_v59  ;;  %181 = vmatpush.msra.mxu0 %v98_v61  ;;  %v48_v32 = vld [vmem:[%s1109_s0 + $0x110] sm:$0xff]  ;;  %v46_v33 = vld [vmem:[%s1109_s0 + $0x100] sm:$0xff]  ;;  %v49_v34 = vld [vmem:[%s1109_s0 + $0x118] sm:$0xff] }
  0x22   :  { %342 = vmatmul.f32.vlgmr.msra.gmra.mxu2 %v16_v62  ;;  %421 = vmatpush.msra.mxu3 %v146_v63  ;;  %v47_v35 = vld [vmem:[%s1109_s0 + $0x108] sm:$0xff]  ;;  %v52_v36 = vld [vmem:[%s1109_s0 + $0x130] sm:$0xff]  ;;  %v50_v37 = vld [vmem:[%s1109_s0 + $0x120] sm:$0xff] }
  0x23   :  { %182 = vmatmul.f32.vlgmr.msra.gmra.mxu0 %v14_v0  ;;  %422 = vmatmul.f32.vlgmr.msra.gmra.mxu3 %v17_v1  ;;  %v53_v38 = vld [vmem:[%s1109_s0 + $0x138] sm:$0xff]  ;;  %v51_v39 = vld [vmem:[%s1109_s0 + $0x128] sm:$0xff]  ;;  %v56_v40 = vld [vmem:[%s1109_s0 + $0x150] sm:$0xff] }
  0x24   :  { %261 = vmatpush.msra.mxu1 %v114_v2  ;;  %v54_v41 = vld [vmem:[%s1109_s0 + $0x140] sm:$0xff]  ;;  %v57_v42 = vld [vmem:[%s1109_s0 + $0x158] sm:$0xff]  ;;  %v55_v43 = vld [vmem:[%s1109_s0 + $0x148] sm:$0xff] }
  0x25   :  { %262 = vmatmul.f32.vlgmr.msra.gmra.mxu1 %v15_v3  ;;  %v60_v44 = vld [vmem:[%s1109_s0 + $0x170] sm:$0xff]  ;;  %v58_v45 = vld [vmem:[%s1109_s0 + $0x160] sm:$0xff]  ;;  %v61_v46 = vld [vmem:[%s1109_s0 + $0x178] sm:$0xff] }
  0x26   :  { %v59_v47 = vld [vmem:[%s1109_s0 + $0x168] sm:$0xff]  ;;  %v64_v48 = vld [vmem:[%s1109_s0 + $0x190] sm:$0xff]  ;;  %v62_v49 = vld [vmem:[%s1109_s0 + $0x180] sm:$0xff] }
  0x27   :  { %v65_v50 = vld [vmem:[%s1109_s0 + $0x198] sm:$0xff]  ;;  %v63_v51 = vld [vmem:[%s1109_s0 + $0x188] sm:$0xff]  ;;  %v68_v52 = vld [vmem:[%s1109_s0 + $0x1b0] sm:$0xff] }
  0x28   :  { %v66_v53 = vld [vmem:[%s1109_s0 + $0x1a0] sm:$0xff]  ;;  %v69_v54 = vld [vmem:[%s1109_s0 + $0x1b8] sm:$0xff]  ;;  %v67_v55 = vld [vmem:[%s1109_s0 + $0x1a8] sm:$0xff] }
  0x29   :  { %v72_v56 = vld [vmem:[%s1109_s0 + $0x1d0] sm:$0xff]  ;;  %v70_v57 = vld [vmem:[%s1109_s0 + $0x1c0] sm:$0xff]  ;;  %v73_v58 = vld [vmem:[%s1109_s0 + $0x1d8] sm:$0xff] }
  0x2a   :  { %345 = vmatmul.f32.gmra.mxu2 %v20_v4  ;;  %v71_v59 = vld [vmem:[%s1109_s0 + $0x1c8] sm:$0xff]  ;;  %v76_v60 = vld [vmem:[%s1109_s0 + $0x1f0] sm:$0xff]  ;;  %v74_v61 = vld [vmem:[%s1109_s0 + $0x1e0] sm:$0xff] }
  0x2b   :  { %185 = vmatmul.f32.gmra.mxu0 %v18_v5  ;;  %425 = vmatmul.f32.gmra.mxu3 %v21_v6  ;;  %v77_v62 = vld [vmem:[%s1109_s0 + $0x1f8] sm:$0xff]  ;;  %v75_v63 = vld [vmem:[%s1109_s0 + $0x1e8] sm:$0xff]  ;;  %v941_v0 = vld [vmem:[%s1110_s2] ss:$0 sm:$0xff] }
  0x2c   :  { %v80_v1 = vld [vmem:[%s1109_s0 + $0x210] sm:$0xff]  ;;  %v78_v3 = vld [vmem:[%s1109_s0 + $0x200] sm:$0xff]  ;;  %v81_v4 = vld [vmem:[%s1109_s0 + $0x218] sm:$0xff] }
  0x2d   :  { %265 = vmatmul.f32.gmra.mxu1 %v19_v7  ;;  %v79_v7 = vld [vmem:[%s1109_s0 + $0x208] sm:$0xff] }
  0x32   :  { %348 = vmatmul.f32.gmra.mxu2 %v24_v8 }
  0x33   :  { %188 = vmatmul.f32.gmra.mxu0 %v22_v9  ;;  %428 = vmatmul.f32.gmra.mxu3 %v25_v10 }
  0x35   :  { %268 = vmatmul.f32.gmra.mxu1 %v23_v11 }
  0x3a   :  { %351 = vmatmul.f32.gmra.mxu2 %v28_v12  ;;  %v84_v12 = vld [vmem:[%s1109_s0 + $0x230] sm:$0xff] }
  0x3b   :  { %191 = vmatmul.f32.gmra.mxu0 %v26_v13  ;;  %431 = vmatmul.f32.gmra.mxu3 %v29_v14 }
  0x3d   :  { %271 = vmatmul.f32.gmra.mxu1 %v27_v15  ;;  %v82_v15 = vld [vmem:[%s1109_s0 + $0x220] sm:$0xff] }
  0x42   :  { %354 = vmatmul.f32.gmra.mxu2 %v32_v16  ;;  %v85_v16 = vld [vmem:[%s1109_s0 + $0x238] sm:$0xff] }
  0x43   :  { %194 = vmatmul.f32.gmra.mxu0 %v30_v17  ;;  %434 = vmatmul.f32.gmra.mxu3 %v33_v18 }
  0x45   :  { %274 = vmatmul.f32.gmra.mxu1 %v31_v19 }
  0x4a   :  { %357 = vmatmul.f32.gmra.mxu2 %v36_v20  ;;  %v83_v20 = vld [vmem:[%s1109_s0 + $0x228] sm:$0xff] }
  0x4b   :  { %197 = vmatmul.f32.gmra.mxu0 %v34_v21  ;;  %437 = vmatmul.f32.gmra.mxu3 %v37_v22 }
  0x4d   :  { %277 = vmatmul.f32.gmra.mxu1 %v35_v23 }
  0x52   :  { %360 = vmatmul.f32.gmra.mxu2 %v40_v24 }
  0x53   :  { %200 = vmatmul.f32.gmra.mxu0 %v38_v25  ;;  %440 = vmatmul.f32.gmra.mxu3 %v41_v26  ;;  %v88_v25 = vld [vmem:[%s1109_s0 + $0x250] sm:$0xff] }
  0x55   :  { %280 = vmatmul.f32.gmra.mxu1 %v39_v27 }
  0x5a   :  { %363 = vmatmul.f32.gmra.mxu2 %v44_v28  ;;  %v86_v28 = vld [vmem:[%s1109_s0 + $0x240] sm:$0xff] }
  0x5b   :  { %203 = vmatmul.f32.gmra.mxu0 %v42_v29  ;;  %443 = vmatmul.f32.gmra.mxu3 %v45_v30  ;;  %v89_v29 = vld [vmem:[%s1109_s0 + $0x258] sm:$0xff] }
  0x5d   :  { %283 = vmatmul.f32.gmra.mxu1 %v43_v31 }
  0x62   :  { %366 = vmatmul.f32.gmra.mxu2 %v48_v32 }
  0x63   :  { %206 = vmatmul.f32.gmra.mxu0 %v46_v33  ;;  %446 = vmatmul.f32.gmra.mxu3 %v49_v34  ;;  %v87_v33 = vld [vmem:[%s1109_s0 + $0x248] sm:$0xff] }
  0x65   :  { %286 = vmatmul.f32.gmra.mxu1 %v47_v35 }
  0x6a   :  { %369 = vmatmul.f32.gmra.mxu2 %v52_v36 }
  0x6b   :  { %209 = vmatmul.f32.gmra.mxu0 %v50_v37  ;;  %449 = vmatmul.f32.gmra.mxu3 %v53_v38  ;;  %v92_v38 = vld [vmem:[%s1109_s0 + $0x270] sm:$0xff] }
  0x6d   :  { %289 = vmatmul.f32.gmra.mxu1 %v51_v39 }
  0x72   :  { %372 = vmatmul.f32.gmra.mxu2 %v56_v40 }
  0x73   :  { %212 = vmatmul.f32.gmra.mxu0 %v54_v41  ;;  %452 = vmatmul.f32.gmra.mxu3 %v57_v42  ;;  %v90_v41 = vld [vmem:[%s1109_s0 + $0x260] sm:$0xff]  ;;  %v93_v42 = vld [vmem:[%s1109_s0 + $0x278] sm:$0xff] }
  0x75   :  { %292 = vmatmul.f32.gmra.mxu1 %v55_v43 }
  0x7a   :  { %375 = vmatmul.f32.gmra.mxu2 %v60_v44 }
  0x7b   :  { %215 = vmatmul.f32.gmra.mxu0 %v58_v45  ;;  %455 = vmatmul.f32.gmra.mxu3 %v61_v46  ;;  %v91_v46 = vld [vmem:[%s1109_s0 + $0x268] sm:$0xff] }
  0x7d   :  { %295 = vmatmul.f32.gmra.mxu1 %v59_v47 }
  0x82   :  { %378 = vmatmul.f32.gmra.mxu2 %v64_v48 }
  0x83   :  { %218 = vmatmul.f32.gmra.mxu0 %v62_v49  ;;  %458 = vmatmul.f32.gmra.mxu3 %v65_v50 }
  0x85   :  { %298 = vmatmul.f32.gmra.mxu1 %v63_v51  ;;  %v96_v51 = vld [vmem:[%s1109_s0 + $0x290] sm:$0xff] }
  0x8a   :  { %381 = vmatmul.f32.gmra.mxu2 %v68_v52 }
  0x8b   :  { %221 = vmatmul.f32.gmra.mxu0 %v66_v53  ;;  %461 = vmatmul.f32.gmra.mxu3 %v69_v54  ;;  %v94_v54 = vld [vmem:[%s1109_s0 + $0x280] sm:$0xff] }
  0x8d   :  { %301 = vmatmul.f32.gmra.mxu1 %v67_v55  ;;  %v97_v55 = vld [vmem:[%s1109_s0 + $0x298] sm:$0xff] }
  0x92   :  { %384 = vmatmul.f32.gmra.mxu2 %v72_v56 }
  0x93   :  { %224 = vmatmul.f32.gmra.mxu0 %v70_v57  ;;  %464 = vmatmul.f32.gmra.mxu3 %v73_v58 }
  0x95   :  { %304 = vmatmul.f32.gmra.mxu1 %v71_v59  ;;  %v95_v59 = vld [vmem:[%s1109_s0 + $0x288] sm:$0xff] }
  0x9a   :  { %387 = vmatmul.f32.gmra.mxu2 %v76_v60 }
  0x9b   :  { %227 = vmatmul.f32.gmra.mxu0 %v74_v61  ;;  %467 = vmatmul.f32.gmra.mxu3 %v77_v62 }
  0x9d   :  { %307 = vmatmul.f32.gmra.mxu1 %v75_v63 }
  0xa0   :  { %v183_v2 = vpop.f32.mrf.mxu0 }
  0xa1   :  { %v184_v5 = vadd.f32 %v941_v0, %v183_v2 }
  0xa2   :  { %390 = vmatmul.f32.gmra.mxu2 %v80_v1  ;;  %v263_v6 = vpop.f32.mrf.mxu1 }
  0xa3   :  { %v264_v8 = vadd.f32 %v263_v6, %v184_v5  ;;  %230 = vmatmul.f32.gmra.mxu0 %v78_v3  ;;  %470 = vmatmul.f32.gmra.mxu3 %v81_v4 }
  0xa5   :  { %v343_v9 = vpop.f32.mrf.mxu2  ;;  %310 = vmatmul.f32.gmra.mxu1 %v79_v7 }
  0xa6   :  { %v344_v10 = vadd.f32 %v343_v9, %v264_v8  ;;  %v423_v11 = vpop.f32.mrf.mxu3 }
  0xa8   :  { %v424_v13 = vadd.f32 %v423_v11, %v344_v10  ;;  %v186_v14 = vpop.f32.mrf.mxu0 }
  0xa9   :  { %v187_v17 = vadd.f32 %v941_v0, %v186_v14 }
  0xaa   :  { %v486_v18 = vmax.f32 %v424_v13, 0.0  ;;  %393 = vmatmul.f32.gmra.mxu2 %v84_v12  ;;  %v266_v19 = vpop.f32.mrf.mxu1 }
  0xab   :  { %v267_v21 = vadd.f32 %v266_v19, %v187_v17  ;;  %233 = vmatmul.f32.gmra.mxu0 %v82_v15  ;;  %473 = vmatmul.f32.gmra.mxu3 %v85_v16 }
  0xac   :  { %508 = vst.msk [vmem:[%s1111_s3] sm:$0xff] %vm507_vm0, %v486_v18 }
  0xad   :  { %v346_v22 = vpop.f32.mrf.mxu2  ;;  %313 = vmatmul.f32.gmra.mxu1 %v83_v20 }
  0xae   :  { %v347_v23 = vadd.f32 %v346_v22, %v267_v21  ;;  %v426_v24 = vpop.f32.mrf.mxu3 }
  0xb0   :  { %v427_v26 = vadd.f32 %v426_v24, %v347_v23  ;;  %v189_v27 = vpop.f32.mrf.mxu0 }
  0xb1   :  { %v190_v30 = vadd.f32 %v941_v0, %v189_v27 }
  0xb2   :  { %v487_v31 = vmax.f32 %v427_v26, 0.0  ;;  %396 = vmatmul.f32.gmra.mxu2 %v88_v25  ;;  %v269_v32 = vpop.f32.mrf.mxu1 }
  0xb3   :  { %v270_v34 = vadd.f32 %v269_v32, %v190_v30  ;;  %236 = vmatmul.f32.gmra.mxu0 %v86_v28  ;;  %476 = vmatmul.f32.gmra.mxu3 %v89_v29 }
  0xb4   :  { %509 = vst.msk [vmem:[%s1111_s3 + $0x8] sm:$0xff] %vm507_vm0, %v487_v31 }
  0xb5   :  { %v349_v35 = vpop.f32.mrf.mxu2  ;;  %316 = vmatmul.f32.gmra.mxu1 %v87_v33 }
  0xb6   :  { %v350_v36 = vadd.f32 %v349_v35, %v270_v34  ;;  %v429_v37 = vpop.f32.mrf.mxu3 }
  0xb8   :  { %v430_v39 = vadd.f32 %v429_v37, %v350_v36  ;;  %v192_v40 = vpop.f32.mrf.mxu0 }
  0xb9   :  { %v193_v43 = vadd.f32 %v941_v0, %v192_v40 }
  0xba   :  { %v488_v44 = vmax.f32 %v430_v39, 0.0  ;;  %399 = vmatmul.f32.gmra.mxu2 %v92_v38  ;;  %v272_v45 = vpop.f32.mrf.mxu1 }
  0xbb   :  { %v273_v47 = vadd.f32 %v272_v45, %v193_v43  ;;  %239 = vmatmul.f32.gmra.mxu0 %v90_v41  ;;  %479 = vmatmul.f32.gmra.mxu3 %v93_v42 }
  0xbc   :  { %510 = vst.msk [vmem:[%s1111_s3 + $0x10] sm:$0xff] %vm507_vm0, %v488_v44 }
  0xbd   :  { %v352_v48 = vpop.f32.mrf.mxu2  ;;  %319 = vmatmul.f32.gmra.mxu1 %v91_v46 }
  0xbe   :  { %v353_v49 = vadd.f32 %v352_v48, %v273_v47  ;;  %v432_v50 = vpop.f32.mrf.mxu3 }
  0xc0   :  { %v433_v52 = vadd.f32 %v432_v50, %v353_v49  ;;  %v195_v53 = vpop.f32.mrf.mxu0 }
  0xc1   :  { %v196_v56 = vadd.f32 %v941_v0, %v195_v53 }
  0xc2   :  { %v489_v57 = vmax.f32 %v433_v52, 0.0  ;;  %402 = vmatmul.f32.gmra.mxu2 %v96_v51  ;;  %v275_v58 = vpop.f32.mrf.mxu1 }
  0xc3   :  { %v276_v60 = vadd.f32 %v275_v58, %v196_v56  ;;  %242 = vmatmul.f32.gmra.mxu0 %v94_v54  ;;  %482 = vmatmul.f32.gmra.mxu3 %v97_v55 }
  0xc4   :  { %511 = vst.msk [vmem:[%s1111_s3 + $0x18] sm:$0xff] %vm507_vm0, %v489_v57 }
  0xc5   :  { %v355_v61 = vpop.f32.mrf.mxu2  ;;  %322 = vmatmul.f32.gmra.mxu1 %v95_v59 }
  0xc6   :  { %v356_v62 = vadd.f32 %v355_v61, %v276_v60  ;;  %v435_v63 = vpop.f32.mrf.mxu3 }
  0xc8   :  { %v436_v1 = vadd.f32 %v435_v63, %v356_v62  ;;  %v198_v2 = vpop.f32.mrf.mxu0 }
  0xc9   :  { %v199_v3 = vadd.f32 %v941_v0, %v198_v2 }
  0xca   :  { %v490_v4 = vmax.f32 %v436_v1, 0.0  ;;  %v278_v5 = vpop.f32.mrf.mxu1 }
  0xcb   :  { %v279_v6 = vadd.f32 %v278_v5, %v199_v3 }
  0xcc   :  { %512 = vst.msk [vmem:[%s1111_s3 + $0x20] sm:$0xff] %vm507_vm0, %v490_v4 }
  0xcd   :  { %v358_v7 = vpop.f32.mrf.mxu2 }
  0xce   :  { %v359_v8 = vadd.f32 %v358_v7, %v279_v6  ;;  %v438_v9 = vpop.f32.mrf.mxu3 }
  0xd0   :  { %v439_v10 = vadd.f32 %v438_v9, %v359_v8  ;;  %v201_v11 = vpop.f32.mrf.mxu0 }
  0xd1   :  { %v202_v12 = vadd.f32 %v941_v0, %v201_v11 }
  0xd2   :  { %v491_v13 = vmax.f32 %v439_v10, 0.0  ;;  %v281_v14 = vpop.f32.mrf.mxu1 }
  0xd3   :  { %v282_v15 = vadd.f32 %v281_v14, %v202_v12 }
  0xd4   :  { %513 = vst.msk [vmem:[%s1111_s3 + $0x28] sm:$0xff] %vm507_vm0, %v491_v13 }
  0xd5   :  { %v361_v16 = vpop.f32.mrf.mxu2 }
  0xd6   :  { %v362_v17 = vadd.f32 %v361_v16, %v282_v15  ;;  %v441_v18 = vpop.f32.mrf.mxu3 }
  0xd8   :  { %v442_v19 = vadd.f32 %v441_v18, %v362_v17  ;;  %v204_v20 = vpop.f32.mrf.mxu0 }
  0xd9   :  { %v205_v21 = vadd.f32 %v941_v0, %v204_v20 }
  0xda   :  { %v492_v22 = vmax.f32 %v442_v19, 0.0  ;;  %v284_v23 = vpop.f32.mrf.mxu1 }
  0xdb   :  { %v285_v24 = vadd.f32 %v284_v23, %v205_v21 }
  0xdc   :  { %514 = vst.msk [vmem:[%s1111_s3 + $0x30] sm:$0xff] %vm507_vm0, %v492_v22 }
  0xdd   :  { %v364_v25 = vpop.f32.mrf.mxu2 }
  0xde   :  { %v365_v26 = vadd.f32 %v364_v25, %v285_v24  ;;  %v444_v27 = vpop.f32.mrf.mxu3 }
  0xe0   :  { %v445_v28 = vadd.f32 %v444_v27, %v365_v26  ;;  %v207_v29 = vpop.f32.mrf.mxu0 }
  0xe1   :  { %v208_v30 = vadd.f32 %v941_v0, %v207_v29 }
  0xe2   :  { %v493_v31 = vmax.f32 %v445_v28, 0.0  ;;  %v287_v32 = vpop.f32.mrf.mxu1 }
  0xe3   :  { %v288_v33 = vadd.f32 %v287_v32, %v208_v30 }
  0xe4   :  { %515 = vst.msk [vmem:[%s1111_s3 + $0x38] sm:$0xff] %vm507_vm0, %v493_v31 }
  0xe5   :  { %v367_v34 = vpop.f32.mrf.mxu2 }
  0xe6   :  { %v368_v35 = vadd.f32 %v367_v34, %v288_v33  ;;  %v447_v36 = vpop.f32.mrf.mxu3 }
  0xe8   :  { %v448_v37 = vadd.f32 %v447_v36, %v368_v35  ;;  %v210_v38 = vpop.f32.mrf.mxu0 }
  0xe9   :  { %v211_v39 = vadd.f32 %v941_v0, %v210_v38 }
  0xea   :  { %v494_v40 = vmax.f32 %v448_v37, 0.0  ;;  %v290_v41 = vpop.f32.mrf.mxu1 }
  0xeb   :  { %v291_v42 = vadd.f32 %v290_v41, %v211_v39 }
  0xec   :  { %516 = vst.msk [vmem:[%s1111_s3 + $0x40] sm:$0xff] %vm507_vm0, %v494_v40 }
  0xed   :  { %v370_v43 = vpop.f32.mrf.mxu2 }
  0xee   :  { %v371_v44 = vadd.f32 %v370_v43, %v291_v42  ;;  %v450_v45 = vpop.f32.mrf.mxu3 }
  0xf0   :  { %v451_v46 = vadd.f32 %v450_v45, %v371_v44  ;;  %v213_v47 = vpop.f32.mrf.mxu0 }
  0xf1   :  { %v214_v48 = vadd.f32 %v941_v0, %v213_v47 }
  0xf2   :  { %v495_v49 = vmax.f32 %v451_v46, 0.0  ;;  %v293_v50 = vpop.f32.mrf.mxu1 }
  0xf3   :  { %v294_v51 = vadd.f32 %v293_v50, %v214_v48 }
  0xf4   :  { %517 = vst.msk [vmem:[%s1111_s3 + $0x48] sm:$0xff] %vm507_vm0, %v495_v49 }
  0xf5   :  { %v373_v52 = vpop.f32.mrf.mxu2 }
  0xf6   :  { %v374_v53 = vadd.f32 %v373_v52, %v294_v51  ;;  %v453_v54 = vpop.f32.mrf.mxu3 }
  0xf8   :  { %v454_v55 = vadd.f32 %v453_v54, %v374_v53  ;;  %v216_v56 = vpop.f32.mrf.mxu0 }
  0xf9   :  { %v217_v57 = vadd.f32 %v941_v0, %v216_v56 }
  0xfa   :  { %v496_v58 = vmax.f32 %v454_v55, 0.0  ;;  %v296_v59 = vpop.f32.mrf.mxu1 }
  0xfb   :  { %v297_v60 = vadd.f32 %v296_v59, %v217_v57 }
  0xfc   :  { %518 = vst.msk [vmem:[%s1111_s3 + $0x50] sm:$0xff] %vm507_vm0, %v496_v58 }
  0xfd   :  { %v376_v61 = vpop.f32.mrf.mxu2 }
  0xfe   :  { %v377_v62 = vadd.f32 %v376_v61, %v297_v60  ;;  %v456_v63 = vpop.f32.mrf.mxu3 }
 0x100   :  { %v457_v1 = vadd.f32 %v456_v63, %v377_v62  ;;  %v219_v2 = vpop.f32.mrf.mxu0 }
 0x101   :  { %v220_v3 = vadd.f32 %v941_v0, %v219_v2 }
 0x102   :  { %v497_v4 = vmax.f32 %v457_v1, 0.0  ;;  %v299_v5 = vpop.f32.mrf.mxu1 }
 0x103   :  { %v300_v6 = vadd.f32 %v299_v5, %v220_v3 }
 0x104   :  { %519 = vst.msk [vmem:[%s1111_s3 + $0x58] sm:$0xff] %vm507_vm0, %v497_v4 }
 0x105   :  { %v379_v7 = vpop.f32.mrf.mxu2 }
 0x106   :  { %v380_v8 = vadd.f32 %v379_v7, %v300_v6  ;;  %v459_v9 = vpop.f32.mrf.mxu3 }
 0x108   :  { %v460_v10 = vadd.f32 %v459_v9, %v380_v8  ;;  %v222_v11 = vpop.f32.mrf.mxu0 }
 0x109   :  { %v223_v12 = vadd.f32 %v941_v0, %v222_v11 }
 0x10a   :  { %v498_v13 = vmax.f32 %v460_v10, 0.0  ;;  %v302_v14 = vpop.f32.mrf.mxu1 }
 0x10b   :  { %v303_v15 = vadd.f32 %v302_v14, %v223_v12 }
 0x10c   :  { %520 = vst.msk [vmem:[%s1111_s3 + $0x60] sm:$0xff] %vm507_vm0, %v498_v13 }
 0x10d   :  { %v382_v16 = vpop.f32.mrf.mxu2 }
 0x10e   :  { %v383_v17 = vadd.f32 %v382_v16, %v303_v15  ;;  %v462_v18 = vpop.f32.mrf.mxu3 }
 0x110   :  { %v463_v19 = vadd.f32 %v462_v18, %v383_v17  ;;  %v225_v20 = vpop.f32.mrf.mxu0 }
 0x111   :  { %v226_v21 = vadd.f32 %v941_v0, %v225_v20 }
 0x112   :  { %v499_v22 = vmax.f32 %v463_v19, 0.0  ;;  %v305_v23 = vpop.f32.mrf.mxu1 }
 0x113   :  { %v306_v24 = vadd.f32 %v305_v23, %v226_v21 }
 0x114   :  { %521 = vst.msk [vmem:[%s1111_s3 + $0x68] sm:$0xff] %vm507_vm0, %v499_v22 }
 0x115   :  { %v385_v25 = vpop.f32.mrf.mxu2 }
 0x116   :  { %v386_v26 = vadd.f32 %v385_v25, %v306_v24  ;;  %v465_v27 = vpop.f32.mrf.mxu3 }
 0x118   :  { %v466_v28 = vadd.f32 %v465_v27, %v386_v26  ;;  %v228_v29 = vpop.f32.mrf.mxu0 }
 0x119   :  { %v229_v30 = vadd.f32 %v941_v0, %v228_v29 }
 0x11a   :  { %v500_v31 = vmax.f32 %v466_v28, 0.0  ;;  %v308_v32 = vpop.f32.mrf.mxu1 }
 0x11b   :  { %v309_v33 = vadd.f32 %v308_v32, %v229_v30 }
 0x11c   :  { %522 = vst.msk [vmem:[%s1111_s3 + $0x70] sm:$0xff] %vm507_vm0, %v500_v31 }
 0x11d   :  { %v388_v34 = vpop.f32.mrf.mxu2 }
 0x11e   :  { %v389_v35 = vadd.f32 %v388_v34, %v309_v33  ;;  %v468_v36 = vpop.f32.mrf.mxu3 }
 0x120   :  { %v469_v37 = vadd.f32 %v468_v36, %v389_v35  ;;  %v231_v38 = vpop.f32.mrf.mxu0 }
 0x121   :  { %v232_v39 = vadd.f32 %v941_v0, %v231_v38 }
 0x122   :  { %v501_v40 = vmax.f32 %v469_v37, 0.0  ;;  %v311_v41 = vpop.f32.mrf.mxu1 }
 0x123   :  { %v312_v42 = vadd.f32 %v311_v41, %v232_v39 }
 0x124   :  { %523 = vst.msk [vmem:[%s1111_s3 + $0x78] sm:$0xff] %vm507_vm0, %v501_v40 }
 0x125   :  { %v391_v43 = vpop.f32.mrf.mxu2 }
 0x126   :  { %v392_v44 = vadd.f32 %v391_v43, %v312_v42  ;;  %v471_v45 = vpop.f32.mrf.mxu3 }
 0x128   :  { %v472_v46 = vadd.f32 %v471_v45, %v392_v44  ;;  %v234_v47 = vpop.f32.mrf.mxu0 }
 0x129   :  { %v235_v48 = vadd.f32 %v941_v0, %v234_v47 }
 0x12a   :  { %v502_v49 = vmax.f32 %v472_v46, 0.0  ;;  %v314_v50 = vpop.f32.mrf.mxu1 }
 0x12b   :  { %v315_v51 = vadd.f32 %v314_v50, %v235_v48 }
 0x12c   :  { %524 = vst.msk [vmem:[%s1111_s3 + $0x80] sm:$0xff] %vm507_vm0, %v502_v49 }
 0x12d   :  { %v394_v52 = vpop.f32.mrf.mxu2 }
 0x12e   :  { %v395_v53 = vadd.f32 %v394_v52, %v315_v51  ;;  %v474_v54 = vpop.f32.mrf.mxu3 }
 0x130   :  { %v475_v55 = vadd.f32 %v474_v54, %v395_v53  ;;  %v237_v56 = vpop.f32.mrf.mxu0 }
 0x131   :  { %v238_v57 = vadd.f32 %v941_v0, %v237_v56 }
 0x132   :  { %v503_v58 = vmax.f32 %v475_v55, 0.0  ;;  %v317_v59 = vpop.f32.mrf.mxu1 }
 0x133   :  { %v318_v60 = vadd.f32 %v317_v59, %v238_v57 }
 0x134   :  { %525 = vst.msk [vmem:[%s1111_s3 + $0x88] sm:$0xff] %vm507_vm0, %v503_v58 }
 0x135   :  { %v397_v61 = vpop.f32.mrf.mxu2 }
 0x136   :  { %v398_v62 = vadd.f32 %v397_v61, %v318_v60  ;;  %v477_v63 = vpop.f32.mrf.mxu3 }
 0x138   :  { %v478_v1 = vadd.f32 %v477_v63, %v398_v62  ;;  %v240_v2 = vpop.f32.mrf.mxu0 }
 0x139   :  { %v241_v3 = vadd.f32 %v941_v0, %v240_v2 }
 0x13a   :  { %v504_v4 = vmax.f32 %v478_v1, 0.0  ;;  %v320_v5 = vpop.f32.mrf.mxu1 }
 0x13b   :  { %v321_v6 = vadd.f32 %v320_v5, %v241_v3 }
 0x13c   :  { %526 = vst.msk [vmem:[%s1111_s3 + $0x90] sm:$0xff] %vm507_vm0, %v504_v4 }
 0x13d   :  { %v400_v7 = vpop.f32.mrf.mxu2 }
 0x13e   :  { %v401_v8 = vadd.f32 %v400_v7, %v321_v6  ;;  %v480_v9 = vpop.f32.mrf.mxu3 }
 0x140   :  { %v481_v10 = vadd.f32 %v480_v9, %v401_v8  ;;  %v243_v11 = vpop.f32.mrf.mxu0 }
 0x141   :  { %v244_v12 = vadd.f32 %v941_v0, %v243_v11 }
 0x142   :  { %v505_v13 = vmax.f32 %v481_v10, 0.0  ;;  %v323_v14 = vpop.f32.mrf.mxu1 }
 0x143   :  { %v324_v15 = vadd.f32 %v323_v14, %v244_v12 }
 0x144   :  { %527 = vst.msk [vmem:[%s1111_s3 + $0x98] sm:$0xff] %vm507_vm0, %v505_v13 }
 0x145   :  { %v403_v16 = vpop.f32.mrf.mxu2 }
 0x146   :  { %v404_v17 = vadd.f32 %v403_v16, %v324_v15  ;;  %v483_v18 = vpop.f32.mrf.mxu3 }
 0x148   :  { %v484_v19 = vadd.f32 %v483_v18, %v404_v17 }
 0x14a   :  { %v506_v20 = vmax.f32 %v484_v19, 0.0 }
 0x14c   :  { %528 = vst.msk [vmem:[%s1111_s3 + $0xa0] sm:$0xff] %vm507_vm0, %v506_v20 }

// kernel: policy_forward.6
= control target key start
LH: loop header
LB: loop body
LE: loop exit
PB: predicated region body
PF: predicated region fallthrough
CT: control target
= control target key end

     0   :  { %vm456_vm0 = vcmask 523264   ;;  %s1075_s1 = inlined_call_operand.vmem [shape: f32[640,64], index: 1, kind: input, shape index: {}]   ;;  %s1076_s0 = inlined_call_operand.vmem [shape: f32[104,640], index: 0, kind: input, shape index: {}]   ;;  %s1077_s2 = inlined_call_operand.vmem [shape: f32[1,64], index: 2, kind: input, shape index: {}]   ;;  %s1078_s3 = inlined_call_operand.vmem [shape: f32[104,64], index: 3, kind: output, shape index: {}]  }
   0x1   :  { %v94_v0 = vld [vmem:[%s1075_s1 + $0x78] sm:$0xff]  ;;  %v93_v1 = vld [vmem:[%s1075_s1 + $0x70] sm:$0xff]  ;;  %v92_v2 = vld [vmem:[%s1075_s1 + $0x68] sm:$0xff] }
   0x2   :  { %474 = vmatpush.msra.mxu1 %v94_v0  ;;  %475 = vmatpush.msra.mxu2 %v94_v0  ;;  %v91_v3 = vld [vmem:[%s1075_s1 + $0x60] sm:$0xff]  ;;  %v90_v4 = vld [vmem:[%s1075_s1 + $0x58] sm:$0xff]  ;;  %v89_v5 = vld [vmem:[%s1075_s1 + $0x50] sm:$0xff] }
   0x3   :  { %476 = vmatpush.msra.mxu3 %v94_v0  ;;  %163 = vmatpush.msra.mxu0 %v94_v0  ;;  %v88_v6 = vld [vmem:[%s1075_s1 + $0x48] sm:$0xff]  ;;  %v87_v7 = vld [vmem:[%s1075_s1 + $0x40] sm:$0xff]  ;;  %v86_v8 = vld [vmem:[%s1075_s1 + $0x38] sm:$0xff] }
   0x4   :  { %477 = vmatpush.msra.mxu1 %v93_v1  ;;  %478 = vmatpush.msra.mxu2 %v93_v1  ;;  %v85_v9 = vld [vmem:[%s1075_s1 + $0x30] sm:$0xff]  ;;  %v84_v10 = vld [vmem:[%s1075_s1 + $0x28] sm:$0xff]  ;;  %v83_v11 = vld [vmem:[%s1075_s1 + $0x20] sm:$0xff] }
   0x5   :  { %479 = vmatpush.msra.mxu3 %v93_v1  ;;  %164 = vmatpush.msra.mxu0 %v93_v1  ;;  %v82_v12 = vld [vmem:[%s1075_s1 + $0x18] sm:$0xff]  ;;  %v81_v13 = vld [vmem:[%s1075_s1 + $0x10] sm:$0xff]  ;;  %v80_v14 = vld [vmem:[%s1075_s1 + $0x8] sm:$0xff] }
   0x6   :  { %480 = vmatpush.msra.mxu1 %v92_v2  ;;  %481 = vmatpush.msra.mxu2 %v92_v2  ;;  %v79_v15 = vld [vmem:[%s1075_s1] sm:$0xff]  ;;  %v126_v18 = vld [vmem:[%s1075_s1 + $0x178] sm:$0xff]  ;;  %v125_v20 = vld [vmem:[%s1075_s1 + $0x170] sm:$0xff] }
   0x7   :  { %482 = vmatpush.msra.mxu3 %v92_v2  ;;  %165 = vmatpush.msra.mxu0 %v92_v2  ;;  %v34_v16 = vld [vmem:[%s1076_s0 + $0xa0] sm:$0xff]  ;;  %v110_v19 = vld [vmem:[%s1075_s1 + $0xf8] sm:$0xff]  ;;  %v109_v21 = vld [vmem:[%s1075_s1 + $0xf0] sm:$0xff] }
   0x8   :  { %483 = vmatpush.msra.mxu1 %v91_v3  ;;  %484 = vmatpush.msra.mxu2 %v91_v3  ;;  %v54_v17 = vld [vmem:[%s1076_s0 + $0x140] sm:$0xff]  ;;  %v142_v22 = vld [vmem:[%s1075_s1 + $0x1f8] sm:$0xff]  ;;  %v124_v24 = vld [vmem:[%s1075_s1 + $0x168] sm:$0xff] }
   0x9   :  { %485 = vmatpush.msra.mxu3 %v91_v3  ;;  %166 = vmatpush.msra.mxu0 %v91_v3  ;;  %v14_v23 = vld [vmem:[%s1076_s0] sm:$0xff]  ;;  %v108_v25 = vld [vmem:[%s1075_s1 + $0xe8] sm:$0xff]  ;;  %v141_v26 = vld [vmem:[%s1075_s1 + $0x1f0] sm:$0xff] }
   0xa   :  { %486 = vmatpush.msra.mxu1 %v90_v4  ;;  %487 = vmatpush.msra.mxu2 %v90_v4  ;;  %v158_v27 = vld [vmem:[%s1075_s1 + $0x278] sm:$0xff]  ;;  %v123_v28 = vld [vmem:[%s1075_s1 + $0x160] sm:$0xff]  ;;  %v140_v30 = vld [vmem:[%s1075_s1 + $0x1e8] sm:$0xff] }
   0xb   :  { %488 = vmatpush.msra.mxu3 %v90_v4  ;;  %167 = vmatpush.msra.mxu0 %v90_v4  ;;  %v107_v29 = vld [vmem:[%s1075_s1 + $0xe0] sm:$0xff]  ;;  %v39_v31 = vld [vmem:[%s1076_s0 + $0xc8] sm:$0xff]  ;;  %v106_v33 = vld [vmem:[%s1075_s1 + $0xd8] sm:$0xff] }
   0xc   :  { %489 = vmatpush.msra.mxu1 %v89_v5  ;;  %490 = vmatpush.msra.mxu2 %v89_v5  ;;  %v59_v32 = vld [vmem:[%s1076_s0 + $0x168] sm:$0xff]  ;;  %v122_v34 = vld [vmem:[%s1075_s1 + $0x158] sm:$0xff]  ;;  %v139_v35 = vld [vmem:[%s1075_s1 + $0x1e0] sm:$0xff] }
   0xd   :  { %491 = vmatpush.msra.mxu3 %v89_v5  ;;  %168 = vmatpush.msra.mxu0 %v89_v5  ;;  %v105_v36 = vld [vmem:[%s1075_s1 + $0xd0] sm:$0xff]  ;;  %v138_v39 = vld [vmem:[%s1075_s1 + $0x1d8] sm:$0xff]  ;;  %v104_v40 = vld [vmem:[%s1075_s1 + $0xc8] sm:$0xff] }
   0xe   :  { %492 = vmatpush.msra.mxu1 %v88_v6  ;;  %493 = vmatpush.msra.mxu2 %v88_v6  ;;  %v157_v37 = vld [vmem:[%s1075_s1 + $0x270] sm:$0xff]  ;;  %v156_v41 = vld [vmem:[%s1075_s1 + $0x268] sm:$0xff]  ;;  %v103_v44 = vld [vmem:[%s1075_s1 + $0xc0] sm:$0xff] }
   0xf   :  { %494 = vmatpush.msra.mxu3 %v88_v6  ;;  %169 = vmatpush.msra.mxu0 %v88_v6  ;;  %v121_v38 = vld [vmem:[%s1075_s1 + $0x150] sm:$0xff]  ;;  %v120_v42 = vld [vmem:[%s1075_s1 + $0x148] sm:$0xff]  ;;  %v155_v45 = vld [vmem:[%s1075_s1 + $0x260] sm:$0xff] }
  0x10   :  { %495 = vmatpush.msra.mxu1 %v87_v7  ;;  %496 = vmatpush.msra.mxu2 %v87_v7  ;;  %v137_v43 = vld [vmem:[%s1075_s1 + $0x1d0] sm:$0xff]  ;;  %v119_v46 = vld [vmem:[%s1075_s1 + $0x140] sm:$0xff]  ;;  %v136_v47 = vld [vmem:[%s1075_s1 + $0x1c8] sm:$0xff] }
  0x11   :  { %497 = vmatpush.msra.mxu3 %v87_v7  ;;  %170 = vmatpush.msra.mxu0 %v87_v7  ;;  %v44_v48 = vld [vmem:[%s1076_s0 + $0xf0] sm:$0xff]  ;;  %v118_v50 = vld [vmem:[%s1075_s1 + $0x138] sm:$0xff]  ;;  %v135_v52 = vld [vmem:[%s1075_s1 + $0x1c0] sm:$0xff] }
  0x12   :  { %498 = vmatpush.msra.mxu1 %v86_v8  ;;  %499 = vmatpush.msra.mxu2 %v86_v8  ;;  %v64_v49 = vld [vmem:[%s1076_s0 + $0x190] sm:$0xff]  ;;  %v102_v51 = vld [vmem:[%s1075_s1 + $0xb8] sm:$0xff]  ;;  %v19_v53 = vld [vmem:[%s1076_s0 + $0x28] sm:$0xff] }
  0x13   :  { %500 = vmatpush.msra.mxu3 %v86_v8  ;;  %171 = vmatpush.msra.mxu0 %v86_v8  ;;  %v117_v54 = vld [vmem:[%s1075_s1 + $0x130] sm:$0xff]  ;;  %v154_v55 = vld [vmem:[%s1075_s1 + $0x258] sm:$0xff]  ;;  %v116_v58 = vld [vmem:[%s1075_s1 + $0x128] sm:$0xff] }
  0x14   :  { %501 = vmatpush.msra.mxu1 %v85_v9  ;;  %502 = vmatpush.msra.mxu2 %v85_v9  ;;  %v101_v56 = vld [vmem:[%s1075_s1 + $0xb0] sm:$0xff]  ;;  %v134_v57 = vld [vmem:[%s1075_s1 + $0x1b8] sm:$0xff]  ;;  %v100_v60 = vld [vmem:[%s1075_s1 + $0xa8] sm:$0xff] }
  0x15   :  { %503 = vmatpush.msra.mxu3 %v85_v9  ;;  %172 = vmatpush.msra.mxu0 %v85_v9  ;;  %v153_v59 = vld [vmem:[%s1075_s1 + $0x250] sm:$0xff]  ;;  %v115_v62 = vld [vmem:[%s1075_s1 + $0x120] sm:$0xff]  ;;  %v152_v63 = vld [vmem:[%s1075_s1 + $0x248] sm:$0xff] }
  0x16   :  { %504 = vmatpush.msra.mxu1 %v84_v10  ;;  %505 = vmatpush.msra.mxu2 %v84_v10  ;;  %v133_v61 = vld [vmem:[%s1075_s1 + $0x1b0] sm:$0xff]  ;;  %v99_v0 = vld [vmem:[%s1075_s1 + $0xa0] sm:$0xff]  ;;  %v132_v1 = vld [vmem:[%s1075_s1 + $0x1a8] sm:$0xff] }
  0x17   :  { %506 = vmatpush.msra.mxu3 %v84_v10  ;;  %173 = vmatpush.msra.mxu0 %v84_v10  ;;  %v49_v2 = vld [vmem:[%s1076_s0 + $0x118] sm:$0xff]  ;;  %v151_v5 = vld [vmem:[%s1075_s1 + $0x240] sm:$0xff]  ;;  %v24_v8 = vld [vmem:[%s1076_s0 + $0x50] sm:$0xff] }
  0x18   :  { %507 = vmatpush.msra.mxu1 %v83_v11  ;;  %508 = vmatpush.msra.mxu2 %v83_v11  ;;  %v69_v3 = vld [vmem:[%s1076_s0 + $0x1b8] sm:$0xff]  ;;  %v131_v7 = vld [vmem:[%s1075_s1 + $0x1a0] sm:$0xff]  ;;  %v113_v10 = vld [vmem:[%s1075_s1 + $0x110] sm:$0xff] }
  0x19   :  { %509 = vmatpush.msra.mxu3 %v83_v11  ;;  %174 = vmatpush.msra.mxu0 %v83_v11  ;;  %v114_v4 = vld [vmem:[%s1075_s1 + $0x118] sm:$0xff]  ;;  %v74_v9 = vld [vmem:[%s1076_s0 + $0x1e0] sm:$0xff] }
  0x1a   :  { %510 = vmatpush.msra.mxu1 %v82_v12  ;;  %511 = vmatpush.msra.mxu2 %v82_v12  ;;  %v98_v6 = vld [vmem:[%s1075_s1 + $0x98] sm:$0xff] }
  0x1b   :  { %512 = vmatpush.msra.mxu3 %v82_v12  ;;  %175 = vmatpush.msra.mxu0 %v82_v12  ;;  %v150_v11 = vld [vmem:[%s1075_s1 + $0x238] sm:$0xff]  ;;  %v97_v12 = vld [vmem:[%s1075_s1 + $0x90] sm:$0xff] }
  0x1c   :  { %513 = vmatpush.msra.mxu1 %v81_v13  ;;  %514 = vmatpush.msra.mxu2 %v81_v13 }
  0x1d   :  { %515 = vmatpush.msra.mxu3 %v81_v13  ;;  %176 = vmatpush.msra.mxu0 %v81_v13  ;;  %v130_v13 = vld [vmem:[%s1075_s1 + $0x198] sm:$0xff] }
  0x1e   :  { %516 = vmatpush.msra.mxu1 %v80_v14  ;;  %517 = vmatpush.msra.mxu2 %v80_v14 }
  0x1f   :  { %518 = vmatpush.msra.mxu3 %v80_v14  ;;  %177 = vmatpush.msra.mxu0 %v80_v14  ;;  %v112_v14 = vld [vmem:[%s1075_s1 + $0x108] sm:$0xff] }
  0x20   :  { %519 = vmatpush.msra.mxu1 %v79_v15  ;;  %520 = vmatpush.msra.mxu2 %v79_v15 }
  0x21   :  { %191 = vmatmul.f32.vlgmr.msra.gmra.mxu1 %v34_v16  ;;  %203 = vmatmul.f32.vlgmr.msra.gmra.mxu2 %v54_v17  ;;  %v96_v16 = vld [vmem:[%s1075_s1 + $0x88] sm:$0xff]  ;;  %v129_v17 = vld [vmem:[%s1075_s1 + $0x190] sm:$0xff] }
  0x22   :  { %275 = vmatpush.msrb.mxu2 %v126_v18  ;;  %219 = vmatpush.msrb.mxu1 %v110_v19  ;;  %v111_v18 = vld [vmem:[%s1075_s1 + $0x100] sm:$0xff]  ;;  %v148_v19 = vld [vmem:[%s1075_s1 + $0x228] sm:$0xff] }
  0x23   :  { %521 = vmatpush.msra.mxu3 %v79_v15  ;;  %178 = vmatpush.msra.mxu0 %v79_v15  ;;  %v149_v15 = vld [vmem:[%s1075_s1 + $0x230] sm:$0xff] }
  0x24   :  { %276 = vmatpush.msrb.mxu2 %v125_v20  ;;  %220 = vmatpush.msrb.mxu1 %v109_v21  ;;  %v95_v20 = vld [vmem:[%s1075_s1 + $0x80] sm:$0xff]  ;;  %v128_v21 = vld [vmem:[%s1075_s1 + $0x188] sm:$0xff] }
  0x25   :  { %331 = vmatpush.msrb.mxu3 %v142_v22  ;;  %179 = vmatmul.f32.vlgmr.msra.gmra.mxu0 %v14_v23  ;;  %v15_v22 = vld [vmem:[%s1076_s0 + $0x8] sm:$0xff]  ;;  %v16_v23 = vld [vmem:[%s1076_s0 + $0x10] sm:$0xff] }
  0x26   :  { %277 = vmatpush.msrb.mxu2 %v124_v24  ;;  %221 = vmatpush.msrb.mxu1 %v108_v25  ;;  %v147_v24 = vld [vmem:[%s1075_s1 + $0x220] sm:$0xff] }
  0x27   :  { %332 = vmatpush.msrb.mxu3 %v141_v26  ;;  %387 = vmatpush.msrb.mxu0 %v158_v27  ;;  %v127_v25 = vld [vmem:[%s1075_s1 + $0x180] sm:$0xff]  ;;  %v29_v26 = vld [vmem:[%s1076_s0 + $0x78] sm:$0xff] }
  0x28   :  { %278 = vmatpush.msrb.mxu2 %v123_v28  ;;  %222 = vmatpush.msrb.mxu1 %v107_v29  ;;  %v17_v27 = vld [vmem:[%s1076_s0 + $0x18] sm:$0xff]  ;;  %v145_v29 = vld [vmem:[%s1075_s1 + $0x210] sm:$0xff] }
  0x29   :  { %333 = vmatpush.msrb.mxu3 %v140_v30  ;;  %194 = vmatmul.f32.gmra.mxu1 %v39_v31  ;;  %v146_v28 = vld [vmem:[%s1075_s1 + $0x218] sm:$0xff]  ;;  %v144_v30 = vld [vmem:[%s1075_s1 + $0x208] sm:$0xff]  ;;  %v20_v31 = vld [vmem:[%s1076_s0 + $0x30] sm:$0xff] }
  0x2a   :  { %206 = vmatmul.f32.gmra.mxu2 %v59_v32  ;;  %223 = vmatpush.msrb.mxu1 %v106_v33  ;;  %v21_v32 = vld [vmem:[%s1076_s0 + $0x38] sm:$0xff]  ;;  %v143_v33 = vld [vmem:[%s1075_s1 + $0x200] sm:$0xff] }
  0x2b   :  { %279 = vmatpush.msrb.mxu2 %v122_v34  ;;  %334 = vmatpush.msrb.mxu3 %v139_v35  ;;  %v22_v34 = vld [vmem:[%s1076_s0 + $0x40] sm:$0xff] }
  0x2c   :  { %224 = vmatpush.msrb.mxu1 %v105_v36  ;;  %388 = vmatpush.msrb.mxu0 %v157_v37  ;;  %v18_v35 = vld [vmem:[%s1076_s0 + $0x20] sm:$0xff]  ;;  %v25_v36 = vld [vmem:[%s1076_s0 + $0x58] sm:$0xff] }
  0x2d   :  { %280 = vmatpush.msrb.mxu2 %v121_v38  ;;  %335 = vmatpush.msrb.mxu3 %v138_v39  ;;  %v26_v37 = vld [vmem:[%s1076_s0 + $0x60] sm:$0xff]  ;;  %v27_v38 = vld [vmem:[%s1076_s0 + $0x68] sm:$0xff] }
  0x2e   :  { %225 = vmatpush.msrb.mxu1 %v104_v40  ;;  %389 = vmatpush.msrb.mxu0 %v156_v41  ;;  %v23_v39 = vld [vmem:[%s1076_s0 + $0x48] sm:$0xff]  ;;  %v30_v40 = vld [vmem:[%s1076_s0 + $0x80] sm:$0xff] }
  0x2f   :  { %281 = vmatpush.msrb.mxu2 %v120_v42  ;;  %336 = vmatpush.msrb.mxu3 %v137_v43  ;;  %v31_v41 = vld [vmem:[%s1076_s0 + $0x88] sm:$0xff]  ;;  %v32_v42 = vld [vmem:[%s1076_s0 + $0x90] sm:$0xff] }
  0x30   :  { %226 = vmatpush.msrb.mxu1 %v103_v44  ;;  %390 = vmatpush.msrb.mxu0 %v155_v45  ;;  %v28_v43 = vld [vmem:[%s1076_s0 + $0x70] sm:$0xff]  ;;  %v35_v44 = vld [vmem:[%s1076_s0 + $0xa8] sm:$0xff] }
  0x31   :  { %282 = vmatpush.msrb.mxu2 %v119_v46  ;;  %337 = vmatpush.msrb.mxu3 %v136_v47  ;;  %v36_v45 = vld [vmem:[%s1076_s0 + $0xb0] sm:$0xff]  ;;  %v37_v46 = vld [vmem:[%s1076_s0 + $0xb8] sm:$0xff] }
  0x32   :  { %197 = vmatmul.f32.gmra.mxu1 %v44_v48  ;;  %209 = vmatmul.f32.gmra.mxu2 %v64_v49  ;;  %v33_v47 = vld [vmem:[%s1076_s0 + $0x98] sm:$0xff]  ;;  %v40_v48 = vld [vmem:[%s1076_s0 + $0xd0] sm:$0xff] }
  0x33   :  { %283 = vmatpush.msrb.mxu2 %v118_v50  ;;  %227 = vmatpush.msrb.mxu1 %v102_v51  ;;  %v41_v49 = vld [vmem:[%s1076_s0 + $0xd8] sm:$0xff]  ;;  %v42_v50 = vld [vmem:[%s1076_s0 + $0xe0] sm:$0xff] }
  0x34   :  { %338 = vmatpush.msrb.mxu3 %v135_v52  ;;  %182 = vmatmul.f32.gmra.mxu0 %v19_v53  ;;  %v38_v51 = vld [vmem:[%s1076_s0 + $0xc0] sm:$0xff]  ;;  %v45_v52 = vld [vmem:[%s1076_s0 + $0xf8] sm:$0xff] }
  0x35   :  { %284 = vmatpush.msrb.mxu2 %v117_v54  ;;  %391 = vmatpush.msrb.mxu0 %v154_v55  ;;  %v46_v53 = vld [vmem:[%s1076_s0 + $0x100] sm:$0xff]  ;;  %v47_v54 = vld [vmem:[%s1076_s0 + $0x108] sm:$0xff] }
  0x36   :  { %228 = vmatpush.msrb.mxu1 %v101_v56  ;;  %339 = vmatpush.msrb.mxu3 %v134_v57  ;;  %v43_v55 = vld [vmem:[%s1076_s0 + $0xe8] sm:$0xff]  ;;  %v50_v56 = vld [vmem:[%s1076_s0 + $0x120] sm:$0xff] }
  0x37   :  { %285 = vmatpush.msrb.mxu2 %v116_v58  ;;  %392 = vmatpush.msrb.mxu0 %v153_v59  ;;  %v51_v57 = vld [vmem:[%s1076_s0 + $0x128] sm:$0xff]  ;;  %v52_v58 = vld [vmem:[%s1076_s0 + $0x130] sm:$0xff] }
  0x38   :  { %229 = vmatpush.msrb.mxu1 %v100_v60  ;;  %340 = vmatpush.msrb.mxu3 %v133_v61  ;;  %v48_v59 = vld [vmem:[%s1076_s0 + $0x110] sm:$0xff]  ;;  %v55_v60 = vld [vmem:[%s1076_s0 + $0x148] sm:$0xff] }
  0x39   :  { %286 = vmatpush.msrb.mxu2 %v115_v62  ;;  %393 = vmatpush.msrb.mxu0 %v152_v63  ;;  %v56_v61 = vld [vmem:[%s1076_s0 + $0x150] sm:$0xff]  ;;  %v57_v62 = vld [vmem:[%s1076_s0 + $0x158] sm:$0xff] }
  0x3a   :  { %230 = vmatpush.msrb.mxu1 %v99_v0  ;;  %341 = vmatpush.msrb.mxu3 %v132_v1  ;;  %v53_v63 = vld [vmem:[%s1076_s0 + $0x138] sm:$0xff]  ;;  %v60_v0 = vld [vmem:[%s1076_s0 + $0x170] sm:$0xff] }
  0x3b   :  { %200 = vmatmul.f32.gmra.mxu1 %v49_v2  ;;  %212 = vmatmul.f32.gmra.mxu2 %v69_v3  ;;  %v61_v1 = vld [vmem:[%s1076_s0 + $0x178] sm:$0xff]  ;;  %v62_v2 = vld [vmem:[%s1076_s0 + $0x180] sm:$0xff] }
  0x3c   :  { %287 = vmatpush.msrb.mxu2 %v114_v4  ;;  %394 = vmatpush.msrb.mxu0 %v151_v5  ;;  %v58_v3 = vld [vmem:[%s1076_s0 + $0x160] sm:$0xff]  ;;  %v65_v4 = vld [vmem:[%s1076_s0 + $0x198] sm:$0xff] }
  0x3d   :  { %231 = vmatpush.msrb.mxu1 %v98_v6  ;;  %342 = vmatpush.msrb.mxu3 %v131_v7  ;;  %v66_v5 = vld [vmem:[%s1076_s0 + $0x1a0] sm:$0xff]  ;;  %v67_v6 = vld [vmem:[%s1076_s0 + $0x1a8] sm:$0xff] }
  0x3e   :  { %185 = vmatmul.f32.gmra.mxu0 %v24_v8  ;;  %215 = vmatmul.f32.vlgmr.msra.gmra.mxu3 %v74_v9  ;;  %v63_v7 = vld [vmem:[%s1076_s0 + $0x188] sm:$0xff]  ;;  %v70_v8 = vld [vmem:[%s1076_s0 + $0x1c0] sm:$0xff] }
  0x3f   :  { %288 = vmatpush.msrb.mxu2 %v113_v10  ;;  %395 = vmatpush.msrb.mxu0 %v150_v11  ;;  %v71_v9 = vld [vmem:[%s1076_s0 + $0x1c8] sm:$0xff]  ;;  %v72_v10 = vld [vmem:[%s1076_s0 + $0x1d0] sm:$0xff] }
  0x40   :  { %232 = vmatpush.msrb.mxu1 %v97_v12  ;;  %343 = vmatpush.msrb.mxu3 %v130_v13  ;;  %v68_v11 = vld [vmem:[%s1076_s0 + $0x1b0] sm:$0xff]  ;;  %v75_v13 = vld [vmem:[%s1076_s0 + $0x1e8] sm:$0xff] }
  0x41   :  { %289 = vmatpush.msrb.mxu2 %v112_v14  ;;  %396 = vmatpush.msrb.mxu0 %v149_v15  ;;  %v76_v14 = vld [vmem:[%s1076_s0 + $0x1f0] sm:$0xff]  ;;  %v974_v15 = vld [vmem:[%s1077_s2] ss:$0 sm:$0xff] }
  0x42   :  { %233 = vmatpush.msrb.mxu1 %v96_v16  ;;  %344 = vmatpush.msrb.mxu3 %v129_v17  ;;  %v77_v16 = vld [vmem:[%s1076_s0 + $0x1f8] sm:$0xff] }
  0x43   :  { %290 = vmatpush.msrb.mxu2 %v111_v18  ;;  %397 = vmatpush.msrb.mxu0 %v148_v19  ;;  %v73_v17 = vld [vmem:[%s1076_s0 + $0x1d8] sm:$0xff] }
  0x44   :  { %234 = vmatpush.msrb.mxu1 %v95_v20  ;;  %345 = vmatpush.msrb.mxu3 %v128_v21 }
  0x45   :  { %235 = vmatmul.f32.vlgmr.msrb.gmra.mxu1 %v15_v22  ;;  %291 = vmatmul.f32.vlgmr.msrb.gmra.mxu2 %v16_v23  ;;  %v78_v22 = vld [vmem:[%s1076_s0 + $0x200] sm:$0xff] }
  0x46   :  { %398 = vmatpush.msrb.mxu0 %v147_v24  ;;  %346 = vmatpush.msrb.mxu3 %v127_v25 }
  0x47   :  { %188 = vmatmul.f32.gmra.mxu0 %v29_v26  ;;  %347 = vmatmul.f32.vlgmr.msrb.gmra.mxu3 %v17_v27 }
  0x48   :  { %399 = vmatpush.msrb.mxu0 %v146_v28 }
  0x4a   :  { %400 = vmatpush.msrb.mxu0 %v145_v29 }
  0x4c   :  { %401 = vmatpush.msrb.mxu0 %v144_v30 }
  0x4d   :  { %238 = vmatmul.f32.gmra.mxu1 %v20_v31  ;;  %294 = vmatmul.f32.gmra.mxu2 %v21_v32 }
  0x4e   :  { %402 = vmatpush.msrb.mxu0 %v143_v33 }
  0x4f   :  { %350 = vmatmul.f32.gmra.mxu3 %v22_v34  ;;  %403 = vmatmul.f32.vlgmr.msrb.gmra.mxu0 %v18_v35 }
  0x55   :  { %241 = vmatmul.f32.gmra.mxu1 %v25_v36  ;;  %297 = vmatmul.f32.gmra.mxu2 %v26_v37 }
  0x57   :  { %353 = vmatmul.f32.gmra.mxu3 %v27_v38  ;;  %406 = vmatmul.f32.gmra.mxu0 %v23_v39 }
  0x5d   :  { %244 = vmatmul.f32.gmra.mxu1 %v30_v40  ;;  %300 = vmatmul.f32.gmra.mxu2 %v31_v41 }
  0x5f   :  { %356 = vmatmul.f32.gmra.mxu3 %v32_v42  ;;  %409 = vmatmul.f32.gmra.mxu0 %v28_v43 }
  0x65   :  { %247 = vmatmul.f32.gmra.mxu1 %v35_v44  ;;  %303 = vmatmul.f32.gmra.mxu2 %v36_v45 }
  0x67   :  { %359 = vmatmul.f32.gmra.mxu3 %v37_v46  ;;  %412 = vmatmul.f32.gmra.mxu0 %v33_v47 }
  0x6d   :  { %250 = vmatmul.f32.gmra.mxu1 %v40_v48  ;;  %306 = vmatmul.f32.gmra.mxu2 %v41_v49 }
  0x6f   :  { %362 = vmatmul.f32.gmra.mxu3 %v42_v50  ;;  %415 = vmatmul.f32.gmra.mxu0 %v38_v51 }
  0x75   :  { %253 = vmatmul.f32.gmra.mxu1 %v45_v52  ;;  %309 = vmatmul.f32.gmra.mxu2 %v46_v53 }
  0x77   :  { %365 = vmatmul.f32.gmra.mxu3 %v47_v54  ;;  %418 = vmatmul.f32.gmra.mxu0 %v43_v55 }
  0x7d   :  { %256 = vmatmul.f32.gmra.mxu1 %v50_v56  ;;  %312 = vmatmul.f32.gmra.mxu2 %v51_v57 }
  0x7f   :  { %368 = vmatmul.f32.gmra.mxu3 %v52_v58  ;;  %421 = vmatmul.f32.gmra.mxu0 %v48_v59 }
  0x85   :  { %259 = vmatmul.f32.gmra.mxu1 %v55_v60  ;;  %315 = vmatmul.f32.gmra.mxu2 %v56_v61 }
  0x87   :  { %371 = vmatmul.f32.gmra.mxu3 %v57_v62  ;;  %424 = vmatmul.f32.gmra.mxu0 %v53_v63 }
  0x8d   :  { %262 = vmatmul.f32.gmra.mxu1 %v60_v0  ;;  %318 = vmatmul.f32.gmra.mxu2 %v61_v1 }
  0x8f   :  { %374 = vmatmul.f32.gmra.mxu3 %v62_v2  ;;  %427 = vmatmul.f32.gmra.mxu0 %v58_v3 }
  0x95   :  { %265 = vmatmul.f32.gmra.mxu1 %v65_v4  ;;  %321 = vmatmul.f32.gmra.mxu2 %v66_v5 }
  0x97   :  { %377 = vmatmul.f32.gmra.mxu3 %v67_v6  ;;  %430 = vmatmul.f32.gmra.mxu0 %v63_v7 }
  0x9d   :  { %268 = vmatmul.f32.gmra.mxu1 %v70_v8  ;;  %324 = vmatmul.f32.gmra.mxu2 %v71_v9 }
  0x9e   :  { %v963_v12 = vpop.f32.mrf.mxu1 }
  0x9f   :  { %380 = vmatmul.f32.gmra.mxu3 %v72_v10  ;;  %433 = vmatmul.f32.gmra.mxu0 %v68_v11  ;;  %v193_v11 = vadd.f32 %v974_v15, %v963_v12 }
  0xa2   :  { %v180_v21 = vpop.f32.mrf.mxu0 }
  0xa3   :  { %v181_v37 = vadd.f32 %v974_v15, %v180_v21 }
  0xa4   :  { %v204_v18 = vpop.f32.mrf.mxu2 }
  0xa5   :  { %271 = vmatmul.f32.gmra.mxu1 %v75_v13  ;;  %327 = vmatmul.f32.gmra.mxu2 %v76_v14  ;;  %v983_v19 = vadd.f32 %v974_v15, %v204_v18 }
  0xa6   :  { %v985_v20 = vpop.f32.mrf.mxu1 }
  0xa7   :  { %383 = vmatmul.f32.gmra.mxu3 %v77_v16  ;;  %436 = vmatmul.f32.gmra.mxu0 %v73_v17 }
  0xad   :  { %v207_v23 = vpop.f32.mrf.mxu2 }
  0xae   :  { %v991_v24 = vadd.f32 %v974_v15, %v207_v23 }
  0xaf   :  { %439 = vmatmul.f32.gmra.mxu0 %v78_v22  ;;  %v993_v25 = vpop.f32.mrf.mxu1 }
  0xb1   :  { %v183_v26 = vpop.f32.mrf.mxu0 }
  0xb2   :  { %v184_v45 = vadd.f32 %v974_v15, %v183_v26 }
  0xb5   :  { %v210_v27 = vpop.f32.mrf.mxu2 }
  0xb6   :  { %v996_v28 = vadd.f32 %v974_v15, %v210_v27  ;;  %v196_v27 = vadd.f32 %v974_v15, %v985_v20 }
  0xb8   :  { %v998_v29 = vpop.f32.mrf.mxu1 }
  0xbb   :  { %v186_v30 = vpop.f32.mrf.mxu0 }
  0xbc   :  { %v187_v55 = vadd.f32 %v974_v15, %v186_v30 }
  0xbe   :  { %v213_v31 = vpop.f32.mrf.mxu2 }
  0xbf   :  { %v1001_v32 = vadd.f32 %v974_v15, %v213_v31 }
  0xc1   :  { %v216_v33 = vpop.f32.mrf.mxu3 }
  0xc2   :  { %v1004_v34 = vadd.f32 %v974_v15, %v216_v33  ;;  %v236_v35 = vpop.f32.mrf.mxu1 }
  0xc3   :  { %v237_v38 = vadd.f32 %v236_v35, %v181_v37 }
  0xc4   :  { %v189_v36 = vpop.f32.mrf.mxu0 }
  0xc5   :  { %v190_v1 = vadd.f32 %v974_v15, %v189_v36 }
  0xc8   :  { %v292_v39 = vpop.f32.mrf.mxu2 }
  0xc9   :  { %v293_v40 = vadd.f32 %v292_v39, %v237_v38 }
  0xca   :  { %v239_v41 = vpop.f32.mrf.mxu1  ;;  %v348_v42 = vpop.f32.mrf.mxu3 }
  0xcb   :  { %v349_v43 = vadd.f32 %v348_v42, %v293_v40  ;;  %v240_v47 = vadd.f32 %v239_v41, %v184_v45  ;;  %v199_v40 = vadd.f32 %v974_v15, %v993_v25 }
  0xcc   :  { %v404_v44 = vpop.f32.mrf.mxu0 }
  0xcd   :  { %v405_v46 = vadd.f32 %v404_v44, %v349_v43 }
  0xcf   :  { %v443_v48 = vmax.f32 %v405_v46, 0.0 }
  0xd0   :  { %v295_v49 = vpop.f32.mrf.mxu2 }
  0xd1   :  { %457 = vst.msk [vmem:[%s1078_s3] sm:$0xff] %vm456_vm0, %v443_v48  ;;  %v296_v50 = vadd.f32 %v295_v49, %v240_v47  ;;  %v202_v49 = vadd.f32 %v974_v15, %v998_v29 }
  0xd2   :  { %v242_v51 = vpop.f32.mrf.mxu1  ;;  %v351_v52 = vpop.f32.mrf.mxu3 }
  0xd3   :  { %v352_v53 = vadd.f32 %v351_v52, %v296_v50  ;;  %v243_v57 = vadd.f32 %v242_v51, %v187_v55 }
  0xd4   :  { %v407_v54 = vpop.f32.mrf.mxu0 }
  0xd5   :  { %v408_v56 = vadd.f32 %v407_v54, %v352_v53 }
  0xd7   :  { %v444_v58 = vmax.f32 %v408_v56, 0.0 }
  0xd8   :  { %v298_v59 = vpop.f32.mrf.mxu2 }
  0xd9   :  { %458 = vst.msk [vmem:[%s1078_s3 + $0x8] sm:$0xff] %vm456_vm0, %v444_v58  ;;  %v299_v60 = vadd.f32 %v298_v59, %v243_v57 }
  0xda   :  { %v245_v61 = vpop.f32.mrf.mxu1  ;;  %v354_v62 = vpop.f32.mrf.mxu3 }
  0xdb   :  { %v355_v63 = vadd.f32 %v354_v62, %v299_v60  ;;  %v246_v3 = vadd.f32 %v245_v61, %v190_v1 }
  0xdc   :  { %v410_v0 = vpop.f32.mrf.mxu0 }
  0xdd   :  { %v411_v2 = vadd.f32 %v410_v0, %v355_v63 }
  0xdf   :  { %v445_v4 = vmax.f32 %v411_v2, 0.0 }
  0xe0   :  { %v301_v5 = vpop.f32.mrf.mxu2 }
  0xe1   :  { %459 = vst.msk [vmem:[%s1078_s3 + $0x10] sm:$0xff] %vm456_vm0, %v445_v4  ;;  %v302_v6 = vadd.f32 %v301_v5, %v246_v3 }
  0xe2   :  { %v248_v7 = vpop.f32.mrf.mxu1  ;;  %v357_v8 = vpop.f32.mrf.mxu3 }
  0xe3   :  { %v358_v9 = vadd.f32 %v357_v8, %v302_v6  ;;  %v249_v14 = vadd.f32 %v248_v7, %v193_v11 }
  0xe4   :  { %v413_v10 = vpop.f32.mrf.mxu0 }
  0xe5   :  { %v414_v13 = vadd.f32 %v413_v10, %v358_v9 }
  0xe7   :  { %v446_v16 = vmax.f32 %v414_v13, 0.0 }
  0xe8   :  { %v304_v17 = vpop.f32.mrf.mxu2 }
  0xe9   :  { %460 = vst.msk [vmem:[%s1078_s3 + $0x18] sm:$0xff] %vm456_vm0, %v446_v16  ;;  %v305_v18 = vadd.f32 %v304_v17, %v249_v14 }
  0xea   :  { %v251_v21 = vpop.f32.mrf.mxu1  ;;  %v360_v22 = vpop.f32.mrf.mxu3 }
  0xeb   :  { %v361_v23 = vadd.f32 %v360_v22, %v305_v18  ;;  %v252_v31 = vadd.f32 %v251_v21, %v196_v27 }
  0xec   :  { %v416_v26 = vpop.f32.mrf.mxu0 }
  0xed   :  { %v417_v30 = vadd.f32 %v416_v26, %v361_v23 }
  0xef   :  { %v447_v12 = vmax.f32 %v417_v30, 0.0 }
  0xf0   :  { %v307_v33 = vpop.f32.mrf.mxu2 }
  0xf1   :  { %461 = vst.msk [vmem:[%s1078_s3 + $0x20] sm:$0xff] %vm456_vm0, %v447_v12  ;;  %v308_v35 = vadd.f32 %v307_v33, %v252_v31 }
  0xf2   :  { %v254_v36 = vpop.f32.mrf.mxu1  ;;  %v363_v37 = vpop.f32.mrf.mxu3 }
  0xf3   :  { %v364_v38 = vadd.f32 %v363_v37, %v308_v35  ;;  %v255_v42 = vadd.f32 %v254_v36, %v199_v40 }
  0xf4   :  { %v419_v39 = vpop.f32.mrf.mxu0 }
  0xf5   :  { %v420_v41 = vadd.f32 %v419_v39, %v364_v38 }
  0xf7   :  { %v448_v20 = vmax.f32 %v420_v41, 0.0 }
  0xf8   :  { %v310_v43 = vpop.f32.mrf.mxu2 }
  0xf9   :  { %462 = vst.msk [vmem:[%s1078_s3 + $0x28] sm:$0xff] %vm456_vm0, %v448_v20  ;;  %v311_v44 = vadd.f32 %v310_v43, %v255_v42 }
  0xfa   :  { %v257_v45 = vpop.f32.mrf.mxu1  ;;  %v366_v46 = vpop.f32.mrf.mxu3 }
  0xfb   :  { %v367_v47 = vadd.f32 %v366_v46, %v311_v44  ;;  %v258_v51 = vadd.f32 %v257_v45, %v202_v49 }
  0xfc   :  { %v422_v48 = vpop.f32.mrf.mxu0 }
  0xfd   :  { %v423_v50 = vadd.f32 %v422_v48, %v367_v47 }
  0xff   :  { %v449_v25 = vmax.f32 %v423_v50, 0.0 }
 0x100   :  { %v313_v52 = vpop.f32.mrf.mxu2 }
 0x101   :  { %463 = vst.msk [vmem:[%s1078_s3 + $0x30] sm:$0xff] %vm456_vm0, %v449_v25  ;;  %v314_v53 = vadd.f32 %v313_v52, %v258_v51 }
 0x102   :  { %v260_v54 = vpop.f32.mrf.mxu1  ;;  %v369_v55 = vpop.f32.mrf.mxu3 }
 0x103   :  { %v370_v56 = vadd.f32 %v369_v55, %v314_v53  ;;  %v261_v59 = vadd.f32 %v260_v54, %v983_v19 }
 0x104   :  { %v425_v57 = vpop.f32.mrf.mxu0 }
 0x105   :  { %v426_v58 = vadd.f32 %v425_v57, %v370_v56 }
 0x107   :  { %v450_v60 = vmax.f32 %v426_v58, 0.0 }
 0x108   :  { %v316_v61 = vpop.f32.mrf.mxu2 }
 0x109   :  { %464 = vst.msk [vmem:[%s1078_s3 + $0x38] sm:$0xff] %vm456_vm0, %v450_v60  ;;  %v317_v15 = vadd.f32 %v316_v61, %v261_v59 }
 0x10a   :  { %v263_v29 = vpop.f32.mrf.mxu1  ;;  %v372_v62 = vpop.f32.mrf.mxu3 }
 0x10b   :  { %v373_v63 = vadd.f32 %v372_v62, %v317_v15  ;;  %v264_v2 = vadd.f32 %v263_v29, %v991_v24 }
 0x10c   :  { %v428_v0 = vpop.f32.mrf.mxu0 }
 0x10d   :  { %v429_v1 = vadd.f32 %v428_v0, %v373_v63 }
 0x10f   :  { %v451_v3 = vmax.f32 %v429_v1, 0.0 }
 0x110   :  { %v319_v4 = vpop.f32.mrf.mxu2 }
 0x111   :  { %465 = vst.msk [vmem:[%s1078_s3 + $0x40] sm:$0xff] %vm456_vm0, %v451_v3  ;;  %v320_v19 = vadd.f32 %v319_v4, %v264_v2 }
 0x112   :  { %v266_v5 = vpop.f32.mrf.mxu1  ;;  %v375_v6 = vpop.f32.mrf.mxu3 }
 0x113   :  { %v376_v7 = vadd.f32 %v375_v6, %v320_v19  ;;  %v267_v10 = vadd.f32 %v266_v5, %v996_v28 }
 0x114   :  { %v431_v8 = vpop.f32.mrf.mxu0 }
 0x115   :  { %v432_v9 = vadd.f32 %v431_v8, %v376_v7 }
 0x117   :  { %v452_v11 = vmax.f32 %v432_v9, 0.0 }
 0x118   :  { %v322_v13 = vpop.f32.mrf.mxu2 }
 0x119   :  { %466 = vst.msk [vmem:[%s1078_s3 + $0x48] sm:$0xff] %vm456_vm0, %v452_v11  ;;  %v323_v24 = vadd.f32 %v322_v13, %v267_v10 }
 0x11a   :  { %v269_v14 = vpop.f32.mrf.mxu1  ;;  %v378_v16 = vpop.f32.mrf.mxu3 }
 0x11b   :  { %v379_v17 = vadd.f32 %v378_v16, %v323_v24  ;;  %v270_v22 = vadd.f32 %v269_v14, %v1001_v32 }
 0x11c   :  { %v434_v18 = vpop.f32.mrf.mxu0 }
 0x11d   :  { %v435_v21 = vadd.f32 %v434_v18, %v379_v17 }
 0x11f   :  { %v453_v23 = vmax.f32 %v435_v21, 0.0 }
 0x120   :  { %v325_v26 = vpop.f32.mrf.mxu2 }
 0x121   :  { %467 = vst.msk [vmem:[%s1078_s3 + $0x50] sm:$0xff] %vm456_vm0, %v453_v23  ;;  %v326_v28 = vadd.f32 %v325_v26, %v270_v22 }
 0x122   :  { %v381_v27 = vpop.f32.mrf.mxu3  ;;  %v272_v31 = vpop.f32.mrf.mxu1 }
 0x123   :  { %v382_v30 = vadd.f32 %v381_v27, %v326_v28  ;;  %v273_v35 = vadd.f32 %v272_v31, %v1004_v34 }
 0x124   :  { %v437_v12 = vpop.f32.mrf.mxu0 }
 0x125   :  { %v438_v33 = vadd.f32 %v437_v12, %v382_v30 }
 0x127   :  { %v454_v36 = vmax.f32 %v438_v33, 0.0 }
 0x128   :  { %v328_v37 = vpop.f32.mrf.mxu2 }
 0x129   :  { %468 = vst.msk [vmem:[%s1078_s3 + $0x58] sm:$0xff] %vm456_vm0, %v454_v36  ;;  %v329_v32 = vadd.f32 %v328_v37, %v273_v35 }
 0x12a   :  { %v384_v38 = vpop.f32.mrf.mxu3 }
 0x12b   :  { %v385_v39 = vadd.f32 %v384_v38, %v329_v32 }
 0x12c   :  { %v440_v40 = vpop.f32.mrf.mxu0 }
 0x12d   :  { %v441_v41 = vadd.f32 %v440_v40, %v385_v39 }
 0x12f   :  { %v455_v42 = vmax.f32 %v441_v41, 0.0 }
 0x131   :  { %469 = vst.msk [vmem:[%s1078_s3 + $0x60] sm:$0xff] %vm456_vm0, %v455_v42 }

// kernel: policy_forward.7
= control target key start
LH: loop header
LB: loop body
LE: loop exit
PB: predicated region body
PF: predicated region fallthrough
CT: control target
= control target key end

     0   :  { %s9318_s1 = inlined_call_operand.vmem [shape: f32[3200,512], index: 1, kind: input, shape index: {}]   ;;  %s9319_s0 = inlined_call_operand.vmem [shape: f32[8,3200], index: 0, kind: input, shape index: {}]   ;;  %s9320_s2 = inlined_call_operand.vmem [shape: f32[1,512], index: 2, kind: input, shape index: {}]   ;;  %s9321_s3 = inlined_call_operand.vmem [shape: f32[512,128], index: 3, kind: input, shape index: {}]   ;;  %s9322_s4 = inlined_call_operand.vmem [shape: f32[1,128], index: 4, kind: input, shape index: {}]   ;;  %s9323_s5 = inlined_call_operand.vmem [shape: f32[8,128], index: 5, kind: output, shape index: {}]  }
   0x1   :  { %v105_v0 = vld [vmem:[%s9318_s1 + $0x1e0] sm:$0xff] }
   0x2   :  { %v169_v1 = vld [vmem:[%s9318_s1 + $0x3e0] sm:$0xff]  ;;  %1655 = vmatpush.msra.mxu0 %v105_v0 }
   0x3   :  { %v233_v2 = vld [vmem:[%s9318_s1 + $0x5e0] sm:$0xff]  ;;  %1675 = vmatpush.msra.mxu1 %v169_v1 }
   0x4   :  { %v101_v3 = vld [vmem:[%s9318_s1 + $0x1c0] sm:$0xff]  ;;  %1695 = vmatpush.msra.mxu2 %v233_v2 }
   0x5   :  { %v165_v4 = vld [vmem:[%s9318_s1 + $0x3c0] sm:$0xff]  ;;  %1656 = vmatpush.msra.mxu0 %v101_v3 }
   0x6   :  { %v229_v5 = vld [vmem:[%s9318_s1 + $0x5c0] sm:$0xff]  ;;  %1676 = vmatpush.msra.mxu1 %v165_v4 }
   0x7   :  { %v297_v6 = vld [vmem:[%s9318_s1 + $0x7e0] sm:$0xff]  ;;  %1696 = vmatpush.msra.mxu2 %v229_v5 }
   0x8   :  { %v97_v7 = vld [vmem:[%s9318_s1 + $0x1a0] sm:$0xff]  ;;  %1715 = vmatpush.msra.mxu3 %v297_v6 }
   0x9   :  { %v161_v8 = vld [vmem:[%s9318_s1 + $0x3a0] sm:$0xff]  ;;  %1657 = vmatpush.msra.mxu0 %v97_v7 }
   0xa   :  { %v225_v9 = vld [vmem:[%s9318_s1 + $0x5a0] sm:$0xff]  ;;  %1677 = vmatpush.msra.mxu1 %v161_v8 }
   0xb   :  { %v293_v10 = vld [vmem:[%s9318_s1 + $0x7c0] sm:$0xff]  ;;  %1697 = vmatpush.msra.mxu2 %v225_v9 }
   0xc   :  { %v93_v11 = vld [vmem:[%s9318_s1 + $0x180] sm:$0xff]  ;;  %1716 = vmatpush.msra.mxu3 %v293_v10 }
   0xd   :  { %v157_v12 = vld [vmem:[%s9318_s1 + $0x380] sm:$0xff]  ;;  %1658 = vmatpush.msra.mxu0 %v93_v11 }
   0xe   :  { %v221_v13 = vld [vmem:[%s9318_s1 + $0x580] sm:$0xff]  ;;  %1678 = vmatpush.msra.mxu1 %v157_v12 }
   0xf   :  { %v289_v14 = vld [vmem:[%s9318_s1 + $0x7a0] sm:$0xff]  ;;  %1698 = vmatpush.msra.mxu2 %v221_v13 }
  0x10   :  { %v89_v15 = vld [vmem:[%s9318_s1 + $0x160] sm:$0xff]  ;;  %1717 = vmatpush.msra.mxu3 %v289_v14 }
  0x11   :  { %v153_v16 = vld [vmem:[%s9318_s1 + $0x360] sm:$0xff]  ;;  %1659 = vmatpush.msra.mxu0 %v89_v15 }
  0x12   :  { %v217_v17 = vld [vmem:[%s9318_s1 + $0x560] sm:$0xff]  ;;  %1679 = vmatpush.msra.mxu1 %v153_v16 }
  0x13   :  { %v285_v18 = vld [vmem:[%s9318_s1 + $0x780] sm:$0xff]  ;;  %1699 = vmatpush.msra.mxu2 %v217_v17 }
  0x14   :  { %v85_v19 = vld [vmem:[%s9318_s1 + $0x140] sm:$0xff]  ;;  %1718 = vmatpush.msra.mxu3 %v285_v18 }
  0x15   :  { %v149_v20 = vld [vmem:[%s9318_s1 + $0x340] sm:$0xff]  ;;  %1660 = vmatpush.msra.mxu0 %v85_v19 }
  0x16   :  { %v213_v21 = vld [vmem:[%s9318_s1 + $0x540] sm:$0xff]  ;;  %1680 = vmatpush.msra.mxu1 %v149_v20 }
  0x17   :  { %v281_v22 = vld [vmem:[%s9318_s1 + $0x760] sm:$0xff]  ;;  %1700 = vmatpush.msra.mxu2 %v213_v21 }
  0x18   :  { %v81_v23 = vld [vmem:[%s9318_s1 + $0x120] sm:$0xff]  ;;  %1719 = vmatpush.msra.mxu3 %v281_v22 }
  0x19   :  { %v145_v24 = vld [vmem:[%s9318_s1 + $0x320] sm:$0xff]  ;;  %1661 = vmatpush.msra.mxu0 %v81_v23 }
  0x1a   :  { %v209_v25 = vld [vmem:[%s9318_s1 + $0x520] sm:$0xff]  ;;  %1681 = vmatpush.msra.mxu1 %v145_v24 }
  0x1b   :  { %v277_v26 = vld [vmem:[%s9318_s1 + $0x740] sm:$0xff]  ;;  %1701 = vmatpush.msra.mxu2 %v209_v25 }
  0x1c   :  { %v77_v27 = vld [vmem:[%s9318_s1 + $0x100] sm:$0xff]  ;;  %1720 = vmatpush.msra.mxu3 %v277_v26 }
  0x1d   :  { %v141_v28 = vld [vmem:[%s9318_s1 + $0x300] sm:$0xff]  ;;  %1662 = vmatpush.msra.mxu0 %v77_v27 }
  0x1e   :  { %v205_v29 = vld [vmem:[%s9318_s1 + $0x500] sm:$0xff]  ;;  %1682 = vmatpush.msra.mxu1 %v141_v28 }
  0x1f   :  { %v273_v30 = vld [vmem:[%s9318_s1 + $0x720] sm:$0xff]  ;;  %1702 = vmatpush.msra.mxu2 %v205_v29 }
  0x20   :  { %v73_v31 = vld [vmem:[%s9318_s1 + $0xe0] sm:$0xff]  ;;  %1721 = vmatpush.msra.mxu3 %v273_v30 }
  0x21   :  { %v137_v32 = vld [vmem:[%s9318_s1 + $0x2e0] sm:$0xff]  ;;  %1663 = vmatpush.msra.mxu0 %v73_v31 }
  0x22   :  { %v201_v33 = vld [vmem:[%s9318_s1 + $0x4e0] sm:$0xff]  ;;  %1683 = vmatpush.msra.mxu1 %v137_v32 }
  0x23   :  { %v269_v34 = vld [vmem:[%s9318_s1 + $0x700] sm:$0xff]  ;;  %1703 = vmatpush.msra.mxu2 %v201_v33 }
  0x24   :  { %v69_v35 = vld [vmem:[%s9318_s1 + $0xc0] sm:$0xff]  ;;  %1722 = vmatpush.msra.mxu3 %v269_v34 }
  0x25   :  { %v133_v36 = vld [vmem:[%s9318_s1 + $0x2c0] sm:$0xff]  ;;  %1664 = vmatpush.msra.mxu0 %v69_v35 }
  0x26   :  { %v197_v37 = vld [vmem:[%s9318_s1 + $0x4c0] sm:$0xff]  ;;  %1684 = vmatpush.msra.mxu1 %v133_v36 }
  0x27   :  { %v265_v38 = vld [vmem:[%s9318_s1 + $0x6e0] sm:$0xff]  ;;  %1704 = vmatpush.msra.mxu2 %v197_v37 }
  0x28   :  { %v65_v39 = vld [vmem:[%s9318_s1 + $0xa0] sm:$0xff]  ;;  %1723 = vmatpush.msra.mxu3 %v265_v38 }
  0x29   :  { %v129_v40 = vld [vmem:[%s9318_s1 + $0x2a0] sm:$0xff]  ;;  %1665 = vmatpush.msra.mxu0 %v65_v39 }
  0x2a   :  { %v193_v41 = vld [vmem:[%s9318_s1 + $0x4a0] sm:$0xff]  ;;  %1685 = vmatpush.msra.mxu1 %v129_v40 }
  0x2b   :  { %v261_v42 = vld [vmem:[%s9318_s1 + $0x6c0] sm:$0xff]  ;;  %1705 = vmatpush.msra.mxu2 %v193_v41 }
  0x2c   :  { %v61_v43 = vld [vmem:[%s9318_s1 + $0x80] sm:$0xff]  ;;  %1724 = vmatpush.msra.mxu3 %v261_v42 }
  0x2d   :  { %v125_v44 = vld [vmem:[%s9318_s1 + $0x280] sm:$0xff]  ;;  %1666 = vmatpush.msra.mxu0 %v61_v43 }
  0x2e   :  { %v189_v45 = vld [vmem:[%s9318_s1 + $0x480] sm:$0xff]  ;;  %1686 = vmatpush.msra.mxu1 %v125_v44 }
  0x2f   :  { %v257_v46 = vld [vmem:[%s9318_s1 + $0x6a0] sm:$0xff]  ;;  %1706 = vmatpush.msra.mxu2 %v189_v45 }
  0x30   :  { %v57_v47 = vld [vmem:[%s9318_s1 + $0x60] sm:$0xff]  ;;  %1725 = vmatpush.msra.mxu3 %v257_v46 }
  0x31   :  { %v121_v48 = vld [vmem:[%s9318_s1 + $0x260] sm:$0xff]  ;;  %1667 = vmatpush.msra.mxu0 %v57_v47 }
  0x32   :  { %v185_v49 = vld [vmem:[%s9318_s1 + $0x460] sm:$0xff]  ;;  %1687 = vmatpush.msra.mxu1 %v121_v48 }
  0x33   :  { %v253_v50 = vld [vmem:[%s9318_s1 + $0x680] sm:$0xff]  ;;  %1707 = vmatpush.msra.mxu2 %v185_v49 }
  0x34   :  { %v53_v51 = vld [vmem:[%s9318_s1 + $0x40] sm:$0xff]  ;;  %1726 = vmatpush.msra.mxu3 %v253_v50 }
  0x35   :  { %v117_v52 = vld [vmem:[%s9318_s1 + $0x240] sm:$0xff]  ;;  %1668 = vmatpush.msra.mxu0 %v53_v51 }
  0x36   :  { %v181_v53 = vld [vmem:[%s9318_s1 + $0x440] sm:$0xff]  ;;  %1688 = vmatpush.msra.mxu1 %v117_v52 }
  0x37   :  { %v249_v54 = vld [vmem:[%s9318_s1 + $0x660] sm:$0xff]  ;;  %1708 = vmatpush.msra.mxu2 %v181_v53 }
  0x38   :  { %v49_v55 = vld [vmem:[%s9318_s1 + $0x20] sm:$0xff]  ;;  %1727 = vmatpush.msra.mxu3 %v249_v54 }
  0x39   :  { %v113_v56 = vld [vmem:[%s9318_s1 + $0x220] sm:$0xff]  ;;  %1669 = vmatpush.msra.mxu0 %v49_v55 }
  0x3a   :  { %v177_v57 = vld [vmem:[%s9318_s1 + $0x420] sm:$0xff]  ;;  %1689 = vmatpush.msra.mxu1 %v113_v56 }
  0x3b   :  { %v245_v58 = vld [vmem:[%s9318_s1 + $0x640] sm:$0xff]  ;;  %1709 = vmatpush.msra.mxu2 %v177_v57 }
  0x3c   :  { %v45_v59 = vld [vmem:[%s9318_s1] sm:$0xff]  ;;  %1728 = vmatpush.msra.mxu3 %v245_v58 }
  0x3d   :  { %v109_v60 = vld [vmem:[%s9318_s1 + $0x200] sm:$0xff]  ;;  %1670 = vmatpush.msra.mxu0 %v45_v59 }
  0x3e   :  { %v173_v61 = vld [vmem:[%s9318_s1 + $0x400] sm:$0xff]  ;;  %1690 = vmatpush.msra.mxu1 %v109_v60 }
  0x3f   :  { %v241_v62 = vld [vmem:[%s9318_s1 + $0x620] sm:$0xff]  ;;  %1710 = vmatpush.msra.mxu2 %v173_v61 }
  0x40   :  { %v361_v63 = vld [vmem:[%s9318_s1 + $0x9e0] sm:$0xff]  ;;  %1729 = vmatpush.msra.mxu3 %v241_v62 }
  0x41   :  { %v425_v0 = vld [vmem:[%s9318_s1 + $0xbe0] sm:$0xff]  ;;  %1735 = vmatpush.msrb.mxu0 %v361_v63 }
  0x42   :  { %v489_v1 = vld [vmem:[%s9318_s1 + $0xde0] sm:$0xff]  ;;  %1755 = vmatpush.msrb.mxu1 %v425_v0  ;;  %v21_v0 = vld [vmem:[%s9319_s0 + $0x8] sm:$0xff] }
  0x43   :  { %v237_v2 = vld [vmem:[%s9318_s1 + $0x600] sm:$0xff]  ;;  %1775 = vmatpush.msrb.mxu2 %v489_v1  ;;  %v22_v1 = vld [vmem:[%s9319_s0 + $0x10] sm:$0xff]  ;;  %1691 = vmatmul.f32.vlgmr.msra.gmra.mxu1 %v21_v0 }
  0x44   :  { %v357_v3 = vld [vmem:[%s9318_s1 + $0x9c0] sm:$0xff]  ;;  %1730 = vmatpush.msra.mxu3 %v237_v2  ;;  %1711 = vmatmul.f32.vlgmr.msra.gmra.mxu2 %v22_v1 }
  0x45   :  { %v421_v4 = vld [vmem:[%s9318_s1 + $0xbc0] sm:$0xff]  ;;  %1736 = vmatpush.msrb.mxu0 %v357_v3 }
  0x46   :  { %v485_v5 = vld [vmem:[%s9318_s1 + $0xdc0] sm:$0xff]  ;;  %1756 = vmatpush.msrb.mxu1 %v421_v4 }
  0x47   :  { %v553_v6 = vld [vmem:[%s9318_s1 + $0xfe0] sm:$0xff]  ;;  %1776 = vmatpush.msrb.mxu2 %v485_v5 }
  0x48   :  { %v353_v7 = vld [vmem:[%s9318_s1 + $0x9a0] sm:$0xff]  ;;  %1795 = vmatpush.msrb.mxu3 %v553_v6 }
  0x49   :  { %v417_v8 = vld [vmem:[%s9318_s1 + $0xba0] sm:$0xff]  ;;  %1737 = vmatpush.msrb.mxu0 %v353_v7  ;;  %v23_v7 = vld [vmem:[%s9319_s0 + $0x18] sm:$0xff] }
  0x4a   :  { %v481_v9 = vld [vmem:[%s9318_s1 + $0xda0] sm:$0xff]  ;;  %1757 = vmatpush.msrb.mxu1 %v417_v8  ;;  %1731 = vmatmul.f32.vlgmr.msra.gmra.mxu3 %v23_v7 }
  0x4b   :  { %v549_v10 = vld [vmem:[%s9318_s1 + $0xfc0] sm:$0xff]  ;;  %1777 = vmatpush.msrb.mxu2 %v481_v9 }
  0x4c   :  { %v349_v11 = vld [vmem:[%s9318_s1 + $0x980] sm:$0xff]  ;;  %1796 = vmatpush.msrb.mxu3 %v549_v10 }
  0x4d   :  { %v413_v12 = vld [vmem:[%s9318_s1 + $0xb80] sm:$0xff]  ;;  %1738 = vmatpush.msrb.mxu0 %v349_v11 }
  0x4e   :  { %v477_v13 = vld [vmem:[%s9318_s1 + $0xd80] sm:$0xff]  ;;  %1758 = vmatpush.msrb.mxu1 %v413_v12 }
  0x4f   :  { %v545_v14 = vld [vmem:[%s9318_s1 + $0xfa0] sm:$0xff]  ;;  %1778 = vmatpush.msrb.mxu2 %v477_v13 }
  0x50   :  { %v345_v15 = vld [vmem:[%s9318_s1 + $0x960] sm:$0xff]  ;;  %1797 = vmatpush.msrb.mxu3 %v545_v14 }
  0x51   :  { %v409_v16 = vld [vmem:[%s9318_s1 + $0xb60] sm:$0xff]  ;;  %1739 = vmatpush.msrb.mxu0 %v345_v15 }
  0x52   :  { %v473_v17 = vld [vmem:[%s9318_s1 + $0xd60] sm:$0xff]  ;;  %1759 = vmatpush.msrb.mxu1 %v409_v16 }
  0x53   :  { %v541_v18 = vld [vmem:[%s9318_s1 + $0xf80] sm:$0xff]  ;;  %1779 = vmatpush.msrb.mxu2 %v473_v17 }
  0x54   :  { %v341_v19 = vld [vmem:[%s9318_s1 + $0x940] sm:$0xff]  ;;  %1798 = vmatpush.msrb.mxu3 %v541_v18 }
  0x55   :  { %v405_v20 = vld [vmem:[%s9318_s1 + $0xb40] sm:$0xff]  ;;  %1740 = vmatpush.msrb.mxu0 %v341_v19  ;;  %v26_v19 = vld [vmem:[%s9319_s0 + $0x30] sm:$0xff] }
  0x56   :  { %v469_v21 = vld [vmem:[%s9318_s1 + $0xd40] sm:$0xff]  ;;  %1760 = vmatpush.msrb.mxu1 %v405_v20 }
  0x57   :  { %v537_v22 = vld [vmem:[%s9318_s1 + $0xf60] sm:$0xff]  ;;  %1780 = vmatpush.msrb.mxu2 %v469_v21 }
  0x58   :  { %v337_v23 = vld [vmem:[%s9318_s1 + $0x920] sm:$0xff]  ;;  %1799 = vmatpush.msrb.mxu3 %v537_v22 }
  0x59   :  { %v401_v24 = vld [vmem:[%s9318_s1 + $0xb20] sm:$0xff]  ;;  %1741 = vmatpush.msrb.mxu0 %v337_v23 }
  0x5a   :  { %v465_v25 = vld [vmem:[%s9318_s1 + $0xd20] sm:$0xff]  ;;  %1761 = vmatpush.msrb.mxu1 %v401_v24 }
  0x5b   :  { %v533_v26 = vld [vmem:[%s9318_s1 + $0xf40] sm:$0xff]  ;;  %1781 = vmatpush.msrb.mxu2 %v465_v25  ;;  %v27_v25 = vld [vmem:[%s9319_s0 + $0x38] sm:$0xff] }
  0x5c   :  { %v333_v27 = vld [vmem:[%s9318_s1 + $0x900] sm:$0xff]  ;;  %1800 = vmatpush.msrb.mxu3 %v533_v26 }
  0x5d   :  { %v397_v28 = vld [vmem:[%s9318_s1 + $0xb00] sm:$0xff]  ;;  %1742 = vmatpush.msrb.mxu0 %v333_v27 }
  0x5e   :  { %v461_v29 = vld [vmem:[%s9318_s1 + $0xd00] sm:$0xff]  ;;  %1762 = vmatpush.msrb.mxu1 %v397_v28 }
  0x5f   :  { %v529_v30 = vld [vmem:[%s9318_s1 + $0xf20] sm:$0xff]  ;;  %1782 = vmatpush.msrb.mxu2 %v461_v29 }
  0x60   :  { %v329_v31 = vld [vmem:[%s9318_s1 + $0x8e0] sm:$0xff]  ;;  %1801 = vmatpush.msrb.mxu3 %v529_v30  ;;  %v25_v30 = vld [vmem:[%s9319_s0 + $0x28] sm:$0xff] }
  0x61   :  { %v393_v32 = vld [vmem:[%s9318_s1 + $0xae0] sm:$0xff]  ;;  %1743 = vmatpush.msrb.mxu0 %v329_v31 }
  0x62   :  { %v457_v33 = vld [vmem:[%s9318_s1 + $0xce0] sm:$0xff]  ;;  %1763 = vmatpush.msrb.mxu1 %v393_v32 }
  0x63   :  { %v525_v34 = vld [vmem:[%s9318_s1 + $0xf00] sm:$0xff]  ;;  %1783 = vmatpush.msrb.mxu2 %v457_v33 }
  0x64   :  { %v325_v35 = vld [vmem:[%s9318_s1 + $0x8c0] sm:$0xff]  ;;  %1802 = vmatpush.msrb.mxu3 %v525_v34 }
  0x65   :  { %v389_v36 = vld [vmem:[%s9318_s1 + $0xac0] sm:$0xff]  ;;  %1744 = vmatpush.msrb.mxu0 %v325_v35 }
  0x66   :  { %v453_v37 = vld [vmem:[%s9318_s1 + $0xcc0] sm:$0xff]  ;;  %1764 = vmatpush.msrb.mxu1 %v389_v36 }
  0x67   :  { %v521_v38 = vld [vmem:[%s9318_s1 + $0xee0] sm:$0xff]  ;;  %1784 = vmatpush.msrb.mxu2 %v453_v37 }
  0x68   :  { %v321_v39 = vld [vmem:[%s9318_s1 + $0x8a0] sm:$0xff]  ;;  %1803 = vmatpush.msrb.mxu3 %v521_v38 }
  0x69   :  { %v385_v40 = vld [vmem:[%s9318_s1 + $0xaa0] sm:$0xff]  ;;  %1745 = vmatpush.msrb.mxu0 %v321_v39 }
  0x6a   :  { %v449_v41 = vld [vmem:[%s9318_s1 + $0xca0] sm:$0xff]  ;;  %1765 = vmatpush.msrb.mxu1 %v385_v40 }
  0x6b   :  { %v517_v42 = vld [vmem:[%s9318_s1 + $0xec0] sm:$0xff]  ;;  %1785 = vmatpush.msrb.mxu2 %v449_v41 }
  0x6c   :  { %v317_v43 = vld [vmem:[%s9318_s1 + $0x880] sm:$0xff]  ;;  %1804 = vmatpush.msrb.mxu3 %v517_v42 }
  0x6d   :  { %v381_v44 = vld [vmem:[%s9318_s1 + $0xa80] sm:$0xff]  ;;  %1746 = vmatpush.msrb.mxu0 %v317_v43 }
  0x6e   :  { %v445_v45 = vld [vmem:[%s9318_s1 + $0xc80] sm:$0xff]  ;;  %1766 = vmatpush.msrb.mxu1 %v381_v44 }
  0x6f   :  { %v513_v46 = vld [vmem:[%s9318_s1 + $0xea0] sm:$0xff]  ;;  %1786 = vmatpush.msrb.mxu2 %v445_v45 }
  0x70   :  { %v313_v47 = vld [vmem:[%s9318_s1 + $0x860] sm:$0xff]  ;;  %1805 = vmatpush.msrb.mxu3 %v513_v46 }
  0x71   :  { %v377_v48 = vld [vmem:[%s9318_s1 + $0xa60] sm:$0xff]  ;;  %1747 = vmatpush.msrb.mxu0 %v313_v47 }
  0x72   :  { %v441_v49 = vld [vmem:[%s9318_s1 + $0xc60] sm:$0xff]  ;;  %1767 = vmatpush.msrb.mxu1 %v377_v48 }
  0x73   :  { %v509_v50 = vld [vmem:[%s9318_s1 + $0xe80] sm:$0xff]  ;;  %1787 = vmatpush.msrb.mxu2 %v441_v49 }
  0x74   :  { %v309_v51 = vld [vmem:[%s9318_s1 + $0x840] sm:$0xff]  ;;  %1806 = vmatpush.msrb.mxu3 %v509_v50 }
  0x75   :  { %v373_v52 = vld [vmem:[%s9318_s1 + $0xa40] sm:$0xff]  ;;  %1748 = vmatpush.msrb.mxu0 %v309_v51 }
  0x76   :  { %v437_v53 = vld [vmem:[%s9318_s1 + $0xc40] sm:$0xff]  ;;  %1768 = vmatpush.msrb.mxu1 %v373_v52 }
  0x77   :  { %v505_v54 = vld [vmem:[%s9318_s1 + $0xe60] sm:$0xff]  ;;  %1788 = vmatpush.msrb.mxu2 %v437_v53 }
  0x78   :  { %v305_v55 = vld [vmem:[%s9318_s1 + $0x820] sm:$0xff]  ;;  %1807 = vmatpush.msrb.mxu3 %v505_v54 }
  0x79   :  { %v369_v56 = vld [vmem:[%s9318_s1 + $0xa20] sm:$0xff]  ;;  %1749 = vmatpush.msrb.mxu0 %v305_v55 }
  0x7a   :  { %v433_v57 = vld [vmem:[%s9318_s1 + $0xc20] sm:$0xff]  ;;  %1769 = vmatpush.msrb.mxu1 %v369_v56 }
  0x7b   :  { %v501_v58 = vld [vmem:[%s9318_s1 + $0xe40] sm:$0xff]  ;;  %1789 = vmatpush.msrb.mxu2 %v433_v57 }
  0x7c   :  { %v301_v59 = vld [vmem:[%s9318_s1 + $0x800] sm:$0xff]  ;;  %1808 = vmatpush.msrb.mxu3 %v501_v58 }
  0x7d   :  { %v365_v60 = vld [vmem:[%s9318_s1 + $0xa00] sm:$0xff]  ;;  %1750 = vmatpush.msrb.mxu0 %v301_v59 }
  0x7e   :  { %v429_v61 = vld [vmem:[%s9318_s1 + $0xc00] sm:$0xff]  ;;  %1770 = vmatpush.msrb.mxu1 %v365_v60 }
  0x7f   :  { %v497_v62 = vld [vmem:[%s9318_s1 + $0xe20] sm:$0xff]  ;;  %1790 = vmatpush.msrb.mxu2 %v429_v61  ;;  %1771 = vmatmul.f32.vlgmr.msrb.gmra.mxu1 %v25_v30 }
  0x80   :  { %v20_v63 = vld [vmem:[%s9319_s0] sm:$0xff]  ;;  %1809 = vmatpush.msrb.mxu3 %v497_v62  ;;  %1791 = vmatmul.f32.vlgmr.msrb.gmra.mxu2 %v26_v19 }
  0x81   :  { %v617_v2 = vld [vmem:[%s9318_s1 + $0x11e0] sm:$0xff]  ;;  %1671 = vmatmul.f32.vlgmr.msra.gmra.mxu0 %v20_v63 }
  0x82   :  { %v681_v3 = vld [vmem:[%s9318_s1 + $0x13e0] sm:$0xff]  ;;  %1815 = vmatpush.msra.mxu0 %v617_v2 }
  0x83   :  { %v745_v4 = vld [vmem:[%s9318_s1 + $0x15e0] sm:$0xff]  ;;  %1835 = vmatpush.msra.mxu1 %v681_v3 }
  0x84   :  { %v493_v5 = vld [vmem:[%s9318_s1 + $0xe00] sm:$0xff]  ;;  %1855 = vmatpush.msra.mxu2 %v745_v4 }
  0x85   :  { %v613_v6 = vld [vmem:[%s9318_s1 + $0x11c0] sm:$0xff]  ;;  %1810 = vmatpush.msrb.mxu3 %v493_v5 }
  0x86   :  { %v677_v8 = vld [vmem:[%s9318_s1 + $0x13c0] sm:$0xff]  ;;  %1816 = vmatpush.msra.mxu0 %v613_v6  ;;  %1811 = vmatmul.f32.vlgmr.msrb.gmra.mxu3 %v27_v25 }
  0x87   :  { %v741_v9 = vld [vmem:[%s9318_s1 + $0x15c0] sm:$0xff]  ;;  %1836 = vmatpush.msra.mxu1 %v677_v8  ;;  %v30_v8 = vld [vmem:[%s9319_s0 + $0x50] sm:$0xff] }
  0x88   :  { %v809_v10 = vld [vmem:[%s9318_s1 + $0x17e0] sm:$0xff]  ;;  %1856 = vmatpush.msra.mxu2 %v741_v9 }
  0x89   :  { %v609_v11 = vld [vmem:[%s9318_s1 + $0x11a0] sm:$0xff]  ;;  %1875 = vmatpush.msra.mxu3 %v809_v10 }
  0x8a   :  { %v673_v12 = vld [vmem:[%s9318_s1 + $0x13a0] sm:$0xff]  ;;  %1817 = vmatpush.msra.mxu0 %v609_v11 }
  0x8b   :  { %v737_v13 = vld [vmem:[%s9318_s1 + $0x15a0] sm:$0xff]  ;;  %1837 = vmatpush.msra.mxu1 %v673_v12 }
  0x8c   :  { %v805_v14 = vld [vmem:[%s9318_s1 + $0x17c0] sm:$0xff]  ;;  %1857 = vmatpush.msra.mxu2 %v737_v13  ;;  %v29_v13 = vld [vmem:[%s9319_s0 + $0x48] sm:$0xff] }
  0x8d   :  { %v605_v15 = vld [vmem:[%s9318_s1 + $0x1180] sm:$0xff]  ;;  %1876 = vmatpush.msra.mxu3 %v805_v14  ;;  %v31_v14 = vld [vmem:[%s9319_s0 + $0x58] sm:$0xff] }
  0x8e   :  { %v669_v16 = vld [vmem:[%s9318_s1 + $0x1380] sm:$0xff]  ;;  %1818 = vmatpush.msra.mxu0 %v605_v15 }
  0x8f   :  { %v733_v17 = vld [vmem:[%s9318_s1 + $0x1580] sm:$0xff]  ;;  %1838 = vmatpush.msra.mxu1 %v669_v16 }
  0x90   :  { %v801_v18 = vld [vmem:[%s9318_s1 + $0x17a0] sm:$0xff]  ;;  %1858 = vmatpush.msra.mxu2 %v733_v17 }
  0x91   :  { %v601_v20 = vld [vmem:[%s9318_s1 + $0x1160] sm:$0xff]  ;;  %1877 = vmatpush.msra.mxu3 %v801_v18 }
  0x92   :  { %v665_v21 = vld [vmem:[%s9318_s1 + $0x1360] sm:$0xff]  ;;  %1819 = vmatpush.msra.mxu0 %v601_v20 }
  0x93   :  { %v729_v22 = vld [vmem:[%s9318_s1 + $0x1560] sm:$0xff]  ;;  %1839 = vmatpush.msra.mxu1 %v665_v21 }
  0x94   :  { %v797_v23 = vld [vmem:[%s9318_s1 + $0x1780] sm:$0xff]  ;;  %1859 = vmatpush.msra.mxu2 %v729_v22 }
  0x95   :  { %v24_v24 = vld [vmem:[%s9319_s0 + $0x20] sm:$0xff]  ;;  %1878 = vmatpush.msra.mxu3 %v797_v23 }
  0x96   :  { %v597_v26 = vld [vmem:[%s9318_s1 + $0x1140] sm:$0xff]  ;;  %1751 = vmatmul.f32.vlgmr.msrb.gmra.mxu0 %v24_v24 }
  0x97   :  { %v661_v27 = vld [vmem:[%s9318_s1 + $0x1340] sm:$0xff]  ;;  %1820 = vmatpush.msra.mxu0 %v597_v26 }
  0x98   :  { %v725_v28 = vld [vmem:[%s9318_s1 + $0x1540] sm:$0xff]  ;;  %1840 = vmatpush.msra.mxu1 %v661_v27 }
  0x99   :  { %v793_v29 = vld [vmem:[%s9318_s1 + $0x1760] sm:$0xff]  ;;  %1860 = vmatpush.msra.mxu2 %v725_v28 }
  0x9a   :  { %v593_v31 = vld [vmem:[%s9318_s1 + $0x1120] sm:$0xff]  ;;  %1879 = vmatpush.msra.mxu3 %v793_v29 }
  0x9b   :  { %v657_v32 = vld [vmem:[%s9318_s1 + $0x1320] sm:$0xff]  ;;  %1821 = vmatpush.msra.mxu0 %v593_v31 }
  0x9c   :  { %v721_v33 = vld [vmem:[%s9318_s1 + $0x1520] sm:$0xff]  ;;  %1841 = vmatpush.msra.mxu1 %v657_v32 }
  0x9d   :  { %v789_v34 = vld [vmem:[%s9318_s1 + $0x1740] sm:$0xff]  ;;  %1861 = vmatpush.msra.mxu2 %v721_v33 }
  0x9e   :  { %v589_v35 = vld [vmem:[%s9318_s1 + $0x1100] sm:$0xff]  ;;  %1880 = vmatpush.msra.mxu3 %v789_v34 }
  0x9f   :  { %v653_v36 = vld [vmem:[%s9318_s1 + $0x1300] sm:$0xff]  ;;  %1822 = vmatpush.msra.mxu0 %v589_v35 }
  0xa0   :  { %v717_v37 = vld [vmem:[%s9318_s1 + $0x1500] sm:$0xff]  ;;  %1842 = vmatpush.msra.mxu1 %v653_v36 }
  0xa1   :  { %v785_v38 = vld [vmem:[%s9318_s1 + $0x1720] sm:$0xff]  ;;  %1862 = vmatpush.msra.mxu2 %v717_v37 }
  0xa2   :  { %v585_v39 = vld [vmem:[%s9318_s1 + $0x10e0] sm:$0xff]  ;;  %1881 = vmatpush.msra.mxu3 %v785_v38 }
  0xa3   :  { %v649_v40 = vld [vmem:[%s9318_s1 + $0x12e0] sm:$0xff]  ;;  %1823 = vmatpush.msra.mxu0 %v585_v39 }
  0xa4   :  { %v713_v41 = vld [vmem:[%s9318_s1 + $0x14e0] sm:$0xff]  ;;  %1843 = vmatpush.msra.mxu1 %v649_v40 }
  0xa5   :  { %v781_v42 = vld [vmem:[%s9318_s1 + $0x1700] sm:$0xff]  ;;  %1863 = vmatpush.msra.mxu2 %v713_v41 }
  0xa6   :  { %v581_v43 = vld [vmem:[%s9318_s1 + $0x10c0] sm:$0xff]  ;;  %1882 = vmatpush.msra.mxu3 %v781_v42 }
  0xa7   :  { %v645_v44 = vld [vmem:[%s9318_s1 + $0x12c0] sm:$0xff]  ;;  %1824 = vmatpush.msra.mxu0 %v581_v43 }
  0xa8   :  { %v709_v45 = vld [vmem:[%s9318_s1 + $0x14c0] sm:$0xff]  ;;  %1844 = vmatpush.msra.mxu1 %v645_v44 }
  0xa9   :  { %v777_v46 = vld [vmem:[%s9318_s1 + $0x16e0] sm:$0xff]  ;;  %1864 = vmatpush.msra.mxu2 %v709_v45 }
  0xaa   :  { %v577_v47 = vld [vmem:[%s9318_s1 + $0x10a0] sm:$0xff]  ;;  %1883 = vmatpush.msra.mxu3 %v777_v46 }
  0xab   :  { %v641_v48 = vld [vmem:[%s9318_s1 + $0x12a0] sm:$0xff]  ;;  %1825 = vmatpush.msra.mxu0 %v577_v47 }
  0xac   :  { %v705_v49 = vld [vmem:[%s9318_s1 + $0x14a0] sm:$0xff]  ;;  %1845 = vmatpush.msra.mxu1 %v641_v48 }
  0xad   :  { %v773_v50 = vld [vmem:[%s9318_s1 + $0x16c0] sm:$0xff]  ;;  %1865 = vmatpush.msra.mxu2 %v705_v49 }
  0xae   :  { %v573_v51 = vld [vmem:[%s9318_s1 + $0x1080] sm:$0xff]  ;;  %1884 = vmatpush.msra.mxu3 %v773_v50 }
  0xaf   :  { %v637_v52 = vld [vmem:[%s9318_s1 + $0x1280] sm:$0xff]  ;;  %1826 = vmatpush.msra.mxu0 %v573_v51 }
  0xb0   :  { %v701_v53 = vld [vmem:[%s9318_s1 + $0x1480] sm:$0xff]  ;;  %1846 = vmatpush.msra.mxu1 %v637_v52 }
  0xb1   :  { %v769_v54 = vld [vmem:[%s9318_s1 + $0x16a0] sm:$0xff]  ;;  %1866 = vmatpush.msra.mxu2 %v701_v53 }
  0xb2   :  { %v569_v55 = vld [vmem:[%s9318_s1 + $0x1060] sm:$0xff]  ;;  %1885 = vmatpush.msra.mxu3 %v769_v54 }
  0xb3   :  { %v633_v56 = vld [vmem:[%s9318_s1 + $0x1260] sm:$0xff]  ;;  %1827 = vmatpush.msra.mxu0 %v569_v55 }
  0xb4   :  { %v697_v57 = vld [vmem:[%s9318_s1 + $0x1460] sm:$0xff]  ;;  %1847 = vmatpush.msra.mxu1 %v633_v56 }
  0xb5   :  { %v765_v58 = vld [vmem:[%s9318_s1 + $0x1680] sm:$0xff]  ;;  %1867 = vmatpush.msra.mxu2 %v697_v57 }
  0xb6   :  { %v565_v59 = vld [vmem:[%s9318_s1 + $0x1040] sm:$0xff]  ;;  %1886 = vmatpush.msra.mxu3 %v765_v58 }
  0xb7   :  { %v629_v60 = vld [vmem:[%s9318_s1 + $0x1240] sm:$0xff]  ;;  %1828 = vmatpush.msra.mxu0 %v565_v59 }
  0xb8   :  { %v693_v61 = vld [vmem:[%s9318_s1 + $0x1440] sm:$0xff]  ;;  %1848 = vmatpush.msra.mxu1 %v629_v60 }
  0xb9   :  { %v761_v62 = vld [vmem:[%s9318_s1 + $0x1660] sm:$0xff]  ;;  %1868 = vmatpush.msra.mxu2 %v693_v61 }
  0xba   :  { %v561_v63 = vld [vmem:[%s9318_s1 + $0x1020] sm:$0xff]  ;;  %1887 = vmatpush.msra.mxu3 %v761_v62 }
  0xbb   :  { %v625_v0 = vld [vmem:[%s9318_s1 + $0x1220] sm:$0xff]  ;;  %1829 = vmatpush.msra.mxu0 %v561_v63 }
  0xbc   :  { %v689_v1 = vld [vmem:[%s9318_s1 + $0x1420] sm:$0xff]  ;;  %1849 = vmatpush.msra.mxu1 %v625_v0 }
  0xbd   :  { %v757_v2 = vld [vmem:[%s9318_s1 + $0x1640] sm:$0xff]  ;;  %1869 = vmatpush.msra.mxu2 %v689_v1 }
  0xbe   :  { %v557_v3 = vld [vmem:[%s9318_s1 + $0x1000] sm:$0xff]  ;;  %1888 = vmatpush.msra.mxu3 %v757_v2 }
  0xbf   :  { %v621_v4 = vld [vmem:[%s9318_s1 + $0x1200] sm:$0xff]  ;;  %1830 = vmatpush.msra.mxu0 %v557_v3 }
  0xc0   :  { %v685_v5 = vld [vmem:[%s9318_s1 + $0x1400] sm:$0xff]  ;;  %1850 = vmatpush.msra.mxu1 %v621_v4 }
  0xc1   :  { %v753_v6 = vld [vmem:[%s9318_s1 + $0x1620] sm:$0xff]  ;;  %1870 = vmatpush.msra.mxu2 %v685_v5  ;;  %1851 = vmatmul.f32.vlgmr.msra.gmra.mxu1 %v29_v13 }
  0xc2   :  { %v28_v7 = vld [vmem:[%s9319_s0 + $0x40] sm:$0xff]  ;;  %1889 = vmatpush.msra.mxu3 %v753_v6  ;;  %1871 = vmatmul.f32.vlgmr.msra.gmra.mxu2 %v30_v8 }
  0xc3   :  { %v873_v9 = vld [vmem:[%s9318_s1 + $0x19e0] sm:$0xff]  ;;  %1831 = vmatmul.f32.vlgmr.msra.gmra.mxu0 %v28_v7 }
  0xc4   :  { %v937_v10 = vld [vmem:[%s9318_s1 + $0x1be0] sm:$0xff]  ;;  %1895 = vmatpush.msrb.mxu0 %v873_v9 }
  0xc5   :  { %v1001_v11 = vld [vmem:[%s9318_s1 + $0x1de0] sm:$0xff]  ;;  %1915 = vmatpush.msrb.mxu1 %v937_v10 }
  0xc6   :  { %v749_v12 = vld [vmem:[%s9318_s1 + $0x1600] sm:$0xff]  ;;  %1935 = vmatpush.msrb.mxu2 %v1001_v11 }
  0xc7   :  { %v869_v15 = vld [vmem:[%s9318_s1 + $0x19c0] sm:$0xff]  ;;  %1890 = vmatpush.msra.mxu3 %v749_v12  ;;  %v34_v12 = vld [vmem:[%s9319_s0 + $0x70] sm:$0xff] }
  0xc8   :  { %v933_v16 = vld [vmem:[%s9318_s1 + $0x1bc0] sm:$0xff]  ;;  %1891 = vmatmul.f32.vlgmr.msra.gmra.mxu3 %v31_v14  ;;  %1896 = vmatpush.msrb.mxu0 %v869_v15 }
  0xc9   :  { %v997_v17 = vld [vmem:[%s9318_s1 + $0x1dc0] sm:$0xff]  ;;  %1916 = vmatpush.msrb.mxu1 %v933_v16 }
  0xca   :  { %v1065_v18 = vld [vmem:[%s9318_s1 + $0x1fe0] sm:$0xff]  ;;  %1936 = vmatpush.msrb.mxu2 %v997_v17  ;;  %v33_v17 = vld [vmem:[%s9319_s0 + $0x68] sm:$0xff] }
  0xcb   :  { %v865_v19 = vld [vmem:[%s9318_s1 + $0x19a0] sm:$0xff]  ;;  %1955 = vmatpush.msrb.mxu3 %v1065_v18  ;;  %v35_v18 = vld [vmem:[%s9319_s0 + $0x78] sm:$0xff] }
  0xcc   :  { %v929_v20 = vld [vmem:[%s9318_s1 + $0x1ba0] sm:$0xff]  ;;  %1897 = vmatpush.msrb.mxu0 %v865_v19 }
  0xcd   :  { %v993_v21 = vld [vmem:[%s9318_s1 + $0x1da0] sm:$0xff]  ;;  %1917 = vmatpush.msrb.mxu1 %v929_v20 }
  0xce   :  { %v1061_v22 = vld [vmem:[%s9318_s1 + $0x1fc0] sm:$0xff]  ;;  %1937 = vmatpush.msrb.mxu2 %v993_v21 }
  0xcf   :  { %v861_v23 = vld [vmem:[%s9318_s1 + $0x1980] sm:$0xff]  ;;  %1956 = vmatpush.msrb.mxu3 %v1061_v22 }
  0xd0   :  { %v925_v24 = vld [vmem:[%s9318_s1 + $0x1b80] sm:$0xff]  ;;  %1898 = vmatpush.msrb.mxu0 %v861_v23 }
  0xd1   :  { %v989_v25 = vld [vmem:[%s9318_s1 + $0x1d80] sm:$0xff]  ;;  %1918 = vmatpush.msrb.mxu1 %v925_v24 }
  0xd2   :  { %v1057_v26 = vld [vmem:[%s9318_s1 + $0x1fa0] sm:$0xff]  ;;  %1938 = vmatpush.msrb.mxu2 %v989_v25 }
  0xd3   :  { %v857_v27 = vld [vmem:[%s9318_s1 + $0x1960] sm:$0xff]  ;;  %1957 = vmatpush.msrb.mxu3 %v1057_v26 }
  0xd4   :  { %v921_v28 = vld [vmem:[%s9318_s1 + $0x1b60] sm:$0xff]  ;;  %1899 = vmatpush.msrb.mxu0 %v857_v27 }
  0xd5   :  { %v985_v29 = vld [vmem:[%s9318_s1 + $0x1d60] sm:$0xff]  ;;  %1919 = vmatpush.msrb.mxu1 %v921_v28 }
  0xd6   :  { %v1053_v30 = vld [vmem:[%s9318_s1 + $0x1f80] sm:$0xff]  ;;  %1939 = vmatpush.msrb.mxu2 %v985_v29 }
  0xd7   :  { %v853_v31 = vld [vmem:[%s9318_s1 + $0x1940] sm:$0xff]  ;;  %1958 = vmatpush.msrb.mxu3 %v1053_v30 }
  0xd8   :  { %v917_v32 = vld [vmem:[%s9318_s1 + $0x1b40] sm:$0xff]  ;;  %1900 = vmatpush.msrb.mxu0 %v853_v31 }
  0xd9   :  { %v981_v33 = vld [vmem:[%s9318_s1 + $0x1d40] sm:$0xff]  ;;  %1920 = vmatpush.msrb.mxu1 %v917_v32 }
  0xda   :  { %v1049_v34 = vld [vmem:[%s9318_s1 + $0x1f60] sm:$0xff]  ;;  %1940 = vmatpush.msrb.mxu2 %v981_v33 }
  0xdb   :  { %v849_v35 = vld [vmem:[%s9318_s1 + $0x1920] sm:$0xff]  ;;  %1959 = vmatpush.msrb.mxu3 %v1049_v34 }
  0xdc   :  { %v913_v36 = vld [vmem:[%s9318_s1 + $0x1b20] sm:$0xff]  ;;  %1901 = vmatpush.msrb.mxu0 %v849_v35 }
  0xdd   :  { %v977_v37 = vld [vmem:[%s9318_s1 + $0x1d20] sm:$0xff]  ;;  %1921 = vmatpush.msrb.mxu1 %v913_v36 }
  0xde   :  { %v1045_v38 = vld [vmem:[%s9318_s1 + $0x1f40] sm:$0xff]  ;;  %1941 = vmatpush.msrb.mxu2 %v977_v37 }
  0xdf   :  { %v845_v39 = vld [vmem:[%s9318_s1 + $0x1900] sm:$0xff]  ;;  %1960 = vmatpush.msrb.mxu3 %v1045_v38 }
  0xe0   :  { %v909_v40 = vld [vmem:[%s9318_s1 + $0x1b00] sm:$0xff]  ;;  %1902 = vmatpush.msrb.mxu0 %v845_v39 }
  0xe1   :  { %v973_v41 = vld [vmem:[%s9318_s1 + $0x1d00] sm:$0xff]  ;;  %1922 = vmatpush.msrb.mxu1 %v909_v40 }
  0xe2   :  { %v1041_v42 = vld [vmem:[%s9318_s1 + $0x1f20] sm:$0xff]  ;;  %1942 = vmatpush.msrb.mxu2 %v973_v41 }
  0xe3   :  { %v841_v43 = vld [vmem:[%s9318_s1 + $0x18e0] sm:$0xff]  ;;  %1961 = vmatpush.msrb.mxu3 %v1041_v42 }
  0xe4   :  { %v905_v44 = vld [vmem:[%s9318_s1 + $0x1ae0] sm:$0xff]  ;;  %1903 = vmatpush.msrb.mxu0 %v841_v43 }
  0xe5   :  { %v969_v45 = vld [vmem:[%s9318_s1 + $0x1ce0] sm:$0xff]  ;;  %1923 = vmatpush.msrb.mxu1 %v905_v44 }
  0xe6   :  { %v1037_v46 = vld [vmem:[%s9318_s1 + $0x1f00] sm:$0xff]  ;;  %1943 = vmatpush.msrb.mxu2 %v969_v45 }
  0xe7   :  { %v837_v47 = vld [vmem:[%s9318_s1 + $0x18c0] sm:$0xff]  ;;  %1962 = vmatpush.msrb.mxu3 %v1037_v46 }
  0xe8   :  { %v901_v48 = vld [vmem:[%s9318_s1 + $0x1ac0] sm:$0xff]  ;;  %1904 = vmatpush.msrb.mxu0 %v837_v47 }
  0xe9   :  { %v965_v49 = vld [vmem:[%s9318_s1 + $0x1cc0] sm:$0xff]  ;;  %1924 = vmatpush.msrb.mxu1 %v901_v48 }
  0xea   :  { %v1033_v50 = vld [vmem:[%s9318_s1 + $0x1ee0] sm:$0xff]  ;;  %1944 = vmatpush.msrb.mxu2 %v965_v49 }
  0xeb   :  { %v833_v51 = vld [vmem:[%s9318_s1 + $0x18a0] sm:$0xff]  ;;  %1963 = vmatpush.msrb.mxu3 %v1033_v50 }
  0xec   :  { %v897_v52 = vld [vmem:[%s9318_s1 + $0x1aa0] sm:$0xff]  ;;  %1905 = vmatpush.msrb.mxu0 %v833_v51 }
  0xed   :  { %v961_v53 = vld [vmem:[%s9318_s1 + $0x1ca0] sm:$0xff]  ;;  %1925 = vmatpush.msrb.mxu1 %v897_v52 }
  0xee   :  { %v1029_v54 = vld [vmem:[%s9318_s1 + $0x1ec0] sm:$0xff]  ;;  %1945 = vmatpush.msrb.mxu2 %v961_v53 }
  0xef   :  { %v829_v55 = vld [vmem:[%s9318_s1 + $0x1880] sm:$0xff]  ;;  %1964 = vmatpush.msrb.mxu3 %v1029_v54 }
  0xf0   :  { %v893_v56 = vld [vmem:[%s9318_s1 + $0x1a80] sm:$0xff]  ;;  %1906 = vmatpush.msrb.mxu0 %v829_v55 }
  0xf1   :  { %v957_v57 = vld [vmem:[%s9318_s1 + $0x1c80] sm:$0xff]  ;;  %1926 = vmatpush.msrb.mxu1 %v893_v56 }
  0xf2   :  { %v1025_v58 = vld [vmem:[%s9318_s1 + $0x1ea0] sm:$0xff]  ;;  %1946 = vmatpush.msrb.mxu2 %v957_v57 }
  0xf3   :  { %v825_v59 = vld [vmem:[%s9318_s1 + $0x1860] sm:$0xff]  ;;  %1965 = vmatpush.msrb.mxu3 %v1025_v58 }
  0xf4   :  { %v889_v60 = vld [vmem:[%s9318_s1 + $0x1a60] sm:$0xff]  ;;  %1907 = vmatpush.msrb.mxu0 %v825_v59 }
  0xf5   :  { %v953_v61 = vld [vmem:[%s9318_s1 + $0x1c60] sm:$0xff]  ;;  %1927 = vmatpush.msrb.mxu1 %v889_v60 }
  0xf6   :  { %v1021_v62 = vld [vmem:[%s9318_s1 + $0x1e80] sm:$0xff]  ;;  %1947 = vmatpush.msrb.mxu2 %v953_v61 }
  0xf7   :  { %v821_v63 = vld [vmem:[%s9318_s1 + $0x1840] sm:$0xff]  ;;  %1966 = vmatpush.msrb.mxu3 %v1021_v62 }
  0xf8   :  { %v885_v0 = vld [vmem:[%s9318_s1 + $0x1a40] sm:$0xff]  ;;  %1908 = vmatpush.msrb.mxu0 %v821_v63 }
  0xf9   :  { %v949_v1 = vld [vmem:[%s9318_s1 + $0x1c40] sm:$0xff]  ;;  %1928 = vmatpush.msrb.mxu1 %v885_v0 }
  0xfa   :  { %v1017_v2 = vld [vmem:[%s9318_s1 + $0x1e60] sm:$0xff]  ;;  %1948 = vmatpush.msrb.mxu2 %v949_v1 }
  0xfb   :  { %v817_v3 = vld [vmem:[%s9318_s1 + $0x1820] sm:$0xff]  ;;  %1967 = vmatpush.msrb.mxu3 %v1017_v2 }
  0xfc   :  { %v881_v4 = vld [vmem:[%s9318_s1 + $0x1a20] sm:$0xff]  ;;  %1909 = vmatpush.msrb.mxu0 %v817_v3 }
  0xfd   :  { %v945_v5 = vld [vmem:[%s9318_s1 + $0x1c20] sm:$0xff]  ;;  %1929 = vmatpush.msrb.mxu1 %v881_v4 }
  0xfe   :  { %v1013_v6 = vld [vmem:[%s9318_s1 + $0x1e40] sm:$0xff]  ;;  %1949 = vmatpush.msrb.mxu2 %v945_v5 }
  0xff   :  { %v813_v7 = vld [vmem:[%s9318_s1 + $0x1800] sm:$0xff]  ;;  %1968 = vmatpush.msrb.mxu3 %v1013_v6 }
 0x100   :  { %v877_v8 = vld [vmem:[%s9318_s1 + $0x1a00] sm:$0xff]  ;;  %1910 = vmatpush.msrb.mxu0 %v813_v7 }
 0x101   :  { %v941_v9 = vld [vmem:[%s9318_s1 + $0x1c00] sm:$0xff]  ;;  %1930 = vmatpush.msrb.mxu1 %v877_v8 }
 0x102   :  { %v1009_v10 = vld [vmem:[%s9318_s1 + $0x1e20] sm:$0xff]  ;;  %1950 = vmatpush.msrb.mxu2 %v941_v9  ;;  %1931 = vmatmul.f32.vlgmr.msrb.gmra.mxu1 %v33_v17 }
 0x103   :  { %v32_v11 = vld [vmem:[%s9319_s0 + $0x60] sm:$0xff]  ;;  %1969 = vmatpush.msrb.mxu3 %v1009_v10  ;;  %1951 = vmatmul.f32.vlgmr.msrb.gmra.mxu2 %v34_v12 }
 0x104   :  { %v1129_v13 = vld [vmem:[%s9318_s1 + $0x21e0] sm:$0xff]  ;;  %1911 = vmatmul.f32.vlgmr.msrb.gmra.mxu0 %v32_v11 }
 0x105   :  { %v1193_v14 = vld [vmem:[%s9318_s1 + $0x23e0] sm:$0xff]  ;;  %1975 = vmatpush.msra.mxu0 %v1129_v13 }
 0x106   :  { %v1257_v15 = vld [vmem:[%s9318_s1 + $0x25e0] sm:$0xff]  ;;  %1995 = vmatpush.msra.mxu1 %v1193_v14 }
 0x107   :  { %v1005_v16 = vld [vmem:[%s9318_s1 + $0x1e00] sm:$0xff]  ;;  %2015 = vmatpush.msra.mxu2 %v1257_v15 }
 0x108   :  { %v1125_v19 = vld [vmem:[%s9318_s1 + $0x21c0] sm:$0xff]  ;;  %1970 = vmatpush.msrb.mxu3 %v1005_v16  ;;  %v38_v16 = vld [vmem:[%s9319_s0 + $0x90] sm:$0xff] }
 0x109   :  { %v1189_v20 = vld [vmem:[%s9318_s1 + $0x23c0] sm:$0xff]  ;;  %1971 = vmatmul.f32.vlgmr.msrb.gmra.mxu3 %v35_v18  ;;  %1976 = vmatpush.msra.mxu0 %v1125_v19 }
 0x10a   :  { %v1253_v21 = vld [vmem:[%s9318_s1 + $0x25c0] sm:$0xff]  ;;  %1996 = vmatpush.msra.mxu1 %v1189_v20 }
 0x10b   :  { %v1321_v22 = vld [vmem:[%s9318_s1 + $0x27e0] sm:$0xff]  ;;  %2016 = vmatpush.msra.mxu2 %v1253_v21  ;;  %v37_v21 = vld [vmem:[%s9319_s0 + $0x88] sm:$0xff] }
 0x10c   :  { %v1121_v23 = vld [vmem:[%s9318_s1 + $0x21a0] sm:$0xff]  ;;  %2035 = vmatpush.msra.mxu3 %v1321_v22  ;;  %v39_v22 = vld [vmem:[%s9319_s0 + $0x98] sm:$0xff] }
 0x10d   :  { %v1185_v24 = vld [vmem:[%s9318_s1 + $0x23a0] sm:$0xff]  ;;  %1977 = vmatpush.msra.mxu0 %v1121_v23 }
 0x10e   :  { %v1249_v25 = vld [vmem:[%s9318_s1 + $0x25a0] sm:$0xff]  ;;  %1997 = vmatpush.msra.mxu1 %v1185_v24 }
 0x10f   :  { %v1317_v26 = vld [vmem:[%s9318_s1 + $0x27c0] sm:$0xff]  ;;  %2017 = vmatpush.msra.mxu2 %v1249_v25 }
 0x110   :  { %v1117_v27 = vld [vmem:[%s9318_s1 + $0x2180] sm:$0xff]  ;;  %2036 = vmatpush.msra.mxu3 %v1317_v26 }
 0x111   :  { %v1181_v28 = vld [vmem:[%s9318_s1 + $0x2380] sm:$0xff]  ;;  %1978 = vmatpush.msra.mxu0 %v1117_v27 }
 0x112   :  { %v1245_v29 = vld [vmem:[%s9318_s1 + $0x2580] sm:$0xff]  ;;  %1998 = vmatpush.msra.mxu1 %v1181_v28 }
 0x113   :  { %v1313_v30 = vld [vmem:[%s9318_s1 + $0x27a0] sm:$0xff]  ;;  %2018 = vmatpush.msra.mxu2 %v1245_v29 }
 0x114   :  { %v1113_v31 = vld [vmem:[%s9318_s1 + $0x2160] sm:$0xff]  ;;  %2037 = vmatpush.msra.mxu3 %v1313_v30 }
 0x115   :  { %v1177_v32 = vld [vmem:[%s9318_s1 + $0x2360] sm:$0xff]  ;;  %1979 = vmatpush.msra.mxu0 %v1113_v31 }
 0x116   :  { %v1241_v33 = vld [vmem:[%s9318_s1 + $0x2560] sm:$0xff]  ;;  %1999 = vmatpush.msra.mxu1 %v1177_v32 }
 0x117   :  { %v1309_v34 = vld [vmem:[%s9318_s1 + $0x2780] sm:$0xff]  ;;  %2019 = vmatpush.msra.mxu2 %v1241_v33 }
 0x118   :  { %v1109_v35 = vld [vmem:[%s9318_s1 + $0x2140] sm:$0xff]  ;;  %2038 = vmatpush.msra.mxu3 %v1309_v34 }
 0x119   :  { %v1173_v36 = vld [vmem:[%s9318_s1 + $0x2340] sm:$0xff]  ;;  %1980 = vmatpush.msra.mxu0 %v1109_v35 }
 0x11a   :  { %v1237_v37 = vld [vmem:[%s9318_s1 + $0x2540] sm:$0xff]  ;;  %2000 = vmatpush.msra.mxu1 %v1173_v36 }
 0x11b   :  { %v1305_v38 = vld [vmem:[%s9318_s1 + $0x2760] sm:$0xff]  ;;  %2020 = vmatpush.msra.mxu2 %v1237_v37 }
 0x11c   :  { %v1105_v39 = vld [vmem:[%s9318_s1 + $0x2120] sm:$0xff]  ;;  %2039 = vmatpush.msra.mxu3 %v1305_v38 }
 0x11d   :  { %v1169_v40 = vld [vmem:[%s9318_s1 + $0x2320] sm:$0xff]  ;;  %1981 = vmatpush.msra.mxu0 %v1105_v39 }
 0x11e   :  { %v1233_v41 = vld [vmem:[%s9318_s1 + $0x2520] sm:$0xff]  ;;  %2001 = vmatpush.msra.mxu1 %v1169_v40 }
 0x11f   :  { %v1301_v42 = vld [vmem:[%s9318_s1 + $0x2740] sm:$0xff]  ;;  %2021 = vmatpush.msra.mxu2 %v1233_v41 }
 0x120   :  { %v1101_v43 = vld [vmem:[%s9318_s1 + $0x2100] sm:$0xff]  ;;  %2040 = vmatpush.msra.mxu3 %v1301_v42 }
 0x121   :  { %v1165_v44 = vld [vmem:[%s9318_s1 + $0x2300] sm:$0xff]  ;;  %1982 = vmatpush.msra.mxu0 %v1101_v43 }
 0x122   :  { %v1229_v45 = vld [vmem:[%s9318_s1 + $0x2500] sm:$0xff]  ;;  %2002 = vmatpush.msra.mxu1 %v1165_v44 }
 0x123   :  { %v1297_v46 = vld [vmem:[%s9318_s1 + $0x2720] sm:$0xff]  ;;  %2022 = vmatpush.msra.mxu2 %v1229_v45 }
 0x124   :  { %v1097_v47 = vld [vmem:[%s9318_s1 + $0x20e0] sm:$0xff]  ;;  %2041 = vmatpush.msra.mxu3 %v1297_v46 }
 0x125   :  { %v1161_v48 = vld [vmem:[%s9318_s1 + $0x22e0] sm:$0xff]  ;;  %1983 = vmatpush.msra.mxu0 %v1097_v47 }
 0x126   :  { %v1225_v49 = vld [vmem:[%s9318_s1 + $0x24e0] sm:$0xff]  ;;  %2003 = vmatpush.msra.mxu1 %v1161_v48 }
 0x127   :  { %v1293_v50 = vld [vmem:[%s9318_s1 + $0x2700] sm:$0xff]  ;;  %2023 = vmatpush.msra.mxu2 %v1225_v49 }
 0x128   :  { %v1093_v51 = vld [vmem:[%s9318_s1 + $0x20c0] sm:$0xff]  ;;  %2042 = vmatpush.msra.mxu3 %v1293_v50 }
 0x129   :  { %v1157_v52 = vld [vmem:[%s9318_s1 + $0x22c0] sm:$0xff]  ;;  %1984 = vmatpush.msra.mxu0 %v1093_v51 }
 0x12a   :  { %v1221_v53 = vld [vmem:[%s9318_s1 + $0x24c0] sm:$0xff]  ;;  %2004 = vmatpush.msra.mxu1 %v1157_v52 }
 0x12b   :  { %v1289_v54 = vld [vmem:[%s9318_s1 + $0x26e0] sm:$0xff]  ;;  %2024 = vmatpush.msra.mxu2 %v1221_v53 }
 0x12c   :  { %v1089_v55 = vld [vmem:[%s9318_s1 + $0x20a0] sm:$0xff]  ;;  %2043 = vmatpush.msra.mxu3 %v1289_v54 }
 0x12d   :  { %v1153_v56 = vld [vmem:[%s9318_s1 + $0x22a0] sm:$0xff]  ;;  %1985 = vmatpush.msra.mxu0 %v1089_v55 }
 0x12e   :  { %v1217_v57 = vld [vmem:[%s9318_s1 + $0x24a0] sm:$0xff]  ;;  %2005 = vmatpush.msra.mxu1 %v1153_v56 }
 0x12f   :  { %v1285_v58 = vld [vmem:[%s9318_s1 + $0x26c0] sm:$0xff]  ;;  %2025 = vmatpush.msra.mxu2 %v1217_v57 }
 0x130   :  { %v1085_v59 = vld [vmem:[%s9318_s1 + $0x2080] sm:$0xff]  ;;  %2044 = vmatpush.msra.mxu3 %v1285_v58 }
 0x131   :  { %v1149_v60 = vld [vmem:[%s9318_s1 + $0x2280] sm:$0xff]  ;;  %1986 = vmatpush.msra.mxu0 %v1085_v59 }
 0x132   :  { %v1213_v61 = vld [vmem:[%s9318_s1 + $0x2480] sm:$0xff]  ;;  %2006 = vmatpush.msra.mxu1 %v1149_v60 }
 0x133   :  { %v1281_v62 = vld [vmem:[%s9318_s1 + $0x26a0] sm:$0xff]  ;;  %2026 = vmatpush.msra.mxu2 %v1213_v61 }
 0x134   :  { %v1081_v63 = vld [vmem:[%s9318_s1 + $0x2060] sm:$0xff]  ;;  %2045 = vmatpush.msra.mxu3 %v1281_v62 }
 0x135   :  { %v1145_v0 = vld [vmem:[%s9318_s1 + $0x2260] sm:$0xff]  ;;  %1987 = vmatpush.msra.mxu0 %v1081_v63 }
 0x136   :  { %v1209_v1 = vld [vmem:[%s9318_s1 + $0x2460] sm:$0xff]  ;;  %2007 = vmatpush.msra.mxu1 %v1145_v0 }
 0x137   :  { %v1277_v2 = vld [vmem:[%s9318_s1 + $0x2680] sm:$0xff]  ;;  %2027 = vmatpush.msra.mxu2 %v1209_v1 }
 0x138   :  { %v1077_v3 = vld [vmem:[%s9318_s1 + $0x2040] sm:$0xff]  ;;  %2046 = vmatpush.msra.mxu3 %v1277_v2 }
 0x139   :  { %v1141_v4 = vld [vmem:[%s9318_s1 + $0x2240] sm:$0xff]  ;;  %1988 = vmatpush.msra.mxu0 %v1077_v3 }
 0x13a   :  { %v1205_v5 = vld [vmem:[%s9318_s1 + $0x2440] sm:$0xff]  ;;  %2008 = vmatpush.msra.mxu1 %v1141_v4 }
 0x13b   :  { %v1273_v6 = vld [vmem:[%s9318_s1 + $0x2660] sm:$0xff]  ;;  %2028 = vmatpush.msra.mxu2 %v1205_v5 }
 0x13c   :  { %v1073_v7 = vld [vmem:[%s9318_s1 + $0x2020] sm:$0xff]  ;;  %2047 = vmatpush.msra.mxu3 %v1273_v6 }
 0x13d   :  { %v1137_v8 = vld [vmem:[%s9318_s1 + $0x2220] sm:$0xff]  ;;  %1989 = vmatpush.msra.mxu0 %v1073_v7 }
 0x13e   :  { %v1201_v9 = vld [vmem:[%s9318_s1 + $0x2420] sm:$0xff]  ;;  %2009 = vmatpush.msra.mxu1 %v1137_v8 }
 0x13f   :  { %v1269_v10 = vld [vmem:[%s9318_s1 + $0x2640] sm:$0xff]  ;;  %2029 = vmatpush.msra.mxu2 %v1201_v9 }
 0x140   :  { %v1069_v11 = vld [vmem:[%s9318_s1 + $0x2000] sm:$0xff]  ;;  %2048 = vmatpush.msra.mxu3 %v1269_v10 }
 0x141   :  { %v1133_v12 = vld [vmem:[%s9318_s1 + $0x2200] sm:$0xff]  ;;  %1990 = vmatpush.msra.mxu0 %v1069_v11  ;;  %v1672_v11 = vpop.f32.mrf.mxu0 }
 0x142   :  { %v1197_v13 = vld [vmem:[%s9318_s1 + $0x2400] sm:$0xff]  ;;  %2010 = vmatpush.msra.mxu1 %v1133_v12 }
 0x143   :  { %v1265_v14 = vld [vmem:[%s9318_s1 + $0x2620] sm:$0xff]  ;;  %2030 = vmatpush.msra.mxu2 %v1197_v13  ;;  %2011 = vmatmul.f32.vlgmr.msra.gmra.mxu1 %v37_v21  ;;  %v1692_v21 = vpop.f32.mrf.mxu1 }
 0x144   :  { %v36_v15 = vld [vmem:[%s9319_s0 + $0x80] sm:$0xff]  ;;  %2049 = vmatpush.msra.mxu3 %v1265_v14  ;;  %2031 = vmatmul.f32.vlgmr.msra.gmra.mxu2 %v38_v16 }
 0x145   :  { %v1385_v17 = vld [vmem:[%s9318_s1 + $0x29e0] sm:$0xff]  ;;  %1991 = vmatmul.f32.vlgmr.msra.gmra.mxu0 %v36_v15 }
 0x146   :  { %v1449_v18 = vld [vmem:[%s9318_s1 + $0x2be0] sm:$0xff]  ;;  %2055 = vmatpush.msrb.mxu0 %v1385_v17 }
 0x147   :  { %v1513_v19 = vld [vmem:[%s9318_s1 + $0x2de0] sm:$0xff]  ;;  %2075 = vmatpush.msrb.mxu1 %v1449_v18 }
 0x148   :  { %v1261_v20 = vld [vmem:[%s9318_s1 + $0x2600] sm:$0xff]  ;;  %2095 = vmatpush.msrb.mxu2 %v1513_v19 }
 0x149   :  { %v1381_v23 = vld [vmem:[%s9318_s1 + $0x29c0] sm:$0xff]  ;;  %2050 = vmatpush.msra.mxu3 %v1261_v20 }
 0x14a   :  { %v1445_v24 = vld [vmem:[%s9318_s1 + $0x2bc0] sm:$0xff]  ;;  %2051 = vmatmul.f32.vlgmr.msra.gmra.mxu3 %v39_v22  ;;  %2056 = vmatpush.msrb.mxu0 %v1381_v23 }
 0x14b   :  { %v1509_v25 = vld [vmem:[%s9318_s1 + $0x2dc0] sm:$0xff]  ;;  %2076 = vmatpush.msrb.mxu1 %v1445_v24 }
 0x14c   :  { %v1577_v26 = vld [vmem:[%s9318_s1 + $0x2fe0] sm:$0xff]  ;;  %2096 = vmatpush.msrb.mxu2 %v1509_v25  ;;  %v42_v25 = vld [vmem:[%s9319_s0 + $0xb0] sm:$0xff] }
 0x14d   :  { %v1377_v27 = vld [vmem:[%s9318_s1 + $0x29a0] sm:$0xff]  ;;  %2115 = vmatpush.msrb.mxu3 %v1577_v26 }
 0x14e   :  { %v1441_v28 = vld [vmem:[%s9318_s1 + $0x2ba0] sm:$0xff]  ;;  %2057 = vmatpush.msrb.mxu0 %v1377_v27  ;;  %v106_v27 = vld [vmem:[%s9318_s1 + $0x1e8] sm:$0xff] }
 0x14f   :  { %v1505_v29 = vld [vmem:[%s9318_s1 + $0x2da0] sm:$0xff]  ;;  %2077 = vmatpush.msrb.mxu1 %v1441_v28 }
 0x150   :  { %v1573_v30 = vld [vmem:[%s9318_s1 + $0x2fc0] sm:$0xff]  ;;  %2097 = vmatpush.msrb.mxu2 %v1505_v29  ;;  %v170_v29 = vld [vmem:[%s9318_s1 + $0x3e8] sm:$0xff] }
 0x151   :  { %v1373_v31 = vld [vmem:[%s9318_s1 + $0x2980] sm:$0xff]  ;;  %2116 = vmatpush.msrb.mxu3 %v1573_v30 }
 0x152   :  { %v1437_v32 = vld [vmem:[%s9318_s1 + $0x2b80] sm:$0xff]  ;;  %2058 = vmatpush.msrb.mxu0 %v1373_v31  ;;  %v1712_v31 = vpop.f32.mrf.mxu2 }
 0x153   :  { %v1501_v33 = vld [vmem:[%s9318_s1 + $0x2d80] sm:$0xff]  ;;  %2078 = vmatpush.msrb.mxu1 %v1437_v32  ;;  %v41_v32 = vld [vmem:[%s9319_s0 + $0xa8] sm:$0xff] }
 0x154   :  { %v1569_v34 = vld [vmem:[%s9318_s1 + $0x2fa0] sm:$0xff]  ;;  %2098 = vmatpush.msrb.mxu2 %v1501_v33  ;;  %v43_v33 = vld [vmem:[%s9319_s0 + $0xb8] sm:$0xff] }
 0x155   :  { %v1369_v35 = vld [vmem:[%s9318_s1 + $0x2960] sm:$0xff]  ;;  %2117 = vmatpush.msrb.mxu3 %v1569_v34 }
 0x156   :  { %v1433_v36 = vld [vmem:[%s9318_s1 + $0x2b60] sm:$0xff]  ;;  %2059 = vmatpush.msrb.mxu0 %v1369_v35  ;;  %v102_v35 = vld [vmem:[%s9318_s1 + $0x1c8] sm:$0xff] }
 0x157   :  { %v1497_v37 = vld [vmem:[%s9318_s1 + $0x2d60] sm:$0xff]  ;;  %2079 = vmatpush.msrb.mxu1 %v1433_v36  ;;  %v166_v36 = vld [vmem:[%s9318_s1 + $0x3c8] sm:$0xff] }
 0x158   :  { %v1565_v38 = vld [vmem:[%s9318_s1 + $0x2f80] sm:$0xff]  ;;  %2099 = vmatpush.msrb.mxu2 %v1497_v37  ;;  %v234_v37 = vld [vmem:[%s9318_s1 + $0x5e8] sm:$0xff] }
 0x159   :  { %v1365_v39 = vld [vmem:[%s9318_s1 + $0x2940] sm:$0xff]  ;;  %2118 = vmatpush.msrb.mxu3 %v1565_v38 }
 0x15a   :  { %v1429_v40 = vld [vmem:[%s9318_s1 + $0x2b40] sm:$0xff]  ;;  %2060 = vmatpush.msrb.mxu0 %v1365_v39 }
 0x15b   :  { %v1493_v41 = vld [vmem:[%s9318_s1 + $0x2d40] sm:$0xff]  ;;  %2080 = vmatpush.msrb.mxu1 %v1429_v40  ;;  %v98_v40 = vld [vmem:[%s9318_s1 + $0x1a8] sm:$0xff] }
 0x15c   :  { %v1561_v42 = vld [vmem:[%s9318_s1 + $0x2f60] sm:$0xff]  ;;  %2100 = vmatpush.msrb.mxu2 %v1493_v41  ;;  %v1732_v41 = vpop.f32.mrf.mxu3 }
 0x15d   :  { %v1361_v43 = vld [vmem:[%s9318_s1 + $0x2920] sm:$0xff]  ;;  %2119 = vmatpush.msrb.mxu3 %v1561_v42  ;;  %v162_v42 = vld [vmem:[%s9318_s1 + $0x3a8] sm:$0xff] }
 0x15e   :  { %v1425_v44 = vld [vmem:[%s9318_s1 + $0x2b20] sm:$0xff]  ;;  %2061 = vmatpush.msrb.mxu0 %v1361_v43  ;;  %v230_v43 = vld [vmem:[%s9318_s1 + $0x5c8] sm:$0xff] }
 0x15f   :  { %v1489_v45 = vld [vmem:[%s9318_s1 + $0x2d20] sm:$0xff]  ;;  %2081 = vmatpush.msrb.mxu1 %v1425_v44 }
 0x160   :  { %v1557_v46 = vld [vmem:[%s9318_s1 + $0x2f40] sm:$0xff]  ;;  %2101 = vmatpush.msrb.mxu2 %v1489_v45  ;;  %v94_v45 = vld [vmem:[%s9318_s1 + $0x188] sm:$0xff] }
 0x161   :  { %v1357_v47 = vld [vmem:[%s9318_s1 + $0x2900] sm:$0xff]  ;;  %2120 = vmatpush.msrb.mxu3 %v1557_v46  ;;  %v158_v46 = vld [vmem:[%s9318_s1 + $0x388] sm:$0xff] }
 0x162   :  { %v1421_v48 = vld [vmem:[%s9318_s1 + $0x2b00] sm:$0xff]  ;;  %2062 = vmatpush.msrb.mxu0 %v1357_v47  ;;  %v226_v47 = vld [vmem:[%s9318_s1 + $0x5a8] sm:$0xff] }
 0x163   :  { %v1485_v49 = vld [vmem:[%s9318_s1 + $0x2d00] sm:$0xff]  ;;  %2082 = vmatpush.msrb.mxu1 %v1421_v48 }
 0x164   :  { %v1553_v50 = vld [vmem:[%s9318_s1 + $0x2f20] sm:$0xff]  ;;  %2102 = vmatpush.msrb.mxu2 %v1485_v49 }
 0x165   :  { %v1353_v51 = vld [vmem:[%s9318_s1 + $0x28e0] sm:$0xff]  ;;  %2121 = vmatpush.msrb.mxu3 %v1553_v50  ;;  %v90_v50 = vld [vmem:[%s9318_s1 + $0x168] sm:$0xff] }
 0x166   :  { %v1417_v52 = vld [vmem:[%s9318_s1 + $0x2ae0] sm:$0xff]  ;;  %2063 = vmatpush.msrb.mxu0 %v1353_v51  ;;  %v1752_v51 = vpop.f32.mrf.mxu0 }
 0x167   :  { %v1481_v53 = vld [vmem:[%s9318_s1 + $0x2ce0] sm:$0xff]  ;;  %2083 = vmatpush.msrb.mxu1 %v1417_v52  ;;  %v154_v52 = vld [vmem:[%s9318_s1 + $0x368] sm:$0xff] }
 0x168   :  { %v1549_v54 = vld [vmem:[%s9318_s1 + $0x2f00] sm:$0xff]  ;;  %2103 = vmatpush.msrb.mxu2 %v1481_v53  ;;  %v222_v53 = vld [vmem:[%s9318_s1 + $0x588] sm:$0xff] }
 0x169   :  { %v1349_v55 = vld [vmem:[%s9318_s1 + $0x28c0] sm:$0xff]  ;;  %2122 = vmatpush.msrb.mxu3 %v1549_v54 }
 0x16a   :  { %v1413_v56 = vld [vmem:[%s9318_s1 + $0x2ac0] sm:$0xff]  ;;  %2064 = vmatpush.msrb.mxu0 %v1349_v55  ;;  %v86_v55 = vld [vmem:[%s9318_s1 + $0x148] sm:$0xff] }
 0x16b   :  { %v1477_v57 = vld [vmem:[%s9318_s1 + $0x2cc0] sm:$0xff]  ;;  %2084 = vmatpush.msrb.mxu1 %v1413_v56  ;;  %v150_v56 = vld [vmem:[%s9318_s1 + $0x348] sm:$0xff] }
 0x16c   :  { %v1545_v58 = vld [vmem:[%s9318_s1 + $0x2ee0] sm:$0xff]  ;;  %2104 = vmatpush.msrb.mxu2 %v1477_v57  ;;  %v218_v57 = vld [vmem:[%s9318_s1 + $0x568] sm:$0xff] }
 0x16d   :  { %v1345_v59 = vld [vmem:[%s9318_s1 + $0x28a0] sm:$0xff]  ;;  %2123 = vmatpush.msrb.mxu3 %v1545_v58 }
 0x16e   :  { %v1409_v60 = vld [vmem:[%s9318_s1 + $0x2aa0] sm:$0xff]  ;;  %2065 = vmatpush.msrb.mxu0 %v1345_v59 }
 0x16f   :  { %v1473_v61 = vld [vmem:[%s9318_s1 + $0x2ca0] sm:$0xff]  ;;  %2085 = vmatpush.msrb.mxu1 %v1409_v60  ;;  %v82_v60 = vld [vmem:[%s9318_s1 + $0x128] sm:$0xff] }
 0x170   :  { %v1541_v62 = vld [vmem:[%s9318_s1 + $0x2ec0] sm:$0xff]  ;;  %2105 = vmatpush.msrb.mxu2 %v1473_v61  ;;  %v1772_v61 = vpop.f32.mrf.mxu1 }
 0x171   :  { %v1341_v63 = vld [vmem:[%s9318_s1 + $0x2880] sm:$0xff]  ;;  %2124 = vmatpush.msrb.mxu3 %v1541_v62  ;;  %v146_v62 = vld [vmem:[%s9318_s1 + $0x328] sm:$0xff] }
 0x172   :  { %v1405_v0 = vld [vmem:[%s9318_s1 + $0x2a80] sm:$0xff]  ;;  %2066 = vmatpush.msrb.mxu0 %v1341_v63  ;;  %v214_v63 = vld [vmem:[%s9318_s1 + $0x548] sm:$0xff] }
 0x173   :  { %v1645_v1 = vld [vmem:[%s9320_s2] sm:$0xf]  ;;  %2086 = vmatpush.msrb.mxu1 %v1405_v0 }
 0x174   :  { %v1469_v2 = vld [vmem:[%s9318_s1 + $0x2c80] sm:$0xff]  ;;  %v1647_v8 = vperm.slane %v1645_v1, 0  ;;  %v78_v1 = vld [vmem:[%s9318_s1 + $0x108] sm:$0xff] }
 0x175   :  { %v1537_v3 = vld [vmem:[%s9318_s1 + $0x2ea0] sm:$0xff]  ;;  %2106 = vmatpush.msrb.mxu2 %v1469_v2 }
 0x176   :  { %v1337_v4 = vld [vmem:[%s9318_s1 + $0x2860] sm:$0xff]  ;;  %2125 = vmatpush.msrb.mxu3 %v1537_v3  ;;  %v1673_v18 = vadd.f32 %v1672_v11, %v1647_v8  ;;  %v142_v3 = vld [vmem:[%s9318_s1 + $0x308] sm:$0xff] }
 0x177   :  { %v1401_v5 = vld [vmem:[%s9318_s1 + $0x2a60] sm:$0xff]  ;;  %2067 = vmatpush.msrb.mxu0 %v1337_v4  ;;  %v210_v4 = vld [vmem:[%s9318_s1 + $0x528] sm:$0xff] }
 0x178   :  { %v1465_v6 = vld [vmem:[%s9318_s1 + $0x2c60] sm:$0xff]  ;;  %2087 = vmatpush.msrb.mxu1 %v1401_v5  ;;  %v1693_v28 = vadd.f32 %v1692_v21, %v1673_v18  ;;  %v1792_v5 = vpop.f32.mrf.mxu2  ;;  %v138_v8 = vld [vmem:[%s9318_s1 + $0x2e8] sm:$0xff] }
 0x179   :  { %v1533_v7 = vld [vmem:[%s9318_s1 + $0x2e80] sm:$0xff]  ;;  %2107 = vmatpush.msrb.mxu2 %v1465_v6  ;;  %v70_v11 = vld [vmem:[%s9318_s1 + $0xc8] sm:$0xff] }
 0x17a   :  { %v1333_v9 = vld [vmem:[%s9318_s1 + $0x2840] sm:$0xff]  ;;  %2126 = vmatpush.msrb.mxu3 %v1533_v7  ;;  %v1713_v38 = vadd.f32 %v1712_v31, %v1693_v28  ;;  %v74_v7 = vld [vmem:[%s9318_s1 + $0xe8] sm:$0xff] }
 0x17b   :  { %v1397_v10 = vld [vmem:[%s9318_s1 + $0x2a40] sm:$0xff]  ;;  %2068 = vmatpush.msrb.mxu0 %v1333_v9  ;;  %v206_v9 = vld [vmem:[%s9318_s1 + $0x508] sm:$0xff] }
 0x17c   :  { %v1461_v12 = vld [vmem:[%s9318_s1 + $0x2c40] sm:$0xff]  ;;  %2088 = vmatpush.msrb.mxu1 %v1397_v10  ;;  %v1733_v48 = vadd.f32 %v1732_v41, %v1713_v38  ;;  %v130_v18 = vld [vmem:[%s9318_s1 + $0x2a8] sm:$0xff] }
 0x17d   :  { %v1529_v13 = vld [vmem:[%s9318_s1 + $0x2e60] sm:$0xff]  ;;  %2108 = vmatpush.msrb.mxu2 %v1461_v12  ;;  %v62_v21 = vld [vmem:[%s9318_s1 + $0x88] sm:$0xff] }
 0x17e   :  { %v1329_v14 = vld [vmem:[%s9318_s1 + $0x2820] sm:$0xff]  ;;  %2127 = vmatpush.msrb.mxu3 %v1529_v13  ;;  %v1753_v58 = vadd.f32 %v1752_v51, %v1733_v48  ;;  %v134_v13 = vld [vmem:[%s9318_s1 + $0x2c8] sm:$0xff] }
 0x17f   :  { %v1393_v15 = vld [vmem:[%s9318_s1 + $0x2a20] sm:$0xff]  ;;  %2069 = vmatpush.msrb.mxu0 %v1329_v14  ;;  %v202_v14 = vld [vmem:[%s9318_s1 + $0x4e8] sm:$0xff] }
 0x180   :  { %v1457_v16 = vld [vmem:[%s9318_s1 + $0x2c20] sm:$0xff]  ;;  %2089 = vmatpush.msrb.mxu1 %v1393_v15  ;;  %v1773_v2 = vadd.f32 %v1772_v61, %v1753_v58  ;;  %v1812_v15 = vpop.f32.mrf.mxu3  ;;  %v122_v28 = vld [vmem:[%s9318_s1 + $0x268] sm:$0xff] }
 0x181   :  { %v1525_v17 = vld [vmem:[%s9318_s1 + $0x2e40] sm:$0xff]  ;;  %2109 = vmatpush.msrb.mxu2 %v1457_v16  ;;  %v362_v48 = vld [vmem:[%s9318_s1 + $0x9e8] sm:$0xff] }
 0x182   :  { %v1325_v19 = vld [vmem:[%s9318_s1 + $0x2800] sm:$0xff]  ;;  %2128 = vmatpush.msrb.mxu3 %v1525_v17  ;;  %v1793_v12 = vadd.f32 %v1792_v5, %v1773_v2  ;;  %v66_v17 = vld [vmem:[%s9318_s1 + $0xa8] sm:$0xff] }
 0x183   :  { %v1389_v20 = vld [vmem:[%s9318_s1 + $0x2a00] sm:$0xff]  ;;  %2070 = vmatpush.msrb.mxu0 %v1325_v19  ;;  %v198_v19 = vld [vmem:[%s9318_s1 + $0x4c8] sm:$0xff] }
 0x184   :  { %v1453_v22 = vld [vmem:[%s9318_s1 + $0x2c00] sm:$0xff]  ;;  %2090 = vmatpush.msrb.mxu1 %v1389_v20  ;;  %v354_v58 = vld [vmem:[%s9318_s1 + $0x9a8] sm:$0xff] }
 0x185   :  { %v1521_v23 = vld [vmem:[%s9318_s1 + $0x2e20] sm:$0xff]  ;;  %2110 = vmatpush.msrb.mxu2 %v1453_v22  ;;  %2091 = vmatmul.f32.vlgmr.msrb.gmra.mxu1 %v41_v32  ;;  %v1813_v22 = vadd.f32 %v1812_v15, %v1793_v12  ;;  %v54_v32 = vld [vmem:[%s9318_s1 + $0x48] sm:$0xff] }
 0x186   :  { %v40_v24 = vld [vmem:[%s9319_s0 + $0xa0] sm:$0xff]  ;;  %2129 = vmatpush.msrb.mxu3 %v1521_v23  ;;  %2111 = vmatmul.f32.vlgmr.msrb.gmra.mxu2 %v42_v25  ;;  %v126_v23 = vld [vmem:[%s9318_s1 + $0x288] sm:$0xff] }
 0x187   :  { %v1641_v26 = vld [vmem:[%s9318_s1 + $0x31e0] sm:$0xff]  ;;  %2071 = vmatmul.f32.vlgmr.msrb.gmra.mxu0 %v40_v24  ;;  %2155 = vmatpush.msra.mxu1 %v106_v27  ;;  %v194_v24 = vld [vmem:[%s9318_s1 + $0x4a8] sm:$0xff]  ;;  %v1832_v27 = vpop.f32.mrf.mxu0 }
 0x188   :  { %v1517_v30 = vld [vmem:[%s9318_s1 + $0x2e00] sm:$0xff]  ;;  %2135 = vmatpush.msra.mxu0 %v1641_v26  ;;  %2175 = vmatpush.msra.mxu2 %v170_v29  ;;  %v58_v26 = vld [vmem:[%s9318_s1 + $0x68] sm:$0xff]  ;;  %v1892_v51 = vpop.f32.mrf.mxu3 }
 0x189   :  { %v1637_v34 = vld [vmem:[%s9318_s1 + $0x31c0] sm:$0xff]  ;;  %2130 = vmatpush.msrb.mxu3 %v1517_v30  ;;  %2156 = vmatpush.msra.mxu1 %v102_v35  ;;  %v190_v29 = vld [vmem:[%s9318_s1 + $0x488] sm:$0xff]  ;;  %v1833_v30 = vadd.f32 %v1832_v27, %v1813_v22  ;;  %v1852_v35 = vpop.f32.mrf.mxu1 }
 0x18a   :  { %2131 = vmatmul.f32.vlgmr.msrb.gmra.mxu3 %v43_v33  ;;  %v1633_v39 = vld [vmem:[%s9318_s1 + $0x31a0] sm:$0xff]  ;;  %2136 = vmatpush.msra.mxu0 %v1637_v34  ;;  %v118_v33 = vld [vmem:[%s9318_s1 + $0x248] sm:$0xff] }
 0x18b   :  { %2176 = vmatpush.msra.mxu2 %v166_v36  ;;  %2195 = vmatpush.msra.mxu3 %v234_v37  ;;  %v1629_v44 = vld [vmem:[%s9318_s1 + $0x3180] sm:$0xff]  ;;  %v186_v34 = vld [vmem:[%s9318_s1 + $0x468] sm:$0xff]  ;;  %v1853_v38 = vadd.f32 %v1852_v35, %v1833_v30 }
 0x18c   :  { %2137 = vmatpush.msra.mxu0 %v1633_v39  ;;  %2157 = vmatpush.msra.mxu1 %v98_v40  ;;  %v1625_v49 = vld [vmem:[%s9318_s1 + $0x3160] sm:$0xff]  ;;  %v50_v37 = vld [vmem:[%s9318_s1 + $0x28] sm:$0xff] }
 0x18d   :  { %2177 = vmatpush.msra.mxu2 %v162_v42  ;;  %2196 = vmatpush.msra.mxu3 %v230_v43  ;;  %v1621_v54 = vld [vmem:[%s9318_s1 + $0x3140] sm:$0xff]  ;;  %v114_v39 = vld [vmem:[%s9318_s1 + $0x228] sm:$0xff]  ;;  %v1872_v43 = vpop.f32.mrf.mxu2 }
 0x18e   :  { %2138 = vmatpush.msra.mxu0 %v1629_v44  ;;  %2158 = vmatpush.msra.mxu1 %v94_v45  ;;  %v1617_v59 = vld [vmem:[%s9318_s1 + $0x3120] sm:$0xff]  ;;  %v182_v40 = vld [vmem:[%s9318_s1 + $0x448] sm:$0xff] }
 0x18f   :  { %2178 = vmatpush.msra.mxu2 %v158_v46  ;;  %2197 = vmatpush.msra.mxu3 %v226_v47  ;;  %v1613_v0 = vld [vmem:[%s9318_s1 + $0x3100] sm:$0xff]  ;;  %v46_v42 = vld [vmem:[%s9318_s1 + $0x8] sm:$0xff]  ;;  %v1873_v46 = vadd.f32 %v1872_v43, %v1853_v38 }
 0x190   :  { %2139 = vmatpush.msra.mxu0 %v1625_v49  ;;  %2159 = vmatpush.msra.mxu1 %v90_v50  ;;  %v1609_v6 = vld [vmem:[%s9318_s1 + $0x30e0] sm:$0xff]  ;;  %v110_v44 = vld [vmem:[%s9318_s1 + $0x208] sm:$0xff] }
 0x191   :  { %2179 = vmatpush.msra.mxu2 %v154_v52  ;;  %2198 = vmatpush.msra.mxu3 %v222_v53  ;;  %v1605_v10 = vld [vmem:[%s9318_s1 + $0x30c0] sm:$0xff]  ;;  %v178_v45 = vld [vmem:[%s9318_s1 + $0x428] sm:$0xff] }
 0x192   :  { %2140 = vmatpush.msra.mxu0 %v1621_v54  ;;  %2160 = vmatpush.msra.mxu1 %v86_v55  ;;  %v1601_v16 = vld [vmem:[%s9318_s1 + $0x30a0] sm:$0xff]  ;;  %v298_v49 = vld [vmem:[%s9318_s1 + $0x7e8] sm:$0xff]  ;;  %v5353_v54 = vadd.f32 %v1892_v51, %v1873_v46 }
 0x193   :  { %2180 = vmatpush.msra.mxu2 %v150_v56  ;;  %2199 = vmatpush.msra.mxu3 %v218_v57  ;;  %v1597_v20 = vld [vmem:[%s9318_s1 + $0x3080] sm:$0xff]  ;;  %v426_v50 = vld [vmem:[%s9318_s1 + $0xbe8] sm:$0xff] }
 0x194   :  { %2141 = vmatpush.msra.mxu0 %v1617_v59  ;;  %2161 = vmatpush.msra.mxu1 %v82_v60  ;;  %v1593_v25 = vld [vmem:[%s9318_s1 + $0x3060] sm:$0xff]  ;;  %v174_v52 = vld [vmem:[%s9318_s1 + $0x408] sm:$0xff] }
 0x195   :  { %2181 = vmatpush.msra.mxu2 %v146_v62  ;;  %2200 = vmatpush.msra.mxu3 %v214_v63  ;;  %v1589_v31 = vld [vmem:[%s9318_s1 + $0x3040] sm:$0xff]  ;;  %v358_v53 = vld [vmem:[%s9318_s1 + $0x9c8] sm:$0xff] }
 0x196   :  { %2142 = vmatpush.msra.mxu0 %v1613_v0  ;;  %2162 = vmatpush.msra.mxu1 %v78_v1  ;;  %v1585_v36 = vld [vmem:[%s9318_s1 + $0x3020] sm:$0xff]  ;;  %v294_v55 = vld [vmem:[%s9318_s1 + $0x7c8] sm:$0xff] }
 0x197   :  { %2182 = vmatpush.msra.mxu2 %v142_v3  ;;  %2201 = vmatpush.msra.mxu3 %v210_v4  ;;  %v1581_v41 = vld [vmem:[%s9318_s1 + $0x3000] sm:$0xff]  ;;  %v422_v56 = vld [vmem:[%s9318_s1 + $0xbc8] sm:$0xff] }
 0x198   :  { %2143 = vmatpush.msra.mxu0 %v1609_v6  ;;  %2163 = vmatpush.msra.mxu1 %v74_v7  ;;  %v44_v47 = vld [vmem:[%s9319_s0 + $0xc0] sm:$0xff]  ;;  %v490_v57 = vld [vmem:[%s9318_s1 + $0xde8] sm:$0xff] }
 0x199   :  { %2183 = vmatpush.msra.mxu2 %v138_v8  ;;  %2202 = vmatpush.msra.mxu3 %v206_v9  ;;  %v290_v59 = vld [vmem:[%s9318_s1 + $0x7a8] sm:$0xff] }
 0x19a   :  { %2144 = vmatpush.msra.mxu0 %v1605_v10  ;;  %2164 = vmatpush.msra.mxu1 %v70_v11  ;;  %v418_v60 = vld [vmem:[%s9318_s1 + $0xba8] sm:$0xff] }
 0x19b   :  { %2184 = vmatpush.msra.mxu2 %v134_v13  ;;  %2203 = vmatpush.msra.mxu3 %v202_v14  ;;  %v486_v61 = vld [vmem:[%s9318_s1 + $0xdc8] sm:$0xff] }
 0x19c   :  { %2145 = vmatpush.msra.mxu0 %v1601_v16  ;;  %2165 = vmatpush.msra.mxu1 %v66_v17  ;;  %v350_v62 = vld [vmem:[%s9318_s1 + $0x988] sm:$0xff] }
 0x19d   :  { %2185 = vmatpush.msra.mxu2 %v130_v18  ;;  %2204 = vmatpush.msra.mxu3 %v198_v19  ;;  %v286_v63 = vld [vmem:[%s9318_s1 + $0x788] sm:$0xff] }
 0x19e   :  { %2146 = vmatpush.msra.mxu0 %v1597_v20  ;;  %2166 = vmatpush.msra.mxu1 %v62_v21  ;;  %v414_v0 = vld [vmem:[%s9318_s1 + $0xb88] sm:$0xff] }
 0x19f   :  { %2186 = vmatpush.msra.mxu2 %v126_v23  ;;  %2205 = vmatpush.msra.mxu3 %v194_v24  ;;  %v482_v1 = vld [vmem:[%s9318_s1 + $0xda8] sm:$0xff] }
 0x1a0   :  { %2147 = vmatpush.msra.mxu0 %v1593_v25  ;;  %2167 = vmatpush.msra.mxu1 %v58_v26  ;;  %v346_v2 = vld [vmem:[%s9318_s1 + $0x968] sm:$0xff] }
 0x1a1   :  { %2187 = vmatpush.msra.mxu2 %v122_v28  ;;  %2206 = vmatpush.msra.mxu3 %v190_v29  ;;  %v282_v3 = vld [vmem:[%s9318_s1 + $0x768] sm:$0xff] }
 0x1a2   :  { %2148 = vmatpush.msra.mxu0 %v1589_v31  ;;  %2168 = vmatpush.msra.mxu1 %v54_v32  ;;  %v410_v4 = vld [vmem:[%s9318_s1 + $0xb68] sm:$0xff] }
 0x1a3   :  { %2188 = vmatpush.msra.mxu2 %v118_v33  ;;  %2207 = vmatpush.msra.mxu3 %v186_v34  ;;  %v478_v5 = vld [vmem:[%s9318_s1 + $0xd88] sm:$0xff] }
 0x1a4   :  { %2149 = vmatpush.msra.mxu0 %v1585_v36  ;;  %2169 = vmatpush.msra.mxu1 %v50_v37  ;;  %v342_v6 = vld [vmem:[%s9318_s1 + $0x948] sm:$0xff] }
 0x1a5   :  { %2189 = vmatpush.msra.mxu2 %v114_v39  ;;  %2208 = vmatpush.msra.mxu3 %v182_v40  ;;  %v278_v7 = vld [vmem:[%s9318_s1 + $0x748] sm:$0xff]  ;;  %v1912_v39 = vpop.f32.mrf.mxu0 }
 0x1a6   :  { %2150 = vmatpush.msra.mxu0 %v1581_v41  ;;  %2170 = vmatpush.msra.mxu1 %v46_v42  ;;  %v406_v8 = vld [vmem:[%s9318_s1 + $0xb48] sm:$0xff]  ;;  %v1913_v42 = vadd.f32 %v1912_v39, %v5353_v54  ;;  %v1952_v54 = vpop.f32.mrf.mxu2 }
 0x1a7   :  { %2190 = vmatpush.msra.mxu2 %v110_v44  ;;  %2209 = vmatpush.msra.mxu3 %v178_v45  ;;  %v474_v9 = vld [vmem:[%s9318_s1 + $0xd68] sm:$0xff] }
 0x1a8   :  { %2151 = vmatmul.f32.vlgmr.msra.gmra.mxu0 %v44_v47  ;;  %2235 = vmatpush.msrb.mxu1 %v362_v48  ;;  %v338_v10 = vld [vmem:[%s9318_s1 + $0x928] sm:$0xff]  ;;  %v1932_v47 = vpop.f32.mrf.mxu1 }
 0x1a9   :  { %2215 = vmatpush.msrb.mxu0 %v298_v49  ;;  %2255 = vmatpush.msrb.mxu2 %v426_v50  ;;  %v274_v11 = vld [vmem:[%s9318_s1 + $0x728] sm:$0xff]  ;;  %v1933_v50 = vadd.f32 %v1932_v47, %v1913_v42 }
 0x1aa   :  { %2210 = vmatpush.msra.mxu3 %v174_v52  ;;  %2236 = vmatpush.msrb.mxu1 %v358_v53  ;;  %v402_v12 = vld [vmem:[%s9318_s1 + $0xb28] sm:$0xff] }
 0x1ab   :  { %2216 = vmatpush.msrb.mxu0 %v294_v55  ;;  %2256 = vmatpush.msrb.mxu2 %v422_v56  ;;  %v470_v13 = vld [vmem:[%s9318_s1 + $0xd48] sm:$0xff]  ;;  %v1953_v56 = vadd.f32 %v1952_v54, %v1933_v50 }
 0x1ac   :  { %2275 = vmatpush.msrb.mxu3 %v490_v57  ;;  %2237 = vmatpush.msrb.mxu1 %v354_v58  ;;  %v334_v14 = vld [vmem:[%s9318_s1 + $0x908] sm:$0xff] }
 0x1ad   :  { %2217 = vmatpush.msrb.mxu0 %v290_v59  ;;  %2257 = vmatpush.msrb.mxu2 %v418_v60  ;;  %v270_v15 = vld [vmem:[%s9318_s1 + $0x708] sm:$0xff]  ;;  %v3813_v59 = vld [vmem:[%s9319_s0] sm:$0xff] }
 0x1ae   :  { %2276 = vmatpush.msrb.mxu3 %v486_v61  ;;  %2238 = vmatpush.msrb.mxu1 %v350_v62  ;;  %v398_v16 = vld [vmem:[%s9318_s1 + $0xb08] sm:$0xff]  ;;  %v1972_v62 = vpop.f32.mrf.mxu3 }
 0x1af   :  { %2218 = vmatpush.msrb.mxu0 %v286_v63  ;;  %2258 = vmatpush.msrb.mxu2 %v414_v0  ;;  %v466_v17 = vld [vmem:[%s9318_s1 + $0xd28] sm:$0xff] }
 0x1b0   :  { %2277 = vmatpush.msrb.mxu3 %v482_v1  ;;  %2239 = vmatpush.msrb.mxu1 %v346_v2  ;;  %v330_v18 = vld [vmem:[%s9318_s1 + $0x8e8] sm:$0xff]  ;;  %v5557_v1 = vadd.f32 %v1972_v62, %v1953_v56 }
 0x1b1   :  { %2219 = vmatpush.msrb.mxu0 %v282_v3  ;;  %2259 = vmatpush.msrb.mxu2 %v410_v4  ;;  %v266_v19 = vld [vmem:[%s9318_s1 + $0x6e8] sm:$0xff] }
 0x1b2   :  { %2278 = vmatpush.msrb.mxu3 %v478_v5  ;;  %2240 = vmatpush.msrb.mxu1 %v342_v6  ;;  %v394_v20 = vld [vmem:[%s9318_s1 + $0xae8] sm:$0xff]  ;;  %v3815_v6 = vld [vmem:[%s9319_s0 + $0x10] sm:$0xff] }
 0x1b3   :  { %2220 = vmatpush.msrb.mxu0 %v278_v7  ;;  %2260 = vmatpush.msrb.mxu2 %v406_v8  ;;  %v462_v21 = vld [vmem:[%s9318_s1 + $0xd08] sm:$0xff] }
 0x1b4   :  { %2279 = vmatpush.msrb.mxu3 %v474_v9  ;;  %2241 = vmatpush.msrb.mxu1 %v338_v10  ;;  %v326_v22 = vld [vmem:[%s9318_s1 + $0x8c8] sm:$0xff] }
 0x1b5   :  { %2221 = vmatpush.msrb.mxu0 %v274_v11  ;;  %2261 = vmatpush.msrb.mxu2 %v402_v12  ;;  %v262_v23 = vld [vmem:[%s9318_s1 + $0x6c8] sm:$0xff] }
 0x1b6   :  { %2280 = vmatpush.msrb.mxu3 %v470_v13  ;;  %2242 = vmatpush.msrb.mxu1 %v334_v14  ;;  %v390_v24 = vld [vmem:[%s9318_s1 + $0xac8] sm:$0xff] }
 0x1b7   :  { %2222 = vmatpush.msrb.mxu0 %v270_v15  ;;  %2262 = vmatpush.msrb.mxu2 %v398_v16  ;;  %v458_v25 = vld [vmem:[%s9318_s1 + $0xce8] sm:$0xff] }
 0x1b8   :  { %2281 = vmatpush.msrb.mxu3 %v466_v17  ;;  %2243 = vmatpush.msrb.mxu1 %v330_v18  ;;  %v322_v26 = vld [vmem:[%s9318_s1 + $0x8a8] sm:$0xff] }
 0x1b9   :  { %2223 = vmatpush.msrb.mxu0 %v266_v19  ;;  %2263 = vmatpush.msrb.mxu2 %v394_v20  ;;  %v258_v27 = vld [vmem:[%s9318_s1 + $0x6a8] sm:$0xff] }
 0x1ba   :  { %2282 = vmatpush.msrb.mxu3 %v462_v21  ;;  %2244 = vmatpush.msrb.mxu1 %v326_v22  ;;  %v386_v28 = vld [vmem:[%s9318_s1 + $0xaa8] sm:$0xff]  ;;  %v3817_v21 = vld [vmem:[%s9319_s0 + $0x18] sm:$0xff] }
 0x1bb   :  { %2224 = vmatpush.msrb.mxu0 %v262_v23  ;;  %2264 = vmatpush.msrb.mxu2 %v390_v24  ;;  %v454_v29 = vld [vmem:[%s9318_s1 + $0xcc8] sm:$0xff]  ;;  %v3818_v23 = vld [vmem:[%s9319_s0 + $0x30] sm:$0xff] }
 0x1bc   :  { %v318_v30 = vld [vmem:[%s9318_s1 + $0x888] sm:$0xff]  ;;  %2283 = vmatpush.msrb.mxu3 %v458_v25  ;;  %2245 = vmatpush.msrb.mxu1 %v322_v26 }
 0x1bd   :  { %v254_v31 = vld [vmem:[%s9318_s1 + $0x688] sm:$0xff]  ;;  %2225 = vmatpush.msrb.mxu0 %v258_v27  ;;  %2265 = vmatpush.msrb.mxu2 %v386_v28  ;;  %v3819_v28 = vld [vmem:[%s9319_s0 + $0x20] sm:$0xff] }
 0x1be   :  { %v382_v32 = vld [vmem:[%s9318_s1 + $0xa88] sm:$0xff]  ;;  %2284 = vmatpush.msrb.mxu3 %v454_v29  ;;  %2246 = vmatpush.msrb.mxu1 %v318_v30 }
 0x1bf   :  { %v450_v33 = vld [vmem:[%s9318_s1 + $0xca8] sm:$0xff]  ;;  %2226 = vmatpush.msrb.mxu0 %v254_v31  ;;  %2266 = vmatpush.msrb.mxu2 %v382_v32 }
 0x1c0   :  { %v314_v34 = vld [vmem:[%s9318_s1 + $0x868] sm:$0xff]  ;;  %2285 = vmatpush.msrb.mxu3 %v450_v33  ;;  %2171 = vmatmul.f32.vlgmr.msra.gmra.mxu1 %v3813_v59  ;;  %v2012_v59 = vpop.f32.mrf.mxu1 }
 0x1c1   :  { %v250_v35 = vld [vmem:[%s9318_s1 + $0x668] sm:$0xff]  ;;  %2247 = vmatpush.msrb.mxu1 %v314_v34  ;;  %2211 = vmatmul.f32.vlgmr.msra.gmra.mxu3 %v3815_v6 }
 0x1c2   :  { %v378_v36 = vld [vmem:[%s9318_s1 + $0xa68] sm:$0xff]  ;;  %2227 = vmatpush.msrb.mxu0 %v250_v35 }
 0x1c3   :  { %v446_v37 = vld [vmem:[%s9318_s1 + $0xc88] sm:$0xff]  ;;  %2267 = vmatpush.msrb.mxu2 %v378_v36 }
 0x1c4   :  { %v310_v38 = vld [vmem:[%s9318_s1 + $0x848] sm:$0xff]  ;;  %2286 = vmatpush.msrb.mxu3 %v446_v37 }
 0x1c5   :  { %v246_v40 = vld [vmem:[%s9318_s1 + $0x648] sm:$0xff]  ;;  %2248 = vmatpush.msrb.mxu1 %v310_v38 }
 0x1c6   :  { %v374_v41 = vld [vmem:[%s9318_s1 + $0xa48] sm:$0xff]  ;;  %2228 = vmatpush.msrb.mxu0 %v246_v40 }
 0x1c7   :  { %v442_v43 = vld [vmem:[%s9318_s1 + $0xc68] sm:$0xff]  ;;  %2268 = vmatpush.msrb.mxu2 %v374_v41 }
 0x1c8   :  { %v306_v44 = vld [vmem:[%s9318_s1 + $0x828] sm:$0xff]  ;;  %2287 = vmatpush.msrb.mxu3 %v442_v43 }
 0x1c9   :  { %v242_v45 = vld [vmem:[%s9318_s1 + $0x628] sm:$0xff]  ;;  %2249 = vmatpush.msrb.mxu1 %v306_v44 }
 0x1ca   :  { %v370_v46 = vld [vmem:[%s9318_s1 + $0xa28] sm:$0xff]  ;;  %2229 = vmatpush.msrb.mxu0 %v242_v45 }
 0x1cb   :  { %v438_v48 = vld [vmem:[%s9318_s1 + $0xc48] sm:$0xff]  ;;  %2269 = vmatpush.msrb.mxu2 %v370_v46 }
 0x1cc   :  { %v302_v49 = vld [vmem:[%s9318_s1 + $0x808] sm:$0xff]  ;;  %2288 = vmatpush.msrb.mxu3 %v438_v48 }
 0x1cd   :  { %v238_v51 = vld [vmem:[%s9318_s1 + $0x608] sm:$0xff]  ;;  %2250 = vmatpush.msrb.mxu1 %v302_v49 }
 0x1ce   :  { %v366_v52 = vld [vmem:[%s9318_s1 + $0xa08] sm:$0xff]  ;;  %2230 = vmatpush.msrb.mxu0 %v238_v51  ;;  %2251 = vmatmul.f32.vlgmr.msrb.gmra.mxu1 %v3819_v28  ;;  %v1992_v51 = vpop.f32.mrf.mxu0 }
 0x1cf   :  { %v434_v53 = vld [vmem:[%s9318_s1 + $0xc28] sm:$0xff]  ;;  %2270 = vmatpush.msrb.mxu2 %v366_v52  ;;  %2231 = vmatmul.f32.vlgmr.msrb.gmra.mxu0 %v3817_v21  ;;  %v1993_v54 = vadd.f32 %v1992_v51, %v5557_v1 }
 0x1d0   :  { %v554_v55 = vld [vmem:[%s9318_s1 + $0xfe8] sm:$0xff]  ;;  %2289 = vmatpush.msrb.mxu3 %v434_v53 }
 0x1d1   :  { %v618_v57 = vld [vmem:[%s9318_s1 + $0x11e8] sm:$0xff]  ;;  %2295 = vmatpush.msra.mxu0 %v554_v55  ;;  %v2013_v62 = vadd.f32 %v2012_v59, %v1993_v54 }
 0x1d2   :  { %v682_v58 = vld [vmem:[%s9318_s1 + $0x13e8] sm:$0xff]  ;;  %2315 = vmatpush.msra.mxu1 %v618_v57 }
 0x1d3   :  { %v430_v60 = vld [vmem:[%s9318_s1 + $0xc08] sm:$0xff] }
 0x1d4   :  { %v550_v61 = vld [vmem:[%s9318_s1 + $0xfc8] sm:$0xff]  ;;  %2290 = vmatpush.msrb.mxu3 %v430_v60 }
 0x1d5   :  { %v3814_v63 = vld [vmem:[%s9319_s0 + $0x8] sm:$0xff]  ;;  %2296 = vmatpush.msra.mxu0 %v550_v61  ;;  %2291 = vmatmul.f32.vlgmr.msrb.gmra.mxu3 %v3818_v23 }
 0x1d6   :  { %2191 = vmatmul.f32.vlgmr.msra.gmra.mxu2 %v3814_v63  ;;  %v614_v0 = vld [vmem:[%s9318_s1 + $0x11c8] sm:$0xff] }
 0x1d7   :  { %2335 = vmatpush.msra.mxu2 %v682_v58  ;;  %v678_v2 = vld [vmem:[%s9318_s1 + $0x13c8] sm:$0xff]  ;;  %2316 = vmatpush.msra.mxu1 %v614_v0 }
 0x1d8   :  { %v746_v3 = vld [vmem:[%s9318_s1 + $0x15e8] sm:$0xff] }
 0x1d9   :  { %v546_v4 = vld [vmem:[%s9318_s1 + $0xfa8] sm:$0xff]  ;;  %2336 = vmatpush.msra.mxu2 %v678_v2  ;;  %2355 = vmatpush.msra.mxu3 %v746_v3  ;;  %v2032_v3 = vpop.f32.mrf.mxu2 }
 0x1da   :  { %v610_v5 = vld [vmem:[%s9318_s1 + $0x11a8] sm:$0xff]  ;;  %2297 = vmatpush.msra.mxu0 %v546_v4  ;;  %v2033_v6 = vadd.f32 %v2032_v3, %v2013_v62 }
 0x1db   :  { %v674_v7 = vld [vmem:[%s9318_s1 + $0x13a8] sm:$0xff]  ;;  %2317 = vmatpush.msra.mxu1 %v610_v5 }
 0x1dc   :  { %v742_v8 = vld [vmem:[%s9318_s1 + $0x15c8] sm:$0xff]  ;;  %2337 = vmatpush.msra.mxu2 %v674_v7 }
 0x1dd   :  { %v542_v9 = vld [vmem:[%s9318_s1 + $0xf88] sm:$0xff]  ;;  %2356 = vmatpush.msra.mxu3 %v742_v8 }
 0x1de   :  { %v606_v10 = vld [vmem:[%s9318_s1 + $0x1188] sm:$0xff]  ;;  %2298 = vmatpush.msra.mxu0 %v542_v9  ;;  %v2052_v9 = vpop.f32.mrf.mxu3 }
 0x1df   :  { %v670_v11 = vld [vmem:[%s9318_s1 + $0x1388] sm:$0xff]  ;;  %2318 = vmatpush.msra.mxu1 %v606_v10 }
 0x1e0   :  { %v738_v12 = vld [vmem:[%s9318_s1 + $0x15a8] sm:$0xff]  ;;  %2338 = vmatpush.msra.mxu2 %v670_v11 }
 0x1e1   :  { %v538_v13 = vld [vmem:[%s9318_s1 + $0xf68] sm:$0xff]  ;;  %2357 = vmatpush.msra.mxu3 %v738_v12  ;;  %v5761_v12 = vadd.f32 %v2052_v9, %v2033_v6 }
 0x1e2   :  { %v602_v14 = vld [vmem:[%s9318_s1 + $0x1168] sm:$0xff]  ;;  %2299 = vmatpush.msra.mxu0 %v538_v13  ;;  %v3820_v13 = vld [vmem:[%s9319_s0 + $0x38] sm:$0xff] }
 0x1e3   :  { %v666_v15 = vld [vmem:[%s9318_s1 + $0x1368] sm:$0xff]  ;;  %2319 = vmatpush.msra.mxu1 %v602_v14 }
 0x1e4   :  { %v734_v16 = vld [vmem:[%s9318_s1 + $0x1588] sm:$0xff]  ;;  %2339 = vmatpush.msra.mxu2 %v666_v15 }
 0x1e5   :  { %v3816_v17 = vld [vmem:[%s9319_s0 + $0x28] sm:$0xff]  ;;  %2358 = vmatpush.msra.mxu3 %v734_v16 }
 0x1e6   :  { %2271 = vmatmul.f32.vlgmr.msrb.gmra.mxu2 %v3816_v17  ;;  %v534_v18 = vld [vmem:[%s9318_s1 + $0xf48] sm:$0xff] }
 0x1e7   :  { %v598_v19 = vld [vmem:[%s9318_s1 + $0x1148] sm:$0xff]  ;;  %2300 = vmatpush.msra.mxu0 %v534_v18 }
 0x1e8   :  { %v662_v20 = vld [vmem:[%s9318_s1 + $0x1348] sm:$0xff]  ;;  %2320 = vmatpush.msra.mxu1 %v598_v19  ;;  %v3822_v19 = vld [vmem:[%s9319_s0 + $0x40] sm:$0xff] }
 0x1e9   :  { %v730_v22 = vld [vmem:[%s9318_s1 + $0x1568] sm:$0xff]  ;;  %2340 = vmatpush.msra.mxu2 %v662_v20  ;;  %v3823_v20 = vld [vmem:[%s9319_s0 + $0x50] sm:$0xff] }
 0x1ea   :  { %v530_v24 = vld [vmem:[%s9318_s1 + $0xf28] sm:$0xff]  ;;  %2359 = vmatpush.msra.mxu3 %v730_v22 }
 0x1eb   :  { %v594_v25 = vld [vmem:[%s9318_s1 + $0x1128] sm:$0xff]  ;;  %2301 = vmatpush.msra.mxu0 %v530_v24 }
 0x1ec   :  { %v658_v26 = vld [vmem:[%s9318_s1 + $0x1328] sm:$0xff]  ;;  %2321 = vmatpush.msra.mxu1 %v594_v25 }
 0x1ed   :  { %v726_v27 = vld [vmem:[%s9318_s1 + $0x1548] sm:$0xff]  ;;  %2341 = vmatpush.msra.mxu2 %v658_v26 }
 0x1ee   :  { %v526_v29 = vld [vmem:[%s9318_s1 + $0xf08] sm:$0xff]  ;;  %2360 = vmatpush.msra.mxu3 %v726_v27 }
 0x1ef   :  { %v590_v30 = vld [vmem:[%s9318_s1 + $0x1108] sm:$0xff]  ;;  %2302 = vmatpush.msra.mxu0 %v526_v29 }
 0x1f0   :  { %v654_v31 = vld [vmem:[%s9318_s1 + $0x1308] sm:$0xff]  ;;  %2322 = vmatpush.msra.mxu1 %v590_v30 }
 0x1f1   :  { %v722_v32 = vld [vmem:[%s9318_s1 + $0x1528] sm:$0xff]  ;;  %2342 = vmatpush.msra.mxu2 %v654_v31 }
 0x1f2   :  { %v522_v33 = vld [vmem:[%s9318_s1 + $0xee8] sm:$0xff]  ;;  %2361 = vmatpush.msra.mxu3 %v722_v32 }
 0x1f3   :  { %v586_v34 = vld [vmem:[%s9318_s1 + $0x10e8] sm:$0xff]  ;;  %2303 = vmatpush.msra.mxu0 %v522_v33 }
 0x1f4   :  { %v650_v35 = vld [vmem:[%s9318_s1 + $0x12e8] sm:$0xff]  ;;  %2323 = vmatpush.msra.mxu1 %v586_v34 }
 0x1f5   :  { %v718_v36 = vld [vmem:[%s9318_s1 + $0x1508] sm:$0xff]  ;;  %2343 = vmatpush.msra.mxu2 %v650_v35 }
 0x1f6   :  { %v518_v37 = vld [vmem:[%s9318_s1 + $0xec8] sm:$0xff]  ;;  %2362 = vmatpush.msra.mxu3 %v718_v36 }
 0x1f7   :  { %v582_v38 = vld [vmem:[%s9318_s1 + $0x10c8] sm:$0xff]  ;;  %2304 = vmatpush.msra.mxu0 %v518_v37 }
 0x1f8   :  { %v646_v39 = vld [vmem:[%s9318_s1 + $0x12c8] sm:$0xff]  ;;  %2324 = vmatpush.msra.mxu1 %v582_v38 }
 0x1f9   :  { %v714_v40 = vld [vmem:[%s9318_s1 + $0x14e8] sm:$0xff]  ;;  %2344 = vmatpush.msra.mxu2 %v646_v39 }
 0x1fa   :  { %v514_v41 = vld [vmem:[%s9318_s1 + $0xea8] sm:$0xff]  ;;  %2363 = vmatpush.msra.mxu3 %v714_v40 }
 0x1fb   :  { %v578_v42 = vld [vmem:[%s9318_s1 + $0x10a8] sm:$0xff]  ;;  %2305 = vmatpush.msra.mxu0 %v514_v41 }
 0x1fc   :  { %v642_v43 = vld [vmem:[%s9318_s1 + $0x12a8] sm:$0xff]  ;;  %2325 = vmatpush.msra.mxu1 %v578_v42 }
 0x1fd   :  { %v710_v44 = vld [vmem:[%s9318_s1 + $0x14c8] sm:$0xff]  ;;  %2345 = vmatpush.msra.mxu2 %v642_v43 }
 0x1fe   :  { %v510_v45 = vld [vmem:[%s9318_s1 + $0xe88] sm:$0xff]  ;;  %2364 = vmatpush.msra.mxu3 %v710_v44 }
 0x1ff   :  { %v574_v46 = vld [vmem:[%s9318_s1 + $0x1088] sm:$0xff]  ;;  %2306 = vmatpush.msra.mxu0 %v510_v45 }
 0x200   :  { %v638_v47 = vld [vmem:[%s9318_s1 + $0x1288] sm:$0xff]  ;;  %2326 = vmatpush.msra.mxu1 %v574_v46 }
 0x201   :  { %v706_v48 = vld [vmem:[%s9318_s1 + $0x14a8] sm:$0xff]  ;;  %2346 = vmatpush.msra.mxu2 %v638_v47 }
 0x202   :  { %v506_v49 = vld [vmem:[%s9318_s1 + $0xe68] sm:$0xff]  ;;  %2365 = vmatpush.msra.mxu3 %v706_v48 }
 0x203   :  { %v570_v50 = vld [vmem:[%s9318_s1 + $0x1068] sm:$0xff]  ;;  %2307 = vmatpush.msra.mxu0 %v506_v49 }
 0x204   :  { %v634_v52 = vld [vmem:[%s9318_s1 + $0x1268] sm:$0xff]  ;;  %2327 = vmatpush.msra.mxu1 %v570_v50 }
 0x205   :  { %v702_v53 = vld [vmem:[%s9318_s1 + $0x1488] sm:$0xff]  ;;  %2347 = vmatpush.msra.mxu2 %v634_v52 }
 0x206   :  { %v502_v55 = vld [vmem:[%s9318_s1 + $0xe48] sm:$0xff]  ;;  %2366 = vmatpush.msra.mxu3 %v702_v53 }
 0x207   :  { %v566_v56 = vld [vmem:[%s9318_s1 + $0x1048] sm:$0xff]  ;;  %2308 = vmatpush.msra.mxu0 %v502_v55 }
 0x208   :  { %v630_v57 = vld [vmem:[%s9318_s1 + $0x1248] sm:$0xff]  ;;  %2328 = vmatpush.msra.mxu1 %v566_v56 }
 0x209   :  { %v698_v58 = vld [vmem:[%s9318_s1 + $0x1468] sm:$0xff]  ;;  %2348 = vmatpush.msra.mxu2 %v630_v57 }
 0x20a   :  { %v498_v60 = vld [vmem:[%s9318_s1 + $0xe28] sm:$0xff]  ;;  %2367 = vmatpush.msra.mxu3 %v698_v58 }
 0x20b   :  { %v562_v61 = vld [vmem:[%s9318_s1 + $0x1028] sm:$0xff]  ;;  %2309 = vmatpush.msra.mxu0 %v498_v60 }
 0x20c   :  { %v626_v63 = vld [vmem:[%s9318_s1 + $0x1228] sm:$0xff]  ;;  %2329 = vmatpush.msra.mxu1 %v562_v61 }
 0x20d   :  { %v694_v0 = vld [vmem:[%s9318_s1 + $0x1448] sm:$0xff]  ;;  %2349 = vmatpush.msra.mxu2 %v626_v63  ;;  %v2072_v63 = vpop.f32.mrf.mxu0 }
 0x20e   :  { %v494_v1 = vld [vmem:[%s9318_s1 + $0xe08] sm:$0xff]  ;;  %2368 = vmatpush.msra.mxu3 %v694_v0 }
 0x20f   :  { %v558_v2 = vld [vmem:[%s9318_s1 + $0x1008] sm:$0xff]  ;;  %2310 = vmatpush.msra.mxu0 %v494_v1 }
 0x210   :  { %v622_v4 = vld [vmem:[%s9318_s1 + $0x1208] sm:$0xff]  ;;  %2330 = vmatpush.msra.mxu1 %v558_v2  ;;  %2311 = vmatmul.f32.vlgmr.msra.gmra.mxu0 %v3820_v13  ;;  %v2073_v2 = vadd.f32 %v2072_v63, %v5761_v12  ;;  %v2132_v63 = vpop.f32.mrf.mxu3 }
 0x211   :  { %v690_v5 = vld [vmem:[%s9318_s1 + $0x1428] sm:$0xff]  ;;  %2350 = vmatpush.msra.mxu2 %v622_v4  ;;  %2331 = vmatmul.f32.vlgmr.msra.gmra.mxu1 %v3822_v19 }
 0x212   :  { %v810_v7 = vld [vmem:[%s9318_s1 + $0x17e8] sm:$0xff]  ;;  %2369 = vmatpush.msra.mxu3 %v690_v5 }
 0x213   :  { %v874_v8 = vld [vmem:[%s9318_s1 + $0x19e8] sm:$0xff]  ;;  %2375 = vmatpush.msrb.mxu0 %v810_v7  ;;  %v2092_v7 = vpop.f32.mrf.mxu1 }
 0x214   :  { %v938_v10 = vld [vmem:[%s9318_s1 + $0x1be8] sm:$0xff]  ;;  %2395 = vmatpush.msrb.mxu1 %v874_v8 }
 0x215   :  { %v686_v11 = vld [vmem:[%s9318_s1 + $0x1408] sm:$0xff]  ;;  %2415 = vmatpush.msrb.mxu2 %v938_v10  ;;  %v5938_v10 = vadd.f32 %v2092_v7, %v2073_v2 }
 0x216   :  { %v3821_v14 = vld [vmem:[%s9319_s0 + $0x48] sm:$0xff]  ;;  %2370 = vmatpush.msra.mxu3 %v686_v11 }
 0x217   :  { %2351 = vmatmul.f32.vlgmr.msra.gmra.mxu2 %v3821_v14  ;;  %v806_v15 = vld [vmem:[%s9318_s1 + $0x17c8] sm:$0xff]  ;;  %2371 = vmatmul.f32.vlgmr.msra.gmra.mxu3 %v3823_v20 }
 0x218   :  { %v870_v16 = vld [vmem:[%s9318_s1 + $0x19c8] sm:$0xff]  ;;  %2376 = vmatpush.msrb.mxu0 %v806_v15 }
 0x219   :  { %v934_v17 = vld [vmem:[%s9318_s1 + $0x1bc8] sm:$0xff]  ;;  %2396 = vmatpush.msrb.mxu1 %v870_v16 }
 0x21a   :  { %v1002_v18 = vld [vmem:[%s9318_s1 + $0x1de8] sm:$0xff]  ;;  %2416 = vmatpush.msrb.mxu2 %v934_v17 }
 0x21b   :  { %v802_v21 = vld [vmem:[%s9318_s1 + $0x17a8] sm:$0xff]  ;;  %2435 = vmatpush.msrb.mxu3 %v1002_v18 }
 0x21c   :  { %v866_v22 = vld [vmem:[%s9318_s1 + $0x19a8] sm:$0xff]  ;;  %2377 = vmatpush.msrb.mxu0 %v802_v21  ;;  %v3824_v21 = vld [vmem:[%s9319_s0 + $0x58] sm:$0xff] }
 0x21d   :  { %v930_v23 = vld [vmem:[%s9318_s1 + $0x1ba8] sm:$0xff]  ;;  %2397 = vmatpush.msrb.mxu1 %v866_v22 }
 0x21e   :  { %v998_v24 = vld [vmem:[%s9318_s1 + $0x1dc8] sm:$0xff]  ;;  %2417 = vmatpush.msrb.mxu2 %v930_v23 }
 0x21f   :  { %v798_v25 = vld [vmem:[%s9318_s1 + $0x1788] sm:$0xff]  ;;  %2436 = vmatpush.msrb.mxu3 %v998_v24 }
 0x220   :  { %v862_v26 = vld [vmem:[%s9318_s1 + $0x1988] sm:$0xff]  ;;  %2378 = vmatpush.msrb.mxu0 %v798_v25 }
 0x221   :  { %v926_v27 = vld [vmem:[%s9318_s1 + $0x1b88] sm:$0xff]  ;;  %2398 = vmatpush.msrb.mxu1 %v862_v26 }
 0x222   :  { %v994_v28 = vld [vmem:[%s9318_s1 + $0x1da8] sm:$0xff]  ;;  %2418 = vmatpush.msrb.mxu2 %v926_v27  ;;  %v3826_v27 = vld [vmem:[%s9319_s0 + $0x60] sm:$0xff] }
 0x223   :  { %v794_v29 = vld [vmem:[%s9318_s1 + $0x1768] sm:$0xff]  ;;  %2437 = vmatpush.msrb.mxu3 %v994_v28  ;;  %v3827_v28 = vld [vmem:[%s9319_s0 + $0x70] sm:$0xff] }
 0x224   :  { %v858_v30 = vld [vmem:[%s9318_s1 + $0x1968] sm:$0xff]  ;;  %2379 = vmatpush.msrb.mxu0 %v794_v29 }
 0x225   :  { %v922_v31 = vld [vmem:[%s9318_s1 + $0x1b68] sm:$0xff]  ;;  %2399 = vmatpush.msrb.mxu1 %v858_v30 }
 0x226   :  { %v990_v32 = vld [vmem:[%s9318_s1 + $0x1d88] sm:$0xff]  ;;  %2419 = vmatpush.msrb.mxu2 %v922_v31 }
 0x227   :  { %v790_v33 = vld [vmem:[%s9318_s1 + $0x1748] sm:$0xff]  ;;  %2438 = vmatpush.msrb.mxu3 %v990_v32 }
 0x228   :  { %v854_v34 = vld [vmem:[%s9318_s1 + $0x1948] sm:$0xff]  ;;  %2380 = vmatpush.msrb.mxu0 %v790_v33 }
 0x229   :  { %v918_v35 = vld [vmem:[%s9318_s1 + $0x1b48] sm:$0xff]  ;;  %2400 = vmatpush.msrb.mxu1 %v854_v34 }
 0x22a   :  { %v986_v36 = vld [vmem:[%s9318_s1 + $0x1d68] sm:$0xff]  ;;  %2420 = vmatpush.msrb.mxu2 %v918_v35 }
 0x22b   :  { %v786_v37 = vld [vmem:[%s9318_s1 + $0x1728] sm:$0xff]  ;;  %2439 = vmatpush.msrb.mxu3 %v986_v36 }
 0x22c   :  { %v850_v38 = vld [vmem:[%s9318_s1 + $0x1928] sm:$0xff]  ;;  %2381 = vmatpush.msrb.mxu0 %v786_v37 }
 0x22d   :  { %v914_v39 = vld [vmem:[%s9318_s1 + $0x1b28] sm:$0xff]  ;;  %2401 = vmatpush.msrb.mxu1 %v850_v38 }
 0x22e   :  { %v982_v40 = vld [vmem:[%s9318_s1 + $0x1d48] sm:$0xff]  ;;  %2421 = vmatpush.msrb.mxu2 %v914_v39 }
 0x22f   :  { %v782_v41 = vld [vmem:[%s9318_s1 + $0x1708] sm:$0xff]  ;;  %2440 = vmatpush.msrb.mxu3 %v982_v40 }
 0x230   :  { %v846_v42 = vld [vmem:[%s9318_s1 + $0x1908] sm:$0xff]  ;;  %2382 = vmatpush.msrb.mxu0 %v782_v41 }
 0x231   :  { %v910_v43 = vld [vmem:[%s9318_s1 + $0x1b08] sm:$0xff]  ;;  %2402 = vmatpush.msrb.mxu1 %v846_v42 }
 0x232   :  { %v978_v44 = vld [vmem:[%s9318_s1 + $0x1d28] sm:$0xff]  ;;  %2422 = vmatpush.msrb.mxu2 %v910_v43 }
 0x233   :  { %v778_v45 = vld [vmem:[%s9318_s1 + $0x16e8] sm:$0xff]  ;;  %2441 = vmatpush.msrb.mxu3 %v978_v44 }
 0x234   :  { %v842_v46 = vld [vmem:[%s9318_s1 + $0x18e8] sm:$0xff]  ;;  %2383 = vmatpush.msrb.mxu0 %v778_v45 }
 0x235   :  { %v906_v47 = vld [vmem:[%s9318_s1 + $0x1ae8] sm:$0xff]  ;;  %2403 = vmatpush.msrb.mxu1 %v842_v46 }
 0x236   :  { %v974_v48 = vld [vmem:[%s9318_s1 + $0x1d08] sm:$0xff]  ;;  %2423 = vmatpush.msrb.mxu2 %v906_v47 }
 0x237   :  { %v774_v49 = vld [vmem:[%s9318_s1 + $0x16c8] sm:$0xff]  ;;  %2442 = vmatpush.msrb.mxu3 %v974_v48 }
 0x238   :  { %v838_v50 = vld [vmem:[%s9318_s1 + $0x18c8] sm:$0xff]  ;;  %2384 = vmatpush.msrb.mxu0 %v774_v49 }
 0x239   :  { %v902_v51 = vld [vmem:[%s9318_s1 + $0x1ac8] sm:$0xff]  ;;  %2404 = vmatpush.msrb.mxu1 %v838_v50 }
 0x23a   :  { %v970_v52 = vld [vmem:[%s9318_s1 + $0x1ce8] sm:$0xff]  ;;  %2424 = vmatpush.msrb.mxu2 %v902_v51 }
 0x23b   :  { %v770_v53 = vld [vmem:[%s9318_s1 + $0x16a8] sm:$0xff]  ;;  %2443 = vmatpush.msrb.mxu3 %v970_v52 }
 0x23c   :  { %v834_v54 = vld [vmem:[%s9318_s1 + $0x18a8] sm:$0xff]  ;;  %2385 = vmatpush.msrb.mxu0 %v770_v53  ;;  %v2112_v53 = vpop.f32.mrf.mxu2 }
 0x23d   :  { %v898_v55 = vld [vmem:[%s9318_s1 + $0x1aa8] sm:$0xff]  ;;  %2405 = vmatpush.msrb.mxu1 %v834_v54 }
 0x23e   :  { %v966_v56 = vld [vmem:[%s9318_s1 + $0x1cc8] sm:$0xff]  ;;  %2425 = vmatpush.msrb.mxu2 %v898_v55 }
 0x23f   :  { %v766_v57 = vld [vmem:[%s9318_s1 + $0x1688] sm:$0xff]  ;;  %2444 = vmatpush.msrb.mxu3 %v966_v56 }
 0x240   :  { %v830_v58 = vld [vmem:[%s9318_s1 + $0x1888] sm:$0xff]  ;;  %2386 = vmatpush.msrb.mxu0 %v766_v57 }
 0x241   :  { %v894_v59 = vld [vmem:[%s9318_s1 + $0x1a88] sm:$0xff]  ;;  %2406 = vmatpush.msrb.mxu1 %v830_v58 }
 0x242   :  { %v962_v60 = vld [vmem:[%s9318_s1 + $0x1ca8] sm:$0xff]  ;;  %2426 = vmatpush.msrb.mxu2 %v894_v59 }
 0x243   :  { %v762_v61 = vld [vmem:[%s9318_s1 + $0x1668] sm:$0xff]  ;;  %2445 = vmatpush.msrb.mxu3 %v962_v60  ;;  %v2113_v60 = vadd.f32 %v2112_v53, %v5938_v10 }
 0x244   :  { %v826_v62 = vld [vmem:[%s9318_s1 + $0x1868] sm:$0xff]  ;;  %2387 = vmatpush.msrb.mxu0 %v762_v61 }
 0x245   :  { %v890_v0 = vld [vmem:[%s9318_s1 + $0x1a68] sm:$0xff]  ;;  %2407 = vmatpush.msrb.mxu1 %v826_v62 }
 0x246   :  { %v958_v1 = vld [vmem:[%s9318_s1 + $0x1c88] sm:$0xff]  ;;  %2427 = vmatpush.msrb.mxu2 %v890_v0 }
 0x247   :  { %v758_v3 = vld [vmem:[%s9318_s1 + $0x1648] sm:$0xff]  ;;  %2446 = vmatpush.msrb.mxu3 %v958_v1 }
 0x248   :  { %v822_v4 = vld [vmem:[%s9318_s1 + $0x1848] sm:$0xff]  ;;  %2388 = vmatpush.msrb.mxu0 %v758_v3 }
 0x249   :  { %v886_v5 = vld [vmem:[%s9318_s1 + $0x1a48] sm:$0xff]  ;;  %2408 = vmatpush.msrb.mxu1 %v822_v4 }
 0x24a   :  { %v954_v6 = vld [vmem:[%s9318_s1 + $0x1c68] sm:$0xff]  ;;  %2428 = vmatpush.msrb.mxu2 %v886_v5 }
 0x24b   :  { %v754_v8 = vld [vmem:[%s9318_s1 + $0x1628] sm:$0xff]  ;;  %2447 = vmatpush.msrb.mxu3 %v954_v6  ;;  %v2133_v6 = vadd.f32 %v2132_v63, %v2113_v60 }
 0x24c   :  { %v818_v9 = vld [vmem:[%s9318_s1 + $0x1828] sm:$0xff]  ;;  %2389 = vmatpush.msrb.mxu0 %v754_v8 }
 0x24d   :  { %v882_v11 = vld [vmem:[%s9318_s1 + $0x1a28] sm:$0xff]  ;;  %2409 = vmatpush.msrb.mxu1 %v818_v9 }
 0x24e   :  { %v950_v12 = vld [vmem:[%s9318_s1 + $0x1c48] sm:$0xff]  ;;  %2429 = vmatpush.msrb.mxu2 %v882_v11  ;;  %v2152_v11 = vpop.f32.mrf.mxu0 }
 0x24f   :  { %v750_v13 = vld [vmem:[%s9318_s1 + $0x1608] sm:$0xff]  ;;  %2448 = vmatpush.msrb.mxu3 %v950_v12 }
 0x250   :  { %v814_v14 = vld [vmem:[%s9318_s1 + $0x1808] sm:$0xff]  ;;  %2390 = vmatpush.msrb.mxu0 %v750_v13 }
 0x251   :  { %v878_v15 = vld [vmem:[%s9318_s1 + $0x1a08] sm:$0xff]  ;;  %2410 = vmatpush.msrb.mxu1 %v814_v14  ;;  %2391 = vmatmul.f32.vlgmr.msrb.gmra.mxu0 %v3824_v21  ;;  %v6127_v14 = vadd.f32 %v2152_v11, %v2133_v6 }
 0x252   :  { %v946_v16 = vld [vmem:[%s9318_s1 + $0x1c28] sm:$0xff]  ;;  %2430 = vmatpush.msrb.mxu2 %v878_v15  ;;  %2411 = vmatmul.f32.vlgmr.msrb.gmra.mxu1 %v3826_v27 }
 0x253   :  { %v1066_v17 = vld [vmem:[%s9318_s1 + $0x1fe8] sm:$0xff]  ;;  %2449 = vmatpush.msrb.mxu3 %v946_v16 }
 0x254   :  { %v1130_v18 = vld [vmem:[%s9318_s1 + $0x21e8] sm:$0xff]  ;;  %2455 = vmatpush.msra.mxu0 %v1066_v17 }
 0x255   :  { %v1194_v19 = vld [vmem:[%s9318_s1 + $0x23e8] sm:$0xff]  ;;  %2475 = vmatpush.msra.mxu1 %v1130_v18 }
 0x256   :  { %v942_v20 = vld [vmem:[%s9318_s1 + $0x1c08] sm:$0xff]  ;;  %2495 = vmatpush.msra.mxu2 %v1194_v19 }
 0x257   :  { %v3825_v22 = vld [vmem:[%s9319_s0 + $0x68] sm:$0xff]  ;;  %2450 = vmatpush.msrb.mxu3 %v942_v20 }
 0x258   :  { %2431 = vmatmul.f32.vlgmr.msrb.gmra.mxu2 %v3825_v22  ;;  %v1062_v23 = vld [vmem:[%s9318_s1 + $0x1fc8] sm:$0xff]  ;;  %2451 = vmatmul.f32.vlgmr.msrb.gmra.mxu3 %v3827_v28 }
 0x259   :  { %v1126_v24 = vld [vmem:[%s9318_s1 + $0x21c8] sm:$0xff]  ;;  %2456 = vmatpush.msra.mxu0 %v1062_v23 }
 0x25a   :  { %v1190_v25 = vld [vmem:[%s9318_s1 + $0x23c8] sm:$0xff]  ;;  %2476 = vmatpush.msra.mxu1 %v1126_v24 }
 0x25b   :  { %v1258_v26 = vld [vmem:[%s9318_s1 + $0x25e8] sm:$0xff]  ;;  %2496 = vmatpush.msra.mxu2 %v1190_v25 }
 0x25c   :  { %v1058_v29 = vld [vmem:[%s9318_s1 + $0x1fa8] sm:$0xff]  ;;  %2515 = vmatpush.msra.mxu3 %v1258_v26 }
 0x25d   :  { %v1122_v30 = vld [vmem:[%s9318_s1 + $0x21a8] sm:$0xff]  ;;  %2457 = vmatpush.msra.mxu0 %v1058_v29 }
 0x25e   :  { %v1186_v31 = vld [vmem:[%s9318_s1 + $0x23a8] sm:$0xff]  ;;  %2477 = vmatpush.msra.mxu1 %v1122_v30 }
 0x25f   :  { %v1254_v32 = vld [vmem:[%s9318_s1 + $0x25c8] sm:$0xff]  ;;  %2497 = vmatpush.msra.mxu2 %v1186_v31  ;;  %v3828_v31 = vld [vmem:[%s9319_s0 + $0x78] sm:$0xff] }
 0x260   :  { %v1054_v33 = vld [vmem:[%s9318_s1 + $0x1f88] sm:$0xff]  ;;  %2516 = vmatpush.msra.mxu3 %v1254_v32 }
 0x261   :  { %v1118_v34 = vld [vmem:[%s9318_s1 + $0x2188] sm:$0xff]  ;;  %2458 = vmatpush.msra.mxu0 %v1054_v33 }
 0x262   :  { %v1182_v35 = vld [vmem:[%s9318_s1 + $0x2388] sm:$0xff]  ;;  %2478 = vmatpush.msra.mxu1 %v1118_v34 }
 0x263   :  { %v1250_v36 = vld [vmem:[%s9318_s1 + $0x25a8] sm:$0xff]  ;;  %2498 = vmatpush.msra.mxu2 %v1182_v35 }
 0x264   :  { %v1050_v37 = vld [vmem:[%s9318_s1 + $0x1f68] sm:$0xff]  ;;  %2517 = vmatpush.msra.mxu3 %v1250_v36 }
 0x265   :  { %v1114_v38 = vld [vmem:[%s9318_s1 + $0x2168] sm:$0xff]  ;;  %2459 = vmatpush.msra.mxu0 %v1050_v37  ;;  %v3830_v37 = vld [vmem:[%s9319_s0 + $0x80] sm:$0xff] }
 0x266   :  { %v1178_v39 = vld [vmem:[%s9318_s1 + $0x2368] sm:$0xff]  ;;  %2479 = vmatpush.msra.mxu1 %v1114_v38  ;;  %v3831_v38 = vld [vmem:[%s9319_s0 + $0x90] sm:$0xff] }
 0x267   :  { %v1246_v40 = vld [vmem:[%s9318_s1 + $0x2588] sm:$0xff]  ;;  %2499 = vmatpush.msra.mxu2 %v1178_v39 }
 0x268   :  { %v1046_v41 = vld [vmem:[%s9318_s1 + $0x1f48] sm:$0xff]  ;;  %2518 = vmatpush.msra.mxu3 %v1246_v40 }
 0x269   :  { %v1110_v42 = vld [vmem:[%s9318_s1 + $0x2148] sm:$0xff]  ;;  %2460 = vmatpush.msra.mxu0 %v1046_v41 }
 0x26a   :  { %v1174_v43 = vld [vmem:[%s9318_s1 + $0x2348] sm:$0xff]  ;;  %2480 = vmatpush.msra.mxu1 %v1110_v42 }
 0x26b   :  { %v1242_v44 = vld [vmem:[%s9318_s1 + $0x2568] sm:$0xff]  ;;  %2500 = vmatpush.msra.mxu2 %v1174_v43 }
 0x26c   :  { %v1042_v45 = vld [vmem:[%s9318_s1 + $0x1f28] sm:$0xff]  ;;  %2519 = vmatpush.msra.mxu3 %v1242_v44 }
 0x26d   :  { %v1106_v46 = vld [vmem:[%s9318_s1 + $0x2128] sm:$0xff]  ;;  %2461 = vmatpush.msra.mxu0 %v1042_v45 }
 0x26e   :  { %v1170_v47 = vld [vmem:[%s9318_s1 + $0x2328] sm:$0xff]  ;;  %2481 = vmatpush.msra.mxu1 %v1106_v46 }
 0x26f   :  { %v1238_v48 = vld [vmem:[%s9318_s1 + $0x2548] sm:$0xff]  ;;  %2501 = vmatpush.msra.mxu2 %v1170_v47 }
 0x270   :  { %v1038_v49 = vld [vmem:[%s9318_s1 + $0x1f08] sm:$0xff]  ;;  %2520 = vmatpush.msra.mxu3 %v1238_v48 }
 0x271   :  { %v1102_v50 = vld [vmem:[%s9318_s1 + $0x2108] sm:$0xff]  ;;  %2462 = vmatpush.msra.mxu0 %v1038_v49 }
 0x272   :  { %v1166_v51 = vld [vmem:[%s9318_s1 + $0x2308] sm:$0xff]  ;;  %2482 = vmatpush.msra.mxu1 %v1102_v50 }
 0x273   :  { %v1234_v52 = vld [vmem:[%s9318_s1 + $0x2528] sm:$0xff]  ;;  %2502 = vmatpush.msra.mxu2 %v1166_v51 }
 0x274   :  { %v1034_v54 = vld [vmem:[%s9318_s1 + $0x1ee8] sm:$0xff]  ;;  %2521 = vmatpush.msra.mxu3 %v1234_v52 }
 0x275   :  { %v1098_v55 = vld [vmem:[%s9318_s1 + $0x20e8] sm:$0xff]  ;;  %2463 = vmatpush.msra.mxu0 %v1034_v54 }
 0x276   :  { %v1162_v56 = vld [vmem:[%s9318_s1 + $0x22e8] sm:$0xff]  ;;  %2483 = vmatpush.msra.mxu1 %v1098_v55 }
 0x277   :  { %v1230_v57 = vld [vmem:[%s9318_s1 + $0x2508] sm:$0xff]  ;;  %2503 = vmatpush.msra.mxu2 %v1162_v56 }
 0x278   :  { %v1030_v58 = vld [vmem:[%s9318_s1 + $0x1ec8] sm:$0xff]  ;;  %2522 = vmatpush.msra.mxu3 %v1230_v57 }
 0x279   :  { %v1094_v59 = vld [vmem:[%s9318_s1 + $0x20c8] sm:$0xff]  ;;  %2464 = vmatpush.msra.mxu0 %v1030_v58 }
 0x27a   :  { %v1158_v61 = vld [vmem:[%s9318_s1 + $0x22c8] sm:$0xff]  ;;  %2484 = vmatpush.msra.mxu1 %v1094_v59 }
 0x27b   :  { %v1226_v62 = vld [vmem:[%s9318_s1 + $0x24e8] sm:$0xff]  ;;  %2504 = vmatpush.msra.mxu2 %v1158_v61 }
 0x27c   :  { %v1026_v0 = vld [vmem:[%s9318_s1 + $0x1ea8] sm:$0xff]  ;;  %2523 = vmatpush.msra.mxu3 %v1226_v62 }
 0x27d   :  { %v1090_v1 = vld [vmem:[%s9318_s1 + $0x20a8] sm:$0xff]  ;;  %2465 = vmatpush.msra.mxu0 %v1026_v0 }
 0x27e   :  { %v1154_v2 = vld [vmem:[%s9318_s1 + $0x22a8] sm:$0xff]  ;;  %2485 = vmatpush.msra.mxu1 %v1090_v1 }
 0x27f   :  { %v1222_v3 = vld [vmem:[%s9318_s1 + $0x24c8] sm:$0xff]  ;;  %2505 = vmatpush.msra.mxu2 %v1154_v2 }
 0x280   :  { %v1022_v4 = vld [vmem:[%s9318_s1 + $0x1e88] sm:$0xff]  ;;  %2524 = vmatpush.msra.mxu3 %v1222_v3 }
 0x281   :  { %v1086_v5 = vld [vmem:[%s9318_s1 + $0x2088] sm:$0xff]  ;;  %2466 = vmatpush.msra.mxu0 %v1022_v4 }
 0x282   :  { %v1150_v7 = vld [vmem:[%s9318_s1 + $0x2288] sm:$0xff]  ;;  %2486 = vmatpush.msra.mxu1 %v1086_v5 }
 0x283   :  { %v1218_v8 = vld [vmem:[%s9318_s1 + $0x24a8] sm:$0xff]  ;;  %2506 = vmatpush.msra.mxu2 %v1150_v7 }
 0x284   :  { %v1018_v9 = vld [vmem:[%s9318_s1 + $0x1e68] sm:$0xff]  ;;  %2525 = vmatpush.msra.mxu3 %v1218_v8 }
 0x285   :  { %v1082_v10 = vld [vmem:[%s9318_s1 + $0x2068] sm:$0xff]  ;;  %2467 = vmatpush.msra.mxu0 %v1018_v9 }
 0x286   :  { %v1146_v12 = vld [vmem:[%s9318_s1 + $0x2268] sm:$0xff]  ;;  %2487 = vmatpush.msra.mxu1 %v1082_v10 }
 0x287   :  { %v1214_v13 = vld [vmem:[%s9318_s1 + $0x2488] sm:$0xff]  ;;  %2507 = vmatpush.msra.mxu2 %v1146_v12 }
 0x288   :  { %v1014_v15 = vld [vmem:[%s9318_s1 + $0x1e48] sm:$0xff]  ;;  %2526 = vmatpush.msra.mxu3 %v1214_v13 }
 0x289   :  { %v1078_v16 = vld [vmem:[%s9318_s1 + $0x2048] sm:$0xff]  ;;  %2468 = vmatpush.msra.mxu0 %v1014_v15 }
 0x28a   :  { %v1142_v17 = vld [vmem:[%s9318_s1 + $0x2248] sm:$0xff]  ;;  %2488 = vmatpush.msra.mxu1 %v1078_v16 }
 0x28b   :  { %v1210_v18 = vld [vmem:[%s9318_s1 + $0x2468] sm:$0xff]  ;;  %2508 = vmatpush.msra.mxu2 %v1142_v17 }
 0x28c   :  { %v1010_v19 = vld [vmem:[%s9318_s1 + $0x1e28] sm:$0xff]  ;;  %2527 = vmatpush.msra.mxu3 %v1210_v18 }
 0x28d   :  { %v1074_v20 = vld [vmem:[%s9318_s1 + $0x2028] sm:$0xff]  ;;  %2469 = vmatpush.msra.mxu0 %v1010_v19 }
 0x28e   :  { %v1138_v21 = vld [vmem:[%s9318_s1 + $0x2228] sm:$0xff]  ;;  %2489 = vmatpush.msra.mxu1 %v1074_v20 }
 0x28f   :  { %v1206_v22 = vld [vmem:[%s9318_s1 + $0x2448] sm:$0xff]  ;;  %2509 = vmatpush.msra.mxu2 %v1138_v21 }
 0x290   :  { %v1006_v23 = vld [vmem:[%s9318_s1 + $0x1e08] sm:$0xff]  ;;  %2528 = vmatpush.msra.mxu3 %v1206_v22 }
 0x291   :  { %v1070_v24 = vld [vmem:[%s9318_s1 + $0x2008] sm:$0xff]  ;;  %2470 = vmatpush.msra.mxu0 %v1006_v23 }
 0x292   :  { %v1134_v25 = vld [vmem:[%s9318_s1 + $0x2208] sm:$0xff]  ;;  %2490 = vmatpush.msra.mxu1 %v1070_v24  ;;  %2471 = vmatmul.f32.vlgmr.msra.gmra.mxu0 %v3828_v31 }
 0x293   :  { %v1202_v26 = vld [vmem:[%s9318_s1 + $0x2428] sm:$0xff]  ;;  %2510 = vmatpush.msra.mxu2 %v1134_v25  ;;  %2491 = vmatmul.f32.vlgmr.msra.gmra.mxu1 %v3830_v37 }
 0x294   :  { %v1322_v27 = vld [vmem:[%s9318_s1 + $0x27e8] sm:$0xff]  ;;  %2529 = vmatpush.msra.mxu3 %v1202_v26 }
 0x295   :  { %v1386_v28 = vld [vmem:[%s9318_s1 + $0x29e8] sm:$0xff]  ;;  %2535 = vmatpush.msrb.mxu0 %v1322_v27 }
 0x296   :  { %v1450_v29 = vld [vmem:[%s9318_s1 + $0x2be8] sm:$0xff]  ;;  %2555 = vmatpush.msrb.mxu1 %v1386_v28 }
 0x297   :  { %v1198_v30 = vld [vmem:[%s9318_s1 + $0x2408] sm:$0xff]  ;;  %2575 = vmatpush.msrb.mxu2 %v1450_v29 }
 0x298   :  { %v3829_v32 = vld [vmem:[%s9319_s0 + $0x88] sm:$0xff]  ;;  %2530 = vmatpush.msra.mxu3 %v1198_v30 }
 0x299   :  { %2511 = vmatmul.f32.vlgmr.msra.gmra.mxu2 %v3829_v32  ;;  %v1318_v33 = vld [vmem:[%s9318_s1 + $0x27c8] sm:$0xff]  ;;  %2531 = vmatmul.f32.vlgmr.msra.gmra.mxu3 %v3831_v38 }
 0x29a   :  { %v1382_v34 = vld [vmem:[%s9318_s1 + $0x29c8] sm:$0xff]  ;;  %2536 = vmatpush.msrb.mxu0 %v1318_v33 }
 0x29b   :  { %v1446_v35 = vld [vmem:[%s9318_s1 + $0x2bc8] sm:$0xff]  ;;  %2556 = vmatpush.msrb.mxu1 %v1382_v34  ;;  %v107_v34 = vld [vmem:[%s9318_s1 + $0x1f0] sm:$0xff] }
 0x29c   :  { %v1514_v36 = vld [vmem:[%s9318_s1 + $0x2de8] sm:$0xff]  ;;  %2576 = vmatpush.msrb.mxu2 %v1446_v35 }
 0x29d   :  { %v1314_v39 = vld [vmem:[%s9318_s1 + $0x27a8] sm:$0xff]  ;;  %2595 = vmatpush.msrb.mxu3 %v1514_v36  ;;  %v3832_v36 = vld [vmem:[%s9319_s0 + $0x98] sm:$0xff] }
 0x29e   :  { %v1378_v40 = vld [vmem:[%s9318_s1 + $0x29a8] sm:$0xff]  ;;  %2537 = vmatpush.msrb.mxu0 %v1314_v39 }
 0x29f   :  { %v1442_v41 = vld [vmem:[%s9318_s1 + $0x2ba8] sm:$0xff]  ;;  %2557 = vmatpush.msrb.mxu1 %v1378_v40  ;;  %v103_v40 = vld [vmem:[%s9318_s1 + $0x1d0] sm:$0xff] }
 0x2a0   :  { %v1510_v42 = vld [vmem:[%s9318_s1 + $0x2dc8] sm:$0xff]  ;;  %2577 = vmatpush.msrb.mxu2 %v1442_v41  ;;  %v171_v41 = vld [vmem:[%s9318_s1 + $0x3f0] sm:$0xff] }
 0x2a1   :  { %v1310_v43 = vld [vmem:[%s9318_s1 + $0x2788] sm:$0xff]  ;;  %2596 = vmatpush.msrb.mxu3 %v1510_v42  ;;  %v3834_v42 = vld [vmem:[%s9319_s0 + $0xa0] sm:$0xff] }
 0x2a2   :  { %v1374_v44 = vld [vmem:[%s9318_s1 + $0x2988] sm:$0xff]  ;;  %2538 = vmatpush.msrb.mxu0 %v1310_v43  ;;  %v3835_v43 = vld [vmem:[%s9319_s0 + $0xb0] sm:$0xff] }
 0x2a3   :  { %v1438_v45 = vld [vmem:[%s9318_s1 + $0x2b88] sm:$0xff]  ;;  %2558 = vmatpush.msrb.mxu1 %v1374_v44 }
 0x2a4   :  { %v1506_v46 = vld [vmem:[%s9318_s1 + $0x2da8] sm:$0xff]  ;;  %2578 = vmatpush.msrb.mxu2 %v1438_v45 }
 0x2a5   :  { %v1306_v47 = vld [vmem:[%s9318_s1 + $0x2768] sm:$0xff]  ;;  %2597 = vmatpush.msrb.mxu3 %v1506_v46  ;;  %v99_v46 = vld [vmem:[%s9318_s1 + $0x1b0] sm:$0xff] }
 0x2a6   :  { %v1370_v48 = vld [vmem:[%s9318_s1 + $0x2968] sm:$0xff]  ;;  %2539 = vmatpush.msrb.mxu0 %v1306_v47  ;;  %v167_v47 = vld [vmem:[%s9318_s1 + $0x3d0] sm:$0xff] }
 0x2a7   :  { %v1434_v49 = vld [vmem:[%s9318_s1 + $0x2b68] sm:$0xff]  ;;  %2559 = vmatpush.msrb.mxu1 %v1370_v48 }
 0x2a8   :  { %v1502_v50 = vld [vmem:[%s9318_s1 + $0x2d88] sm:$0xff]  ;;  %2579 = vmatpush.msrb.mxu2 %v1434_v49 }
 0x2a9   :  { %v1302_v51 = vld [vmem:[%s9318_s1 + $0x2748] sm:$0xff]  ;;  %2598 = vmatpush.msrb.mxu3 %v1502_v50  ;;  %v95_v50 = vld [vmem:[%s9318_s1 + $0x190] sm:$0xff] }
 0x2aa   :  { %v1366_v52 = vld [vmem:[%s9318_s1 + $0x2948] sm:$0xff]  ;;  %2540 = vmatpush.msrb.mxu0 %v1302_v51  ;;  %v163_v51 = vld [vmem:[%s9318_s1 + $0x3b0] sm:$0xff] }
 0x2ab   :  { %v1430_v53 = vld [vmem:[%s9318_s1 + $0x2b48] sm:$0xff]  ;;  %2560 = vmatpush.msrb.mxu1 %v1366_v52 }
 0x2ac   :  { %v1498_v54 = vld [vmem:[%s9318_s1 + $0x2d68] sm:$0xff]  ;;  %2580 = vmatpush.msrb.mxu2 %v1430_v53 }
 0x2ad   :  { %v1298_v55 = vld [vmem:[%s9318_s1 + $0x2728] sm:$0xff]  ;;  %2599 = vmatpush.msrb.mxu3 %v1498_v54  ;;  %v91_v54 = vld [vmem:[%s9318_s1 + $0x170] sm:$0xff] }
 0x2ae   :  { %v1362_v56 = vld [vmem:[%s9318_s1 + $0x2928] sm:$0xff]  ;;  %2541 = vmatpush.msrb.mxu0 %v1298_v55  ;;  %v159_v55 = vld [vmem:[%s9318_s1 + $0x390] sm:$0xff] }
 0x2af   :  { %v1426_v57 = vld [vmem:[%s9318_s1 + $0x2b28] sm:$0xff]  ;;  %2561 = vmatpush.msrb.mxu1 %v1362_v56 }
 0x2b0   :  { %v1494_v58 = vld [vmem:[%s9318_s1 + $0x2d48] sm:$0xff]  ;;  %2581 = vmatpush.msrb.mxu2 %v1426_v57 }
 0x2b1   :  { %v1294_v59 = vld [vmem:[%s9318_s1 + $0x2708] sm:$0xff]  ;;  %2600 = vmatpush.msrb.mxu3 %v1494_v58  ;;  %v87_v58 = vld [vmem:[%s9318_s1 + $0x150] sm:$0xff] }
 0x2b2   :  { %v1358_v60 = vld [vmem:[%s9318_s1 + $0x2908] sm:$0xff]  ;;  %2542 = vmatpush.msrb.mxu0 %v1294_v59  ;;  %v155_v59 = vld [vmem:[%s9318_s1 + $0x370] sm:$0xff] }
 0x2b3   :  { %v1422_v61 = vld [vmem:[%s9318_s1 + $0x2b08] sm:$0xff]  ;;  %2562 = vmatpush.msrb.mxu1 %v1358_v60 }
 0x2b4   :  { %v1490_v62 = vld [vmem:[%s9318_s1 + $0x2d28] sm:$0xff]  ;;  %2582 = vmatpush.msrb.mxu2 %v1422_v61 }
 0x2b5   :  { %v1290_v63 = vld [vmem:[%s9318_s1 + $0x26e8] sm:$0xff]  ;;  %2601 = vmatpush.msrb.mxu3 %v1490_v62  ;;  %v83_v62 = vld [vmem:[%s9318_s1 + $0x130] sm:$0xff] }
 0x2b6   :  { %v1354_v0 = vld [vmem:[%s9318_s1 + $0x28e8] sm:$0xff]  ;;  %2543 = vmatpush.msrb.mxu0 %v1290_v63  ;;  %v151_v63 = vld [vmem:[%s9318_s1 + $0x350] sm:$0xff] }
 0x2b7   :  { %v1418_v1 = vld [vmem:[%s9318_s1 + $0x2ae8] sm:$0xff]  ;;  %2563 = vmatpush.msrb.mxu1 %v1354_v0 }
 0x2b8   :  { %v1486_v2 = vld [vmem:[%s9318_s1 + $0x2d08] sm:$0xff]  ;;  %2583 = vmatpush.msrb.mxu2 %v1418_v1 }
 0x2b9   :  { %v1286_v3 = vld [vmem:[%s9318_s1 + $0x26c8] sm:$0xff]  ;;  %2602 = vmatpush.msrb.mxu3 %v1486_v2  ;;  %v79_v2 = vld [vmem:[%s9318_s1 + $0x110] sm:$0xff] }
 0x2ba   :  { %v1350_v4 = vld [vmem:[%s9318_s1 + $0x28c8] sm:$0xff]  ;;  %2544 = vmatpush.msrb.mxu0 %v1286_v3  ;;  %v147_v3 = vld [vmem:[%s9318_s1 + $0x330] sm:$0xff] }
 0x2bb   :  { %v1414_v5 = vld [vmem:[%s9318_s1 + $0x2ac8] sm:$0xff]  ;;  %2564 = vmatpush.msrb.mxu1 %v1350_v4 }
 0x2bc   :  { %v1482_v6 = vld [vmem:[%s9318_s1 + $0x2ce8] sm:$0xff]  ;;  %2584 = vmatpush.msrb.mxu2 %v1414_v5 }
 0x2bd   :  { %v1282_v7 = vld [vmem:[%s9318_s1 + $0x26a8] sm:$0xff]  ;;  %2603 = vmatpush.msrb.mxu3 %v1482_v6  ;;  %v75_v6 = vld [vmem:[%s9318_s1 + $0xf0] sm:$0xff] }
 0x2be   :  { %v1346_v8 = vld [vmem:[%s9318_s1 + $0x28a8] sm:$0xff]  ;;  %2545 = vmatpush.msrb.mxu0 %v1282_v7  ;;  %v143_v7 = vld [vmem:[%s9318_s1 + $0x310] sm:$0xff] }
 0x2bf   :  { %v1410_v9 = vld [vmem:[%s9318_s1 + $0x2aa8] sm:$0xff]  ;;  %2565 = vmatpush.msrb.mxu1 %v1346_v8 }
 0x2c0   :  { %v1478_v10 = vld [vmem:[%s9318_s1 + $0x2cc8] sm:$0xff]  ;;  %2585 = vmatpush.msrb.mxu2 %v1410_v9 }
 0x2c1   :  { %v1278_v11 = vld [vmem:[%s9318_s1 + $0x2688] sm:$0xff]  ;;  %2604 = vmatpush.msrb.mxu3 %v1478_v10  ;;  %v71_v10 = vld [vmem:[%s9318_s1 + $0xd0] sm:$0xff] }
 0x2c2   :  { %v1342_v12 = vld [vmem:[%s9318_s1 + $0x2888] sm:$0xff]  ;;  %2546 = vmatpush.msrb.mxu0 %v1278_v11  ;;  %v139_v11 = vld [vmem:[%s9318_s1 + $0x2f0] sm:$0xff] }
 0x2c3   :  { %v1406_v13 = vld [vmem:[%s9318_s1 + $0x2a88] sm:$0xff]  ;;  %2566 = vmatpush.msrb.mxu1 %v1342_v12 }
 0x2c4   :  { %v1474_v15 = vld [vmem:[%s9318_s1 + $0x2ca8] sm:$0xff]  ;;  %2586 = vmatpush.msrb.mxu2 %v1406_v13 }
 0x2c5   :  { %v1274_v16 = vld [vmem:[%s9318_s1 + $0x2668] sm:$0xff]  ;;  %2605 = vmatpush.msrb.mxu3 %v1474_v15  ;;  %v67_v15 = vld [vmem:[%s9318_s1 + $0xb0] sm:$0xff] }
 0x2c6   :  { %v1338_v17 = vld [vmem:[%s9318_s1 + $0x2868] sm:$0xff]  ;;  %2547 = vmatpush.msrb.mxu0 %v1274_v16  ;;  %v135_v16 = vld [vmem:[%s9318_s1 + $0x2d0] sm:$0xff] }
 0x2c7   :  { %v1402_v18 = vld [vmem:[%s9318_s1 + $0x2a68] sm:$0xff]  ;;  %2567 = vmatpush.msrb.mxu1 %v1338_v17 }
 0x2c8   :  { %v1470_v19 = vld [vmem:[%s9318_s1 + $0x2c88] sm:$0xff]  ;;  %2587 = vmatpush.msrb.mxu2 %v1402_v18 }
 0x2c9   :  { %v1270_v20 = vld [vmem:[%s9318_s1 + $0x2648] sm:$0xff]  ;;  %2606 = vmatpush.msrb.mxu3 %v1470_v19  ;;  %v63_v19 = vld [vmem:[%s9318_s1 + $0x90] sm:$0xff] }
 0x2ca   :  { %v1334_v21 = vld [vmem:[%s9318_s1 + $0x2848] sm:$0xff]  ;;  %2548 = vmatpush.msrb.mxu0 %v1270_v20  ;;  %v131_v20 = vld [vmem:[%s9318_s1 + $0x2b0] sm:$0xff] }
 0x2cb   :  { %v1398_v22 = vld [vmem:[%s9318_s1 + $0x2a48] sm:$0xff]  ;;  %2568 = vmatpush.msrb.mxu1 %v1334_v21 }
 0x2cc   :  { %v1466_v23 = vld [vmem:[%s9318_s1 + $0x2c68] sm:$0xff]  ;;  %2588 = vmatpush.msrb.mxu2 %v1398_v22 }
 0x2cd   :  { %v1266_v24 = vld [vmem:[%s9318_s1 + $0x2628] sm:$0xff]  ;;  %2607 = vmatpush.msrb.mxu3 %v1466_v23  ;;  %v59_v23 = vld [vmem:[%s9318_s1 + $0x70] sm:$0xff] }
 0x2ce   :  { %v1330_v25 = vld [vmem:[%s9318_s1 + $0x2828] sm:$0xff]  ;;  %2549 = vmatpush.msrb.mxu0 %v1266_v24  ;;  %v127_v24 = vld [vmem:[%s9318_s1 + $0x290] sm:$0xff] }
 0x2cf   :  { %v1394_v26 = vld [vmem:[%s9318_s1 + $0x2a28] sm:$0xff]  ;;  %2569 = vmatpush.msrb.mxu1 %v1330_v25 }
 0x2d0   :  { %v1462_v27 = vld [vmem:[%s9318_s1 + $0x2c48] sm:$0xff]  ;;  %2589 = vmatpush.msrb.mxu2 %v1394_v26 }
 0x2d1   :  { %v1262_v28 = vld [vmem:[%s9318_s1 + $0x2608] sm:$0xff]  ;;  %2608 = vmatpush.msrb.mxu3 %v1462_v27  ;;  %v55_v27 = vld [vmem:[%s9318_s1 + $0x50] sm:$0xff] }
 0x2d2   :  { %v1326_v29 = vld [vmem:[%s9318_s1 + $0x2808] sm:$0xff]  ;;  %2550 = vmatpush.msrb.mxu0 %v1262_v28  ;;  %v123_v28 = vld [vmem:[%s9318_s1 + $0x270] sm:$0xff] }
 0x2d3   :  { %v1390_v30 = vld [vmem:[%s9318_s1 + $0x2a08] sm:$0xff]  ;;  %2570 = vmatpush.msrb.mxu1 %v1326_v29  ;;  %2551 = vmatmul.f32.vlgmr.msrb.gmra.mxu0 %v3832_v36  ;;  %v115_v36 = vld [vmem:[%s9318_s1 + $0x230] sm:$0xff] }
 0x2d4   :  { %v1458_v31 = vld [vmem:[%s9318_s1 + $0x2c28] sm:$0xff]  ;;  %2590 = vmatpush.msrb.mxu2 %v1390_v30  ;;  %2571 = vmatmul.f32.vlgmr.msrb.gmra.mxu1 %v3834_v42  ;;  %v231_v42 = vld [vmem:[%s9318_s1 + $0x5d0] sm:$0xff] }
 0x2d5   :  { %v1578_v32 = vld [vmem:[%s9318_s1 + $0x2fe8] sm:$0xff]  ;;  %2609 = vmatpush.msrb.mxu3 %v1458_v31  ;;  %v51_v31 = vld [vmem:[%s9318_s1 + $0x30] sm:$0xff] }
 0x2d6   :  { %v1642_v33 = vld [vmem:[%s9318_s1 + $0x31e8] sm:$0xff]  ;;  %2615 = vmatpush.msra.mxu0 %v1578_v32  ;;  %2655 = vmatpush.msra.mxu2 %v107_v34  ;;  %v119_v32 = vld [vmem:[%s9318_s1 + $0x250] sm:$0xff] }
 0x2d7   :  { %v1454_v35 = vld [vmem:[%s9318_s1 + $0x2c08] sm:$0xff]  ;;  %2635 = vmatpush.msra.mxu1 %v1642_v33 }
 0x2d8   :  { %v3833_v37 = vld [vmem:[%s9319_s0 + $0xa8] sm:$0xff]  ;;  %2610 = vmatpush.msrb.mxu3 %v1454_v35  ;;  %2656 = vmatpush.msra.mxu2 %v103_v40  ;;  %v47_v35 = vld [vmem:[%s9318_s1 + $0x10] sm:$0xff] }
 0x2d9   :  { %2591 = vmatmul.f32.vlgmr.msrb.gmra.mxu2 %v3833_v37  ;;  %v1574_v38 = vld [vmem:[%s9318_s1 + $0x2fc8] sm:$0xff]  ;;  %2611 = vmatmul.f32.vlgmr.msrb.gmra.mxu3 %v3835_v43  ;;  %v299_v37 = vld [vmem:[%s9318_s1 + $0x7f0] sm:$0xff] }
 0x2da   :  { %v1638_v39 = vld [vmem:[%s9318_s1 + $0x31c8] sm:$0xff]  ;;  %2616 = vmatpush.msra.mxu0 %v1574_v38  ;;  %2675 = vmatpush.msra.mxu3 %v171_v41  ;;  %v235_v38 = vld [vmem:[%s9318_s1 + $0x5f0] sm:$0xff]  ;;  %v3836_v41 = vld [vmem:[%s9319_s0 + $0xb8] sm:$0xff] }
 0x2db   :  { %v1570_v44 = vld [vmem:[%s9318_s1 + $0x2fa8] sm:$0xff]  ;;  %2636 = vmatpush.msra.mxu1 %v1638_v39  ;;  %2657 = vmatpush.msra.mxu2 %v99_v46  ;;  %v363_v39 = vld [vmem:[%s9318_s1 + $0x9f0] sm:$0xff]  ;;  %v3837_v46 = vld [vmem:[%s9319_s0 + $0xc0] sm:$0xff] }
 0x2dc   :  { %v1634_v45 = vld [vmem:[%s9318_s1 + $0x31a8] sm:$0xff]  ;;  %2617 = vmatpush.msra.mxu0 %v1570_v44  ;;  %2676 = vmatpush.msra.mxu3 %v167_v47  ;;  %v111_v40 = vld [vmem:[%s9318_s1 + $0x210] sm:$0xff] }
 0x2dd   :  { %v1566_v48 = vld [vmem:[%s9318_s1 + $0x2f88] sm:$0xff]  ;;  %2637 = vmatpush.msra.mxu1 %v1634_v45  ;;  %2658 = vmatpush.msra.mxu2 %v95_v50  ;;  %v295_v43 = vld [vmem:[%s9318_s1 + $0x7d0] sm:$0xff] }
 0x2de   :  { %v1630_v49 = vld [vmem:[%s9318_s1 + $0x3188] sm:$0xff]  ;;  %2618 = vmatpush.msra.mxu0 %v1566_v48  ;;  %2677 = vmatpush.msra.mxu3 %v163_v51  ;;  %v359_v44 = vld [vmem:[%s9318_s1 + $0x9d0] sm:$0xff] }
 0x2df   :  { %v1562_v52 = vld [vmem:[%s9318_s1 + $0x2f68] sm:$0xff]  ;;  %2638 = vmatpush.msra.mxu1 %v1630_v49  ;;  %2659 = vmatpush.msra.mxu2 %v91_v54  ;;  %v427_v45 = vld [vmem:[%s9318_s1 + $0xbf0] sm:$0xff] }
 0x2e0   :  { %v1626_v53 = vld [vmem:[%s9318_s1 + $0x3168] sm:$0xff]  ;;  %2619 = vmatpush.msra.mxu0 %v1562_v52  ;;  %2678 = vmatpush.msra.mxu3 %v159_v55  ;;  %v227_v47 = vld [vmem:[%s9318_s1 + $0x5b0] sm:$0xff] }
 0x2e1   :  { %v1558_v56 = vld [vmem:[%s9318_s1 + $0x2f48] sm:$0xff]  ;;  %2639 = vmatpush.msra.mxu1 %v1626_v53  ;;  %2660 = vmatpush.msra.mxu2 %v87_v58  ;;  %v291_v48 = vld [vmem:[%s9318_s1 + $0x7b0] sm:$0xff] }
 0x2e2   :  { %v1622_v57 = vld [vmem:[%s9318_s1 + $0x3148] sm:$0xff]  ;;  %2620 = vmatpush.msra.mxu0 %v1558_v56  ;;  %2679 = vmatpush.msra.mxu3 %v155_v59  ;;  %v355_v49 = vld [vmem:[%s9318_s1 + $0x9b0] sm:$0xff] }
 0x2e3   :  { %v1554_v60 = vld [vmem:[%s9318_s1 + $0x2f28] sm:$0xff]  ;;  %2640 = vmatpush.msra.mxu1 %v1622_v57  ;;  %2661 = vmatpush.msra.mxu2 %v83_v62  ;;  %v423_v50 = vld [vmem:[%s9318_s1 + $0xbd0] sm:$0xff] }
 0x2e4   :  { %v1618_v61 = vld [vmem:[%s9318_s1 + $0x3128] sm:$0xff]  ;;  %2621 = vmatpush.msra.mxu0 %v1554_v60  ;;  %2680 = vmatpush.msra.mxu3 %v151_v63  ;;  %v223_v51 = vld [vmem:[%s9318_s1 + $0x590] sm:$0xff] }
 0x2e5   :  { %v1550_v0 = vld [vmem:[%s9318_s1 + $0x2f08] sm:$0xff]  ;;  %2641 = vmatpush.msra.mxu1 %v1618_v61  ;;  %2662 = vmatpush.msra.mxu2 %v79_v2  ;;  %v287_v52 = vld [vmem:[%s9318_s1 + $0x790] sm:$0xff] }
 0x2e6   :  { %v1614_v1 = vld [vmem:[%s9318_s1 + $0x3108] sm:$0xff]  ;;  %2622 = vmatpush.msra.mxu0 %v1550_v0  ;;  %2681 = vmatpush.msra.mxu3 %v147_v3  ;;  %v351_v53 = vld [vmem:[%s9318_s1 + $0x990] sm:$0xff] }
 0x2e7   :  { %v1546_v4 = vld [vmem:[%s9318_s1 + $0x2ee8] sm:$0xff]  ;;  %2642 = vmatpush.msra.mxu1 %v1614_v1  ;;  %2663 = vmatpush.msra.mxu2 %v75_v6  ;;  %v419_v54 = vld [vmem:[%s9318_s1 + $0xbb0] sm:$0xff] }
 0x2e8   :  { %v1610_v5 = vld [vmem:[%s9318_s1 + $0x30e8] sm:$0xff]  ;;  %2623 = vmatpush.msra.mxu0 %v1546_v4  ;;  %2682 = vmatpush.msra.mxu3 %v143_v7  ;;  %v219_v55 = vld [vmem:[%s9318_s1 + $0x570] sm:$0xff] }
 0x2e9   :  { %v1542_v8 = vld [vmem:[%s9318_s1 + $0x2ec8] sm:$0xff]  ;;  %2643 = vmatpush.msra.mxu1 %v1610_v5  ;;  %2664 = vmatpush.msra.mxu2 %v71_v10  ;;  %v283_v56 = vld [vmem:[%s9318_s1 + $0x770] sm:$0xff] }
 0x2ea   :  { %v1606_v9 = vld [vmem:[%s9318_s1 + $0x30c8] sm:$0xff]  ;;  %2624 = vmatpush.msra.mxu0 %v1542_v8  ;;  %2683 = vmatpush.msra.mxu3 %v139_v11  ;;  %v347_v57 = vld [vmem:[%s9318_s1 + $0x970] sm:$0xff] }
 0x2eb   :  { %v1538_v12 = vld [vmem:[%s9318_s1 + $0x2ea8] sm:$0xff]  ;;  %2644 = vmatpush.msra.mxu1 %v1606_v9  ;;  %2665 = vmatpush.msra.mxu2 %v67_v15  ;;  %v415_v58 = vld [vmem:[%s9318_s1 + $0xb90] sm:$0xff] }
 0x2ec   :  { %v1602_v13 = vld [vmem:[%s9318_s1 + $0x30a8] sm:$0xff]  ;;  %2625 = vmatpush.msra.mxu0 %v1538_v12  ;;  %2684 = vmatpush.msra.mxu3 %v135_v16  ;;  %v215_v59 = vld [vmem:[%s9318_s1 + $0x550] sm:$0xff] }
 0x2ed   :  { %v1534_v17 = vld [vmem:[%s9318_s1 + $0x2e88] sm:$0xff]  ;;  %2645 = vmatpush.msra.mxu1 %v1602_v13  ;;  %2666 = vmatpush.msra.mxu2 %v63_v19  ;;  %v279_v60 = vld [vmem:[%s9318_s1 + $0x750] sm:$0xff] }
 0x2ee   :  { %v1598_v18 = vld [vmem:[%s9318_s1 + $0x3088] sm:$0xff]  ;;  %2626 = vmatpush.msra.mxu0 %v1534_v17  ;;  %2685 = vmatpush.msra.mxu3 %v131_v20  ;;  %v343_v61 = vld [vmem:[%s9318_s1 + $0x950] sm:$0xff] }
 0x2ef   :  { %v1530_v21 = vld [vmem:[%s9318_s1 + $0x2e68] sm:$0xff]  ;;  %2646 = vmatpush.msra.mxu1 %v1598_v18  ;;  %2667 = vmatpush.msra.mxu2 %v59_v23  ;;  %v411_v62 = vld [vmem:[%s9318_s1 + $0xb70] sm:$0xff] }
 0x2f0   :  { %v1594_v22 = vld [vmem:[%s9318_s1 + $0x3068] sm:$0xff]  ;;  %2627 = vmatpush.msra.mxu0 %v1530_v21  ;;  %2686 = vmatpush.msra.mxu3 %v127_v24  ;;  %v211_v63 = vld [vmem:[%s9318_s1 + $0x530] sm:$0xff] }
 0x2f1   :  { %v1526_v25 = vld [vmem:[%s9318_s1 + $0x2e48] sm:$0xff]  ;;  %2647 = vmatpush.msra.mxu1 %v1594_v22  ;;  %2668 = vmatpush.msra.mxu2 %v55_v27  ;;  %v275_v0 = vld [vmem:[%s9318_s1 + $0x730] sm:$0xff] }
 0x2f2   :  { %v1590_v26 = vld [vmem:[%s9318_s1 + $0x3048] sm:$0xff]  ;;  %2628 = vmatpush.msra.mxu0 %v1526_v25  ;;  %2687 = vmatpush.msra.mxu3 %v123_v28  ;;  %v339_v1 = vld [vmem:[%s9318_s1 + $0x930] sm:$0xff] }
 0x2f3   :  { %v1522_v29 = vld [vmem:[%s9318_s1 + $0x2e28] sm:$0xff]  ;;  %2648 = vmatpush.msra.mxu1 %v1590_v26  ;;  %2669 = vmatpush.msra.mxu2 %v51_v31  ;;  %v407_v2 = vld [vmem:[%s9318_s1 + $0xb50] sm:$0xff] }
 0x2f4   :  { %v1586_v30 = vld [vmem:[%s9318_s1 + $0x3028] sm:$0xff]  ;;  %2629 = vmatpush.msra.mxu0 %v1522_v29  ;;  %2688 = vmatpush.msra.mxu3 %v119_v32  ;;  %v207_v3 = vld [vmem:[%s9318_s1 + $0x510] sm:$0xff] }
 0x2f5   :  { %v1518_v33 = vld [vmem:[%s9318_s1 + $0x2e08] sm:$0xff]  ;;  %2649 = vmatpush.msra.mxu1 %v1586_v30  ;;  %2670 = vmatpush.msra.mxu2 %v47_v35  ;;  %v271_v4 = vld [vmem:[%s9318_s1 + $0x710] sm:$0xff] }
 0x2f6   :  { %v1582_v34 = vld [vmem:[%s9318_s1 + $0x3008] sm:$0xff]  ;;  %2630 = vmatpush.msra.mxu0 %v1518_v33  ;;  %2689 = vmatpush.msra.mxu3 %v115_v36  ;;  %v335_v5 = vld [vmem:[%s9318_s1 + $0x910] sm:$0xff] }
 0x2f7   :  { %2650 = vmatpush.msra.mxu1 %v1582_v34  ;;  %2631 = vmatmul.f32.vlgmr.msra.gmra.mxu0 %v3836_v41  ;;  %v403_v6 = vld [vmem:[%s9318_s1 + $0xb30] sm:$0xff] }
 0x2f8   :  { %2695 = vmatpush.msrb.mxu0 %v235_v38  ;;  %2735 = vmatpush.msrb.mxu2 %v363_v39  ;;  %v203_v7 = vld [vmem:[%s9318_s1 + $0x4f0] sm:$0xff] }
 0x2f9   :  { %2715 = vmatpush.msrb.mxu1 %v299_v37  ;;  %2690 = vmatpush.msra.mxu3 %v111_v40  ;;  %v267_v8 = vld [vmem:[%s9318_s1 + $0x6f0] sm:$0xff] }
 0x2fa   :  { %2651 = vmatmul.f32.vlgmr.msra.gmra.mxu1 %v3837_v46  ;;  %2696 = vmatpush.msrb.mxu0 %v231_v42  ;;  %v331_v9 = vld [vmem:[%s9318_s1 + $0x8f0] sm:$0xff] }
 0x2fb   :  { %2716 = vmatpush.msrb.mxu1 %v295_v43  ;;  %2736 = vmatpush.msrb.mxu2 %v359_v44  ;;  %v399_v10 = vld [vmem:[%s9318_s1 + $0xb10] sm:$0xff] }
 0x2fc   :  { %2755 = vmatpush.msrb.mxu3 %v427_v45  ;;  %2697 = vmatpush.msrb.mxu0 %v227_v47  ;;  %v199_v11 = vld [vmem:[%s9318_s1 + $0x4d0] sm:$0xff]  ;;  %v3838_v45 = vld [vmem:[%s9319_s0] sm:$0xff] }
 0x2fd   :  { %2717 = vmatpush.msrb.mxu1 %v291_v48  ;;  %2737 = vmatpush.msrb.mxu2 %v355_v49  ;;  %v263_v12 = vld [vmem:[%s9318_s1 + $0x6d0] sm:$0xff] }
 0x2fe   :  { %2756 = vmatpush.msrb.mxu3 %v423_v50  ;;  %2698 = vmatpush.msrb.mxu0 %v223_v51  ;;  %v327_v13 = vld [vmem:[%s9318_s1 + $0x8d0] sm:$0xff]  ;;  %v3839_v51 = vld [vmem:[%s9319_s0 + $0x8] sm:$0xff] }
 0x2ff   :  { %2718 = vmatpush.msrb.mxu1 %v287_v52  ;;  %2738 = vmatpush.msrb.mxu2 %v351_v53  ;;  %v395_v15 = vld [vmem:[%s9318_s1 + $0xaf0] sm:$0xff] }
 0x300   :  { %2757 = vmatpush.msrb.mxu3 %v419_v54  ;;  %2699 = vmatpush.msrb.mxu0 %v219_v55  ;;  %v195_v16 = vld [vmem:[%s9318_s1 + $0x4b0] sm:$0xff] }
 0x301   :  { %2719 = vmatpush.msrb.mxu1 %v283_v56  ;;  %2739 = vmatpush.msrb.mxu2 %v347_v57  ;;  %v259_v17 = vld [vmem:[%s9318_s1 + $0x6b0] sm:$0xff] }
 0x302   :  { %2758 = vmatpush.msrb.mxu3 %v415_v58  ;;  %2700 = vmatpush.msrb.mxu0 %v215_v59  ;;  %v323_v18 = vld [vmem:[%s9318_s1 + $0x8b0] sm:$0xff] }
 0x303   :  { %2720 = vmatpush.msrb.mxu1 %v279_v60  ;;  %2740 = vmatpush.msrb.mxu2 %v343_v61  ;;  %v391_v19 = vld [vmem:[%s9318_s1 + $0xad0] sm:$0xff] }
 0x304   :  { %2759 = vmatpush.msrb.mxu3 %v411_v62  ;;  %2701 = vmatpush.msrb.mxu0 %v211_v63  ;;  %v191_v20 = vld [vmem:[%s9318_s1 + $0x490] sm:$0xff]  ;;  %v3840_v62 = vld [vmem:[%s9319_s0 + $0x20] sm:$0xff] }
 0x305   :  { %2721 = vmatpush.msrb.mxu1 %v275_v0  ;;  %2741 = vmatpush.msrb.mxu2 %v339_v1  ;;  %v255_v21 = vld [vmem:[%s9318_s1 + $0x690] sm:$0xff] }
 0x306   :  { %2760 = vmatpush.msrb.mxu3 %v407_v2  ;;  %2702 = vmatpush.msrb.mxu0 %v207_v3  ;;  %v319_v22 = vld [vmem:[%s9318_s1 + $0x890] sm:$0xff] }
 0x307   :  { %2722 = vmatpush.msrb.mxu1 %v271_v4  ;;  %2742 = vmatpush.msrb.mxu2 %v335_v5  ;;  %v387_v23 = vld [vmem:[%s9318_s1 + $0xab0] sm:$0xff]  ;;  %v3842_v4 = vld [vmem:[%s9319_s0 + $0x28] sm:$0xff] }
 0x308   :  { %2761 = vmatpush.msrb.mxu3 %v403_v6  ;;  %2703 = vmatpush.msrb.mxu0 %v203_v7  ;;  %v187_v24 = vld [vmem:[%s9318_s1 + $0x470] sm:$0xff] }
 0x309   :  { %2723 = vmatpush.msrb.mxu1 %v267_v8  ;;  %2743 = vmatpush.msrb.mxu2 %v331_v9  ;;  %v251_v25 = vld [vmem:[%s9318_s1 + $0x670] sm:$0xff]  ;;  %v3843_v9 = vld [vmem:[%s9319_s0 + $0x18] sm:$0xff] }
 0x30a   :  { %2762 = vmatpush.msrb.mxu3 %v399_v10  ;;  %2704 = vmatpush.msrb.mxu0 %v199_v11  ;;  %v315_v26 = vld [vmem:[%s9318_s1 + $0x870] sm:$0xff] }
 0x30b   :  { %2724 = vmatpush.msrb.mxu1 %v263_v12  ;;  %2744 = vmatpush.msrb.mxu2 %v327_v13  ;;  %v383_v27 = vld [vmem:[%s9318_s1 + $0xa90] sm:$0xff] }
 0x30c   :  { %2763 = vmatpush.msrb.mxu3 %v395_v15  ;;  %2705 = vmatpush.msrb.mxu0 %v195_v16  ;;  %v183_v28 = vld [vmem:[%s9318_s1 + $0x450] sm:$0xff] }
 0x30d   :  { %2725 = vmatpush.msrb.mxu1 %v259_v17  ;;  %2745 = vmatpush.msrb.mxu2 %v323_v18  ;;  %v247_v29 = vld [vmem:[%s9318_s1 + $0x650] sm:$0xff] }
 0x30e   :  { %2764 = vmatpush.msrb.mxu3 %v391_v19  ;;  %2706 = vmatpush.msrb.mxu0 %v191_v20  ;;  %v311_v30 = vld [vmem:[%s9318_s1 + $0x850] sm:$0xff] }
 0x30f   :  { %2726 = vmatpush.msrb.mxu1 %v255_v21  ;;  %2746 = vmatpush.msrb.mxu2 %v319_v22  ;;  %v379_v31 = vld [vmem:[%s9318_s1 + $0xa70] sm:$0xff] }
 0x310   :  { %2765 = vmatpush.msrb.mxu3 %v387_v23  ;;  %2707 = vmatpush.msrb.mxu0 %v187_v24  ;;  %v179_v32 = vld [vmem:[%s9318_s1 + $0x430] sm:$0xff] }
 0x311   :  { %2727 = vmatpush.msrb.mxu1 %v251_v25  ;;  %2747 = vmatpush.msrb.mxu2 %v315_v26  ;;  %v243_v33 = vld [vmem:[%s9318_s1 + $0x630] sm:$0xff] }
 0x312   :  { %2766 = vmatpush.msrb.mxu3 %v383_v27  ;;  %2708 = vmatpush.msrb.mxu0 %v183_v28  ;;  %v307_v34 = vld [vmem:[%s9318_s1 + $0x830] sm:$0xff] }
 0x313   :  { %2728 = vmatpush.msrb.mxu1 %v247_v29  ;;  %v375_v35 = vld [vmem:[%s9318_s1 + $0xa50] sm:$0xff]  ;;  %2748 = vmatpush.msrb.mxu2 %v311_v30 }
 0x314   :  { %2767 = vmatpush.msrb.mxu3 %v379_v31  ;;  %v175_v36 = vld [vmem:[%s9318_s1 + $0x410] sm:$0xff]  ;;  %2709 = vmatpush.msrb.mxu0 %v179_v32 }
 0x315   :  { %v239_v37 = vld [vmem:[%s9318_s1 + $0x610] sm:$0xff]  ;;  %2729 = vmatpush.msrb.mxu1 %v243_v33  ;;  %2749 = vmatpush.msrb.mxu2 %v307_v34 }
 0x316   :  { %v303_v38 = vld [vmem:[%s9318_s1 + $0x810] sm:$0xff]  ;;  %2768 = vmatpush.msrb.mxu3 %v375_v35  ;;  %2710 = vmatpush.msrb.mxu0 %v175_v36 }
 0x317   :  { %v371_v39 = vld [vmem:[%s9318_s1 + $0xa30] sm:$0xff]  ;;  %2730 = vmatpush.msrb.mxu1 %v239_v37  ;;  %2750 = vmatpush.msrb.mxu2 %v303_v38 }
 0x318   :  { %v491_v40 = vld [vmem:[%s9318_s1 + $0xdf0] sm:$0xff]  ;;  %2769 = vmatpush.msrb.mxu3 %v371_v39  ;;  %2671 = vmatmul.f32.vlgmr.msra.gmra.mxu2 %v3838_v45 }
 0x319   :  { %v555_v41 = vld [vmem:[%s9318_s1 + $0xff0] sm:$0xff]  ;;  %2775 = vmatpush.msra.mxu0 %v491_v40  ;;  %2691 = vmatmul.f32.vlgmr.msra.gmra.mxu3 %v3839_v51 }
 0x31a   :  { %v619_v42 = vld [vmem:[%s9318_s1 + $0x11f0] sm:$0xff]  ;;  %2795 = vmatpush.msra.mxu1 %v555_v41 }
 0x31b   :  { %v367_v43 = vld [vmem:[%s9318_s1 + $0xa10] sm:$0xff]  ;;  %2815 = vmatpush.msra.mxu2 %v619_v42  ;;  %2731 = vmatmul.f32.vlgmr.msrb.gmra.mxu1 %v3843_v9 }
 0x31c   :  { %v487_v44 = vld [vmem:[%s9318_s1 + $0xdd0] sm:$0xff]  ;;  %2770 = vmatpush.msrb.mxu3 %v367_v43 }
 0x31d   :  { %v551_v46 = vld [vmem:[%s9318_s1 + $0xfd0] sm:$0xff]  ;;  %2776 = vmatpush.msra.mxu0 %v487_v44 }
 0x31e   :  { %v615_v47 = vld [vmem:[%s9318_s1 + $0x11d0] sm:$0xff]  ;;  %2796 = vmatpush.msra.mxu1 %v551_v46 }
 0x31f   :  { %v683_v48 = vld [vmem:[%s9318_s1 + $0x13f0] sm:$0xff]  ;;  %2816 = vmatpush.msra.mxu2 %v615_v47 }
 0x320   :  { %v483_v49 = vld [vmem:[%s9318_s1 + $0xdb0] sm:$0xff]  ;;  %2835 = vmatpush.msra.mxu3 %v683_v48  ;;  %2751 = vmatmul.f32.vlgmr.msrb.gmra.mxu2 %v3840_v62 }
 0x321   :  { %v547_v50 = vld [vmem:[%s9318_s1 + $0xfb0] sm:$0xff]  ;;  %2777 = vmatpush.msra.mxu0 %v483_v49  ;;  %2771 = vmatmul.f32.vlgmr.msrb.gmra.mxu3 %v3842_v4 }
 0x322   :  { %v611_v52 = vld [vmem:[%s9318_s1 + $0x11b0] sm:$0xff]  ;;  %2797 = vmatpush.msra.mxu1 %v547_v50 }
 0x323   :  { %v679_v53 = vld [vmem:[%s9318_s1 + $0x13d0] sm:$0xff]  ;;  %2817 = vmatpush.msra.mxu2 %v611_v52  ;;  %v3845_v52 = vld [vmem:[%s9319_s0 + $0x40] sm:$0xff] }
 0x324   :  { %v479_v54 = vld [vmem:[%s9318_s1 + $0xd90] sm:$0xff]  ;;  %2836 = vmatpush.msra.mxu3 %v679_v53 }
 0x325   :  { %v543_v55 = vld [vmem:[%s9318_s1 + $0xf90] sm:$0xff]  ;;  %2778 = vmatpush.msra.mxu0 %v479_v54 }
 0x326   :  { %v607_v56 = vld [vmem:[%s9318_s1 + $0x1190] sm:$0xff]  ;;  %2798 = vmatpush.msra.mxu1 %v543_v55 }
 0x327   :  { %v675_v57 = vld [vmem:[%s9318_s1 + $0x13b0] sm:$0xff]  ;;  %2818 = vmatpush.msra.mxu2 %v607_v56 }
 0x328   :  { %v475_v58 = vld [vmem:[%s9318_s1 + $0xd70] sm:$0xff]  ;;  %2837 = vmatpush.msra.mxu3 %v675_v57  ;;  %v3846_v57 = vld [vmem:[%s9319_s0 + $0x38] sm:$0xff] }
 0x329   :  { %v539_v59 = vld [vmem:[%s9318_s1 + $0xf70] sm:$0xff]  ;;  %2779 = vmatpush.msra.mxu0 %v475_v58  ;;  %v3847_v58 = vld [vmem:[%s9319_s0 + $0x48] sm:$0xff] }
 0x32a   :  { %v603_v60 = vld [vmem:[%s9318_s1 + $0x1170] sm:$0xff]  ;;  %2799 = vmatpush.msra.mxu1 %v539_v59 }
 0x32b   :  { %v671_v61 = vld [vmem:[%s9318_s1 + $0x1390] sm:$0xff]  ;;  %2819 = vmatpush.msra.mxu2 %v603_v60 }
 0x32c   :  { %v471_v63 = vld [vmem:[%s9318_s1 + $0xd50] sm:$0xff]  ;;  %2838 = vmatpush.msra.mxu3 %v671_v61 }
 0x32d   :  { %v535_v0 = vld [vmem:[%s9318_s1 + $0xf50] sm:$0xff]  ;;  %2780 = vmatpush.msra.mxu0 %v471_v63 }
 0x32e   :  { %v599_v1 = vld [vmem:[%s9318_s1 + $0x1150] sm:$0xff]  ;;  %2800 = vmatpush.msra.mxu1 %v535_v0 }
 0x32f   :  { %v3841_v2 = vld [vmem:[%s9319_s0 + $0x10] sm:$0xff]  ;;  %2820 = vmatpush.msra.mxu2 %v599_v1 }
 0x330   :  { %2711 = vmatmul.f32.vlgmr.msrb.gmra.mxu0 %v3841_v2  ;;  %v667_v3 = vld [vmem:[%s9318_s1 + $0x1370] sm:$0xff] }
 0x331   :  { %v467_v5 = vld [vmem:[%s9318_s1 + $0xd30] sm:$0xff]  ;;  %2839 = vmatpush.msra.mxu3 %v667_v3 }
 0x332   :  { %v531_v6 = vld [vmem:[%s9318_s1 + $0xf30] sm:$0xff]  ;;  %2781 = vmatpush.msra.mxu0 %v467_v5 }
 0x333   :  { %v595_v7 = vld [vmem:[%s9318_s1 + $0x1130] sm:$0xff]  ;;  %2801 = vmatpush.msra.mxu1 %v531_v6 }
 0x334   :  { %v663_v8 = vld [vmem:[%s9318_s1 + $0x1350] sm:$0xff]  ;;  %2821 = vmatpush.msra.mxu2 %v595_v7 }
 0x335   :  { %v463_v10 = vld [vmem:[%s9318_s1 + $0xd10] sm:$0xff]  ;;  %2840 = vmatpush.msra.mxu3 %v663_v8 }
 0x336   :  { %v527_v11 = vld [vmem:[%s9318_s1 + $0xf10] sm:$0xff]  ;;  %2782 = vmatpush.msra.mxu0 %v463_v10 }
 0x337   :  { %v591_v12 = vld [vmem:[%s9318_s1 + $0x1110] sm:$0xff]  ;;  %2802 = vmatpush.msra.mxu1 %v527_v11 }
 0x338   :  { %v659_v13 = vld [vmem:[%s9318_s1 + $0x1330] sm:$0xff]  ;;  %2822 = vmatpush.msra.mxu2 %v591_v12 }
 0x339   :  { %v459_v15 = vld [vmem:[%s9318_s1 + $0xcf0] sm:$0xff]  ;;  %2841 = vmatpush.msra.mxu3 %v659_v13 }
 0x33a   :  { %v523_v16 = vld [vmem:[%s9318_s1 + $0xef0] sm:$0xff]  ;;  %2783 = vmatpush.msra.mxu0 %v459_v15 }
 0x33b   :  { %v587_v17 = vld [vmem:[%s9318_s1 + $0x10f0] sm:$0xff]  ;;  %2803 = vmatpush.msra.mxu1 %v523_v16 }
 0x33c   :  { %v655_v18 = vld [vmem:[%s9318_s1 + $0x1310] sm:$0xff]  ;;  %2823 = vmatpush.msra.mxu2 %v587_v17 }
 0x33d   :  { %v455_v19 = vld [vmem:[%s9318_s1 + $0xcd0] sm:$0xff]  ;;  %2842 = vmatpush.msra.mxu3 %v655_v18 }
 0x33e   :  { %v519_v20 = vld [vmem:[%s9318_s1 + $0xed0] sm:$0xff]  ;;  %2784 = vmatpush.msra.mxu0 %v455_v19 }
 0x33f   :  { %v583_v21 = vld [vmem:[%s9318_s1 + $0x10d0] sm:$0xff]  ;;  %2804 = vmatpush.msra.mxu1 %v519_v20 }
 0x340   :  { %v651_v22 = vld [vmem:[%s9318_s1 + $0x12f0] sm:$0xff]  ;;  %2824 = vmatpush.msra.mxu2 %v583_v21 }
 0x341   :  { %v451_v23 = vld [vmem:[%s9318_s1 + $0xcb0] sm:$0xff]  ;;  %2843 = vmatpush.msra.mxu3 %v651_v22 }
 0x342   :  { %v515_v24 = vld [vmem:[%s9318_s1 + $0xeb0] sm:$0xff]  ;;  %2785 = vmatpush.msra.mxu0 %v451_v23 }
 0x343   :  { %v579_v25 = vld [vmem:[%s9318_s1 + $0x10b0] sm:$0xff]  ;;  %2805 = vmatpush.msra.mxu1 %v515_v24 }
 0x344   :  { %v647_v26 = vld [vmem:[%s9318_s1 + $0x12d0] sm:$0xff]  ;;  %2825 = vmatpush.msra.mxu2 %v579_v25 }
 0x345   :  { %v447_v27 = vld [vmem:[%s9318_s1 + $0xc90] sm:$0xff]  ;;  %2844 = vmatpush.msra.mxu3 %v647_v26 }
 0x346   :  { %v511_v28 = vld [vmem:[%s9318_s1 + $0xe90] sm:$0xff]  ;;  %2786 = vmatpush.msra.mxu0 %v447_v27 }
 0x347   :  { %v575_v29 = vld [vmem:[%s9318_s1 + $0x1090] sm:$0xff]  ;;  %2806 = vmatpush.msra.mxu1 %v511_v28 }
 0x348   :  { %v643_v30 = vld [vmem:[%s9318_s1 + $0x12b0] sm:$0xff]  ;;  %2826 = vmatpush.msra.mxu2 %v575_v29 }
 0x349   :  { %v443_v31 = vld [vmem:[%s9318_s1 + $0xc70] sm:$0xff]  ;;  %2845 = vmatpush.msra.mxu3 %v643_v30 }
 0x34a   :  { %v507_v32 = vld [vmem:[%s9318_s1 + $0xe70] sm:$0xff]  ;;  %2787 = vmatpush.msra.mxu0 %v443_v31 }
 0x34b   :  { %v571_v33 = vld [vmem:[%s9318_s1 + $0x1070] sm:$0xff]  ;;  %2807 = vmatpush.msra.mxu1 %v507_v32 }
 0x34c   :  { %v639_v34 = vld [vmem:[%s9318_s1 + $0x1290] sm:$0xff]  ;;  %2827 = vmatpush.msra.mxu2 %v571_v33 }
 0x34d   :  { %v439_v35 = vld [vmem:[%s9318_s1 + $0xc50] sm:$0xff]  ;;  %2846 = vmatpush.msra.mxu3 %v639_v34 }
 0x34e   :  { %v503_v36 = vld [vmem:[%s9318_s1 + $0xe50] sm:$0xff]  ;;  %2788 = vmatpush.msra.mxu0 %v439_v35 }
 0x34f   :  { %v567_v37 = vld [vmem:[%s9318_s1 + $0x1050] sm:$0xff]  ;;  %2808 = vmatpush.msra.mxu1 %v503_v36 }
 0x350   :  { %v635_v38 = vld [vmem:[%s9318_s1 + $0x1270] sm:$0xff]  ;;  %2828 = vmatpush.msra.mxu2 %v567_v37 }
 0x351   :  { %v435_v39 = vld [vmem:[%s9318_s1 + $0xc30] sm:$0xff]  ;;  %2847 = vmatpush.msra.mxu3 %v635_v38 }
 0x352   :  { %v499_v40 = vld [vmem:[%s9318_s1 + $0xe30] sm:$0xff]  ;;  %2789 = vmatpush.msra.mxu0 %v435_v39 }
 0x353   :  { %v563_v41 = vld [vmem:[%s9318_s1 + $0x1030] sm:$0xff]  ;;  %2809 = vmatpush.msra.mxu1 %v499_v40 }
 0x354   :  { %v631_v42 = vld [vmem:[%s9318_s1 + $0x1250] sm:$0xff]  ;;  %2829 = vmatpush.msra.mxu2 %v563_v41 }
 0x355   :  { %v431_v43 = vld [vmem:[%s9318_s1 + $0xc10] sm:$0xff]  ;;  %2848 = vmatpush.msra.mxu3 %v631_v42 }
 0x356   :  { %v495_v44 = vld [vmem:[%s9318_s1 + $0xe10] sm:$0xff]  ;;  %2790 = vmatpush.msra.mxu0 %v431_v43 }
 0x357   :  { %v559_v45 = vld [vmem:[%s9318_s1 + $0x1010] sm:$0xff]  ;;  %2810 = vmatpush.msra.mxu1 %v495_v44 }
 0x358   :  { %v627_v46 = vld [vmem:[%s9318_s1 + $0x1230] sm:$0xff]  ;;  %2830 = vmatpush.msra.mxu2 %v559_v45  ;;  %2811 = vmatmul.f32.vlgmr.msra.gmra.mxu1 %v3846_v57  ;;  %v3849_v57 = vld [vmem:[%s9319_s0 + $0x60] sm:$0xff] }
 0x359   :  { %v747_v47 = vld [vmem:[%s9318_s1 + $0x15f0] sm:$0xff]  ;;  %2849 = vmatpush.msra.mxu3 %v627_v46  ;;  %2831 = vmatmul.f32.vlgmr.msra.gmra.mxu2 %v3845_v52 }
 0x35a   :  { %v811_v48 = vld [vmem:[%s9318_s1 + $0x17f0] sm:$0xff]  ;;  %2855 = vmatpush.msrb.mxu0 %v747_v47 }
 0x35b   :  { %v875_v49 = vld [vmem:[%s9318_s1 + $0x19f0] sm:$0xff]  ;;  %2875 = vmatpush.msrb.mxu1 %v811_v48 }
 0x35c   :  { %v623_v50 = vld [vmem:[%s9318_s1 + $0x1210] sm:$0xff]  ;;  %2895 = vmatpush.msrb.mxu2 %v875_v49 }
 0x35d   :  { %v3844_v51 = vld [vmem:[%s9319_s0 + $0x30] sm:$0xff]  ;;  %2850 = vmatpush.msra.mxu3 %v623_v50 }
 0x35e   :  { %2791 = vmatmul.f32.vlgmr.msra.gmra.mxu0 %v3844_v51  ;;  %v743_v53 = vld [vmem:[%s9318_s1 + $0x15d0] sm:$0xff]  ;;  %2851 = vmatmul.f32.vlgmr.msra.gmra.mxu3 %v3847_v58 }
 0x35f   :  { %v807_v54 = vld [vmem:[%s9318_s1 + $0x17d0] sm:$0xff]  ;;  %2856 = vmatpush.msrb.mxu0 %v743_v53 }
 0x360   :  { %v871_v55 = vld [vmem:[%s9318_s1 + $0x19d0] sm:$0xff]  ;;  %2876 = vmatpush.msrb.mxu1 %v807_v54 }
 0x361   :  { %v939_v56 = vld [vmem:[%s9318_s1 + $0x1bf0] sm:$0xff]  ;;  %2896 = vmatpush.msrb.mxu2 %v871_v55 }
 0x362   :  { %v739_v59 = vld [vmem:[%s9318_s1 + $0x15b0] sm:$0xff]  ;;  %2915 = vmatpush.msrb.mxu3 %v939_v56 }
 0x363   :  { %v803_v60 = vld [vmem:[%s9318_s1 + $0x17b0] sm:$0xff]  ;;  %2857 = vmatpush.msrb.mxu0 %v739_v59 }
 0x364   :  { %v867_v61 = vld [vmem:[%s9318_s1 + $0x19b0] sm:$0xff]  ;;  %2877 = vmatpush.msrb.mxu1 %v803_v60 }
 0x365   :  { %v935_v62 = vld [vmem:[%s9318_s1 + $0x1bd0] sm:$0xff]  ;;  %2897 = vmatpush.msrb.mxu2 %v867_v61 }
 0x366   :  { %v735_v63 = vld [vmem:[%s9318_s1 + $0x1590] sm:$0xff]  ;;  %2916 = vmatpush.msrb.mxu3 %v935_v62  ;;  %v3850_v62 = vld [vmem:[%s9319_s0 + $0x58] sm:$0xff] }
 0x367   :  { %v799_v0 = vld [vmem:[%s9318_s1 + $0x1790] sm:$0xff]  ;;  %2858 = vmatpush.msrb.mxu0 %v735_v63  ;;  %v3851_v63 = vld [vmem:[%s9319_s0 + $0x68] sm:$0xff] }
 0x368   :  { %v863_v1 = vld [vmem:[%s9318_s1 + $0x1990] sm:$0xff]  ;;  %2878 = vmatpush.msrb.mxu1 %v799_v0 }
 0x369   :  { %v931_v2 = vld [vmem:[%s9318_s1 + $0x1bb0] sm:$0xff]  ;;  %2898 = vmatpush.msrb.mxu2 %v863_v1 }
 0x36a   :  { %v731_v3 = vld [vmem:[%s9318_s1 + $0x1570] sm:$0xff]  ;;  %2917 = vmatpush.msrb.mxu3 %v931_v2 }
 0x36b   :  { %v795_v4 = vld [vmem:[%s9318_s1 + $0x1770] sm:$0xff]  ;;  %2859 = vmatpush.msrb.mxu0 %v731_v3 }
 0x36c   :  { %v859_v5 = vld [vmem:[%s9318_s1 + $0x1970] sm:$0xff]  ;;  %2879 = vmatpush.msrb.mxu1 %v795_v4 }
 0x36d   :  { %v927_v6 = vld [vmem:[%s9318_s1 + $0x1b90] sm:$0xff]  ;;  %2899 = vmatpush.msrb.mxu2 %v859_v5 }
 0x36e   :  { %v727_v7 = vld [vmem:[%s9318_s1 + $0x1550] sm:$0xff]  ;;  %2918 = vmatpush.msrb.mxu3 %v927_v6 }
 0x36f   :  { %v791_v8 = vld [vmem:[%s9318_s1 + $0x1750] sm:$0xff]  ;;  %2860 = vmatpush.msrb.mxu0 %v727_v7 }
 0x370   :  { %v855_v9 = vld [vmem:[%s9318_s1 + $0x1950] sm:$0xff]  ;;  %2880 = vmatpush.msrb.mxu1 %v791_v8 }
 0x371   :  { %v923_v10 = vld [vmem:[%s9318_s1 + $0x1b70] sm:$0xff]  ;;  %2900 = vmatpush.msrb.mxu2 %v855_v9 }
 0x372   :  { %v723_v11 = vld [vmem:[%s9318_s1 + $0x1530] sm:$0xff]  ;;  %2919 = vmatpush.msrb.mxu3 %v923_v10 }
 0x373   :  { %v787_v12 = vld [vmem:[%s9318_s1 + $0x1730] sm:$0xff]  ;;  %2861 = vmatpush.msrb.mxu0 %v723_v11 }
 0x374   :  { %v851_v13 = vld [vmem:[%s9318_s1 + $0x1930] sm:$0xff]  ;;  %2881 = vmatpush.msrb.mxu1 %v787_v12 }
 0x375   :  { %v919_v15 = vld [vmem:[%s9318_s1 + $0x1b50] sm:$0xff]  ;;  %2901 = vmatpush.msrb.mxu2 %v851_v13 }
 0x376   :  { %v719_v16 = vld [vmem:[%s9318_s1 + $0x1510] sm:$0xff]  ;;  %2920 = vmatpush.msrb.mxu3 %v919_v15 }
 0x377   :  { %v783_v17 = vld [vmem:[%s9318_s1 + $0x1710] sm:$0xff]  ;;  %2862 = vmatpush.msrb.mxu0 %v719_v16 }
 0x378   :  { %v847_v18 = vld [vmem:[%s9318_s1 + $0x1910] sm:$0xff]  ;;  %2882 = vmatpush.msrb.mxu1 %v783_v17 }
 0x379   :  { %v915_v19 = vld [vmem:[%s9318_s1 + $0x1b30] sm:$0xff]  ;;  %2902 = vmatpush.msrb.mxu2 %v847_v18 }
 0x37a   :  { %v715_v20 = vld [vmem:[%s9318_s1 + $0x14f0] sm:$0xff]  ;;  %2921 = vmatpush.msrb.mxu3 %v915_v19 }
 0x37b   :  { %v779_v21 = vld [vmem:[%s9318_s1 + $0x16f0] sm:$0xff]  ;;  %2863 = vmatpush.msrb.mxu0 %v715_v20 }
 0x37c   :  { %v843_v22 = vld [vmem:[%s9318_s1 + $0x18f0] sm:$0xff]  ;;  %2883 = vmatpush.msrb.mxu1 %v779_v21 }
 0x37d   :  { %v911_v23 = vld [vmem:[%s9318_s1 + $0x1b10] sm:$0xff]  ;;  %2903 = vmatpush.msrb.mxu2 %v843_v22 }
 0x37e   :  { %v711_v24 = vld [vmem:[%s9318_s1 + $0x14d0] sm:$0xff]  ;;  %2922 = vmatpush.msrb.mxu3 %v911_v23 }
 0x37f   :  { %v775_v25 = vld [vmem:[%s9318_s1 + $0x16d0] sm:$0xff]  ;;  %2864 = vmatpush.msrb.mxu0 %v711_v24 }
 0x380   :  { %v839_v26 = vld [vmem:[%s9318_s1 + $0x18d0] sm:$0xff]  ;;  %2884 = vmatpush.msrb.mxu1 %v775_v25 }
 0x381   :  { %v907_v27 = vld [vmem:[%s9318_s1 + $0x1af0] sm:$0xff]  ;;  %2904 = vmatpush.msrb.mxu2 %v839_v26 }
 0x382   :  { %v707_v28 = vld [vmem:[%s9318_s1 + $0x14b0] sm:$0xff]  ;;  %2923 = vmatpush.msrb.mxu3 %v907_v27 }
 0x383   :  { %v771_v29 = vld [vmem:[%s9318_s1 + $0x16b0] sm:$0xff]  ;;  %2865 = vmatpush.msrb.mxu0 %v707_v28 }
 0x384   :  { %v835_v30 = vld [vmem:[%s9318_s1 + $0x18b0] sm:$0xff]  ;;  %2885 = vmatpush.msrb.mxu1 %v771_v29 }
 0x385   :  { %v903_v31 = vld [vmem:[%s9318_s1 + $0x1ad0] sm:$0xff]  ;;  %2905 = vmatpush.msrb.mxu2 %v835_v30 }
 0x386   :  { %v703_v32 = vld [vmem:[%s9318_s1 + $0x1490] sm:$0xff]  ;;  %2924 = vmatpush.msrb.mxu3 %v903_v31 }
 0x387   :  { %v767_v33 = vld [vmem:[%s9318_s1 + $0x1690] sm:$0xff]  ;;  %2866 = vmatpush.msrb.mxu0 %v703_v32 }
 0x388   :  { %v831_v34 = vld [vmem:[%s9318_s1 + $0x1890] sm:$0xff]  ;;  %2886 = vmatpush.msrb.mxu1 %v767_v33 }
 0x389   :  { %v899_v35 = vld [vmem:[%s9318_s1 + $0x1ab0] sm:$0xff]  ;;  %2906 = vmatpush.msrb.mxu2 %v831_v34 }
 0x38a   :  { %v699_v36 = vld [vmem:[%s9318_s1 + $0x1470] sm:$0xff]  ;;  %2925 = vmatpush.msrb.mxu3 %v899_v35 }
 0x38b   :  { %v763_v37 = vld [vmem:[%s9318_s1 + $0x1670] sm:$0xff]  ;;  %2867 = vmatpush.msrb.mxu0 %v699_v36 }
 0x38c   :  { %v827_v38 = vld [vmem:[%s9318_s1 + $0x1870] sm:$0xff]  ;;  %2887 = vmatpush.msrb.mxu1 %v763_v37 }
 0x38d   :  { %v895_v39 = vld [vmem:[%s9318_s1 + $0x1a90] sm:$0xff]  ;;  %2907 = vmatpush.msrb.mxu2 %v827_v38 }
 0x38e   :  { %v695_v40 = vld [vmem:[%s9318_s1 + $0x1450] sm:$0xff]  ;;  %2926 = vmatpush.msrb.mxu3 %v895_v39 }
 0x38f   :  { %v759_v41 = vld [vmem:[%s9318_s1 + $0x1650] sm:$0xff]  ;;  %2868 = vmatpush.msrb.mxu0 %v695_v40 }
 0x390   :  { %v823_v42 = vld [vmem:[%s9318_s1 + $0x1850] sm:$0xff]  ;;  %2888 = vmatpush.msrb.mxu1 %v759_v41 }
 0x391   :  { %v891_v43 = vld [vmem:[%s9318_s1 + $0x1a70] sm:$0xff]  ;;  %2908 = vmatpush.msrb.mxu2 %v823_v42 }
 0x392   :  { %v691_v44 = vld [vmem:[%s9318_s1 + $0x1430] sm:$0xff]  ;;  %2927 = vmatpush.msrb.mxu3 %v891_v43 }
 0x393   :  { %v755_v45 = vld [vmem:[%s9318_s1 + $0x1630] sm:$0xff]  ;;  %2869 = vmatpush.msrb.mxu0 %v691_v44 }
 0x394   :  { %v819_v46 = vld [vmem:[%s9318_s1 + $0x1830] sm:$0xff]  ;;  %2889 = vmatpush.msrb.mxu1 %v755_v45 }
 0x395   :  { %v887_v47 = vld [vmem:[%s9318_s1 + $0x1a50] sm:$0xff]  ;;  %2909 = vmatpush.msrb.mxu2 %v819_v46 }
 0x396   :  { %v687_v48 = vld [vmem:[%s9318_s1 + $0x1410] sm:$0xff]  ;;  %2928 = vmatpush.msrb.mxu3 %v887_v47 }
 0x397   :  { %v751_v49 = vld [vmem:[%s9318_s1 + $0x1610] sm:$0xff]  ;;  %2870 = vmatpush.msrb.mxu0 %v687_v48 }
 0x398   :  { %v815_v50 = vld [vmem:[%s9318_s1 + $0x1810] sm:$0xff]  ;;  %2890 = vmatpush.msrb.mxu1 %v751_v49 }
 0x399   :  { %v883_v51 = vld [vmem:[%s9318_s1 + $0x1a30] sm:$0xff]  ;;  %2910 = vmatpush.msrb.mxu2 %v815_v50  ;;  %2891 = vmatmul.f32.vlgmr.msrb.gmra.mxu1 %v3850_v62  ;;  %v3853_v62 = vld [vmem:[%s9319_s0 + $0x80] sm:$0xff] }
 0x39a   :  { %v1003_v52 = vld [vmem:[%s9318_s1 + $0x1df0] sm:$0xff]  ;;  %2929 = vmatpush.msrb.mxu3 %v883_v51  ;;  %2911 = vmatmul.f32.vlgmr.msrb.gmra.mxu2 %v3849_v57 }
 0x39b   :  { %v1067_v53 = vld [vmem:[%s9318_s1 + $0x1ff0] sm:$0xff]  ;;  %2935 = vmatpush.msra.mxu0 %v1003_v52 }
 0x39c   :  { %v1131_v54 = vld [vmem:[%s9318_s1 + $0x21f0] sm:$0xff]  ;;  %2955 = vmatpush.msra.mxu1 %v1067_v53 }
 0x39d   :  { %v879_v55 = vld [vmem:[%s9318_s1 + $0x1a10] sm:$0xff]  ;;  %2975 = vmatpush.msra.mxu2 %v1131_v54 }
 0x39e   :  { %v3848_v56 = vld [vmem:[%s9319_s0 + $0x50] sm:$0xff]  ;;  %2930 = vmatpush.msrb.mxu3 %v879_v55 }
 0x39f   :  { %2871 = vmatmul.f32.vlgmr.msrb.gmra.mxu0 %v3848_v56  ;;  %v999_v58 = vld [vmem:[%s9318_s1 + $0x1dd0] sm:$0xff]  ;;  %2931 = vmatmul.f32.vlgmr.msrb.gmra.mxu3 %v3851_v63 }
 0x3a0   :  { %v1063_v59 = vld [vmem:[%s9318_s1 + $0x1fd0] sm:$0xff]  ;;  %2936 = vmatpush.msra.mxu0 %v999_v58 }
 0x3a1   :  { %v1127_v60 = vld [vmem:[%s9318_s1 + $0x21d0] sm:$0xff]  ;;  %2956 = vmatpush.msra.mxu1 %v1063_v59 }
 0x3a2   :  { %v1195_v61 = vld [vmem:[%s9318_s1 + $0x23f0] sm:$0xff]  ;;  %2976 = vmatpush.msra.mxu2 %v1127_v60 }
 0x3a3   :  { %v995_v0 = vld [vmem:[%s9318_s1 + $0x1db0] sm:$0xff]  ;;  %2995 = vmatpush.msra.mxu3 %v1195_v61 }
 0x3a4   :  { %v1059_v1 = vld [vmem:[%s9318_s1 + $0x1fb0] sm:$0xff]  ;;  %2937 = vmatpush.msra.mxu0 %v995_v0 }
 0x3a5   :  { %v1123_v2 = vld [vmem:[%s9318_s1 + $0x21b0] sm:$0xff]  ;;  %2957 = vmatpush.msra.mxu1 %v1059_v1 }
 0x3a6   :  { %v1191_v3 = vld [vmem:[%s9318_s1 + $0x23d0] sm:$0xff]  ;;  %2977 = vmatpush.msra.mxu2 %v1123_v2 }
 0x3a7   :  { %v991_v4 = vld [vmem:[%s9318_s1 + $0x1d90] sm:$0xff]  ;;  %2996 = vmatpush.msra.mxu3 %v1191_v3  ;;  %v3854_v3 = vld [vmem:[%s9319_s0 + $0x78] sm:$0xff] }
 0x3a8   :  { %v1055_v5 = vld [vmem:[%s9318_s1 + $0x1f90] sm:$0xff]  ;;  %2938 = vmatpush.msra.mxu0 %v991_v4  ;;  %v3855_v4 = vld [vmem:[%s9319_s0 + $0x88] sm:$0xff] }
 0x3a9   :  { %v1119_v6 = vld [vmem:[%s9318_s1 + $0x2190] sm:$0xff]  ;;  %2958 = vmatpush.msra.mxu1 %v1055_v5 }
 0x3aa   :  { %v1187_v7 = vld [vmem:[%s9318_s1 + $0x23b0] sm:$0xff]  ;;  %2978 = vmatpush.msra.mxu2 %v1119_v6 }
 0x3ab   :  { %v987_v8 = vld [vmem:[%s9318_s1 + $0x1d70] sm:$0xff]  ;;  %2997 = vmatpush.msra.mxu3 %v1187_v7 }
 0x3ac   :  { %v1051_v9 = vld [vmem:[%s9318_s1 + $0x1f70] sm:$0xff]  ;;  %2939 = vmatpush.msra.mxu0 %v987_v8 }
 0x3ad   :  { %v1115_v10 = vld [vmem:[%s9318_s1 + $0x2170] sm:$0xff]  ;;  %2959 = vmatpush.msra.mxu1 %v1051_v9 }
 0x3ae   :  { %v1183_v11 = vld [vmem:[%s9318_s1 + $0x2390] sm:$0xff]  ;;  %2979 = vmatpush.msra.mxu2 %v1115_v10 }
 0x3af   :  { %v983_v12 = vld [vmem:[%s9318_s1 + $0x1d50] sm:$0xff]  ;;  %2998 = vmatpush.msra.mxu3 %v1183_v11 }
 0x3b0   :  { %v1047_v13 = vld [vmem:[%s9318_s1 + $0x1f50] sm:$0xff]  ;;  %2940 = vmatpush.msra.mxu0 %v983_v12 }
 0x3b1   :  { %v1111_v15 = vld [vmem:[%s9318_s1 + $0x2150] sm:$0xff]  ;;  %2960 = vmatpush.msra.mxu1 %v1047_v13 }
 0x3b2   :  { %v1179_v16 = vld [vmem:[%s9318_s1 + $0x2370] sm:$0xff]  ;;  %2980 = vmatpush.msra.mxu2 %v1111_v15 }
 0x3b3   :  { %v979_v17 = vld [vmem:[%s9318_s1 + $0x1d30] sm:$0xff]  ;;  %2999 = vmatpush.msra.mxu3 %v1179_v16 }
 0x3b4   :  { %v1043_v18 = vld [vmem:[%s9318_s1 + $0x1f30] sm:$0xff]  ;;  %2941 = vmatpush.msra.mxu0 %v979_v17 }
 0x3b5   :  { %v1107_v19 = vld [vmem:[%s9318_s1 + $0x2130] sm:$0xff]  ;;  %2961 = vmatpush.msra.mxu1 %v1043_v18 }
 0x3b6   :  { %v1175_v20 = vld [vmem:[%s9318_s1 + $0x2350] sm:$0xff]  ;;  %2981 = vmatpush.msra.mxu2 %v1107_v19 }
 0x3b7   :  { %v975_v21 = vld [vmem:[%s9318_s1 + $0x1d10] sm:$0xff]  ;;  %3000 = vmatpush.msra.mxu3 %v1175_v20 }
 0x3b8   :  { %v1039_v22 = vld [vmem:[%s9318_s1 + $0x1f10] sm:$0xff]  ;;  %2942 = vmatpush.msra.mxu0 %v975_v21 }
 0x3b9   :  { %v1103_v23 = vld [vmem:[%s9318_s1 + $0x2110] sm:$0xff]  ;;  %2962 = vmatpush.msra.mxu1 %v1039_v22 }
 0x3ba   :  { %v1171_v24 = vld [vmem:[%s9318_s1 + $0x2330] sm:$0xff]  ;;  %2982 = vmatpush.msra.mxu2 %v1103_v23 }
 0x3bb   :  { %v971_v25 = vld [vmem:[%s9318_s1 + $0x1cf0] sm:$0xff]  ;;  %3001 = vmatpush.msra.mxu3 %v1171_v24 }
 0x3bc   :  { %v1035_v26 = vld [vmem:[%s9318_s1 + $0x1ef0] sm:$0xff]  ;;  %2943 = vmatpush.msra.mxu0 %v971_v25 }
 0x3bd   :  { %v1099_v27 = vld [vmem:[%s9318_s1 + $0x20f0] sm:$0xff]  ;;  %2963 = vmatpush.msra.mxu1 %v1035_v26 }
 0x3be   :  { %v1167_v28 = vld [vmem:[%s9318_s1 + $0x2310] sm:$0xff]  ;;  %2983 = vmatpush.msra.mxu2 %v1099_v27 }
 0x3bf   :  { %v967_v29 = vld [vmem:[%s9318_s1 + $0x1cd0] sm:$0xff]  ;;  %3002 = vmatpush.msra.mxu3 %v1167_v28 }
 0x3c0   :  { %v1031_v30 = vld [vmem:[%s9318_s1 + $0x1ed0] sm:$0xff]  ;;  %2944 = vmatpush.msra.mxu0 %v967_v29 }
 0x3c1   :  { %v1095_v31 = vld [vmem:[%s9318_s1 + $0x20d0] sm:$0xff]  ;;  %2964 = vmatpush.msra.mxu1 %v1031_v30 }
 0x3c2   :  { %v1163_v32 = vld [vmem:[%s9318_s1 + $0x22f0] sm:$0xff]  ;;  %2984 = vmatpush.msra.mxu2 %v1095_v31 }
 0x3c3   :  { %v963_v33 = vld [vmem:[%s9318_s1 + $0x1cb0] sm:$0xff]  ;;  %3003 = vmatpush.msra.mxu3 %v1163_v32 }
 0x3c4   :  { %v1027_v34 = vld [vmem:[%s9318_s1 + $0x1eb0] sm:$0xff]  ;;  %2945 = vmatpush.msra.mxu0 %v963_v33 }
 0x3c5   :  { %v1091_v35 = vld [vmem:[%s9318_s1 + $0x20b0] sm:$0xff]  ;;  %2965 = vmatpush.msra.mxu1 %v1027_v34 }
 0x3c6   :  { %v1159_v36 = vld [vmem:[%s9318_s1 + $0x22d0] sm:$0xff]  ;;  %2985 = vmatpush.msra.mxu2 %v1091_v35 }
 0x3c7   :  { %v959_v37 = vld [vmem:[%s9318_s1 + $0x1c90] sm:$0xff]  ;;  %3004 = vmatpush.msra.mxu3 %v1159_v36 }
 0x3c8   :  { %v1023_v38 = vld [vmem:[%s9318_s1 + $0x1e90] sm:$0xff]  ;;  %2946 = vmatpush.msra.mxu0 %v959_v37 }
 0x3c9   :  { %v1087_v39 = vld [vmem:[%s9318_s1 + $0x2090] sm:$0xff]  ;;  %2966 = vmatpush.msra.mxu1 %v1023_v38 }
 0x3ca   :  { %v1155_v40 = vld [vmem:[%s9318_s1 + $0x22b0] sm:$0xff]  ;;  %2986 = vmatpush.msra.mxu2 %v1087_v39 }
 0x3cb   :  { %v955_v41 = vld [vmem:[%s9318_s1 + $0x1c70] sm:$0xff]  ;;  %3005 = vmatpush.msra.mxu3 %v1155_v40 }
 0x3cc   :  { %v1019_v42 = vld [vmem:[%s9318_s1 + $0x1e70] sm:$0xff]  ;;  %2947 = vmatpush.msra.mxu0 %v955_v41 }
 0x3cd   :  { %v1083_v43 = vld [vmem:[%s9318_s1 + $0x2070] sm:$0xff]  ;;  %2967 = vmatpush.msra.mxu1 %v1019_v42 }
 0x3ce   :  { %v1151_v44 = vld [vmem:[%s9318_s1 + $0x2290] sm:$0xff]  ;;  %2987 = vmatpush.msra.mxu2 %v1083_v43 }
 0x3cf   :  { %v951_v45 = vld [vmem:[%s9318_s1 + $0x1c50] sm:$0xff]  ;;  %3006 = vmatpush.msra.mxu3 %v1151_v44 }
 0x3d0   :  { %v1015_v46 = vld [vmem:[%s9318_s1 + $0x1e50] sm:$0xff]  ;;  %2948 = vmatpush.msra.mxu0 %v951_v45 }
 0x3d1   :  { %v1079_v47 = vld [vmem:[%s9318_s1 + $0x2050] sm:$0xff]  ;;  %2968 = vmatpush.msra.mxu1 %v1015_v46 }
 0x3d2   :  { %v1147_v48 = vld [vmem:[%s9318_s1 + $0x2270] sm:$0xff]  ;;  %2988 = vmatpush.msra.mxu2 %v1079_v47 }
 0x3d3   :  { %v947_v49 = vld [vmem:[%s9318_s1 + $0x1c30] sm:$0xff]  ;;  %3007 = vmatpush.msra.mxu3 %v1147_v48 }
 0x3d4   :  { %v1011_v50 = vld [vmem:[%s9318_s1 + $0x1e30] sm:$0xff]  ;;  %2949 = vmatpush.msra.mxu0 %v947_v49 }
 0x3d5   :  { %v1075_v51 = vld [vmem:[%s9318_s1 + $0x2030] sm:$0xff]  ;;  %2969 = vmatpush.msra.mxu1 %v1011_v50 }
 0x3d6   :  { %v1143_v52 = vld [vmem:[%s9318_s1 + $0x2250] sm:$0xff]  ;;  %2989 = vmatpush.msra.mxu2 %v1075_v51 }
 0x3d7   :  { %v943_v53 = vld [vmem:[%s9318_s1 + $0x1c10] sm:$0xff]  ;;  %3008 = vmatpush.msra.mxu3 %v1143_v52 }
 0x3d8   :  { %v1007_v54 = vld [vmem:[%s9318_s1 + $0x1e10] sm:$0xff]  ;;  %2950 = vmatpush.msra.mxu0 %v943_v53 }
 0x3d9   :  { %v1071_v55 = vld [vmem:[%s9318_s1 + $0x2010] sm:$0xff]  ;;  %2970 = vmatpush.msra.mxu1 %v1007_v54 }
 0x3da   :  { %v1139_v56 = vld [vmem:[%s9318_s1 + $0x2230] sm:$0xff]  ;;  %2990 = vmatpush.msra.mxu2 %v1071_v55  ;;  %2971 = vmatmul.f32.vlgmr.msra.gmra.mxu1 %v3854_v3  ;;  %v3857_v3 = vld [vmem:[%s9319_s0 + $0xa0] sm:$0xff] }
 0x3db   :  { %v1259_v57 = vld [vmem:[%s9318_s1 + $0x25f0] sm:$0xff]  ;;  %3009 = vmatpush.msra.mxu3 %v1139_v56  ;;  %2991 = vmatmul.f32.vlgmr.msra.gmra.mxu2 %v3853_v62 }
 0x3dc   :  { %v1323_v58 = vld [vmem:[%s9318_s1 + $0x27f0] sm:$0xff]  ;;  %3015 = vmatpush.msrb.mxu0 %v1259_v57 }
 0x3dd   :  { %v1387_v59 = vld [vmem:[%s9318_s1 + $0x29f0] sm:$0xff]  ;;  %3035 = vmatpush.msrb.mxu1 %v1323_v58 }
 0x3de   :  { %v1135_v60 = vld [vmem:[%s9318_s1 + $0x2210] sm:$0xff]  ;;  %3055 = vmatpush.msrb.mxu2 %v1387_v59 }
 0x3df   :  { %v3852_v61 = vld [vmem:[%s9319_s0 + $0x70] sm:$0xff]  ;;  %3010 = vmatpush.msra.mxu3 %v1135_v60 }
 0x3e0   :  { %2951 = vmatmul.f32.vlgmr.msra.gmra.mxu0 %v3852_v61  ;;  %v1255_v63 = vld [vmem:[%s9318_s1 + $0x25d0] sm:$0xff]  ;;  %3011 = vmatmul.f32.vlgmr.msra.gmra.mxu3 %v3855_v4 }
 0x3e1   :  { %v1319_v0 = vld [vmem:[%s9318_s1 + $0x27d0] sm:$0xff]  ;;  %3016 = vmatpush.msrb.mxu0 %v1255_v63 }
 0x3e2   :  { %v1383_v1 = vld [vmem:[%s9318_s1 + $0x29d0] sm:$0xff]  ;;  %3036 = vmatpush.msrb.mxu1 %v1319_v0 }
 0x3e3   :  { %v1451_v2 = vld [vmem:[%s9318_s1 + $0x2bf0] sm:$0xff]  ;;  %3056 = vmatpush.msrb.mxu2 %v1383_v1 }
 0x3e4   :  { %v1251_v5 = vld [vmem:[%s9318_s1 + $0x25b0] sm:$0xff]  ;;  %3075 = vmatpush.msrb.mxu3 %v1451_v2 }
 0x3e5   :  { %v1315_v6 = vld [vmem:[%s9318_s1 + $0x27b0] sm:$0xff]  ;;  %3017 = vmatpush.msrb.mxu0 %v1251_v5 }
 0x3e6   :  { %v1379_v7 = vld [vmem:[%s9318_s1 + $0x29b0] sm:$0xff]  ;;  %3037 = vmatpush.msrb.mxu1 %v1315_v6 }
 0x3e7   :  { %v1447_v8 = vld [vmem:[%s9318_s1 + $0x2bd0] sm:$0xff]  ;;  %3057 = vmatpush.msrb.mxu2 %v1379_v7  ;;  %v108_v7 = vld [vmem:[%s9318_s1 + $0x1f8] sm:$0xff] }
 0x3e8   :  { %v1247_v9 = vld [vmem:[%s9318_s1 + $0x2590] sm:$0xff]  ;;  %3076 = vmatpush.msrb.mxu3 %v1447_v8  ;;  %v3858_v8 = vld [vmem:[%s9319_s0 + $0x98] sm:$0xff] }
 0x3e9   :  { %v1311_v10 = vld [vmem:[%s9318_s1 + $0x2790] sm:$0xff]  ;;  %3018 = vmatpush.msrb.mxu0 %v1247_v9  ;;  %v3859_v9 = vld [vmem:[%s9319_s0 + $0xa8] sm:$0xff] }
 0x3ea   :  { %v1375_v11 = vld [vmem:[%s9318_s1 + $0x2990] sm:$0xff]  ;;  %3038 = vmatpush.msrb.mxu1 %v1311_v10 }
 0x3eb   :  { %v1443_v12 = vld [vmem:[%s9318_s1 + $0x2bb0] sm:$0xff]  ;;  %3058 = vmatpush.msrb.mxu2 %v1375_v11 }
 0x3ec   :  { %v1243_v13 = vld [vmem:[%s9318_s1 + $0x2570] sm:$0xff]  ;;  %3077 = vmatpush.msrb.mxu3 %v1443_v12 }
 0x3ed   :  { %v1307_v15 = vld [vmem:[%s9318_s1 + $0x2770] sm:$0xff]  ;;  %3019 = vmatpush.msrb.mxu0 %v1243_v13  ;;  %v104_v13 = vld [vmem:[%s9318_s1 + $0x1d8] sm:$0xff] }
 0x3ee   :  { %v1371_v16 = vld [vmem:[%s9318_s1 + $0x2970] sm:$0xff]  ;;  %3039 = vmatpush.msrb.mxu1 %v1307_v15 }
 0x3ef   :  { %v1439_v17 = vld [vmem:[%s9318_s1 + $0x2b90] sm:$0xff]  ;;  %3059 = vmatpush.msrb.mxu2 %v1371_v16 }
 0x3f0   :  { %v1239_v18 = vld [vmem:[%s9318_s1 + $0x2550] sm:$0xff]  ;;  %3078 = vmatpush.msrb.mxu3 %v1439_v17 }
 0x3f1   :  { %v1303_v19 = vld [vmem:[%s9318_s1 + $0x2750] sm:$0xff]  ;;  %3020 = vmatpush.msrb.mxu0 %v1239_v18  ;;  %v100_v18 = vld [vmem:[%s9318_s1 + $0x1b8] sm:$0xff] }
 0x3f2   :  { %v1367_v20 = vld [vmem:[%s9318_s1 + $0x2950] sm:$0xff]  ;;  %3040 = vmatpush.msrb.mxu1 %v1303_v19 }
 0x3f3   :  { %v1435_v21 = vld [vmem:[%s9318_s1 + $0x2b70] sm:$0xff]  ;;  %3060 = vmatpush.msrb.mxu2 %v1367_v20 }
 0x3f4   :  { %v1235_v22 = vld [vmem:[%s9318_s1 + $0x2530] sm:$0xff]  ;;  %3079 = vmatpush.msrb.mxu3 %v1435_v21 }
 0x3f5   :  { %v1299_v23 = vld [vmem:[%s9318_s1 + $0x2730] sm:$0xff]  ;;  %3021 = vmatpush.msrb.mxu0 %v1235_v22  ;;  %v96_v22 = vld [vmem:[%s9318_s1 + $0x198] sm:$0xff] }
 0x3f6   :  { %v1363_v24 = vld [vmem:[%s9318_s1 + $0x2930] sm:$0xff]  ;;  %3041 = vmatpush.msrb.mxu1 %v1299_v23 }
 0x3f7   :  { %v1431_v25 = vld [vmem:[%s9318_s1 + $0x2b50] sm:$0xff]  ;;  %3061 = vmatpush.msrb.mxu2 %v1363_v24 }
 0x3f8   :  { %v1231_v26 = vld [vmem:[%s9318_s1 + $0x2510] sm:$0xff]  ;;  %3080 = vmatpush.msrb.mxu3 %v1431_v25 }
 0x3f9   :  { %v1295_v27 = vld [vmem:[%s9318_s1 + $0x2710] sm:$0xff]  ;;  %3022 = vmatpush.msrb.mxu0 %v1231_v26  ;;  %v92_v26 = vld [vmem:[%s9318_s1 + $0x178] sm:$0xff] }
 0x3fa   :  { %v1359_v28 = vld [vmem:[%s9318_s1 + $0x2910] sm:$0xff]  ;;  %3042 = vmatpush.msrb.mxu1 %v1295_v27 }
 0x3fb   :  { %v1427_v29 = vld [vmem:[%s9318_s1 + $0x2b30] sm:$0xff]  ;;  %3062 = vmatpush.msrb.mxu2 %v1359_v28 }
 0x3fc   :  { %v1227_v30 = vld [vmem:[%s9318_s1 + $0x24f0] sm:$0xff]  ;;  %3081 = vmatpush.msrb.mxu3 %v1427_v29 }
 0x3fd   :  { %v1291_v31 = vld [vmem:[%s9318_s1 + $0x26f0] sm:$0xff]  ;;  %3023 = vmatpush.msrb.mxu0 %v1227_v30  ;;  %v88_v30 = vld [vmem:[%s9318_s1 + $0x158] sm:$0xff] }
 0x3fe   :  { %v1355_v32 = vld [vmem:[%s9318_s1 + $0x28f0] sm:$0xff]  ;;  %3043 = vmatpush.msrb.mxu1 %v1291_v31 }
 0x3ff   :  { %v1423_v33 = vld [vmem:[%s9318_s1 + $0x2b10] sm:$0xff]  ;;  %3063 = vmatpush.msrb.mxu2 %v1355_v32 }
 0x400   :  { %v1223_v34 = vld [vmem:[%s9318_s1 + $0x24d0] sm:$0xff]  ;;  %3082 = vmatpush.msrb.mxu3 %v1423_v33 }
 0x401   :  { %v1287_v35 = vld [vmem:[%s9318_s1 + $0x26d0] sm:$0xff]  ;;  %3024 = vmatpush.msrb.mxu0 %v1223_v34  ;;  %v84_v34 = vld [vmem:[%s9318_s1 + $0x138] sm:$0xff] }
 0x402   :  { %v1351_v36 = vld [vmem:[%s9318_s1 + $0x28d0] sm:$0xff]  ;;  %3044 = vmatpush.msrb.mxu1 %v1287_v35 }
 0x403   :  { %v1419_v37 = vld [vmem:[%s9318_s1 + $0x2af0] sm:$0xff]  ;;  %3064 = vmatpush.msrb.mxu2 %v1351_v36 }
 0x404   :  { %v1219_v38 = vld [vmem:[%s9318_s1 + $0x24b0] sm:$0xff]  ;;  %3083 = vmatpush.msrb.mxu3 %v1419_v37 }
 0x405   :  { %v1283_v39 = vld [vmem:[%s9318_s1 + $0x26b0] sm:$0xff]  ;;  %3025 = vmatpush.msrb.mxu0 %v1219_v38  ;;  %v80_v38 = vld [vmem:[%s9318_s1 + $0x118] sm:$0xff] }
 0x406   :  { %v1347_v40 = vld [vmem:[%s9318_s1 + $0x28b0] sm:$0xff]  ;;  %3045 = vmatpush.msrb.mxu1 %v1283_v39 }
 0x407   :  { %v1415_v41 = vld [vmem:[%s9318_s1 + $0x2ad0] sm:$0xff]  ;;  %3065 = vmatpush.msrb.mxu2 %v1347_v40 }
 0x408   :  { %v1215_v42 = vld [vmem:[%s9318_s1 + $0x2490] sm:$0xff]  ;;  %3084 = vmatpush.msrb.mxu3 %v1415_v41 }
 0x409   :  { %v1279_v43 = vld [vmem:[%s9318_s1 + $0x2690] sm:$0xff]  ;;  %3026 = vmatpush.msrb.mxu0 %v1215_v42  ;;  %v76_v42 = vld [vmem:[%s9318_s1 + $0xf8] sm:$0xff] }
 0x40a   :  { %v1343_v44 = vld [vmem:[%s9318_s1 + $0x2890] sm:$0xff]  ;;  %3046 = vmatpush.msrb.mxu1 %v1279_v43 }
 0x40b   :  { %v1411_v45 = vld [vmem:[%s9318_s1 + $0x2ab0] sm:$0xff]  ;;  %3066 = vmatpush.msrb.mxu2 %v1343_v44 }
 0x40c   :  { %v1211_v46 = vld [vmem:[%s9318_s1 + $0x2470] sm:$0xff]  ;;  %3085 = vmatpush.msrb.mxu3 %v1411_v45 }
 0x40d   :  { %v1275_v47 = vld [vmem:[%s9318_s1 + $0x2670] sm:$0xff]  ;;  %3027 = vmatpush.msrb.mxu0 %v1211_v46  ;;  %v72_v46 = vld [vmem:[%s9318_s1 + $0xd8] sm:$0xff] }
 0x40e   :  { %v1339_v48 = vld [vmem:[%s9318_s1 + $0x2870] sm:$0xff]  ;;  %3047 = vmatpush.msrb.mxu1 %v1275_v47 }
 0x40f   :  { %v1407_v49 = vld [vmem:[%s9318_s1 + $0x2a90] sm:$0xff]  ;;  %3067 = vmatpush.msrb.mxu2 %v1339_v48 }
 0x410   :  { %v1207_v50 = vld [vmem:[%s9318_s1 + $0x2450] sm:$0xff]  ;;  %3086 = vmatpush.msrb.mxu3 %v1407_v49 }
 0x411   :  { %v1271_v51 = vld [vmem:[%s9318_s1 + $0x2650] sm:$0xff]  ;;  %3028 = vmatpush.msrb.mxu0 %v1207_v50  ;;  %v68_v50 = vld [vmem:[%s9318_s1 + $0xb8] sm:$0xff] }
 0x412   :  { %v1335_v52 = vld [vmem:[%s9318_s1 + $0x2850] sm:$0xff]  ;;  %3048 = vmatpush.msrb.mxu1 %v1271_v51 }
 0x413   :  { %v1403_v53 = vld [vmem:[%s9318_s1 + $0x2a70] sm:$0xff]  ;;  %3068 = vmatpush.msrb.mxu2 %v1335_v52 }
 0x414   :  { %v1203_v54 = vld [vmem:[%s9318_s1 + $0x2430] sm:$0xff]  ;;  %3087 = vmatpush.msrb.mxu3 %v1403_v53 }
 0x415   :  { %v1267_v55 = vld [vmem:[%s9318_s1 + $0x2630] sm:$0xff]  ;;  %3029 = vmatpush.msrb.mxu0 %v1203_v54  ;;  %v64_v54 = vld [vmem:[%s9318_s1 + $0x98] sm:$0xff] }
 0x416   :  { %v1331_v56 = vld [vmem:[%s9318_s1 + $0x2830] sm:$0xff]  ;;  %3049 = vmatpush.msrb.mxu1 %v1267_v55 }
 0x417   :  { %v1399_v57 = vld [vmem:[%s9318_s1 + $0x2a50] sm:$0xff]  ;;  %3069 = vmatpush.msrb.mxu2 %v1331_v56 }
 0x418   :  { %v1199_v58 = vld [vmem:[%s9318_s1 + $0x2410] sm:$0xff]  ;;  %3088 = vmatpush.msrb.mxu3 %v1399_v57 }
 0x419   :  { %v1263_v59 = vld [vmem:[%s9318_s1 + $0x2610] sm:$0xff]  ;;  %3030 = vmatpush.msrb.mxu0 %v1199_v58  ;;  %v60_v58 = vld [vmem:[%s9318_s1 + $0x78] sm:$0xff] }
 0x41a   :  { %v1327_v60 = vld [vmem:[%s9318_s1 + $0x2810] sm:$0xff]  ;;  %3050 = vmatpush.msrb.mxu1 %v1263_v59 }
 0x41b   :  { %v1395_v61 = vld [vmem:[%s9318_s1 + $0x2a30] sm:$0xff]  ;;  %3070 = vmatpush.msrb.mxu2 %v1327_v60  ;;  %3051 = vmatmul.f32.vlgmr.msrb.gmra.mxu1 %v3858_v8  ;;  %v3861_v8 = vld [vmem:[%s9319_s0 + $0xc0] sm:$0xff] }
 0x41c   :  { %v1515_v62 = vld [vmem:[%s9318_s1 + $0x2df0] sm:$0xff]  ;;  %3089 = vmatpush.msrb.mxu3 %v1395_v61  ;;  %3071 = vmatmul.f32.vlgmr.msrb.gmra.mxu2 %v3857_v3  ;;  %v172_v3 = vld [vmem:[%s9318_s1 + $0x3f8] sm:$0xff] }
 0x41d   :  { %v1579_v63 = vld [vmem:[%s9318_s1 + $0x2ff0] sm:$0xff]  ;;  %3095 = vmatpush.msra.mxu0 %v1515_v62  ;;  %v56_v62 = vld [vmem:[%s9318_s1 + $0x58] sm:$0xff] }
 0x41e   :  { %v1643_v0 = vld [vmem:[%s9318_s1 + $0x31f0] sm:$0xff]  ;;  %3115 = vmatpush.msra.mxu1 %v1579_v63 }
 0x41f   :  { %v1391_v1 = vld [vmem:[%s9318_s1 + $0x2a10] sm:$0xff]  ;;  %3135 = vmatpush.msra.mxu2 %v1643_v0 }
 0x420   :  { %v3856_v2 = vld [vmem:[%s9319_s0 + $0x90] sm:$0xff]  ;;  %3090 = vmatpush.msrb.mxu3 %v1391_v1 }
 0x421   :  { %3031 = vmatmul.f32.vlgmr.msrb.gmra.mxu0 %v3856_v2  ;;  %v1511_v4 = vld [vmem:[%s9318_s1 + $0x2dd0] sm:$0xff]  ;;  %3091 = vmatmul.f32.vlgmr.msrb.gmra.mxu3 %v3859_v9  ;;  %v52_v2 = vld [vmem:[%s9318_s1 + $0x38] sm:$0xff] }
 0x422   :  { %v1575_v5 = vld [vmem:[%s9318_s1 + $0x2fd0] sm:$0xff]  ;;  %3096 = vmatpush.msra.mxu0 %v1511_v4  ;;  %3155 = vmatpush.msra.mxu3 %v108_v7  ;;  %v236_v4 = vld [vmem:[%s9318_s1 + $0x5f8] sm:$0xff] }
 0x423   :  { %v1639_v6 = vld [vmem:[%s9318_s1 + $0x31d0] sm:$0xff]  ;;  %3116 = vmatpush.msra.mxu1 %v1575_v5  ;;  %v300_v5 = vld [vmem:[%s9318_s1 + $0x7f8] sm:$0xff] }
 0x424   :  { %v1507_v10 = vld [vmem:[%s9318_s1 + $0x2db0] sm:$0xff]  ;;  %3136 = vmatpush.msra.mxu2 %v1639_v6  ;;  %3156 = vmatpush.msra.mxu3 %v104_v13  ;;  %v48_v6 = vld [vmem:[%s9318_s1 + $0x18] sm:$0xff] }
 0x425   :  { %v1571_v11 = vld [vmem:[%s9318_s1 + $0x2fb0] sm:$0xff]  ;;  %3097 = vmatpush.msra.mxu0 %v1507_v10  ;;  %v168_v9 = vld [vmem:[%s9318_s1 + $0x3d8] sm:$0xff] }
 0x426   :  { %v1635_v12 = vld [vmem:[%s9318_s1 + $0x31b0] sm:$0xff]  ;;  %3117 = vmatpush.msra.mxu1 %v1571_v11  ;;  %3157 = vmatpush.msra.mxu3 %v100_v18  ;;  %v232_v10 = vld [vmem:[%s9318_s1 + $0x5d8] sm:$0xff] }
 0x427   :  { %v1503_v15 = vld [vmem:[%s9318_s1 + $0x2d90] sm:$0xff]  ;;  %3137 = vmatpush.msra.mxu2 %v1635_v12  ;;  %v296_v11 = vld [vmem:[%s9318_s1 + $0x7d8] sm:$0xff] }
 0x428   :  { %v1567_v16 = vld [vmem:[%s9318_s1 + $0x2f90] sm:$0xff]  ;;  %3098 = vmatpush.msra.mxu0 %v1503_v15  ;;  %3158 = vmatpush.msra.mxu3 %v96_v22  ;;  %v364_v12 = vld [vmem:[%s9318_s1 + $0x9f8] sm:$0xff] }
 0x429   :  { %v1631_v17 = vld [vmem:[%s9318_s1 + $0x3190] sm:$0xff]  ;;  %3118 = vmatpush.msra.mxu1 %v1567_v16  ;;  %v164_v13 = vld [vmem:[%s9318_s1 + $0x3b8] sm:$0xff] }
 0x42a   :  { %v1499_v19 = vld [vmem:[%s9318_s1 + $0x2d70] sm:$0xff]  ;;  %3138 = vmatpush.msra.mxu2 %v1631_v17  ;;  %3159 = vmatpush.msra.mxu3 %v92_v26  ;;  %v3862_v15 = vld [vmem:[%s9319_s0 + $0xb8] sm:$0xff] }
 0x42b   :  { %v1563_v20 = vld [vmem:[%s9318_s1 + $0x2f70] sm:$0xff]  ;;  %3099 = vmatpush.msra.mxu0 %v1499_v19  ;;  %v228_v16 = vld [vmem:[%s9318_s1 + $0x5b8] sm:$0xff] }
 0x42c   :  { %v1627_v21 = vld [vmem:[%s9318_s1 + $0x3170] sm:$0xff]  ;;  %3119 = vmatpush.msra.mxu1 %v1563_v20  ;;  %3160 = vmatpush.msra.mxu3 %v88_v30  ;;  %v292_v17 = vld [vmem:[%s9318_s1 + $0x7b8] sm:$0xff] }
 0x42d   :  { %v1495_v23 = vld [vmem:[%s9318_s1 + $0x2d50] sm:$0xff]  ;;  %3139 = vmatpush.msra.mxu2 %v1627_v21  ;;  %v360_v18 = vld [vmem:[%s9318_s1 + $0x9d8] sm:$0xff] }
 0x42e   :  { %v1559_v24 = vld [vmem:[%s9318_s1 + $0x2f50] sm:$0xff]  ;;  %3100 = vmatpush.msra.mxu0 %v1495_v23  ;;  %3161 = vmatpush.msra.mxu3 %v84_v34  ;;  %v160_v19 = vld [vmem:[%s9318_s1 + $0x398] sm:$0xff] }
 0x42f   :  { %v1623_v25 = vld [vmem:[%s9318_s1 + $0x3150] sm:$0xff]  ;;  %3120 = vmatpush.msra.mxu1 %v1559_v24  ;;  %v224_v20 = vld [vmem:[%s9318_s1 + $0x598] sm:$0xff] }
 0x430   :  { %v1491_v27 = vld [vmem:[%s9318_s1 + $0x2d30] sm:$0xff]  ;;  %3140 = vmatpush.msra.mxu2 %v1623_v25  ;;  %3162 = vmatpush.msra.mxu3 %v80_v38  ;;  %v288_v21 = vld [vmem:[%s9318_s1 + $0x798] sm:$0xff] }
 0x431   :  { %v1555_v28 = vld [vmem:[%s9318_s1 + $0x2f30] sm:$0xff]  ;;  %3101 = vmatpush.msra.mxu0 %v1491_v27  ;;  %v356_v22 = vld [vmem:[%s9318_s1 + $0x9b8] sm:$0xff] }
 0x432   :  { %v1619_v29 = vld [vmem:[%s9318_s1 + $0x3130] sm:$0xff]  ;;  %3121 = vmatpush.msra.mxu1 %v1555_v28  ;;  %3163 = vmatpush.msra.mxu3 %v76_v42  ;;  %v156_v23 = vld [vmem:[%s9318_s1 + $0x378] sm:$0xff] }
 0x433   :  { %v1487_v31 = vld [vmem:[%s9318_s1 + $0x2d10] sm:$0xff]  ;;  %3141 = vmatpush.msra.mxu2 %v1619_v29  ;;  %v220_v24 = vld [vmem:[%s9318_s1 + $0x578] sm:$0xff] }
 0x434   :  { %v1551_v32 = vld [vmem:[%s9318_s1 + $0x2f10] sm:$0xff]  ;;  %3102 = vmatpush.msra.mxu0 %v1487_v31  ;;  %3164 = vmatpush.msra.mxu3 %v72_v46  ;;  %v284_v25 = vld [vmem:[%s9318_s1 + $0x778] sm:$0xff] }
 0x435   :  { %v1615_v33 = vld [vmem:[%s9318_s1 + $0x3110] sm:$0xff]  ;;  %3122 = vmatpush.msra.mxu1 %v1551_v32  ;;  %v352_v26 = vld [vmem:[%s9318_s1 + $0x998] sm:$0xff] }
 0x436   :  { %v1483_v35 = vld [vmem:[%s9318_s1 + $0x2cf0] sm:$0xff]  ;;  %3142 = vmatpush.msra.mxu2 %v1615_v33  ;;  %3165 = vmatpush.msra.mxu3 %v68_v50  ;;  %v152_v27 = vld [vmem:[%s9318_s1 + $0x358] sm:$0xff] }
 0x437   :  { %v1547_v36 = vld [vmem:[%s9318_s1 + $0x2ef0] sm:$0xff]  ;;  %3103 = vmatpush.msra.mxu0 %v1483_v35  ;;  %v216_v28 = vld [vmem:[%s9318_s1 + $0x558] sm:$0xff] }
 0x438   :  { %v1611_v37 = vld [vmem:[%s9318_s1 + $0x30f0] sm:$0xff]  ;;  %3123 = vmatpush.msra.mxu1 %v1547_v36  ;;  %3166 = vmatpush.msra.mxu3 %v64_v54  ;;  %v280_v29 = vld [vmem:[%s9318_s1 + $0x758] sm:$0xff] }
 0x439   :  { %v1479_v39 = vld [vmem:[%s9318_s1 + $0x2cd0] sm:$0xff]  ;;  %3143 = vmatpush.msra.mxu2 %v1611_v37  ;;  %v348_v30 = vld [vmem:[%s9318_s1 + $0x978] sm:$0xff] }
 0x43a   :  { %v1543_v40 = vld [vmem:[%s9318_s1 + $0x2ed0] sm:$0xff]  ;;  %3104 = vmatpush.msra.mxu0 %v1479_v39  ;;  %3167 = vmatpush.msra.mxu3 %v60_v58  ;;  %v148_v31 = vld [vmem:[%s9318_s1 + $0x338] sm:$0xff] }
 0x43b   :  { %v1607_v41 = vld [vmem:[%s9318_s1 + $0x30d0] sm:$0xff]  ;;  %3124 = vmatpush.msra.mxu1 %v1543_v40  ;;  %v212_v32 = vld [vmem:[%s9318_s1 + $0x538] sm:$0xff] }
 0x43c   :  { %v1475_v43 = vld [vmem:[%s9318_s1 + $0x2cb0] sm:$0xff]  ;;  %3144 = vmatpush.msra.mxu2 %v1607_v41  ;;  %3168 = vmatpush.msra.mxu3 %v56_v62  ;;  %v276_v33 = vld [vmem:[%s9318_s1 + $0x738] sm:$0xff] }
 0x43d   :  { %v1539_v44 = vld [vmem:[%s9318_s1 + $0x2eb0] sm:$0xff]  ;;  %3105 = vmatpush.msra.mxu0 %v1475_v43  ;;  %v344_v34 = vld [vmem:[%s9318_s1 + $0x958] sm:$0xff] }
 0x43e   :  { %v1603_v45 = vld [vmem:[%s9318_s1 + $0x30b0] sm:$0xff]  ;;  %3125 = vmatpush.msra.mxu1 %v1539_v44  ;;  %3169 = vmatpush.msra.mxu3 %v52_v2  ;;  %v144_v35 = vld [vmem:[%s9318_s1 + $0x318] sm:$0xff] }
 0x43f   :  { %v1471_v47 = vld [vmem:[%s9318_s1 + $0x2c90] sm:$0xff]  ;;  %3145 = vmatpush.msra.mxu2 %v1603_v45  ;;  %v208_v36 = vld [vmem:[%s9318_s1 + $0x518] sm:$0xff] }
 0x440   :  { %v1535_v48 = vld [vmem:[%s9318_s1 + $0x2e90] sm:$0xff]  ;;  %3106 = vmatpush.msra.mxu0 %v1471_v47  ;;  %3170 = vmatpush.msra.mxu3 %v48_v6  ;;  %v272_v37 = vld [vmem:[%s9318_s1 + $0x718] sm:$0xff] }
 0x441   :  { %v1599_v49 = vld [vmem:[%s9318_s1 + $0x3090] sm:$0xff]  ;;  %3126 = vmatpush.msra.mxu1 %v1535_v48  ;;  %v340_v38 = vld [vmem:[%s9318_s1 + $0x938] sm:$0xff] }
 0x442   :  { %v1467_v51 = vld [vmem:[%s9318_s1 + $0x2c70] sm:$0xff]  ;;  %3146 = vmatpush.msra.mxu2 %v1599_v49  ;;  %3235 = vmatpush.msrb.mxu3 %v364_v12  ;;  %v140_v39 = vld [vmem:[%s9318_s1 + $0x2f8] sm:$0xff] }
 0x443   :  { %v1531_v52 = vld [vmem:[%s9318_s1 + $0x2e70] sm:$0xff]  ;;  %3107 = vmatpush.msra.mxu0 %v1467_v51  ;;  %v204_v40 = vld [vmem:[%s9318_s1 + $0x4f8] sm:$0xff] }
 0x444   :  { %v1595_v53 = vld [vmem:[%s9318_s1 + $0x3070] sm:$0xff]  ;;  %3127 = vmatpush.msra.mxu1 %v1531_v52  ;;  %3236 = vmatpush.msrb.mxu3 %v360_v18  ;;  %v268_v41 = vld [vmem:[%s9318_s1 + $0x6f8] sm:$0xff]  ;;  %v3863_v18 = vld [vmem:[%s9319_s0] sm:$0xff] }
 0x445   :  { %v1463_v55 = vld [vmem:[%s9318_s1 + $0x2c50] sm:$0xff]  ;;  %3147 = vmatpush.msra.mxu2 %v1595_v53  ;;  %v336_v42 = vld [vmem:[%s9318_s1 + $0x918] sm:$0xff]  ;;  %3171 = vmatmul.f32.vlgmr.msra.gmra.mxu3 %v3863_v18  ;;  %v3868_v18 = vld [vmem:[%s9319_s0 + $0x28] sm:$0xff] }
 0x446   :  { %v1527_v56 = vld [vmem:[%s9318_s1 + $0x2e50] sm:$0xff]  ;;  %3108 = vmatpush.msra.mxu0 %v1463_v55  ;;  %3237 = vmatpush.msrb.mxu3 %v356_v22  ;;  %v136_v43 = vld [vmem:[%s9318_s1 + $0x2d8] sm:$0xff] }
 0x447   :  { %v1591_v57 = vld [vmem:[%s9318_s1 + $0x3050] sm:$0xff]  ;;  %3128 = vmatpush.msra.mxu1 %v1527_v56  ;;  %v200_v44 = vld [vmem:[%s9318_s1 + $0x4d8] sm:$0xff] }
 0x448   :  { %v1459_v59 = vld [vmem:[%s9318_s1 + $0x2c30] sm:$0xff]  ;;  %3148 = vmatpush.msra.mxu2 %v1591_v57  ;;  %3238 = vmatpush.msrb.mxu3 %v352_v26  ;;  %v264_v45 = vld [vmem:[%s9318_s1 + $0x6d8] sm:$0xff] }
 0x449   :  { %v1523_v60 = vld [vmem:[%s9318_s1 + $0x2e30] sm:$0xff]  ;;  %3109 = vmatpush.msra.mxu0 %v1459_v59  ;;  %v332_v46 = vld [vmem:[%s9318_s1 + $0x8f8] sm:$0xff] }
 0x44a   :  { %v1587_v61 = vld [vmem:[%s9318_s1 + $0x3030] sm:$0xff]  ;;  %3129 = vmatpush.msra.mxu1 %v1523_v60  ;;  %3239 = vmatpush.msrb.mxu3 %v348_v30  ;;  %v132_v47 = vld [vmem:[%s9318_s1 + $0x2b8] sm:$0xff] }
 0x44b   :  { %v1455_v63 = vld [vmem:[%s9318_s1 + $0x2c10] sm:$0xff]  ;;  %3149 = vmatpush.msra.mxu2 %v1587_v61  ;;  %v196_v48 = vld [vmem:[%s9318_s1 + $0x4b8] sm:$0xff] }
 0x44c   :  { %v1519_v0 = vld [vmem:[%s9318_s1 + $0x2e10] sm:$0xff]  ;;  %3110 = vmatpush.msra.mxu0 %v1455_v63  ;;  %3240 = vmatpush.msrb.mxu3 %v344_v34  ;;  %v260_v49 = vld [vmem:[%s9318_s1 + $0x6b8] sm:$0xff] }
 0x44d   :  { %v1583_v1 = vld [vmem:[%s9318_s1 + $0x3010] sm:$0xff]  ;;  %3130 = vmatpush.msra.mxu1 %v1519_v0  ;;  %v328_v50 = vld [vmem:[%s9318_s1 + $0x8d8] sm:$0xff] }
 0x44e   :  { %3150 = vmatpush.msra.mxu2 %v1583_v1  ;;  %v3860_v7 = vld [vmem:[%s9319_s0 + $0xb0] sm:$0xff]  ;;  %3175 = vmatpush.msrb.mxu0 %v172_v3  ;;  %v128_v51 = vld [vmem:[%s9318_s1 + $0x298] sm:$0xff] }
 0x44f   :  { %3111 = vmatmul.f32.vlgmr.msra.gmra.mxu0 %v3860_v7  ;;  %3151 = vmatmul.f32.vlgmr.msra.gmra.mxu2 %v3861_v8  ;;  %v192_v52 = vld [vmem:[%s9318_s1 + $0x498] sm:$0xff] }
 0x450   :  { %3195 = vmatpush.msrb.mxu1 %v236_v4  ;;  %3215 = vmatpush.msrb.mxu2 %v300_v5  ;;  %v256_v53 = vld [vmem:[%s9318_s1 + $0x698] sm:$0xff] }
 0x451   :  { %3131 = vmatmul.f32.vlgmr.msra.gmra.mxu1 %v3862_v15  ;;  %3176 = vmatpush.msrb.mxu0 %v168_v9  ;;  %v324_v54 = vld [vmem:[%s9318_s1 + $0x8b8] sm:$0xff] }
 0x452   :  { %3196 = vmatpush.msrb.mxu1 %v232_v10  ;;  %3216 = vmatpush.msrb.mxu2 %v296_v11  ;;  %v124_v55 = vld [vmem:[%s9318_s1 + $0x278] sm:$0xff] }
 0x453   :  { %3177 = vmatpush.msrb.mxu0 %v164_v13  ;;  %3241 = vmatpush.msrb.mxu3 %v340_v38  ;;  %v188_v56 = vld [vmem:[%s9318_s1 + $0x478] sm:$0xff] }
 0x454   :  { %3197 = vmatpush.msrb.mxu1 %v228_v16  ;;  %3217 = vmatpush.msrb.mxu2 %v292_v17  ;;  %v252_v57 = vld [vmem:[%s9318_s1 + $0x678] sm:$0xff] }
 0x455   :  { %3178 = vmatpush.msrb.mxu0 %v160_v19  ;;  %3242 = vmatpush.msrb.mxu3 %v336_v42  ;;  %v320_v58 = vld [vmem:[%s9318_s1 + $0x898] sm:$0xff] }
 0x456   :  { %3198 = vmatpush.msrb.mxu1 %v224_v20  ;;  %3218 = vmatpush.msrb.mxu2 %v288_v21  ;;  %v120_v59 = vld [vmem:[%s9318_s1 + $0x258] sm:$0xff] }
 0x457   :  { %3179 = vmatpush.msrb.mxu0 %v156_v23  ;;  %3243 = vmatpush.msrb.mxu3 %v332_v46  ;;  %v184_v60 = vld [vmem:[%s9318_s1 + $0x458] sm:$0xff] }
 0x458   :  { %3199 = vmatpush.msrb.mxu1 %v220_v24  ;;  %3219 = vmatpush.msrb.mxu2 %v284_v25  ;;  %v248_v61 = vld [vmem:[%s9318_s1 + $0x658] sm:$0xff] }
 0x459   :  { %3180 = vmatpush.msrb.mxu0 %v152_v27  ;;  %3244 = vmatpush.msrb.mxu3 %v328_v50  ;;  %v316_v62 = vld [vmem:[%s9318_s1 + $0x878] sm:$0xff] }
 0x45a   :  { %3200 = vmatpush.msrb.mxu1 %v216_v28  ;;  %3220 = vmatpush.msrb.mxu2 %v280_v29  ;;  %v116_v63 = vld [vmem:[%s9318_s1 + $0x238] sm:$0xff] }
 0x45b   :  { %3181 = vmatpush.msrb.mxu0 %v148_v31  ;;  %3245 = vmatpush.msrb.mxu3 %v324_v54  ;;  %v180_v0 = vld [vmem:[%s9318_s1 + $0x438] sm:$0xff] }
 0x45c   :  { %3201 = vmatpush.msrb.mxu1 %v212_v32  ;;  %3221 = vmatpush.msrb.mxu2 %v276_v33  ;;  %v244_v1 = vld [vmem:[%s9318_s1 + $0x638] sm:$0xff]  ;;  %v3865_v33 = vld [vmem:[%s9319_s0 + $0x8] sm:$0xff] }
 0x45d   :  { %3182 = vmatpush.msrb.mxu0 %v144_v35  ;;  %3246 = vmatpush.msrb.mxu3 %v320_v58  ;;  %v312_v2 = vld [vmem:[%s9318_s1 + $0x858] sm:$0xff]  ;;  %v3866_v35 = vld [vmem:[%s9319_s0 + $0x20] sm:$0xff] }
 0x45e   :  { %3202 = vmatpush.msrb.mxu1 %v208_v36  ;;  %3222 = vmatpush.msrb.mxu2 %v272_v37  ;;  %v112_v3 = vld [vmem:[%s9318_s1 + $0x218] sm:$0xff] }
 0x45f   :  { %3183 = vmatpush.msrb.mxu0 %v140_v39  ;;  %3247 = vmatpush.msrb.mxu3 %v316_v62  ;;  %v176_v4 = vld [vmem:[%s9318_s1 + $0x418] sm:$0xff] }
 0x460   :  { %3203 = vmatpush.msrb.mxu1 %v204_v40  ;;  %3223 = vmatpush.msrb.mxu2 %v268_v41  ;;  %v240_v5 = vld [vmem:[%s9318_s1 + $0x618] sm:$0xff]  ;;  %v3867_v40 = vld [vmem:[%s9319_s0 + $0x10] sm:$0xff] }
 0x461   :  { %3184 = vmatpush.msrb.mxu0 %v136_v43  ;;  %v308_v6 = vld [vmem:[%s9318_s1 + $0x838] sm:$0xff]  ;;  %3248 = vmatpush.msrb.mxu3 %v312_v2 }
 0x462   :  { %3204 = vmatpush.msrb.mxu1 %v200_v44  ;;  %3224 = vmatpush.msrb.mxu2 %v264_v45  ;;  %v428_v7 = vld [vmem:[%s9318_s1 + $0xbf8] sm:$0xff] }
 0x463   :  { %3185 = vmatpush.msrb.mxu0 %v132_v47  ;;  %v492_v8 = vld [vmem:[%s9318_s1 + $0xdf8] sm:$0xff]  ;;  %3249 = vmatpush.msrb.mxu3 %v308_v6 }
 0x464   :  { %3205 = vmatpush.msrb.mxu1 %v196_v48  ;;  %3225 = vmatpush.msrb.mxu2 %v260_v49  ;;  %v556_v9 = vld [vmem:[%s9318_s1 + $0xff8] sm:$0xff] }
 0x465   :  { %3186 = vmatpush.msrb.mxu0 %v128_v51  ;;  %v304_v10 = vld [vmem:[%s9318_s1 + $0x818] sm:$0xff] }
 0x466   :  { %3206 = vmatpush.msrb.mxu1 %v192_v52  ;;  %3226 = vmatpush.msrb.mxu2 %v256_v53  ;;  %v424_v11 = vld [vmem:[%s9318_s1 + $0xbd8] sm:$0xff] }
 0x467   :  { %3187 = vmatpush.msrb.mxu0 %v124_v55  ;;  %v488_v12 = vld [vmem:[%s9318_s1 + $0xdd8] sm:$0xff]  ;;  %3250 = vmatpush.msrb.mxu3 %v304_v10 }
 0x468   :  { %3207 = vmatpush.msrb.mxu1 %v188_v56  ;;  %3227 = vmatpush.msrb.mxu2 %v252_v57  ;;  %v552_v13 = vld [vmem:[%s9318_s1 + $0xfd8] sm:$0xff] }
 0x469   :  { %3188 = vmatpush.msrb.mxu0 %v120_v59  ;;  %v620_v15 = vld [vmem:[%s9318_s1 + $0x11f8] sm:$0xff]  ;;  %3251 = vmatmul.f32.vlgmr.msrb.gmra.mxu3 %v3866_v35 }
 0x46a   :  { %3208 = vmatpush.msrb.mxu1 %v184_v60  ;;  %3228 = vmatpush.msrb.mxu2 %v248_v61  ;;  %v420_v16 = vld [vmem:[%s9318_s1 + $0xbb8] sm:$0xff] }
 0x46b   :  { %3189 = vmatpush.msrb.mxu0 %v116_v63  ;;  %v484_v17 = vld [vmem:[%s9318_s1 + $0xdb8] sm:$0xff]  ;;  %3315 = vmatpush.msra.mxu3 %v620_v15 }
 0x46c   :  { %3209 = vmatpush.msrb.mxu1 %v180_v0  ;;  %3229 = vmatpush.msrb.mxu2 %v244_v1  ;;  %v548_v19 = vld [vmem:[%s9318_s1 + $0xfb8] sm:$0xff] }
 0x46d   :  { %3190 = vmatpush.msrb.mxu0 %v112_v3  ;;  %v616_v20 = vld [vmem:[%s9318_s1 + $0x11d8] sm:$0xff] }
 0x46e   :  { %3210 = vmatpush.msrb.mxu1 %v176_v4  ;;  %3230 = vmatpush.msrb.mxu2 %v240_v5  ;;  %v416_v21 = vld [vmem:[%s9318_s1 + $0xb98] sm:$0xff] }
 0x46f   :  { %3255 = vmatpush.msra.mxu0 %v428_v7  ;;  %v480_v22 = vld [vmem:[%s9318_s1 + $0xd98] sm:$0xff]  ;;  %3316 = vmatpush.msra.mxu3 %v616_v20 }
 0x470   :  { %3275 = vmatpush.msra.mxu1 %v492_v8  ;;  %3295 = vmatpush.msra.mxu2 %v556_v9  ;;  %v544_v23 = vld [vmem:[%s9318_s1 + $0xf98] sm:$0xff] }
 0x471   :  { %3256 = vmatpush.msra.mxu0 %v424_v11  ;;  %v612_v24 = vld [vmem:[%s9318_s1 + $0x11b8] sm:$0xff]  ;;  %3211 = vmatmul.f32.vlgmr.msrb.gmra.mxu1 %v3867_v40 }
 0x472   :  { %3276 = vmatpush.msra.mxu1 %v488_v12  ;;  %3296 = vmatpush.msra.mxu2 %v552_v13  ;;  %v412_v25 = vld [vmem:[%s9318_s1 + $0xb78] sm:$0xff] }
 0x473   :  { %3257 = vmatpush.msra.mxu0 %v420_v16  ;;  %v476_v26 = vld [vmem:[%s9318_s1 + $0xd78] sm:$0xff]  ;;  %3317 = vmatpush.msra.mxu3 %v612_v24  ;;  %v3870_v24 = vld [vmem:[%s9319_s0 + $0x30] sm:$0xff] }
 0x474   :  { %3277 = vmatpush.msra.mxu1 %v484_v17  ;;  %3297 = vmatpush.msra.mxu2 %v548_v19  ;;  %v540_v27 = vld [vmem:[%s9318_s1 + $0xf78] sm:$0xff] }
 0x475   :  { %3258 = vmatpush.msra.mxu0 %v416_v21  ;;  %v608_v28 = vld [vmem:[%s9318_s1 + $0x1198] sm:$0xff] }
 0x476   :  { %3278 = vmatpush.msra.mxu1 %v480_v22  ;;  %3298 = vmatpush.msra.mxu2 %v544_v23  ;;  %v3864_v29 = vld [vmem:[%s9319_s0 + $0x18] sm:$0xff] }
 0x477   :  { %3231 = vmatmul.f32.vlgmr.msrb.gmra.mxu2 %v3864_v29  ;;  %3259 = vmatpush.msra.mxu0 %v412_v25  ;;  %v408_v30 = vld [vmem:[%s9318_s1 + $0xb58] sm:$0xff]  ;;  %v3871_v25 = vld [vmem:[%s9319_s0 + $0x40] sm:$0xff] }
 0x478   :  { %3279 = vmatpush.msra.mxu1 %v476_v26  ;;  %3299 = vmatpush.msra.mxu2 %v540_v27  ;;  %v472_v31 = vld [vmem:[%s9318_s1 + $0xd58] sm:$0xff] }
 0x479   :  { %v536_v32 = vld [vmem:[%s9318_s1 + $0xf58] sm:$0xff]  ;;  %3318 = vmatpush.msra.mxu3 %v608_v28  ;;  %3191 = vmatmul.f32.vlgmr.msrb.gmra.mxu0 %v3865_v33 }
 0x47a   :  { %v604_v34 = vld [vmem:[%s9318_s1 + $0x1178] sm:$0xff]  ;;  %3260 = vmatpush.msra.mxu0 %v408_v30  ;;  %3280 = vmatpush.msra.mxu1 %v472_v31 }
 0x47b   :  { %v404_v36 = vld [vmem:[%s9318_s1 + $0xb38] sm:$0xff]  ;;  %3300 = vmatpush.msra.mxu2 %v536_v32  ;;  %3319 = vmatpush.msra.mxu3 %v604_v34 }
 0x47c   :  { %v468_v37 = vld [vmem:[%s9318_s1 + $0xd38] sm:$0xff]  ;;  %3261 = vmatpush.msra.mxu0 %v404_v36 }
 0x47d   :  { %v532_v38 = vld [vmem:[%s9318_s1 + $0xf38] sm:$0xff]  ;;  %3281 = vmatpush.msra.mxu1 %v468_v37 }
 0x47e   :  { %v600_v39 = vld [vmem:[%s9318_s1 + $0x1158] sm:$0xff]  ;;  %3301 = vmatpush.msra.mxu2 %v532_v38 }
 0x47f   :  { %v400_v41 = vld [vmem:[%s9318_s1 + $0xb18] sm:$0xff]  ;;  %3320 = vmatpush.msra.mxu3 %v600_v39 }
 0x480   :  { %v464_v42 = vld [vmem:[%s9318_s1 + $0xd18] sm:$0xff]  ;;  %3262 = vmatpush.msra.mxu0 %v400_v41 }
 0x481   :  { %v528_v43 = vld [vmem:[%s9318_s1 + $0xf18] sm:$0xff]  ;;  %3282 = vmatpush.msra.mxu1 %v464_v42 }
 0x482   :  { %v596_v44 = vld [vmem:[%s9318_s1 + $0x1138] sm:$0xff]  ;;  %3302 = vmatpush.msra.mxu2 %v528_v43 }
 0x483   :  { %v396_v45 = vld [vmem:[%s9318_s1 + $0xaf8] sm:$0xff]  ;;  %3321 = vmatpush.msra.mxu3 %v596_v44 }
 0x484   :  { %v460_v46 = vld [vmem:[%s9318_s1 + $0xcf8] sm:$0xff]  ;;  %3263 = vmatpush.msra.mxu0 %v396_v45 }
 0x485   :  { %v524_v47 = vld [vmem:[%s9318_s1 + $0xef8] sm:$0xff]  ;;  %3283 = vmatpush.msra.mxu1 %v460_v46 }
 0x486   :  { %v592_v48 = vld [vmem:[%s9318_s1 + $0x1118] sm:$0xff]  ;;  %3303 = vmatpush.msra.mxu2 %v524_v47 }
 0x487   :  { %v392_v49 = vld [vmem:[%s9318_s1 + $0xad8] sm:$0xff]  ;;  %3322 = vmatpush.msra.mxu3 %v592_v48 }
 0x488   :  { %v456_v50 = vld [vmem:[%s9318_s1 + $0xcd8] sm:$0xff]  ;;  %3264 = vmatpush.msra.mxu0 %v392_v49 }
 0x489   :  { %v520_v51 = vld [vmem:[%s9318_s1 + $0xed8] sm:$0xff]  ;;  %3284 = vmatpush.msra.mxu1 %v456_v50 }
 0x48a   :  { %v588_v52 = vld [vmem:[%s9318_s1 + $0x10f8] sm:$0xff]  ;;  %3304 = vmatpush.msra.mxu2 %v520_v51 }
 0x48b   :  { %v388_v53 = vld [vmem:[%s9318_s1 + $0xab8] sm:$0xff]  ;;  %3323 = vmatpush.msra.mxu3 %v588_v52 }
 0x48c   :  { %v452_v54 = vld [vmem:[%s9318_s1 + $0xcb8] sm:$0xff]  ;;  %3265 = vmatpush.msra.mxu0 %v388_v53 }
 0x48d   :  { %v516_v55 = vld [vmem:[%s9318_s1 + $0xeb8] sm:$0xff]  ;;  %3285 = vmatpush.msra.mxu1 %v452_v54 }
 0x48e   :  { %v584_v56 = vld [vmem:[%s9318_s1 + $0x10d8] sm:$0xff]  ;;  %3305 = vmatpush.msra.mxu2 %v516_v55 }
 0x48f   :  { %v384_v57 = vld [vmem:[%s9318_s1 + $0xa98] sm:$0xff]  ;;  %3324 = vmatpush.msra.mxu3 %v584_v56 }
 0x490   :  { %v448_v58 = vld [vmem:[%s9318_s1 + $0xc98] sm:$0xff]  ;;  %3266 = vmatpush.msra.mxu0 %v384_v57 }
 0x491   :  { %v512_v59 = vld [vmem:[%s9318_s1 + $0xe98] sm:$0xff]  ;;  %3286 = vmatpush.msra.mxu1 %v448_v58 }
 0x492   :  { %v580_v60 = vld [vmem:[%s9318_s1 + $0x10b8] sm:$0xff]  ;;  %3306 = vmatpush.msra.mxu2 %v512_v59 }
 0x493   :  { %v380_v61 = vld [vmem:[%s9318_s1 + $0xa78] sm:$0xff]  ;;  %3325 = vmatpush.msra.mxu3 %v580_v60 }
 0x494   :  { %v444_v62 = vld [vmem:[%s9318_s1 + $0xc78] sm:$0xff]  ;;  %3267 = vmatpush.msra.mxu0 %v380_v61 }
 0x495   :  { %v508_v63 = vld [vmem:[%s9318_s1 + $0xe78] sm:$0xff]  ;;  %3287 = vmatpush.msra.mxu1 %v444_v62 }
 0x496   :  { %v576_v0 = vld [vmem:[%s9318_s1 + $0x1098] sm:$0xff]  ;;  %3307 = vmatpush.msra.mxu2 %v508_v63 }
 0x497   :  { %v376_v1 = vld [vmem:[%s9318_s1 + $0xa58] sm:$0xff]  ;;  %3326 = vmatpush.msra.mxu3 %v576_v0 }
 0x498   :  { %v440_v2 = vld [vmem:[%s9318_s1 + $0xc58] sm:$0xff]  ;;  %3268 = vmatpush.msra.mxu0 %v376_v1 }
 0x499   :  { %v504_v3 = vld [vmem:[%s9318_s1 + $0xe58] sm:$0xff]  ;;  %3288 = vmatpush.msra.mxu1 %v440_v2 }
 0x49a   :  { %v572_v4 = vld [vmem:[%s9318_s1 + $0x1078] sm:$0xff]  ;;  %3308 = vmatpush.msra.mxu2 %v504_v3 }
 0x49b   :  { %v372_v5 = vld [vmem:[%s9318_s1 + $0xa38] sm:$0xff]  ;;  %3327 = vmatpush.msra.mxu3 %v572_v4 }
 0x49c   :  { %v436_v6 = vld [vmem:[%s9318_s1 + $0xc38] sm:$0xff]  ;;  %3269 = vmatpush.msra.mxu0 %v372_v5 }
 0x49d   :  { %v500_v7 = vld [vmem:[%s9318_s1 + $0xe38] sm:$0xff]  ;;  %3289 = vmatpush.msra.mxu1 %v436_v6 }
 0x49e   :  { %v568_v8 = vld [vmem:[%s9318_s1 + $0x1058] sm:$0xff]  ;;  %3309 = vmatpush.msra.mxu2 %v500_v7 }
 0x49f   :  { %v368_v9 = vld [vmem:[%s9318_s1 + $0xa18] sm:$0xff]  ;;  %3328 = vmatpush.msra.mxu3 %v568_v8 }
 0x4a0   :  { %v432_v10 = vld [vmem:[%s9318_s1 + $0xc18] sm:$0xff]  ;;  %3270 = vmatpush.msra.mxu0 %v368_v9 }
 0x4a1   :  { %v496_v11 = vld [vmem:[%s9318_s1 + $0xe18] sm:$0xff]  ;;  %3290 = vmatpush.msra.mxu1 %v432_v10  ;;  %3271 = vmatmul.f32.vlgmr.msra.gmra.mxu0 %v3868_v18 }
 0x4a2   :  { %v564_v12 = vld [vmem:[%s9318_s1 + $0x1038] sm:$0xff]  ;;  %3310 = vmatpush.msra.mxu2 %v496_v11  ;;  %3291 = vmatmul.f32.vlgmr.msra.gmra.mxu1 %v3870_v24 }
 0x4a3   :  { %v684_v13 = vld [vmem:[%s9318_s1 + $0x13f8] sm:$0xff]  ;;  %3329 = vmatpush.msra.mxu3 %v564_v12 }
 0x4a4   :  { %v748_v15 = vld [vmem:[%s9318_s1 + $0x15f8] sm:$0xff]  ;;  %3335 = vmatpush.msrb.mxu0 %v684_v13 }
 0x4a5   :  { %v812_v16 = vld [vmem:[%s9318_s1 + $0x17f8] sm:$0xff]  ;;  %3355 = vmatpush.msrb.mxu1 %v748_v15 }
 0x4a6   :  { %v560_v17 = vld [vmem:[%s9318_s1 + $0x1018] sm:$0xff]  ;;  %3375 = vmatpush.msrb.mxu2 %v812_v16 }
 0x4a7   :  { %v3869_v19 = vld [vmem:[%s9319_s0 + $0x38] sm:$0xff]  ;;  %3330 = vmatpush.msra.mxu3 %v560_v17 }
 0x4a8   :  { %3311 = vmatmul.f32.vlgmr.msra.gmra.mxu2 %v3869_v19  ;;  %v680_v20 = vld [vmem:[%s9318_s1 + $0x13d8] sm:$0xff]  ;;  %3331 = vmatmul.f32.vlgmr.msra.gmra.mxu3 %v3871_v25  ;;  %v8427_v25 = vpop.f32.mrf.mxu2 }
 0x4a9   :  { %v744_v21 = vld [vmem:[%s9318_s1 + $0x15d8] sm:$0xff]  ;;  %3336 = vmatpush.msrb.mxu0 %v680_v20 }
 0x4aa   :  { %v808_v22 = vld [vmem:[%s9318_s1 + $0x17d8] sm:$0xff]  ;;  %3356 = vmatpush.msrb.mxu1 %v744_v21 }
 0x4ab   :  { %v876_v23 = vld [vmem:[%s9318_s1 + $0x19f8] sm:$0xff]  ;;  %3376 = vmatpush.msrb.mxu2 %v808_v22 }
 0x4ac   :  { %v676_v26 = vld [vmem:[%s9318_s1 + $0x13b8] sm:$0xff]  ;;  %3395 = vmatpush.msrb.mxu3 %v876_v23  ;;  %v3872_v23 = vld [vmem:[%s9319_s0 + $0x48] sm:$0xff] }
 0x4ad   :  { %v740_v27 = vld [vmem:[%s9318_s1 + $0x15b8] sm:$0xff]  ;;  %3337 = vmatpush.msrb.mxu0 %v676_v26 }
 0x4ae   :  { %v804_v28 = vld [vmem:[%s9318_s1 + $0x17b8] sm:$0xff]  ;;  %3357 = vmatpush.msrb.mxu1 %v740_v27 }
 0x4af   :  { %v872_v29 = vld [vmem:[%s9318_s1 + $0x19d8] sm:$0xff]  ;;  %3377 = vmatpush.msrb.mxu2 %v804_v28 }
 0x4b0   :  { %v672_v30 = vld [vmem:[%s9318_s1 + $0x1398] sm:$0xff]  ;;  %3396 = vmatpush.msrb.mxu3 %v872_v29 }
 0x4b1   :  { %v736_v31 = vld [vmem:[%s9318_s1 + $0x1598] sm:$0xff]  ;;  %3338 = vmatpush.msrb.mxu0 %v672_v30  ;;  %v3874_v30 = vld [vmem:[%s9319_s0 + $0x50] sm:$0xff] }
 0x4b2   :  { %v800_v32 = vld [vmem:[%s9318_s1 + $0x1798] sm:$0xff]  ;;  %3358 = vmatpush.msrb.mxu1 %v736_v31  ;;  %v3875_v31 = vld [vmem:[%s9319_s0 + $0x60] sm:$0xff] }
 0x4b3   :  { %v868_v33 = vld [vmem:[%s9318_s1 + $0x19b8] sm:$0xff]  ;;  %3378 = vmatpush.msrb.mxu2 %v800_v32 }
 0x4b4   :  { %v668_v34 = vld [vmem:[%s9318_s1 + $0x1378] sm:$0xff]  ;;  %3397 = vmatpush.msrb.mxu3 %v868_v33 }
 0x4b5   :  { %v732_v35 = vld [vmem:[%s9318_s1 + $0x1578] sm:$0xff]  ;;  %3339 = vmatpush.msrb.mxu0 %v668_v34 }
 0x4b6   :  { %v796_v36 = vld [vmem:[%s9318_s1 + $0x1778] sm:$0xff]  ;;  %3359 = vmatpush.msrb.mxu1 %v732_v35 }
 0x4b7   :  { %v864_v37 = vld [vmem:[%s9318_s1 + $0x1998] sm:$0xff]  ;;  %3379 = vmatpush.msrb.mxu2 %v796_v36  ;;  %v8459_v36 = vpop.f32.mrf.mxu1 }
 0x4b8   :  { %v664_v38 = vld [vmem:[%s9318_s1 + $0x1358] sm:$0xff]  ;;  %3398 = vmatpush.msrb.mxu3 %v864_v37  ;;  %v8461_v37 = vpop.f32.mrf.mxu3 }
 0x4b9   :  { %v728_v39 = vld [vmem:[%s9318_s1 + $0x1558] sm:$0xff]  ;;  %3340 = vmatpush.msrb.mxu0 %v664_v38 }
 0x4ba   :  { %v792_v40 = vld [vmem:[%s9318_s1 + $0x1758] sm:$0xff]  ;;  %3360 = vmatpush.msrb.mxu1 %v728_v39 }
 0x4bb   :  { %v860_v41 = vld [vmem:[%s9318_s1 + $0x1978] sm:$0xff]  ;;  %3380 = vmatpush.msrb.mxu2 %v792_v40 }
 0x4bc   :  { %v660_v42 = vld [vmem:[%s9318_s1 + $0x1338] sm:$0xff]  ;;  %3399 = vmatpush.msrb.mxu3 %v860_v41 }
 0x4bd   :  { %v724_v43 = vld [vmem:[%s9318_s1 + $0x1538] sm:$0xff]  ;;  %3341 = vmatpush.msrb.mxu0 %v660_v42 }
 0x4be   :  { %v788_v44 = vld [vmem:[%s9318_s1 + $0x1738] sm:$0xff]  ;;  %3361 = vmatpush.msrb.mxu1 %v724_v43 }
 0x4bf   :  { %v856_v45 = vld [vmem:[%s9318_s1 + $0x1958] sm:$0xff]  ;;  %3381 = vmatpush.msrb.mxu2 %v788_v44 }
 0x4c0   :  { %v656_v46 = vld [vmem:[%s9318_s1 + $0x1318] sm:$0xff]  ;;  %3400 = vmatpush.msrb.mxu3 %v856_v45 }
 0x4c1   :  { %v720_v47 = vld [vmem:[%s9318_s1 + $0x1518] sm:$0xff]  ;;  %3342 = vmatpush.msrb.mxu0 %v656_v46 }
 0x4c2   :  { %v784_v48 = vld [vmem:[%s9318_s1 + $0x1718] sm:$0xff]  ;;  %3362 = vmatpush.msrb.mxu1 %v720_v47 }
 0x4c3   :  { %v852_v49 = vld [vmem:[%s9318_s1 + $0x1938] sm:$0xff]  ;;  %3382 = vmatpush.msrb.mxu2 %v784_v48 }
 0x4c4   :  { %v652_v50 = vld [vmem:[%s9318_s1 + $0x12f8] sm:$0xff]  ;;  %3401 = vmatpush.msrb.mxu3 %v852_v49 }
 0x4c5   :  { %v716_v51 = vld [vmem:[%s9318_s1 + $0x14f8] sm:$0xff]  ;;  %3343 = vmatpush.msrb.mxu0 %v652_v50  ;;  %v8499_v50 = vpop.f32.mrf.mxu0 }
 0x4c6   :  { %v780_v52 = vld [vmem:[%s9318_s1 + $0x16f8] sm:$0xff]  ;;  %3363 = vmatpush.msrb.mxu1 %v716_v51  ;;  %v8501_v51 = vpop.f32.mrf.mxu2 }
 0x4c7   :  { %v848_v53 = vld [vmem:[%s9318_s1 + $0x1918] sm:$0xff]  ;;  %3383 = vmatpush.msrb.mxu2 %v780_v52 }
 0x4c8   :  { %v648_v54 = vld [vmem:[%s9318_s1 + $0x12d8] sm:$0xff]  ;;  %3402 = vmatpush.msrb.mxu3 %v848_v53 }
 0x4c9   :  { %v712_v55 = vld [vmem:[%s9318_s1 + $0x14d8] sm:$0xff]  ;;  %3344 = vmatpush.msrb.mxu0 %v648_v54 }
 0x4ca   :  { %v776_v56 = vld [vmem:[%s9318_s1 + $0x16d8] sm:$0xff]  ;;  %3364 = vmatpush.msrb.mxu1 %v712_v55 }
 0x4cb   :  { %v844_v57 = vld [vmem:[%s9318_s1 + $0x18f8] sm:$0xff]  ;;  %3384 = vmatpush.msrb.mxu2 %v776_v56 }
 0x4cc   :  { %v644_v58 = vld [vmem:[%s9318_s1 + $0x12b8] sm:$0xff]  ;;  %3403 = vmatpush.msrb.mxu3 %v844_v57 }
 0x4cd   :  { %v708_v59 = vld [vmem:[%s9318_s1 + $0x14b8] sm:$0xff]  ;;  %3345 = vmatpush.msrb.mxu0 %v644_v58 }
 0x4ce   :  { %v772_v60 = vld [vmem:[%s9318_s1 + $0x16b8] sm:$0xff]  ;;  %3365 = vmatpush.msrb.mxu1 %v708_v59 }
 0x4cf   :  { %v840_v61 = vld [vmem:[%s9318_s1 + $0x18d8] sm:$0xff]  ;;  %3385 = vmatpush.msrb.mxu2 %v772_v60  ;;  %v8527_v60 = vpop.f32.mrf.mxu1 }
 0x4d0   :  { %v640_v62 = vld [vmem:[%s9318_s1 + $0x1298] sm:$0xff]  ;;  %3404 = vmatpush.msrb.mxu3 %v840_v61  ;;  %v8529_v61 = vpop.f32.mrf.mxu3 }
 0x4d1   :  { %v704_v63 = vld [vmem:[%s9318_s1 + $0x1498] sm:$0xff]  ;;  %3346 = vmatpush.msrb.mxu0 %v640_v62 }
 0x4d2   :  { %v768_v0 = vld [vmem:[%s9318_s1 + $0x1698] sm:$0xff]  ;;  %3366 = vmatpush.msrb.mxu1 %v704_v63 }
 0x4d3   :  { %v836_v1 = vld [vmem:[%s9318_s1 + $0x18b8] sm:$0xff]  ;;  %3386 = vmatpush.msrb.mxu2 %v768_v0 }
 0x4d4   :  { %v636_v2 = vld [vmem:[%s9318_s1 + $0x1278] sm:$0xff]  ;;  %3405 = vmatpush.msrb.mxu3 %v836_v1 }
 0x4d5   :  { %v700_v3 = vld [vmem:[%s9318_s1 + $0x1478] sm:$0xff]  ;;  %3347 = vmatpush.msrb.mxu0 %v636_v2 }
 0x4d6   :  { %v764_v4 = vld [vmem:[%s9318_s1 + $0x1678] sm:$0xff]  ;;  %3367 = vmatpush.msrb.mxu1 %v700_v3 }
 0x4d7   :  { %v832_v5 = vld [vmem:[%s9318_s1 + $0x1898] sm:$0xff]  ;;  %3387 = vmatpush.msrb.mxu2 %v764_v4 }
 0x4d8   :  { %v632_v6 = vld [vmem:[%s9318_s1 + $0x1258] sm:$0xff]  ;;  %3406 = vmatpush.msrb.mxu3 %v832_v5 }
 0x4d9   :  { %v696_v7 = vld [vmem:[%s9318_s1 + $0x1458] sm:$0xff]  ;;  %3348 = vmatpush.msrb.mxu0 %v632_v6  ;;  %v8555_v6 = vpop.f32.mrf.mxu0 }
 0x4da   :  { %v760_v8 = vld [vmem:[%s9318_s1 + $0x1658] sm:$0xff]  ;;  %3368 = vmatpush.msrb.mxu1 %v696_v7  ;;  %v8557_v7 = vpop.f32.mrf.mxu2 }
 0x4db   :  { %v828_v9 = vld [vmem:[%s9318_s1 + $0x1878] sm:$0xff]  ;;  %3388 = vmatpush.msrb.mxu2 %v760_v8 }
 0x4dc   :  { %v628_v10 = vld [vmem:[%s9318_s1 + $0x1238] sm:$0xff]  ;;  %3407 = vmatpush.msrb.mxu3 %v828_v9 }
 0x4dd   :  { %v692_v11 = vld [vmem:[%s9318_s1 + $0x1438] sm:$0xff]  ;;  %3349 = vmatpush.msrb.mxu0 %v628_v10 }
 0x4de   :  { %v756_v12 = vld [vmem:[%s9318_s1 + $0x1638] sm:$0xff]  ;;  %3369 = vmatpush.msrb.mxu1 %v692_v11 }
 0x4df   :  { %v824_v13 = vld [vmem:[%s9318_s1 + $0x1858] sm:$0xff]  ;;  %3389 = vmatpush.msrb.mxu2 %v756_v12 }
 0x4e0   :  { %v624_v15 = vld [vmem:[%s9318_s1 + $0x1218] sm:$0xff]  ;;  %3408 = vmatpush.msrb.mxu3 %v824_v13 }
 0x4e1   :  { %v688_v16 = vld [vmem:[%s9318_s1 + $0x1418] sm:$0xff]  ;;  %3350 = vmatpush.msrb.mxu0 %v624_v15 }
 0x4e2   :  { %v752_v17 = vld [vmem:[%s9318_s1 + $0x1618] sm:$0xff]  ;;  %3370 = vmatpush.msrb.mxu1 %v688_v16  ;;  %3351 = vmatmul.f32.vlgmr.msrb.gmra.mxu0 %v3872_v23 }
 0x4e3   :  { %v820_v18 = vld [vmem:[%s9318_s1 + $0x1838] sm:$0xff]  ;;  %3390 = vmatpush.msrb.mxu2 %v752_v17  ;;  %3371 = vmatmul.f32.vlgmr.msrb.gmra.mxu1 %v3874_v30  ;;  %v8583_v17 = vpop.f32.mrf.mxu1 }
 0x4e4   :  { %v940_v19 = vld [vmem:[%s9318_s1 + $0x1bf8] sm:$0xff]  ;;  %3409 = vmatpush.msrb.mxu3 %v820_v18  ;;  %v8585_v18 = vpop.f32.mrf.mxu3 }
 0x4e5   :  { %v1004_v20 = vld [vmem:[%s9318_s1 + $0x1df8] sm:$0xff]  ;;  %3415 = vmatpush.msra.mxu0 %v940_v19 }
 0x4e6   :  { %v1068_v21 = vld [vmem:[%s9318_s1 + $0x1ff8] sm:$0xff]  ;;  %3435 = vmatpush.msra.mxu1 %v1004_v20 }
 0x4e7   :  { %v816_v22 = vld [vmem:[%s9318_s1 + $0x1818] sm:$0xff]  ;;  %3455 = vmatpush.msra.mxu2 %v1068_v21 }
 0x4e8   :  { %v3873_v24 = vld [vmem:[%s9319_s0 + $0x58] sm:$0xff]  ;;  %3410 = vmatpush.msrb.mxu3 %v816_v22 }
 0x4e9   :  { %3391 = vmatmul.f32.vlgmr.msrb.gmra.mxu2 %v3873_v24  ;;  %v936_v26 = vld [vmem:[%s9318_s1 + $0x1bd8] sm:$0xff]  ;;  %3411 = vmatmul.f32.vlgmr.msrb.gmra.mxu3 %v3875_v31 }
 0x4ea   :  { %v1000_v27 = vld [vmem:[%s9318_s1 + $0x1dd8] sm:$0xff]  ;;  %3416 = vmatpush.msra.mxu0 %v936_v26 }
 0x4eb   :  { %v1064_v28 = vld [vmem:[%s9318_s1 + $0x1fd8] sm:$0xff]  ;;  %3436 = vmatpush.msra.mxu1 %v1000_v27 }
 0x4ec   :  { %v1132_v29 = vld [vmem:[%s9318_s1 + $0x21f8] sm:$0xff]  ;;  %3456 = vmatpush.msra.mxu2 %v1064_v28  ;;  %v8611_v28 = vpop.f32.mrf.mxu0 }
 0x4ed   :  { %v932_v32 = vld [vmem:[%s9318_s1 + $0x1bb8] sm:$0xff]  ;;  %3475 = vmatpush.msra.mxu3 %v1132_v29  ;;  %v8613_v29 = vpop.f32.mrf.mxu2 }
 0x4ee   :  { %v996_v33 = vld [vmem:[%s9318_s1 + $0x1db8] sm:$0xff]  ;;  %3417 = vmatpush.msra.mxu0 %v932_v32 }
 0x4ef   :  { %v1060_v34 = vld [vmem:[%s9318_s1 + $0x1fb8] sm:$0xff]  ;;  %3437 = vmatpush.msra.mxu1 %v996_v33 }
 0x4f0   :  { %v1128_v35 = vld [vmem:[%s9318_s1 + $0x21d8] sm:$0xff]  ;;  %3457 = vmatpush.msra.mxu2 %v1060_v34 }
 0x4f1   :  { %v928_v38 = vld [vmem:[%s9318_s1 + $0x1b98] sm:$0xff]  ;;  %3476 = vmatpush.msra.mxu3 %v1128_v35 }
 0x4f2   :  { %v992_v39 = vld [vmem:[%s9318_s1 + $0x1d98] sm:$0xff]  ;;  %3418 = vmatpush.msra.mxu0 %v928_v38 }
 0x4f3   :  { %v1056_v40 = vld [vmem:[%s9318_s1 + $0x1f98] sm:$0xff]  ;;  %3438 = vmatpush.msra.mxu1 %v992_v39 }
 0x4f4   :  { %v1124_v41 = vld [vmem:[%s9318_s1 + $0x21b8] sm:$0xff]  ;;  %3458 = vmatpush.msra.mxu2 %v1056_v40  ;;  %v8639_v40 = vpop.f32.mrf.mxu1 }
 0x4f5   :  { %v924_v42 = vld [vmem:[%s9318_s1 + $0x1b78] sm:$0xff]  ;;  %3477 = vmatpush.msra.mxu3 %v1124_v41  ;;  %v8641_v41 = vpop.f32.mrf.mxu3 }
 0x4f6   :  { %v988_v43 = vld [vmem:[%s9318_s1 + $0x1d78] sm:$0xff]  ;;  %3419 = vmatpush.msra.mxu0 %v924_v42 }
 0x4f7   :  { %v1052_v44 = vld [vmem:[%s9318_s1 + $0x1f78] sm:$0xff]  ;;  %3439 = vmatpush.msra.mxu1 %v988_v43 }
 0x4f8   :  { %v1120_v45 = vld [vmem:[%s9318_s1 + $0x2198] sm:$0xff]  ;;  %3459 = vmatpush.msra.mxu2 %v1052_v44 }
 0x4f9   :  { %v920_v46 = vld [vmem:[%s9318_s1 + $0x1b58] sm:$0xff]  ;;  %3478 = vmatpush.msra.mxu3 %v1120_v45 }
 0x4fa   :  { %v984_v47 = vld [vmem:[%s9318_s1 + $0x1d58] sm:$0xff]  ;;  %3420 = vmatpush.msra.mxu0 %v920_v46  ;;  %v3876_v46 = vld [vmem:[%s9319_s0 + $0x68] sm:$0xff] }
 0x4fb   :  { %v1048_v48 = vld [vmem:[%s9318_s1 + $0x1f58] sm:$0xff]  ;;  %3440 = vmatpush.msra.mxu1 %v984_v47 }
 0x4fc   :  { %v1116_v49 = vld [vmem:[%s9318_s1 + $0x2178] sm:$0xff]  ;;  %3460 = vmatpush.msra.mxu2 %v1048_v48  ;;  %v8661_v48 = vpop.f32.mrf.mxu0 }
 0x4fd   :  { %v916_v52 = vld [vmem:[%s9318_s1 + $0x1b38] sm:$0xff]  ;;  %3479 = vmatpush.msra.mxu3 %v1116_v49  ;;  %v8663_v49 = vpop.f32.mrf.mxu2 }
 0x4fe   :  { %v980_v53 = vld [vmem:[%s9318_s1 + $0x1d38] sm:$0xff]  ;;  %3421 = vmatpush.msra.mxu0 %v916_v52 }
 0x4ff   :  { %v1044_v54 = vld [vmem:[%s9318_s1 + $0x1f38] sm:$0xff]  ;;  %3441 = vmatpush.msra.mxu1 %v980_v53 }
 0x500   :  { %v1112_v55 = vld [vmem:[%s9318_s1 + $0x2158] sm:$0xff]  ;;  %3461 = vmatpush.msra.mxu2 %v1044_v54 }
 0x501   :  { %v912_v56 = vld [vmem:[%s9318_s1 + $0x1b18] sm:$0xff]  ;;  %3480 = vmatpush.msra.mxu3 %v1112_v55 }
 0x502   :  { %v976_v57 = vld [vmem:[%s9318_s1 + $0x1d18] sm:$0xff]  ;;  %3422 = vmatpush.msra.mxu0 %v912_v56  ;;  %v3878_v56 = vld [vmem:[%s9319_s0 + $0x70] sm:$0xff] }
 0x503   :  { %v1040_v58 = vld [vmem:[%s9318_s1 + $0x1f18] sm:$0xff]  ;;  %3442 = vmatpush.msra.mxu1 %v976_v57  ;;  %v3879_v57 = vld [vmem:[%s9319_s0 + $0x80] sm:$0xff] }
 0x504   :  { %v1108_v59 = vld [vmem:[%s9318_s1 + $0x2138] sm:$0xff]  ;;  %3462 = vmatpush.msra.mxu2 %v1040_v58 }
 0x505   :  { %v908_v62 = vld [vmem:[%s9318_s1 + $0x1af8] sm:$0xff]  ;;  %3481 = vmatpush.msra.mxu3 %v1108_v59 }
 0x506   :  { %v972_v63 = vld [vmem:[%s9318_s1 + $0x1cf8] sm:$0xff]  ;;  %3423 = vmatpush.msra.mxu0 %v908_v62 }
 0x507   :  { %v1036_v0 = vld [vmem:[%s9318_s1 + $0x1ef8] sm:$0xff]  ;;  %3443 = vmatpush.msra.mxu1 %v972_v63 }
 0x508   :  { %v1104_v1 = vld [vmem:[%s9318_s1 + $0x2118] sm:$0xff]  ;;  %3463 = vmatpush.msra.mxu2 %v1036_v0  ;;  %v8695_v0 = vpop.f32.mrf.mxu1 }
 0x509   :  { %v904_v2 = vld [vmem:[%s9318_s1 + $0x1ad8] sm:$0xff]  ;;  %3482 = vmatpush.msra.mxu3 %v1104_v1  ;;  %v8697_v1 = vpop.f32.mrf.mxu3 }
 0x50a   :  { %v968_v3 = vld [vmem:[%s9318_s1 + $0x1cd8] sm:$0xff]  ;;  %3424 = vmatpush.msra.mxu0 %v904_v2 }
 0x50b   :  { %v1032_v4 = vld [vmem:[%s9318_s1 + $0x1ed8] sm:$0xff]  ;;  %3444 = vmatpush.msra.mxu1 %v968_v3 }
 0x50c   :  { %v1100_v5 = vld [vmem:[%s9318_s1 + $0x20f8] sm:$0xff]  ;;  %3464 = vmatpush.msra.mxu2 %v1032_v4 }
 0x50d   :  { %v900_v8 = vld [vmem:[%s9318_s1 + $0x1ab8] sm:$0xff]  ;;  %3483 = vmatpush.msra.mxu3 %v1100_v5 }
 0x50e   :  { %v964_v9 = vld [vmem:[%s9318_s1 + $0x1cb8] sm:$0xff]  ;;  %3425 = vmatpush.msra.mxu0 %v900_v8 }
 0x50f   :  { %v1028_v10 = vld [vmem:[%s9318_s1 + $0x1eb8] sm:$0xff]  ;;  %3445 = vmatpush.msra.mxu1 %v964_v9 }
 0x510   :  { %v1096_v11 = vld [vmem:[%s9318_s1 + $0x20d8] sm:$0xff]  ;;  %3465 = vmatpush.msra.mxu2 %v1028_v10 }
 0x511   :  { %v896_v12 = vld [vmem:[%s9318_s1 + $0x1a98] sm:$0xff]  ;;  %3484 = vmatpush.msra.mxu3 %v1096_v11 }
 0x512   :  { %v960_v13 = vld [vmem:[%s9318_s1 + $0x1c98] sm:$0xff]  ;;  %3426 = vmatpush.msra.mxu0 %v896_v12  ;;  %v8723_v12 = vpop.f32.mrf.mxu0 }
 0x513   :  { %v1024_v15 = vld [vmem:[%s9318_s1 + $0x1e98] sm:$0xff]  ;;  %3446 = vmatpush.msra.mxu1 %v960_v13  ;;  %v8725_v13 = vpop.f32.mrf.mxu2 }
 0x514   :  { %v1092_v16 = vld [vmem:[%s9318_s1 + $0x20b8] sm:$0xff]  ;;  %3466 = vmatpush.msra.mxu2 %v1024_v15 }
 0x515   :  { %v892_v19 = vld [vmem:[%s9318_s1 + $0x1a78] sm:$0xff]  ;;  %3485 = vmatpush.msra.mxu3 %v1092_v16 }
 0x516   :  { %v956_v20 = vld [vmem:[%s9318_s1 + $0x1c78] sm:$0xff]  ;;  %3427 = vmatpush.msra.mxu0 %v892_v19 }
 0x517   :  { %v1020_v21 = vld [vmem:[%s9318_s1 + $0x1e78] sm:$0xff]  ;;  %3447 = vmatpush.msra.mxu1 %v956_v20 }
 0x518   :  { %v1088_v22 = vld [vmem:[%s9318_s1 + $0x2098] sm:$0xff]  ;;  %3467 = vmatpush.msra.mxu2 %v1020_v21 }
 0x519   :  { %v888_v23 = vld [vmem:[%s9318_s1 + $0x1a58] sm:$0xff]  ;;  %3486 = vmatpush.msra.mxu3 %v1088_v22 }
 0x51a   :  { %v952_v24 = vld [vmem:[%s9318_s1 + $0x1c58] sm:$0xff]  ;;  %3428 = vmatpush.msra.mxu0 %v888_v23 }
 0x51b   :  { %v1016_v26 = vld [vmem:[%s9318_s1 + $0x1e58] sm:$0xff]  ;;  %3448 = vmatpush.msra.mxu1 %v952_v24 }
 0x51c   :  { %v1084_v27 = vld [vmem:[%s9318_s1 + $0x2078] sm:$0xff]  ;;  %3468 = vmatpush.msra.mxu2 %v1016_v26  ;;  %v8751_v26 = vpop.f32.mrf.mxu1 }
 0x51d   :  { %v884_v30 = vld [vmem:[%s9318_s1 + $0x1a38] sm:$0xff]  ;;  %3487 = vmatpush.msra.mxu3 %v1084_v27  ;;  %v8753_v27 = vpop.f32.mrf.mxu3 }
 0x51e   :  { %v948_v31 = vld [vmem:[%s9318_s1 + $0x1c38] sm:$0xff]  ;;  %3429 = vmatpush.msra.mxu0 %v884_v30 }
 0x51f   :  { %v1012_v32 = vld [vmem:[%s9318_s1 + $0x1e38] sm:$0xff]  ;;  %3449 = vmatpush.msra.mxu1 %v948_v31 }
 0x520   :  { %v1080_v33 = vld [vmem:[%s9318_s1 + $0x2058] sm:$0xff]  ;;  %3469 = vmatpush.msra.mxu2 %v1012_v32  ;;  %v8764_v32 = vld [vmem:[%s9320_s2] sm:$0xf] }
 0x521   :  { %v880_v34 = vld [vmem:[%s9318_s1 + $0x1a18] sm:$0xff]  ;;  %3488 = vmatpush.msra.mxu3 %v1080_v33  ;;  %v1648_v33 = vperm.slane %v8764_v32, 1 }
 0x522   :  { %v944_v35 = vld [vmem:[%s9318_s1 + $0x1c18] sm:$0xff]  ;;  %3430 = vmatpush.msra.mxu0 %v880_v34 }
 0x523   :  { %v1008_v38 = vld [vmem:[%s9318_s1 + $0x1e18] sm:$0xff]  ;;  %3450 = vmatpush.msra.mxu1 %v944_v35  ;;  %3431 = vmatmul.f32.vlgmr.msra.gmra.mxu0 %v3876_v46  ;;  %v2672_v46 = vpop.f32.mrf.mxu2 }
 0x524   :  { %v1076_v39 = vld [vmem:[%s9318_s1 + $0x2038] sm:$0xff]  ;;  %3470 = vmatpush.msra.mxu2 %v1008_v38  ;;  %3451 = vmatmul.f32.vlgmr.msra.gmra.mxu1 %v3878_v56 }
 0x525   :  { %v1196_v42 = vld [vmem:[%s9318_s1 + $0x23f8] sm:$0xff]  ;;  %3489 = vmatpush.msra.mxu3 %v1076_v39 }
 0x526   :  { %v1260_v43 = vld [vmem:[%s9318_s1 + $0x25f8] sm:$0xff]  ;;  %3495 = vmatpush.msrb.mxu0 %v1196_v42  ;;  %v1649_v42 = vperm.slane %v8764_v32, 2 }
 0x527   :  { %v1324_v44 = vld [vmem:[%s9318_s1 + $0x27f8] sm:$0xff]  ;;  %3515 = vmatpush.msrb.mxu1 %v1260_v43 }
 0x528   :  { %v1072_v45 = vld [vmem:[%s9318_s1 + $0x2018] sm:$0xff]  ;;  %3535 = vmatpush.msrb.mxu2 %v1324_v44 }
 0x529   :  { %v3877_v47 = vld [vmem:[%s9319_s0 + $0x78] sm:$0xff]  ;;  %3490 = vmatpush.msra.mxu3 %v1072_v45  ;;  %v8786_v45 = vpop.f32.mrf.mxu0 }
 0x52a   :  { %3471 = vmatmul.f32.vlgmr.msra.gmra.mxu2 %v3877_v47  ;;  %v1192_v52 = vld [vmem:[%s9318_s1 + $0x23d8] sm:$0xff]  ;;  %3491 = vmatmul.f32.vlgmr.msra.gmra.mxu3 %v3879_v57  ;;  %v2673_v57 = vadd.f32 %v2672_v46, %v1649_v42 }
 0x52b   :  { %v1256_v53 = vld [vmem:[%s9318_s1 + $0x25d8] sm:$0xff]  ;;  %3496 = vmatpush.msrb.mxu0 %v1192_v52 }
 0x52c   :  { %v1320_v54 = vld [vmem:[%s9318_s1 + $0x27d8] sm:$0xff]  ;;  %3516 = vmatpush.msrb.mxu1 %v1256_v53  ;;  %v2173_v53 = vadd.f32 %v8459_v36, %v1648_v33 }
 0x52d   :  { %v1388_v55 = vld [vmem:[%s9318_s1 + $0x29f8] sm:$0xff]  ;;  %3536 = vmatpush.msrb.mxu2 %v1320_v54 }
 0x52e   :  { %v1188_v58 = vld [vmem:[%s9318_s1 + $0x23b8] sm:$0xff]  ;;  %3555 = vmatpush.msrb.mxu3 %v1388_v55 }
 0x52f   :  { %v1252_v59 = vld [vmem:[%s9318_s1 + $0x25b8] sm:$0xff]  ;;  %3497 = vmatpush.msrb.mxu0 %v1188_v58 }
 0x530   :  { %v1316_v62 = vld [vmem:[%s9318_s1 + $0x27b8] sm:$0xff]  ;;  %3517 = vmatpush.msrb.mxu1 %v1252_v59 }
 0x531   :  { %v1384_v63 = vld [vmem:[%s9318_s1 + $0x29d8] sm:$0xff]  ;;  %3537 = vmatpush.msrb.mxu2 %v1316_v62  ;;  %v8813_v62 = vpop.f32.mrf.mxu1 }
 0x532   :  { %v1184_v2 = vld [vmem:[%s9318_s1 + $0x2398] sm:$0xff]  ;;  %3556 = vmatpush.msrb.mxu3 %v1384_v63  ;;  %v2692_v63 = vpop.f32.mrf.mxu3 }
 0x533   :  { %v1248_v3 = vld [vmem:[%s9318_s1 + $0x2598] sm:$0xff]  ;;  %3498 = vmatpush.msrb.mxu0 %v1184_v2 }
 0x534   :  { %v1312_v4 = vld [vmem:[%s9318_s1 + $0x2798] sm:$0xff]  ;;  %3518 = vmatpush.msrb.mxu1 %v1248_v3 }
 0x535   :  { %v1380_v5 = vld [vmem:[%s9318_s1 + $0x29b8] sm:$0xff]  ;;  %3538 = vmatpush.msrb.mxu2 %v1312_v4  ;;  %v2193_v4 = vadd.f32 %v8427_v25, %v2173_v53 }
 0x536   :  { %v1180_v8 = vld [vmem:[%s9318_s1 + $0x2378] sm:$0xff]  ;;  %3557 = vmatpush.msrb.mxu3 %v1380_v5 }
 0x537   :  { %v1244_v9 = vld [vmem:[%s9318_s1 + $0x2578] sm:$0xff]  ;;  %3499 = vmatpush.msrb.mxu0 %v1180_v8 }
 0x538   :  { %v1308_v10 = vld [vmem:[%s9318_s1 + $0x2778] sm:$0xff]  ;;  %3519 = vmatpush.msrb.mxu1 %v1244_v9 }
 0x539   :  { %v1376_v11 = vld [vmem:[%s9318_s1 + $0x2998] sm:$0xff]  ;;  %3539 = vmatpush.msrb.mxu2 %v1308_v10  ;;  %v2693_v10 = vadd.f32 %v2692_v63, %v2673_v57 }
 0x53a   :  { %v1176_v15 = vld [vmem:[%s9318_s1 + $0x2358] sm:$0xff]  ;;  %3558 = vmatpush.msrb.mxu3 %v1376_v11  ;;  %v2772_v63 = vpop.f32.mrf.mxu3 }
 0x53b   :  { %v1240_v16 = vld [vmem:[%s9318_s1 + $0x2558] sm:$0xff]  ;;  %3500 = vmatpush.msrb.mxu0 %v1176_v15 }
 0x53c   :  { %v1304_v19 = vld [vmem:[%s9318_s1 + $0x2758] sm:$0xff]  ;;  %3520 = vmatpush.msrb.mxu1 %v1240_v16  ;;  %v2712_v16 = vpop.f32.mrf.mxu0 }
 0x53d   :  { %v1372_v20 = vld [vmem:[%s9318_s1 + $0x2978] sm:$0xff]  ;;  %3540 = vmatpush.msrb.mxu2 %v1304_v19 }
 0x53e   :  { %v1172_v21 = vld [vmem:[%s9318_s1 + $0x2338] sm:$0xff]  ;;  %3559 = vmatpush.msrb.mxu3 %v1372_v20 }
 0x53f   :  { %v1236_v22 = vld [vmem:[%s9318_s1 + $0x2538] sm:$0xff]  ;;  %3501 = vmatpush.msrb.mxu0 %v1172_v21  ;;  %v2213_v21 = vadd.f32 %v8461_v37, %v2193_v4 }
 0x540   :  { %v1300_v23 = vld [vmem:[%s9318_s1 + $0x2738] sm:$0xff]  ;;  %3521 = vmatpush.msrb.mxu1 %v1236_v22 }
 0x541   :  { %v1368_v24 = vld [vmem:[%s9318_s1 + $0x2958] sm:$0xff]  ;;  %3541 = vmatpush.msrb.mxu2 %v1300_v23 }
 0x542   :  { %v1168_v30 = vld [vmem:[%s9318_s1 + $0x2318] sm:$0xff]  ;;  %3560 = vmatpush.msrb.mxu3 %v1368_v24 }
 0x543   :  { %v1232_v31 = vld [vmem:[%s9318_s1 + $0x2518] sm:$0xff]  ;;  %3502 = vmatpush.msrb.mxu0 %v1168_v30  ;;  %v2713_v30 = vadd.f32 %v2712_v16, %v2693_v10 }
 0x544   :  { %v1296_v34 = vld [vmem:[%s9318_s1 + $0x2718] sm:$0xff]  ;;  %3522 = vmatpush.msrb.mxu1 %v1232_v31  ;;  %v2792_v10 = vpop.f32.mrf.mxu0 }
 0x545   :  { %v1364_v35 = vld [vmem:[%s9318_s1 + $0x2938] sm:$0xff]  ;;  %3542 = vmatpush.msrb.mxu2 %v1296_v34  ;;  %v2732_v34 = vpop.f32.mrf.mxu1 }
 0x546   :  { %v1164_v38 = vld [vmem:[%s9318_s1 + $0x22f8] sm:$0xff]  ;;  %3561 = vmatpush.msrb.mxu3 %v1364_v35 }
 0x547   :  { %v1228_v39 = vld [vmem:[%s9318_s1 + $0x24f8] sm:$0xff]  ;;  %3503 = vmatpush.msrb.mxu0 %v1164_v38 }
 0x548   :  { %v1292_v43 = vld [vmem:[%s9318_s1 + $0x26f8] sm:$0xff]  ;;  %3523 = vmatpush.msrb.mxu1 %v1228_v39  ;;  %v2233_v39 = vadd.f32 %v8499_v50, %v2213_v21 }
 0x549   :  { %v1360_v44 = vld [vmem:[%s9318_s1 + $0x2918] sm:$0xff]  ;;  %3543 = vmatpush.msrb.mxu2 %v1292_v43 }
 0x54a   :  { %v1160_v47 = vld [vmem:[%s9318_s1 + $0x22d8] sm:$0xff]  ;;  %3562 = vmatpush.msrb.mxu3 %v1360_v44  ;;  %v2733_v44 = vadd.f32 %v2732_v34, %v2713_v30 }
 0x54b   :  { %v1224_v52 = vld [vmem:[%s9318_s1 + $0x24d8] sm:$0xff]  ;;  %3504 = vmatpush.msrb.mxu0 %v1160_v47  ;;  %v2752_v47 = vpop.f32.mrf.mxu2 }
 0x54c   :  { %v1288_v54 = vld [vmem:[%s9318_s1 + $0x26d8] sm:$0xff]  ;;  %3524 = vmatpush.msrb.mxu1 %v1224_v52  ;;  %v2753_v57 = vadd.f32 %v2752_v47, %v2733_v44 }
 0x54d   :  { %v1356_v55 = vld [vmem:[%s9318_s1 + $0x28f8] sm:$0xff]  ;;  %3544 = vmatpush.msrb.mxu2 %v1288_v54  ;;  %v2253_v54 = vadd.f32 %v8527_v60, %v2233_v39  ;;  %v2812_v30 = vpop.f32.mrf.mxu1 }
 0x54e   :  { %v1156_v56 = vld [vmem:[%s9318_s1 + $0x22b8] sm:$0xff]  ;;  %3563 = vmatpush.msrb.mxu3 %v1356_v55  ;;  %v3881_v55 = vld [vmem:[%s9319_s0 + $0x88] sm:$0xff] }
 0x54f   :  { %v1220_v36 = vld [vmem:[%s9318_s1 + $0x24b8] sm:$0xff]  ;;  %3505 = vmatpush.msrb.mxu0 %v1156_v56 }
 0x550   :  { %v1284_v58 = vld [vmem:[%s9318_s1 + $0x26b8] sm:$0xff]  ;;  %3525 = vmatpush.msrb.mxu1 %v1220_v36 }
 0x551   :  { %v1352_v59 = vld [vmem:[%s9318_s1 + $0x28d8] sm:$0xff]  ;;  %3545 = vmatpush.msrb.mxu2 %v1284_v58 }
 0x552   :  { %v1152_v2 = vld [vmem:[%s9318_s1 + $0x2298] sm:$0xff]  ;;  %3564 = vmatpush.msrb.mxu3 %v1352_v59 }
 0x553   :  { %v1216_v3 = vld [vmem:[%s9318_s1 + $0x2498] sm:$0xff]  ;;  %3506 = vmatpush.msrb.mxu0 %v1152_v2  ;;  %v3883_v2 = vld [vmem:[%s9319_s0 + $0x90] sm:$0xff] }
 0x554   :  { %v1280_v5 = vld [vmem:[%s9318_s1 + $0x2698] sm:$0xff]  ;;  %3526 = vmatpush.msrb.mxu1 %v1216_v3  ;;  %v3884_v3 = vld [vmem:[%s9319_s0 + $0xa0] sm:$0xff] }
 0x555   :  { %v1348_v8 = vld [vmem:[%s9318_s1 + $0x28b8] sm:$0xff]  ;;  %3546 = vmatpush.msrb.mxu2 %v1280_v5 }
 0x556   :  { %v1148_v9 = vld [vmem:[%s9318_s1 + $0x2278] sm:$0xff]  ;;  %3565 = vmatpush.msrb.mxu3 %v1348_v8  ;;  %v2273_v8 = vadd.f32 %v8501_v51, %v2253_v54 }
 0x557   :  { %v1212_v25 = vld [vmem:[%s9318_s1 + $0x2478] sm:$0xff]  ;;  %3507 = vmatpush.msrb.mxu0 %v1148_v9 }
 0x558   :  { %v1276_v11 = vld [vmem:[%s9318_s1 + $0x2678] sm:$0xff]  ;;  %3527 = vmatpush.msrb.mxu1 %v1212_v25 }
 0x559   :  { %v1344_v15 = vld [vmem:[%s9318_s1 + $0x2898] sm:$0xff]  ;;  %3547 = vmatpush.msrb.mxu2 %v1276_v11 }
 0x55a   :  { %v1144_v19 = vld [vmem:[%s9318_s1 + $0x2258] sm:$0xff]  ;;  %3566 = vmatpush.msrb.mxu3 %v1344_v15  ;;  %v2773_v15 = vadd.f32 %v2772_v63, %v2753_v57 }
 0x55b   :  { %v1208_v20 = vld [vmem:[%s9318_s1 + $0x2458] sm:$0xff]  ;;  %3508 = vmatpush.msrb.mxu0 %v1144_v19 }
 0x55c   :  { %v1272_v22 = vld [vmem:[%s9318_s1 + $0x2658] sm:$0xff]  ;;  %3528 = vmatpush.msrb.mxu1 %v1208_v20 }
 0x55d   :  { %v1340_v23 = vld [vmem:[%s9318_s1 + $0x2878] sm:$0xff]  ;;  %3548 = vmatpush.msrb.mxu2 %v1272_v22  ;;  %v2293_v22 = vadd.f32 %v8529_v61, %v2273_v8 }
 0x55e   :  { %v1140_v24 = vld [vmem:[%s9318_s1 + $0x2238] sm:$0xff]  ;;  %3567 = vmatpush.msrb.mxu3 %v1340_v23  ;;  %v2793_v23 = vadd.f32 %v2792_v10, %v2773_v15 }
 0x55f   :  { %v1204_v37 = vld [vmem:[%s9318_s1 + $0x2438] sm:$0xff]  ;;  %3509 = vmatpush.msrb.mxu0 %v1140_v24 }
 0x560   :  { %v1268_v31 = vld [vmem:[%s9318_s1 + $0x2638] sm:$0xff]  ;;  %3529 = vmatpush.msrb.mxu1 %v1204_v37 }
 0x561   :  { %v1336_v33 = vld [vmem:[%s9318_s1 + $0x2858] sm:$0xff]  ;;  %3549 = vmatpush.msrb.mxu2 %v1268_v31 }
 0x562   :  { %v1136_v35 = vld [vmem:[%s9318_s1 + $0x2218] sm:$0xff]  ;;  %3568 = vmatpush.msrb.mxu3 %v1336_v33  ;;  %v2313_v33 = vadd.f32 %v8555_v6, %v2293_v22 }
 0x563   :  { %v1200_v38 = vld [vmem:[%s9318_s1 + $0x2418] sm:$0xff]  ;;  %3510 = vmatpush.msrb.mxu0 %v1136_v35 }
 0x564   :  { %v1264_v42 = vld [vmem:[%s9318_s1 + $0x2618] sm:$0xff]  ;;  %3530 = vmatpush.msrb.mxu1 %v1200_v38  ;;  %3511 = vmatmul.f32.vlgmr.msrb.gmra.mxu0 %v3881_v55  ;;  %v2832_v38 = vpop.f32.mrf.mxu2  ;;  %v2333_v47 = vadd.f32 %v8583_v17, %v2313_v33  ;;  %v2852_v55 = vpop.f32.mrf.mxu3 }
 0x565   :  { %v1332_v43 = vld [vmem:[%s9318_s1 + $0x2838] sm:$0xff]  ;;  %3550 = vmatpush.msrb.mxu2 %v1264_v42  ;;  %3531 = vmatmul.f32.vlgmr.msrb.gmra.mxu1 %v3883_v2  ;;  %v2813_v42 = vadd.f32 %v2812_v30, %v2793_v23 }
 0x566   :  { %v1452_v46 = vld [vmem:[%s9318_s1 + $0x2bf8] sm:$0xff]  ;;  %3569 = vmatpush.msrb.mxu3 %v1332_v43 }
 0x567   :  { %v1516_v50 = vld [vmem:[%s9318_s1 + $0x2df8] sm:$0xff]  ;;  %3575 = vmatpush.msra.mxu0 %v1452_v46 }
 0x568   :  { %v1580_v52 = vld [vmem:[%s9318_s1 + $0x2ff8] sm:$0xff]  ;;  %3595 = vmatpush.msra.mxu1 %v1516_v50 }
 0x569   :  { %v1328_v53 = vld [vmem:[%s9318_s1 + $0x2818] sm:$0xff]  ;;  %3615 = vmatpush.msra.mxu2 %v1580_v52  ;;  %v2833_v52 = vadd.f32 %v2832_v38, %v2813_v42 }
 0x56a   :  { %v3882_v56 = vld [vmem:[%s9319_s0 + $0x98] sm:$0xff]  ;;  %3570 = vmatpush.msrb.mxu3 %v1328_v53 }
 0x56b   :  { %3551 = vmatmul.f32.vlgmr.msrb.gmra.mxu2 %v3882_v56  ;;  %v1448_v36 = vld [vmem:[%s9318_s1 + $0x2bd8] sm:$0xff]  ;;  %3571 = vmatmul.f32.vlgmr.msrb.gmra.mxu3 %v3884_v3  ;;  %v2853_v63 = vadd.f32 %v2852_v55, %v2833_v52 }
 0x56c   :  { %v1512_v60 = vld [vmem:[%s9318_s1 + $0x2dd8] sm:$0xff]  ;;  %3576 = vmatpush.msra.mxu0 %v1448_v36  ;;  %v2353_v36 = vadd.f32 %v8557_v7, %v2333_v47 }
 0x56d   :  { %v1576_v58 = vld [vmem:[%s9318_s1 + $0x2fd8] sm:$0xff]  ;;  %3596 = vmatpush.msra.mxu1 %v1512_v60 }
 0x56e   :  { %v1644_v59 = vld [vmem:[%s9318_s1 + $0x31f8] sm:$0xff]  ;;  %3616 = vmatpush.msra.mxu2 %v1576_v58  ;;  %v2872_v58 = vpop.f32.mrf.mxu0  ;;  %v2373_v8 = vadd.f32 %v8585_v18, %v2353_v36 }
 0x56f   :  { %v1444_v4 = vld [vmem:[%s9318_s1 + $0x2bb8] sm:$0xff]  ;;  %3635 = vmatpush.msra.mxu3 %v1644_v59 }
 0x570   :  { %v1508_v5 = vld [vmem:[%s9318_s1 + $0x2db8] sm:$0xff]  ;;  %3577 = vmatpush.msra.mxu0 %v1444_v4  ;;  %v2393_v15 = vadd.f32 %v8611_v28, %v2373_v8 }
 0x571   :  { %v1572_v9 = vld [vmem:[%s9318_s1 + $0x2fb8] sm:$0xff]  ;;  %3597 = vmatpush.msra.mxu1 %v1508_v5 }
 0x572   :  { %v1640_v25 = vld [vmem:[%s9318_s1 + $0x31d8] sm:$0xff]  ;;  %3617 = vmatpush.msra.mxu2 %v1572_v9  ;;  %v2873_v9 = vadd.f32 %v2872_v58, %v2853_v63  ;;  %v3705_v63 = vld [vmem:[%s9321_s3 + $0x170] sm:$0xff] }
 0x573   :  { %v1440_v11 = vld [vmem:[%s9318_s1 + $0x2b98] sm:$0xff]  ;;  %3636 = vmatpush.msra.mxu3 %v1640_v25 }
 0x574   :  { %v1504_v51 = vld [vmem:[%s9318_s1 + $0x2d98] sm:$0xff]  ;;  %3578 = vmatpush.msra.mxu0 %v1440_v11  ;;  %v2892_v11 = vpop.f32.mrf.mxu1 }
 0x575   :  { %v1568_v16 = vld [vmem:[%s9318_s1 + $0x2f98] sm:$0xff]  ;;  %3598 = vmatpush.msra.mxu1 %v1504_v51  ;;  %v2893_v22 = vadd.f32 %v2892_v11, %v2873_v9  ;;  %v3671_v11 = vld [vmem:[%s9321_s3 + $0x60] sm:$0xff] }
 0x576   :  { %v1636_v19 = vld [vmem:[%s9318_s1 + $0x31b8] sm:$0xff]  ;;  %3618 = vmatpush.msra.mxu2 %v1568_v16 }
 0x577   :  { %v1436_v20 = vld [vmem:[%s9318_s1 + $0x2b78] sm:$0xff]  ;;  %3637 = vmatpush.msra.mxu3 %v1636_v19 }
 0x578   :  { %v1500_v21 = vld [vmem:[%s9318_s1 + $0x2d78] sm:$0xff]  ;;  %3579 = vmatpush.msra.mxu0 %v1436_v20  ;;  %v2912_v20 = vpop.f32.mrf.mxu2 }
 0x579   :  { %v1564_v24 = vld [vmem:[%s9318_s1 + $0x2f78] sm:$0xff]  ;;  %3599 = vmatpush.msra.mxu1 %v1500_v21 }
 0x57a   :  { %v1632_v37 = vld [vmem:[%s9318_s1 + $0x3198] sm:$0xff]  ;;  %3619 = vmatpush.msra.mxu2 %v1564_v24 }
 0x57b   :  { %v1432_v31 = vld [vmem:[%s9318_s1 + $0x2b58] sm:$0xff]  ;;  %3638 = vmatpush.msra.mxu3 %v1632_v37 }
 0x57c   :  { %v1496_v61 = vld [vmem:[%s9318_s1 + $0x2d58] sm:$0xff]  ;;  %3580 = vmatpush.msra.mxu0 %v1432_v31  ;;  %v2413_v31 = vadd.f32 %v8639_v40, %v2393_v15 }
 0x57d   :  { %v1560_v34 = vld [vmem:[%s9318_s1 + $0x2f58] sm:$0xff]  ;;  %3600 = vmatpush.msra.mxu1 %v1496_v61  ;;  %v2913_v61 = vadd.f32 %v2912_v20, %v2893_v22 }
 0x57e   :  { %v1628_v35 = vld [vmem:[%s9318_s1 + $0x3178] sm:$0xff]  ;;  %3620 = vmatpush.msra.mxu2 %v1560_v34 }
 0x57f   :  { %v1428_v39 = vld [vmem:[%s9318_s1 + $0x2b38] sm:$0xff]  ;;  %3639 = vmatpush.msra.mxu3 %v1628_v35  ;;  %v2932_v35 = vpop.f32.mrf.mxu3 }
 0x580   :  { %v1492_v6 = vld [vmem:[%s9318_s1 + $0x2d38] sm:$0xff]  ;;  %3581 = vmatpush.msra.mxu0 %v1428_v39  ;;  %v2433_v39 = vadd.f32 %v8613_v29, %v2413_v31  ;;  %v2992_v58 = vpop.f32.mrf.mxu2  ;;  %v3684_v31 = vld [vmem:[%s9321_s3 + $0xc8] sm:$0xff] }
 0x581   :  { %v1556_v43 = vld [vmem:[%s9318_s1 + $0x2f38] sm:$0xff]  ;;  %3601 = vmatpush.msra.mxu1 %v1492_v6 }
 0x582   :  { %v1624_v44 = vld [vmem:[%s9318_s1 + $0x3158] sm:$0xff]  ;;  %3621 = vmatpush.msra.mxu2 %v1556_v43  ;;  %v2952_v43 = vpop.f32.mrf.mxu0  ;;  %v2453_v52 = vadd.f32 %v8641_v41, %v2433_v39 }
 0x583   :  { %v1424_v46 = vld [vmem:[%s9318_s1 + $0x2b18] sm:$0xff]  ;;  %3640 = vmatpush.msra.mxu3 %v1624_v44 }
 0x584   :  { %v1488_v50 = vld [vmem:[%s9318_s1 + $0x2d18] sm:$0xff]  ;;  %3582 = vmatpush.msra.mxu0 %v1424_v46  ;;  %v2933_v46 = vadd.f32 %v2932_v35, %v2913_v61  ;;  %v2473_v36 = vadd.f32 %v8661_v48, %v2453_v52  ;;  %v3689_v48 = vld [vmem:[%s9321_s3 + $0xf0] sm:$0xff]  ;;  %v3683_v35 = vld [vmem:[%s9321_s3 + $0xc0] sm:$0xff] }
 0x585   :  { %v1552_v53 = vld [vmem:[%s9318_s1 + $0x2f18] sm:$0xff]  ;;  %3602 = vmatpush.msra.mxu1 %v1488_v50  ;;  %v3664_v52 = vld [vmem:[%s9321_s3 + $0x28] sm:$0xff] }
 0x586   :  { %v1620_v54 = vld [vmem:[%s9318_s1 + $0x3138] sm:$0xff]  ;;  %3622 = vmatpush.msra.mxu2 %v1552_v53  ;;  %v2953_v53 = vadd.f32 %v2952_v43, %v2933_v46  ;;  %v2493_v8 = vadd.f32 %v8695_v0, %v2473_v36  ;;  %v3703_v0 = vld [vmem:[%s9321_s3 + $0x160] sm:$0xff]  ;;  %v3681_v46 = vld [vmem:[%s9321_s3 + $0xb0] sm:$0xff] }
 0x587   :  { %v1420_v56 = vld [vmem:[%s9318_s1 + $0x2af8] sm:$0xff]  ;;  %3641 = vmatpush.msra.mxu3 %v1620_v54  ;;  %v3695_v36 = vld [vmem:[%s9321_s3 + $0x120] sm:$0xff] }
 0x588   :  { %v1484_v17 = vld [vmem:[%s9318_s1 + $0x2cf8] sm:$0xff]  ;;  %3583 = vmatpush.msra.mxu0 %v1420_v56  ;;  %v2972_v56 = vpop.f32.mrf.mxu1 }
 0x589   :  { %v1548_v60 = vld [vmem:[%s9318_s1 + $0x2ef8] sm:$0xff]  ;;  %3603 = vmatpush.msra.mxu1 %v1484_v17 }
 0x58a   :  { %v1616_v57 = vld [vmem:[%s9318_s1 + $0x3118] sm:$0xff]  ;;  %3623 = vmatpush.msra.mxu2 %v1548_v60  ;;  %v3885_v60 = vld [vmem:[%s9319_s0 + $0xa8] sm:$0xff]  ;;  %v3032_v15 = vpop.f32.mrf.mxu0 }
 0x58b   :  { %v1416_v59 = vld [vmem:[%s9318_s1 + $0x2ad8] sm:$0xff]  ;;  %3642 = vmatpush.msra.mxu3 %v1616_v57 }
 0x58c   :  { %v1480_v7 = vld [vmem:[%s9318_s1 + $0x2cd8] sm:$0xff]  ;;  %3584 = vmatpush.msra.mxu0 %v1416_v59  ;;  %v3673_v59 = vld [vmem:[%s9321_s3 + $0x70] sm:$0xff] }
 0x58d   :  { %v1544_v2 = vld [vmem:[%s9318_s1 + $0x2ed8] sm:$0xff]  ;;  %3604 = vmatpush.msra.mxu1 %v1480_v7  ;;  %v2973_v7 = vadd.f32 %v2972_v56, %v2953_v53  ;;  %v3680_v53 = vld [vmem:[%s9321_s3 + $0xa8] sm:$0xff]  ;;  %v3679_v56 = vld [vmem:[%s9321_s3 + $0xa0] sm:$0xff] }
 0x58e   :  { %v1612_v3 = vld [vmem:[%s9318_s1 + $0x30f8] sm:$0xff]  ;;  %3624 = vmatpush.msra.mxu2 %v1544_v2  ;;  %v3887_v2 = vld [vmem:[%s9319_s0 + $0xb0] sm:$0xff] }
 0x58f   :  { %v1412_v4 = vld [vmem:[%s9318_s1 + $0x2ab8] sm:$0xff]  ;;  %3643 = vmatpush.msra.mxu3 %v1612_v3  ;;  %v3888_v3 = vld [vmem:[%s9319_s0 + $0xc0] sm:$0xff]  ;;  %v2993_v9 = vadd.f32 %v2992_v58, %v2973_v7  ;;  %v3661_v7 = vld [vmem:[%s9321_s3 + $0x10] sm:$0xff] }
 0x590   :  { %v1476_v5 = vld [vmem:[%s9318_s1 + $0x2cb8] sm:$0xff]  ;;  %3585 = vmatpush.msra.mxu0 %v1412_v4  ;;  %v3672_v4 = vld [vmem:[%s9321_s3 + $0x68] sm:$0xff] }
 0x591   :  { %v1540_v25 = vld [vmem:[%s9318_s1 + $0x2eb8] sm:$0xff]  ;;  %3605 = vmatpush.msra.mxu1 %v1476_v5  ;;  %v3688_v5 = vld [vmem:[%s9321_s3 + $0xe8] sm:$0xff] }
 0x592   :  { %v1608_v10 = vld [vmem:[%s9318_s1 + $0x30d8] sm:$0xff]  ;;  %3625 = vmatpush.msra.mxu2 %v1540_v25  ;;  %v3704_v25 = vld [vmem:[%s9321_s3 + $0x168] sm:$0xff] }
 0x593   :  { %v1408_v51 = vld [vmem:[%s9318_s1 + $0x2a98] sm:$0xff]  ;;  %3644 = vmatpush.msra.mxu3 %v1608_v10  ;;  %v3012_v10 = vpop.f32.mrf.mxu3 }
 0x594   :  { %v1472_v18 = vld [vmem:[%s9318_s1 + $0x2c98] sm:$0xff]  ;;  %3586 = vmatpush.msra.mxu0 %v1408_v51  ;;  %v3687_v51 = vld [vmem:[%s9321_s3 + $0xe0] sm:$0xff]  ;;  %v3013_v20 = vadd.f32 %v3012_v10, %v2993_v9  ;;  %v3692_v9 = vld [vmem:[%s9321_s3 + $0x108] sm:$0xff] }
 0x595   :  { %v1536_v16 = vld [vmem:[%s9318_s1 + $0x2e98] sm:$0xff]  ;;  %3606 = vmatpush.msra.mxu1 %v1472_v18  ;;  %v2513_v18 = vadd.f32 %v8663_v49, %v2493_v8  ;;  %v3675_v10 = vld [vmem:[%s9321_s3 + $0x80] sm:$0xff] }
 0x596   :  { %v1604_v19 = vld [vmem:[%s9318_s1 + $0x30b8] sm:$0xff]  ;;  %3626 = vmatpush.msra.mxu2 %v1536_v16 }
 0x597   :  { %v1404_v21 = vld [vmem:[%s9318_s1 + $0x2a78] sm:$0xff]  ;;  %3645 = vmatpush.msra.mxu3 %v1604_v19  ;;  %v2533_v22 = vadd.f32 %v8697_v1, %v2513_v18  ;;  %v3700_v1 = vld [vmem:[%s9321_s3 + $0x148] sm:$0xff] }
 0x598   :  { %v1468_v28 = vld [vmem:[%s9318_s1 + $0x2c78] sm:$0xff]  ;;  %3587 = vmatpush.msra.mxu0 %v1404_v21  ;;  %v3669_v21 = vld [vmem:[%s9321_s3 + $0x50] sm:$0xff] }
 0x599   :  { %v1532_v23 = vld [vmem:[%s9318_s1 + $0x2e78] sm:$0xff]  ;;  %3607 = vmatpush.msra.mxu1 %v1468_v28  ;;  %v3685_v28 = vld [vmem:[%s9321_s3 + $0xd0] sm:$0xff]  ;;  %v2553_v61 = vadd.f32 %v8723_v12, %v2533_v22  ;;  %v3699_v12 = vld [vmem:[%s9321_s3 + $0x140] sm:$0xff] }
 0x59a   :  { %v1600_v24 = vld [vmem:[%s9318_s1 + $0x3098] sm:$0xff]  ;;  %3627 = vmatpush.msra.mxu2 %v1532_v23  ;;  %v3033_v23 = vadd.f32 %v3032_v15, %v3013_v20  ;;  %v3721_v22 = vld [vmem:[%s9321_s3 + $0x1f0] sm:$0xff] }
 0x59b   :  { %v1400_v37 = vld [vmem:[%s9318_s1 + $0x2a58] sm:$0xff]  ;;  %3646 = vmatpush.msra.mxu3 %v1600_v24  ;;  %v3701_v24 = vld [vmem:[%s9321_s3 + $0x150] sm:$0xff] }
 0x59c   :  { %v1464_v30 = vld [vmem:[%s9318_s1 + $0x2c58] sm:$0xff]  ;;  %3588 = vmatpush.msra.mxu0 %v1400_v37  ;;  %v3052_v37 = vpop.f32.mrf.mxu1 }
 0x59d   :  { %v1528_v33 = vld [vmem:[%s9318_s1 + $0x2e58] sm:$0xff]  ;;  %3608 = vmatpush.msra.mxu1 %v1464_v30  ;;  %v3668_v30 = vld [vmem:[%s9321_s3 + $0x48] sm:$0xff] }
 0x59e   :  { %v1596_v34 = vld [vmem:[%s9318_s1 + $0x3078] sm:$0xff]  ;;  %3628 = vmatpush.msra.mxu2 %v1528_v33  ;;  %v3072_v33 = vpop.f32.mrf.mxu2 }
 0x59f   :  { %v1396_v38 = vld [vmem:[%s9318_s1 + $0x2a38] sm:$0xff]  ;;  %3647 = vmatpush.msra.mxu3 %v1596_v34  ;;  %v3667_v34 = vld [vmem:[%s9321_s3 + $0x40] sm:$0xff] }
 0x5a0   :  { %v1460_v40 = vld [vmem:[%s9318_s1 + $0x2c38] sm:$0xff]  ;;  %3589 = vmatpush.msra.mxu0 %v1396_v38  ;;  %v3053_v38 = vadd.f32 %v3052_v37, %v3033_v23  ;;  %v3719_v37 = vld [vmem:[%s9321_s3 + $0x1e0] sm:$0xff] }
 0x5a1   :  { %v1524_v6 = vld [vmem:[%s9318_s1 + $0x2e38] sm:$0xff]  ;;  %3609 = vmatpush.msra.mxu1 %v1460_v40 }
 0x5a2   :  { %v1592_v42 = vld [vmem:[%s9318_s1 + $0x3058] sm:$0xff]  ;;  %3629 = vmatpush.msra.mxu2 %v1524_v6  ;;  %v2573_v6 = vadd.f32 %v8751_v26, %v2553_v61  ;;  %v3697_v26 = vld [vmem:[%s9321_s3 + $0x130] sm:$0xff] }
 0x5a3   :  { %v1392_v44 = vld [vmem:[%s9318_s1 + $0x2a18] sm:$0xff]  ;;  %3648 = vmatpush.msra.mxu3 %v1592_v42  ;;  %v3073_v42 = vadd.f32 %v3072_v33, %v3053_v38 }
 0x5a4   :  { %v1456_v29 = vld [vmem:[%s9318_s1 + $0x2c18] sm:$0xff]  ;;  %3590 = vmatpush.msra.mxu0 %v1392_v44  ;;  %v3092_v44 = vpop.f32.mrf.mxu3 }
 0x5a5   :  { %v1520_v50 = vld [vmem:[%s9318_s1 + $0x2e18] sm:$0xff]  ;;  %3610 = vmatpush.msra.mxu1 %v1456_v29  ;;  %3591 = vmatmul.f32.vlgmr.msra.gmra.mxu0 %v3885_v60  ;;  %v3665_v29 = vld [vmem:[%s9321_s3 + $0x30] sm:$0xff]  ;;  %v3132_v60 = vpop.f32.mrf.mxu1 }
 0x5a6   :  { %v1588_v47 = vld [vmem:[%s9318_s1 + $0x3038] sm:$0xff]  ;;  %3630 = vmatpush.msra.mxu2 %v1520_v50  ;;  %3611 = vmatmul.f32.vlgmr.msra.gmra.mxu1 %v3887_v2  ;;  %v2593_v50 = vadd.f32 %v8725_v13, %v2573_v6  ;;  %v3696_v13 = vld [vmem:[%s9321_s3 + $0x128] sm:$0xff] }
 0x5a7   :  { %v3674_v54 = vld [vmem:[%s9321_s3 + $0x78] sm:$0xff]  ;;  %3649 = vmatpush.msra.mxu3 %v1588_v47  ;;  %v3112_v47 = vpop.f32.mrf.mxu0 }
 0x5a8   :  { %v3690_v55 = vld [vmem:[%s9321_s3 + $0xf8] sm:$0xff]  ;;  %3727 = vmatpush.msrb.mxu0 %v3674_v54  ;;  %v3093_v54 = vadd.f32 %v3092_v44, %v3073_v42 }
 0x5a9   :  { %v3706_v17 = vld [vmem:[%s9321_s3 + $0x178] sm:$0xff]  ;;  %3747 = vmatpush.msrb.mxu1 %v3690_v55  ;;  %v3663_v55 = vld [vmem:[%s9321_s3 + $0x20] sm:$0xff] }
 0x5aa   :  { %v1584_v41 = vld [vmem:[%s9318_s1 + $0x3018] sm:$0xff]  ;;  %3767 = vmatpush.msrb.mxu2 %v3706_v17  ;;  %3728 = vmatpush.msrb.mxu0 %v3673_v59  ;;  %v2613_v17 = vadd.f32 %v8753_v27, %v2593_v50 }
 0x5ab   :  { %v3886_v57 = vld [vmem:[%s9319_s0 + $0xb8] sm:$0xff]  ;;  %3650 = vmatpush.msra.mxu3 %v1584_v41  ;;  %3748 = vmatpush.msrb.mxu1 %v3689_v48  ;;  %v3113_v41 = vadd.f32 %v3112_v47, %v3093_v54  ;;  %v3152_v48 = vpop.f32.mrf.mxu2  ;;  %v3713_v47 = vld [vmem:[%s9321_s3 + $0x1b0] sm:$0xff]  ;;  %v3712_v54 = vld [vmem:[%s9321_s3 + $0x1a8] sm:$0xff] }
 0x5ac   :  { %3631 = vmatmul.f32.vlgmr.msra.gmra.mxu2 %v3886_v57  ;;  %3651 = vmatmul.f32.vlgmr.msra.gmra.mxu3 %v3888_v3  ;;  %v3670_v16 = vld [vmem:[%s9321_s3 + $0x58] sm:$0xff]  ;;  %v2633_v59 = vadd.f32 %v8786_v45, %v2613_v17  ;;  %v3693_v45 = vld [vmem:[%s9321_s3 + $0x110] sm:$0xff]  ;;  %v3660_v3 = vld [vmem:[%s9321_s3 + $0x8] sm:$0xff]  ;;  %v3172_v15 = vpop.f32.mrf.mxu3 }
 0x5ad   :  { %3768 = vmatpush.msrb.mxu2 %v3705_v63  ;;  %3729 = vmatpush.msrb.mxu0 %v3672_v4  ;;  %v3686_v19 = vld [vmem:[%s9321_s3 + $0xd8] sm:$0xff]  ;;  %v3677_v63 = vld [vmem:[%s9321_s3 + $0x90] sm:$0xff]  ;;  %v3133_v2 = vadd.f32 %v3132_v60, %v3113_v41  ;;  %v3676_v4 = vld [vmem:[%s9321_s3 + $0x88] sm:$0xff] }
 0x5ae   :  { %3749 = vmatpush.msrb.mxu1 %v3688_v5  ;;  %v3702_v49 = vld [vmem:[%s9321_s3 + $0x158] sm:$0xff]  ;;  %v2653_v5 = vadd.f32 %v8813_v62, %v2633_v59  ;;  %v3691_v62 = vld [vmem:[%s9321_s3 + $0x100] sm:$0xff]  ;;  %v3709_v60 = vld [vmem:[%s9321_s3 + $0x190] sm:$0xff] }
 0x5af   :  { %3769 = vmatpush.msrb.mxu2 %v3704_v25  ;;  %3730 = vmatpush.msrb.mxu0 %v3671_v11  ;;  %v3666_v40 = vld [vmem:[%s9321_s3 + $0x38] sm:$0xff]  ;;  %v3153_v8 = vadd.f32 %v3152_v48, %v3133_v2  ;;  %v3659_v25 = vld [vmem:[%s9321_s3] sm:$0xff]  ;;  %v3655_v11 = vmax.f32 %v6127_v14, 0.0 }
 0x5b0   :  { %3750 = vmatpush.msrb.mxu1 %v3687_v51  ;;  %v3682_v39 = vld [vmem:[%s9321_s3 + $0xb8] sm:$0xff]  ;;  %v3656_v51 = vmax.f32 %v2653_v5, 0.0  ;;  %v3707_v59 = vld [vmem:[%s9321_s3 + $0x180] sm:$0xff] }
 0x5b1   :  { %3770 = vmatpush.msrb.mxu2 %v3703_v0  ;;  %3731 = vmatpush.msrb.mxu0 %v3670_v16  ;;  %v3698_v43 = vld [vmem:[%s9321_s3 + $0x138] sm:$0xff]  ;;  %v3657_v18 = vmax.f32 %v3153_v8, 0.0  ;;  %v1650_v0 = vperm.slane %v8764_v32, 3  ;;  %v3720_v32 = vld [vmem:[%s9321_s3 + $0x1e8] sm:$0xff] }
 0x5b2   :  { %3751 = vmatpush.msrb.mxu1 %v3686_v19  ;;  %v3662_v57 = vld [vmem:[%s9321_s3 + $0x18] sm:$0xff]  ;;  %v3192_v19 = vpop.f32.mrf.mxu0 }
 0x5b3   :  { %3771 = vmatpush.msrb.mxu2 %v3702_v49  ;;  %3732 = vmatpush.msrb.mxu0 %v3669_v21  ;;  %v3678_v58 = vld [vmem:[%s9321_s3 + $0x98] sm:$0xff]  ;;  %v3173_v16 = vadd.f32 %v3172_v15, %v1650_v0  ;;  %v3212_v49 = vpop.f32.mrf.mxu1 }
 0x5b4   :  { %3752 = vmatpush.msrb.mxu1 %v3685_v28  ;;  %v3694_v27 = vld [vmem:[%s9321_s3 + $0x118] sm:$0xff]  ;;  %v3232_v28 = vpop.f32.mrf.mxu2 }
 0x5b5   :  { %3772 = vmatpush.msrb.mxu2 %v3701_v24  ;;  %3733 = vmatpush.msrb.mxu0 %v3668_v30  ;;  %v3193_v20 = vadd.f32 %v3192_v19, %v3173_v16  ;;  %v3722_v14 = vld [vmem:[%s9321_s3 + $0x1f8] sm:$0xff]  ;;  %v3252_v24 = vpop.f32.mrf.mxu3 }
 0x5b6   :  { %3753 = vmatpush.msrb.mxu1 %v3684_v31  ;;  %3787 = vmatpush.msrb.mxu3 %v3722_v14  ;;  %v3718_v31 = vld [vmem:[%s9321_s3 + $0x1d8] sm:$0xff] }
 0x5b7   :  { %3773 = vmatpush.msrb.mxu2 %v3700_v1  ;;  %3734 = vmatpush.msrb.mxu0 %v3667_v34  ;;  %v3213_v21 = vadd.f32 %v3212_v49, %v3193_v20  ;;  %v3717_v1 = vld [vmem:[%s9321_s3 + $0x1d0] sm:$0xff]  ;;  %v3710_v17 = vld [vmem:[%s9321_s3 + $0x198] sm:$0xff]  ;;  %v3812_v20 = vld [vmem:[%s9322_s4] ss:$0 sm:$0xff] }
 0x5b8   :  { %3754 = vmatpush.msrb.mxu1 %v3683_v35  ;;  %3788 = vmatpush.msrb.mxu3 %v3721_v22  ;;  %v3716_v35 = vld [vmem:[%s9321_s3 + $0x1c8] sm:$0xff] }
 0x5b9   :  { %3774 = vmatpush.msrb.mxu2 %v3699_v12  ;;  %3735 = vmatpush.msrb.mxu0 %v3666_v40  ;;  %v3233_v23 = vadd.f32 %v3232_v28, %v3213_v21  ;;  %v3715_v12 = vld [vmem:[%s9321_s3 + $0x1c0] sm:$0xff] }
 0x5ba   :  { %3755 = vmatpush.msrb.mxu1 %v3682_v39  ;;  %3789 = vmatpush.msrb.mxu3 %v3720_v32  ;;  %v3272_v30 = vpop.f32.mrf.mxu0  ;;  %v3714_v39 = vld [vmem:[%s9321_s3 + $0x1b8] sm:$0xff] }
 0x5bb   :  { %3775 = vmatpush.msrb.mxu2 %v3698_v43  ;;  %3736 = vmatpush.msrb.mxu0 %v3665_v29  ;;  %v3253_v61 = vadd.f32 %v3252_v24, %v3233_v23  ;;  %v3292_v34 = vpop.f32.mrf.mxu1 }
 0x5bc   :  { %3756 = vmatpush.msrb.mxu1 %v3681_v46  ;;  %3790 = vmatpush.msrb.mxu3 %v3719_v37  ;;  %v3312_v38 = vpop.f32.mrf.mxu2 }
 0x5bd   :  { %3776 = vmatpush.msrb.mxu2 %v3697_v26  ;;  %3737 = vmatpush.msrb.mxu0 %v3664_v52  ;;  %v3273_v33 = vadd.f32 %v3272_v30, %v3253_v61  ;;  %v3332_v42 = vpop.f32.mrf.mxu3 }
 0x5be   :  { %3757 = vmatpush.msrb.mxu1 %v3680_v53  ;;  %3791 = vmatpush.msrb.mxu3 %v3718_v31 }
 0x5bf   :  { %3777 = vmatpush.msrb.mxu2 %v3696_v13  ;;  %3738 = vmatpush.msrb.mxu0 %v3663_v55  ;;  %v3293_v40 = vadd.f32 %v3292_v34, %v3273_v33  ;;  %v3711_v13 = vld [vmem:[%s9321_s3 + $0x1a0] sm:$0xff] }
 0x5c0   :  { %3758 = vmatpush.msrb.mxu1 %v3679_v56  ;;  %3792 = vmatpush.msrb.mxu3 %v3717_v1 }
 0x5c1   :  { %3778 = vmatpush.msrb.mxu2 %v3695_v36  ;;  %3739 = vmatpush.msrb.mxu0 %v3662_v57  ;;  %v3313_v6 = vadd.f32 %v3312_v38, %v3293_v40 }
 0x5c2   :  { %3759 = vmatpush.msrb.mxu1 %v3678_v58  ;;  %3793 = vmatpush.msrb.mxu3 %v3716_v35  ;;  %v3352_v43 = vpop.f32.mrf.mxu0  ;;  %v3708_v58 = vld [vmem:[%s9321_s3 + $0x188] sm:$0xff] }
 0x5c3   :  { %3779 = vmatpush.msrb.mxu2 %v3694_v27  ;;  %3740 = vmatpush.msrb.mxu0 %v3661_v7  ;;  %v3333_v44 = vadd.f32 %v3332_v42, %v3313_v6  ;;  %v3372_v46 = vpop.f32.mrf.mxu1 }
 0x5c4   :  { %3760 = vmatpush.msrb.mxu1 %v3677_v63  ;;  %3794 = vmatpush.msrb.mxu3 %v3715_v12  ;;  %v3392_v50 = vpop.f32.mrf.mxu2 }
 0x5c5   :  { %3780 = vmatpush.msrb.mxu2 %v3693_v45  ;;  %3741 = vmatpush.msrb.mxu0 %v3660_v3  ;;  %v3353_v29 = vadd.f32 %v3352_v43, %v3333_v44  ;;  %v3412_v53 = vpop.f32.mrf.mxu3 }
 0x5c6   :  { %3761 = vmatpush.msrb.mxu1 %v3676_v4  ;;  %3795 = vmatpush.msrb.mxu3 %v3714_v39 }
 0x5c7   :  { %3781 = vmatpush.msrb.mxu2 %v3692_v9  ;;  %3742 = vmatpush.msrb.mxu0 %v3659_v25  ;;  %v3373_v26 = vadd.f32 %v3372_v46, %v3353_v29 }
 0x5c8   :  { %3762 = vmatpush.msrb.mxu1 %v3675_v10  ;;  %3743 = vmatmul.f32.vlgmr.msrb.gmra.mxu0 %v3655_v11 }
 0x5c9   :  { %3782 = vmatpush.msrb.mxu2 %v3691_v62  ;;  %3763 = vmatmul.f32.vlgmr.msrb.gmra.mxu1 %v3656_v51  ;;  %v3393_v52 = vadd.f32 %v3392_v50, %v3373_v26 }
 0x5ca   :  { %3783 = vmatmul.f32.vlgmr.msrb.gmra.mxu2 %v3657_v18  ;;  %3796 = vmatpush.msrb.mxu3 %v3713_v47  ;;  %v3432_v55 = vpop.f32.mrf.mxu0 }
 0x5cb   :  { %v3413_v56 = vadd.f32 %v3412_v53, %v3393_v52  ;;  %v3452_v36 = vpop.f32.mrf.mxu1 }
 0x5cc   :  { %3797 = vmatpush.msrb.mxu3 %v3712_v54  ;;  %v3472_v57 = vpop.f32.mrf.mxu2 }
 0x5cd   :  { %v3433_v41 = vadd.f32 %v3432_v55, %v3413_v56  ;;  %v3492_v7 = vpop.f32.mrf.mxu3 }
 0x5ce   :  { %3798 = vmatpush.msrb.mxu3 %v3711_v13 }
 0x5cf   :  { %v3453_v27 = vadd.f32 %v3452_v36, %v3433_v41 }
 0x5d0   :  { %3799 = vmatpush.msrb.mxu3 %v3710_v17 }
 0x5d1   :  { %v3473_v48 = vadd.f32 %v3472_v57, %v3453_v27 }
 0x5d2   :  { %3800 = vmatpush.msrb.mxu3 %v3709_v60 }
 0x5d3   :  { %v3493_v2 = vadd.f32 %v3492_v7, %v3473_v48 }
 0x5d4   :  { %3801 = vmatpush.msrb.mxu3 %v3708_v58 }
 0x5d6   :  { %3802 = vmatpush.msrb.mxu3 %v3707_v59 }
 0x5e1   :  { %v3512_v63 = vpop.f32.mrf.mxu0 }
 0x5e2   :  { %v3513_v45 = vadd.f32 %v3512_v63, %v3493_v2  ;;  %v3532_v3 = vpop.f32.mrf.mxu1 }
 0x5e4   :  { %v3533_v5 = vadd.f32 %v3532_v3, %v3513_v45 }
 0x5ee   :  { %v3552_v4 = vpop.f32.mrf.mxu2  ;;  %v3572_v9 = vpop.f32.mrf.mxu3 }
 0x5ef   :  { %v3553_v8 = vadd.f32 %v3552_v4, %v3533_v5 }
 0x5f1   :  { %v3573_v25 = vadd.f32 %v3572_v9, %v3553_v8 }
 0x622   :  { %v3592_v10 = vpop.f32.mrf.mxu0 }
 0x623   :  { %v3593_v62 = vadd.f32 %v3592_v10, %v3573_v25  ;;  %v3612_v11 = vpop.f32.mrf.mxu1 }
 0x625   :  { %v3613_v51 = vadd.f32 %v3612_v11, %v3593_v62 }
 0x62f   :  { %v3632_v18 = vpop.f32.mrf.mxu2  ;;  %v3652_v15 = vpop.f32.mrf.mxu3 }
 0x630   :  { %v3633_v0 = vadd.f32 %v3632_v18, %v3613_v51 }
 0x632   :  { %v3653_v16 = vadd.f32 %v3652_v15, %v3633_v0 }
 0x634   :  { %v3658_v19 = vmax.f32 %v3653_v16, 0.0 }
 0x636   :  { %3803 = vmatmul.f32.vlgmr.msrb.gmra.mxu3 %v3658_v19 }
 0x645   :  { %v3744_v49 = vpop.f32.mrf.mxu0 }
 0x646   :  { %v3745_v21 = vadd.f32 %v3812_v20, %v3744_v49  ;;  %v3764_v28 = vpop.f32.mrf.mxu1 }
 0x648   :  { %v3765_v22 = vadd.f32 %v3764_v28, %v3745_v21 }
 0x64d   :  { %v3784_v14 = vpop.f32.mrf.mxu2 }
 0x64e   :  { %v3785_v32 = vadd.f32 %v3784_v14, %v3765_v22 }
 0x6b9   :  { %v3804_v23 = vpop.f32.mrf.mxu3 }
 0x6ba   :  { %v3805_v24 = vadd.f32 %v3804_v23, %v3785_v32 }
 0x6bc   :  { %3807 = vst [vmem:[%s9323_s5] sm:$0xff] %v3805_v24 }

</bundles_post_ra>
